<compile_context>
chip_gen: v7x
topology: tpu7x:2x2x1
jax: 0.10.0
libtpu: 0.0.40
codegen_flags: <defaults>
</compile_context>

<pallas_src>
import functools

import jax
import jax.numpy as jnp
from jax import lax
from jax.experimental import pallas as pl
from jax.experimental.pallas import tpu as pltpu


# --------------------------------------------------------------------------
# Fused kernel: conv1 + conv2 + conv3 + shortcut + add + ReLU for one row tile
# --------------------------------------------------------------------------
def _bottle_block_kernel(x_ref, w1_ref, b1_ref, w2_ref, b2_ref, w3c_ref, b3c_ref,
                         o_ref, h1_scr, acc_scr,
                         *, TH, H, W, Wp, mid, Cin, out_ch, stride,
                         c1_chunk, c3_chunk):
    r = pl.program_id(1)
    row0 = pl.multiple_of(r * TH, TH)          # first padded row of this tile
    THo = TH // stride
    Wo = W // stride

    # ---- conv1: 1x1 (BN scale folded into w1) + shift + ReLU, row-chunked ----
    # Row chunking bounds the live f32 value; result is staged bf16 in VMEM.
    for c0 in range(0, TH + 2, c1_chunk):
        rc = min(c1_chunk, TH + 2 - c0)
        xr = x_ref[0, pl.ds(row0 + c0, rc), :, :].reshape(rc * Wp, Cin)
        h = jnp.dot(xr, w1_ref[...], preferred_element_type=jnp.float32)
        h = jnp.maximum(h + b1_ref[...], 0.0)
        h1_scr[c0:c0 + rc, :, :] = h.reshape(rc, Wp, mid).astype(h1_scr.dtype)

    # ---- zero the conv2 halo ring IN-SCRATCH (zero-pad ring of the image) ----
    # (1x1 conv of a zero pixel gives relu(shift1) != 0, so the ring must be
    #  explicitly zeroed; only 4 thin strips, no full-tile mask.)
    h1_scr[:, 0:1, :] = jnp.zeros((TH + 2, 1, mid), h1_scr.dtype)
    h1_scr[:, W + 1:W + 2, :] = jnp.zeros((TH + 2, 1, mid), h1_scr.dtype)

    @pl.when(r == 0)
    def _():
        h1_scr[0:1, :, :] = jnp.zeros((1, Wp, mid), h1_scr.dtype)

    @pl.when(r == pl.num_programs(1) - 1)
    def _():
        h1_scr[TH + 1:TH + 2, :, :] = jnp.zeros((1, Wp, mid), h1_scr.dtype)

    # ---- conv2: 3x3 as 9 accumulating tap matmuls (no im2col staging) --------
    # For stride>1 only the strided output ROWS are computed (saves MXU work).
    for t in range(9):
        dy, dx = divmod(t, 3)
        patch = h1_scr[dy:dy + TH, dx:dx + W, :]                 # (TH, W, mid)
        if stride != 1:
            patch = patch.reshape(THo, stride, W, mid)[:, 0, :, :]
        contrib = jnp.dot(patch.reshape(THo * W, mid), w2_ref[t],
                          preferred_element_type=jnp.float32)
        if t == 0:
            acc_scr[...] = contrib
        else:
            acc_scr[...] += contrib

    # ---- conv3 (1x1, stride) + shortcut (1x1, stride) fused into ONE matmul --
    # cat([h2 | x]) @ [w3; wt]  (BN scales folded, shifts pre-summed) + ReLU.
    for c0 in range(0, THo, c3_chunk):
        rc = min(c3_chunk, THo - c0)
        h2 = jnp.maximum(acc_scr[c0 * W:(c0 + rc) * W, :] + b2_ref[...], 0.0)
        if stride != 1:
            h2 = h2.reshape(rc, Wo, stride, mid)[:, :, 0, :]      # strided cols
        h2 = h2.reshape(rc * Wo, mid).astype(jnp.bfloat16)

        xs = x_ref[0, pl.ds(row0 + 1 + c0 * stride, rc * stride), :, :]
        xs = xs[:, 1:W + 1, :]                                    # drop pad cols
        if stride != 1:
            xs = xs.reshape(rc, stride, W, Cin)[:, 0, :, :]
            xs = xs.reshape(rc, Wo, stride, Cin)[:, :, 0, :]
        xs = xs.reshape(rc * Wo, Cin)

        cat = jnp.concatenate([h2, xs], axis=-1)                  # (rc*Wo, mid+Cin)
        y = jnp.dot(cat, w3c_ref[...], preferred_element_type=jnp.float32)
        y = jnp.maximum(y + b3c_ref[...], 0.0)
        o_ref[0, c0:c0 + rc, :, :] = y.reshape(rc, Wo, out_ch).astype(o_ref.dtype)


# --------------------------------------------------------------------------
# Parameter prep: fold BN scale into weights, stack conv3/shortcut, cast bf16
# --------------------------------------------------------------------------
def prepare_params(p):
    f = {}
    f["w1"] = (p["w1"] * p["scale1"]).astype(jnp.bfloat16)                # (Cin, mid)
    f["b1"] = p["shift1"].astype(jnp.float32)                              # (1, mid)
    f["w2"] = (p["w2"] * p["scale2"].reshape(1, 1, -1)).astype(jnp.bfloat16)  # (9, mid, mid)
    f["b2"] = p["shift2"].astype(jnp.float32)                              # (1, mid)
    w3 = p["w3"] * p["scale3"]                                             # (mid, out)
    wt = p["wt"] * p["scalet"]                                             # (Cin, out)
    f["w3c"] = jnp.concatenate([w3, wt], axis=0).astype(jnp.bfloat16)      # (mid+Cin, out)
    f["b3c"] = (p["shift3"] + p["shiftt"]).astype(jnp.float32)             # (1, out)
    return f


# --------------------------------------------------------------------------
# Forward pass (NHWC core + NCHW wrapper matching the PyTorch module)
# --------------------------------------------------------------------------
def bottle_block_forward_nhwc(x_nhwc, params, stride=1, row_tile=16,
                              out_dtype=jnp.float32):
    fp = prepare_params(params)
    N, H, W, Cin = x_nhwc.shape
    mid = fp["w1"].shape[1]
    out_ch = fp["w3c"].shape[1]
    assert H % stride == 0 and W % stride == 0

    # Largest row tile <= row_tile that divides H and is a multiple of stride.
    TH = None
    for t in range(min(row_tile, H), 0, -1):
        if H % t == 0 and t % stride == 0:
            TH = t
            break
    if TH is None:
        raise ValueError("no valid row tile for H=%d stride=%d" % (H, stride))
    THo, Ho, Wo = TH // stride, H // stride, W // stride

    # Pad the raw input: 1-pixel zero ring, width rounded up to a multiple of 8
    # so in-kernel reshapes stay (8,128)-tile aligned.
    Wp = ((W + 2 + 7) // 8) * 8
    x_pad = jnp.pad(x_nhwc, ((0, 0), (1, 1), (1, Wp - W - 1), (0, 0))
                    ).astype(jnp.bfloat16)

    # Row-chunk sizes that keep live f32 intermediates ~<= 64 KiB (vreg budget).
    budget = 64 * 1024
    c1_chunk = max(1, min(TH + 2, budget // max(1, Wp * mid * 4)))
    c3_chunk = max(1, min(THo, budget // max(1, W * mid * 4)))

    flops = (2 * N * H * W * Cin * mid                      # conv1
             + 2 * N * Ho * W * 9 * mid * mid               # conv2 (strided rows)
             + 2 * N * Ho * Wo * (mid + Cin) * out_ch)      # fused conv3+shortcut
    bytes_accessed = (int(x_pad.size) * 2
                      + N * Ho * Wo * out_ch * jnp.dtype(out_dtype).itemsize
                      + sum(int(v.size) * v.dtype.itemsize for v in fp.values()))

    kernel = functools.partial(
        _bottle_block_kernel, TH=TH, H=H, W=W, Wp=Wp, mid=mid, Cin=Cin,
        out_ch=out_ch, stride=stride, c1_chunk=c1_chunk, c3_chunk=c3_chunk)

    y = pl.pallas_call(
        kernel,
        out_shape=jax.ShapeDtypeStruct((N, Ho, Wo, out_ch), out_dtype),
        grid_spec=pltpu.PrefetchScalarGridSpec(
            num_scalar_prefetch=0,
            grid=(N, H // TH),
            in_specs=[
                # full padded image per batch item; constant block index over r
                # -> stays resident in VMEM across the row tiles of one image
                pl.BlockSpec((1, H + 2, Wp, Cin), lambda n, r: (n, 0, 0, 0)),
                pl.BlockSpec((Cin, mid), lambda n, r: (0, 0)),
                pl.BlockSpec((1, mid), lambda n, r: (0, 0)),
                pl.BlockSpec((9, mid, mid), lambda n, r: (0, 0, 0)),
                pl.BlockSpec((1, mid), lambda n, r: (0, 0)),
                pl.BlockSpec((mid + Cin, out_ch), lambda n, r: (0, 0)),
                pl.BlockSpec((1, out_ch), lambda n, r: (0, 0)),
            ],
            out_specs=pl.BlockSpec((1, THo, Wo, out_ch), lambda n, r: (n, r, 0, 0)),
            scratch_shapes=[
                pltpu.VMEM((TH + 2, Wp, mid), jnp.bfloat16),   # conv1 out + halo
                pltpu.VMEM((THo * W, mid), jnp.float32),       # conv2 accumulator
            ],
        ),
        compiler_params=pltpu.CompilerParams(
            dimension_semantics=("parallel", "parallel"),
            vmem_limit_bytes=64 * 1024 * 1024),
        cost_estimate=pl.CostEstimate(flops=int(flops), transcendentals=0,
                                      bytes_accessed=int(bytes_accessed)),
    )(x_pad, fp["w1"], fp["b1"], fp["w2"], fp["b2"], fp["w3c"], fp["b3c"])
    return y


def bottle_block_forward(x_nchw, params, stride=1, row_tile=16,
                         out_dtype=jnp.float32):
    x = jnp.transpose(x_nchw, (0, 2, 3, 1))            # NCHW -> NHWC
    y = bottle_block_forward_nhwc(x, params, stride=stride, row_tile=row_tile,
                                  out_dtype=out_dtype)
    return jnp.transpose(y, (0, 3, 1, 2))              # NHWC -> NCHW


# --------------------------------------------------------------------------
# Pure-JAX reference (f32, unfolded BN) for validation
# --------------------------------------------------------------------------
def bottle_block_reference(x_nchw, p, stride=1):
    x = jnp.transpose(x_nchw, (0, 2, 3, 1))

    def conv(inp, w_hwio, s, pad):
        return lax.conv_general_dilated(
            inp, w_hwio, (s, s), [(pad, pad), (pad, pad)],
            dimension_numbers=("NHWC", "HWIO", "NHWC"),
            precision=lax.Precision.HIGHEST)

    def bn(y, scale, shift):
        return y * scale.reshape(1, 1, 1, -1) + shift.reshape(1, 1, 1, -1)

    in_ch, mid_ch = p["w1"].shape
    out_ch = p["w3"].shape[1]
    w1 = p["w1"].reshape(1, 1, in_ch, mid_ch)
    w2 = p["w2"].reshape(3, 3, mid_ch, mid_ch)
    w3 = p["w3"].reshape(1, 1, mid_ch, out_ch)
    wt = p["wt"].reshape(1, 1, in_ch, out_ch)

    h = jnp.maximum(bn(conv(x, w1, 1, 0), p["scale1"], p["shift1"]), 0.0)
    h = jnp.maximum(bn(conv(h, w2, 1, 1), p["scale2"], p["shift2"]), 0.0)
    h = bn(conv(h, w3, stride, 0), p["scale3"], p["shift3"])
    s = bn(conv(x, wt, stride, 0), p["scalet"], p["shiftt"])
    y = jnp.maximum(h + s, 0.0)
    return jnp.transpose(y, (0, 3, 1, 2))


# --------------------------------------------------------------------------
# Deterministic synthetic parameters (inference-mode folded BatchNorm)
# --------------------------------------------------------------------------
def _folded_bn(key, c, eps=1e-5):
    k1, k2, k3, k4 = jax.random.split(key, 4)
    gamma = jax.random.uniform(k1, (c,), minval=0.5, maxval=1.5)
    beta = jax.random.normal(k2, (c,)) * 0.1
    mean = jax.random.normal(k3, (c,)) * 0.1
    var = jax.random.uniform(k4, (c,), minval=0.5, maxval=1.5)
    scale = gamma / jnp.sqrt(var + eps)
    shift = beta - mean * scale
    return (scale.reshape(1, c).astype(jnp.float32),
            shift.reshape(1, c).astype(jnp.float32))


def init_params(key, in_ch, mid_ch, out_ch):
    ks = jax.random.split(key, 8)
    p = {}
    p["w1"] = (jax.random.normal(ks[0], (in_ch, mid_ch)) * 0.1).astype(jnp.float32)
    p["w2"] = (jax.random.normal(ks[1], (9, mid_ch, mid_ch)) * 0.1).astype(jnp.float32)
    p["w3"] = (jax.random.normal(ks[2], (mid_ch, out_ch)) * 0.1).astype(jnp.float32)
    p["wt"] = (jax.random.normal(ks[3], (in_ch, out_ch)) * 0.1).astype(jnp.float32)
    p["scale1"], p["shift1"] = _folded_bn(ks[4], mid_ch)
    p["scale2"], p["shift2"] = _folded_bn(ks[5], mid_ch)
    p["scale3"], p["shift3"] = _folded_bn(ks[6], out_ch)
    p["scalet"], p["shiftt"] = _folded_bn(ks[7], out_ch)
    return p


# --------------------------------------------------------------------------
if __name__ == "__main__":
    key = jax.random.PRNGKey(0)
    kx, kp = jax.random.split(key)

    N, in_ch, mid_ch, out_ch, H, W = 2, 4, 8, 16, 16, 16
    stride = 1  # BottleBlock default; stride=2 folds into the same fused kernel

    x = jax.random.normal(kx, (N, in_ch, H, W), dtype=jnp.float32)  # NCHW (PyTorch)
    params = init_params(kp, in_ch, mid_ch, out_ch)

    out = jax.block_until_ready(bottle_block_forward(x, params, stride=stride))
    ref = jax.block_until_ready(bottle_block_reference(x, params, stride=stride))

    assert out.shape == ref.shape == (N, out_ch, H // stride, W // stride)
    # kernel uses bf16 matmul operands with f32 accumulation -> bf16-level tolerance
    assert jnp.allclose(out, ref, rtol=2e-2, atol=2e-2), "mismatch vs reference"

    print("KERNEL_OK")
</pallas_src>

<mosaic_0001>
module attributes {stable_mosaic.version = 11 : i64} {
  func.func @_bottle_block_kernel(%arg0: i32, %arg1: i32, %arg2: memref<1x18x24x4xbf16, #tpu.memory_space<vmem>>, %arg3: memref<4x8xbf16, #tpu.memory_space<vmem>>, %arg4: memref<1x8xf32, #tpu.memory_space<vmem>>, %arg5: memref<9x8x8xbf16, #tpu.memory_space<vmem>>, %arg6: memref<1x8xf32, #tpu.memory_space<vmem>>, %arg7: memref<12x16xbf16, #tpu.memory_space<vmem>>, %arg8: memref<1x16xf32, #tpu.memory_space<vmem>>, %arg9: memref<1x16x16x16xf32, #tpu.memory_space<vmem>>, %arg10: memref<18x24x8xbf16, #tpu.memory_space<vmem>>, %arg11: memref<256x8xf32, #tpu.memory_space<vmem>>) attributes {dimension_semantics = [#tpu.dimension_semantics<parallel>, #tpu.dimension_semantics<parallel>], iteration_bounds = array<i64: 2, 1>, scalar_prefetch = 0 : i64, scratch_operands = 2 : i64, tpu.core_type = #tpu.core_type<tc>, window_params = [{transform_indices = @transform_0, window_bounds = array<i64: 1, 18, 24, 4>}, {pipeline_mode = #tpu.pipeline_mode<synchronous>, transform_indices = @transform_1, window_bounds = array<i64: 4, 8>}, {pipeline_mode = #tpu.pipeline_mode<synchronous>, transform_indices = @transform_2, window_bounds = array<i64: 1, 8>}, {pipeline_mode = #tpu.pipeline_mode<synchronous>, transform_indices = @transform_3, window_bounds = array<i64: 9, 8, 8>}, {pipeline_mode = #tpu.pipeline_mode<synchronous>, transform_indices = @transform_4, window_bounds = array<i64: 1, 8>}, {pipeline_mode = #tpu.pipeline_mode<synchronous>, transform_indices = @transform_5, window_bounds = array<i64: 12, 16>}, {pipeline_mode = #tpu.pipeline_mode<synchronous>, transform_indices = @transform_6, window_bounds = array<i64: 1, 16>}, {transform_indices = @transform_7, window_bounds = array<i64: 1, 16, 16, 16>}]} {
    %c16_i32 = arith.constant 16 : i32
    %0 = arith.muli %arg1, %c16_i32 : i32
    %1 = tpu.assume_multiple %0, 16 : i32
    %c0_i32 = arith.constant 0 : i32
    %2 = arith.addi %1, %c0_i32 : i32
    %c0 = arith.constant 0 : index
    %3 = arith.index_cast %2 : i32 to index
    %c0_0 = arith.constant 0 : index
    %c0_1 = arith.constant 0 : index
    %4 = vector.load %arg2[%c0, %3, %c0_0, %c0_1] : memref<1x18x24x4xbf16, #tpu.memory_space<vmem>>, vector<1x18x24x4xbf16>
    %5 = vector.shape_cast %4 : vector<1x18x24x4xbf16> to vector<18x24x4xbf16>
    %6 = vector.shape_cast %5 : vector<18x24x4xbf16> to vector<432x4xbf16>
    %c0_2 = arith.constant 0 : index
    %c0_3 = arith.constant 0 : index
    %7 = vector.load %arg3[%c0_2, %c0_3] : memref<4x8xbf16, #tpu.memory_space<vmem>>, vector<4x8xbf16>
    %cst = arith.constant dense<0.000000e+00> : vector<432x8xf32>
    %8 = tpu.matmul %6, %7, %cst {dimension_numbers = #tpu.dot_dimension_numbers<[1], [0], [0], [1], [0, 0, 1, 1], [], []>} : vector<432x4xbf16>, vector<4x8xbf16>, vector<432x8xf32> -> vector<432x8xf32>
    %c0_4 = arith.constant 0 : index
    %c0_5 = arith.constant 0 : index
    %9 = vector.load %arg4[%c0_4, %c0_5] : memref<1x8xf32, #tpu.memory_space<vmem>>, vector<1x8xf32>
    %10 = vector.broadcast %9 : vector<1x8xf32> to vector<432x8xf32>
    %11 = arith.addf %8, %10 : vector<432x8xf32>
    %cst_6 = arith.constant 0.000000e+00 : f32
    %12 = vector.broadcast %cst_6 : f32 to vector<432x8xf32>
    %13 = arith.maximumf %11, %12 : vector<432x8xf32>
    %14 = vector.shape_cast %13 : vector<432x8xf32> to vector<18x24x8xf32>
    %15 = arith.truncf %14 : vector<18x24x8xf32> to vector<18x24x8xbf16>
    %c0_7 = arith.constant 0 : index
    %c0_8 = arith.constant 0 : index
    %c0_9 = arith.constant 0 : index
    %16 = vector.load %arg10[%c0_7, %c0_8, %c0_9] : memref<18x24x8xbf16, #tpu.memory_space<vmem>>, vector<18x24x8xbf16>
    tpu.vector_store %arg10[%c0_7, %c0_8, %c0_9], %15 {strides = array<i32>} : memref<18x24x8xbf16, #tpu.memory_space<vmem>>, vector<18x24x8xbf16>,
    %cst_10 = arith.constant 0.000000e+00 : bf16
    %17 = vector.broadcast %cst_10 : bf16 to vector<18x1x8xbf16>
    %c0_11 = arith.constant 0 : index
    %c0_12 = arith.constant 0 : index
    %c0_13 = arith.constant 0 : index
    %18 = vector.load %arg10[%c0_11, %c0_12, %c0_13] : memref<18x24x8xbf16, #tpu.memory_space<vmem>>, vector<18x1x8xbf16>
    tpu.vector_store %arg10[%c0_11, %c0_12, %c0_13], %17 {strides = array<i32>} : memref<18x24x8xbf16, #tpu.memory_space<vmem>>, vector<18x1x8xbf16>,
    %cst_14 = arith.constant 0.000000e+00 : bf16
    %19 = vector.broadcast %cst_14 : bf16 to vector<18x1x8xbf16>
    %c0_15 = arith.constant 0 : index
    %c17 = arith.constant 17 : index
    %c0_16 = arith.constant 0 : index
    %20 = vector.load %arg10[%c0_15, %c17, %c0_16] : memref<18x24x8xbf16, #tpu.memory_space<vmem>>, vector<18x1x8xbf16>
    tpu.vector_store %arg10[%c0_15, %c17, %c0_16], %19 {strides = array<i32>} : memref<18x24x8xbf16, #tpu.memory_space<vmem>>, vector<18x1x8xbf16>,
    %c0_i32_17 = arith.constant 0 : i32
    %21 = arith.cmpi eq, %arg1, %c0_i32_17 : i32
    %22 = arith.extui %21 : i1 to i32
    %c0_i32_18 = arith.constant 0 : i32
    %23 = arith.cmpi ne, %22, %c0_i32_18 : i32
    scf.if %23 {
      %cst_129 = arith.constant 0.000000e+00 : bf16
      %123 = vector.broadcast %cst_129 : bf16 to vector<1x24x8xbf16>
      %c0_130 = arith.constant 0 : index
      %c0_131 = arith.constant 0 : index
      %c0_132 = arith.constant 0 : index
      %124 = vector.load %arg10[%c0_130, %c0_131, %c0_132] : memref<18x24x8xbf16, #tpu.memory_space<vmem>>, vector<1x24x8xbf16>
      tpu.vector_store %arg10[%c0_130, %c0_131, %c0_132], %123 {strides = array<i32>} : memref<18x24x8xbf16, #tpu.memory_space<vmem>>, vector<1x24x8xbf16>,
    } else {
    }
    %c0_i32_19 = arith.constant 0 : i32
    %24 = arith.cmpi eq, %arg1, %c0_i32_19 : i32
    %25 = arith.extui %24 : i1 to i32
    %c0_i32_20 = arith.constant 0 : i32
    %26 = arith.cmpi ne, %25, %c0_i32_20 : i32
    scf.if %26 {
      %cst_129 = arith.constant 0.000000e+00 : bf16
      %123 = vector.broadcast %cst_129 : bf16 to vector<1x24x8xbf16>
      %c17_130 = arith.constant 17 : index
      %c0_131 = arith.constant 0 : index
      %c0_132 = arith.constant 0 : index
      %124 = vector.load %arg10[%c17_130, %c0_131, %c0_132] : memref<18x24x8xbf16, #tpu.memory_space<vmem>>, vector<1x24x8xbf16>
      tpu.vector_store %arg10[%c17_130, %c0_131, %c0_132], %123 {strides = array<i32>} : memref<18x24x8xbf16, #tpu.memory_space<vmem>>, vector<1x24x8xbf16>,
    } else {
    }
    %c0_21 = arith.constant 0 : index
    %c0_22 = arith.constant 0 : index
    %c0_23 = arith.constant 0 : index
    %27 = vector.load %arg10[%c0_21, %c0_22, %c0_23] : memref<18x24x8xbf16, #tpu.memory_space<vmem>>, vector<16x16x8xbf16>
    %28 = vector.shape_cast %27 : vector<16x16x8xbf16> to vector<256x8xbf16>
    %c0_24 = arith.constant 0 : index
    %c0_25 = arith.constant 0 : index
    %c0_26 = arith.constant 0 : index
    %29 = vector.load %arg5[%c0_24, %c0_25, %c0_26] : memref<9x8x8xbf16, #tpu.memory_space<vmem>>, vector<1x8x8xbf16>
    %30 = vector.shape_cast %29 : vector<1x8x8xbf16> to vector<8x8xbf16>
    %cst_27 = arith.constant dense<0.000000e+00> : vector<256x8xf32>
    %31 = tpu.matmul %28, %30, %cst_27 {dimension_numbers = #tpu.dot_dimension_numbers<[1], [0], [0], [1], [0, 0, 1, 1], [], []>} : vector<256x8xbf16>, vector<8x8xbf16>, vector<256x8xf32> -> vector<256x8xf32>
    %c0_28 = arith.constant 0 : index
    %c0_29 = arith.constant 0 : index
    %32 = vector.load %arg11[%c0_28, %c0_29] : memref<256x8xf32, #tpu.memory_space<vmem>>, vector<256x8xf32>
    tpu.vector_store %arg11[%c0_28, %c0_29], %31 {strides = array<i32>} : memref<256x8xf32, #tpu.memory_space<vmem>>, vector<256x8xf32>,
    %c0_30 = arith.constant 0 : index
    %c1 = arith.constant 1 : index
    %c0_31 = arith.constant 0 : index
    %33 = vector.load %arg10[%c0_30, %c1, %c0_31] : memref<18x24x8xbf16, #tpu.memory_space<vmem>>, vector<16x16x8xbf16>
    %34 = vector.shape_cast %33 : vector<16x16x8xbf16> to vector<256x8xbf16>
    %c1_32 = arith.constant 1 : index
    %c0_33 = arith.constant 0 : index
    %c0_34 = arith.constant 0 : index
    %35 = vector.load %arg5[%c1_32, %c0_33, %c0_34] : memref<9x8x8xbf16, #tpu.memory_space<vmem>>, vector<1x8x8xbf16>
    %36 = vector.shape_cast %35 : vector<1x8x8xbf16> to vector<8x8xbf16>
    %cst_35 = arith.constant dense<0.000000e+00> : vector<256x8xf32>
    %37 = tpu.matmul %34, %36, %cst_35 {dimension_numbers = #tpu.dot_dimension_numbers<[1], [0], [0], [1], [0, 0, 1, 1], [], []>} : vector<256x8xbf16>, vector<8x8xbf16>, vector<256x8xf32> -> vector<256x8xf32>
    %c0_36 = arith.constant 0 : index
    %c0_37 = arith.constant 0 : index
    %38 = vector.load %arg11[%c0_36, %c0_37] : memref<256x8xf32, #tpu.memory_space<vmem>>, vector<256x8xf32>
    %39 = arith.addf %38, %37 : vector<256x8xf32>
    %c0_38 = arith.constant 0 : index
    %c0_39 = arith.constant 0 : index
    %40 = vector.load %arg11[%c0_38, %c0_39] : memref<256x8xf32, #tpu.memory_space<vmem>>, vector<256x8xf32>
    tpu.vector_store %arg11[%c0_38, %c0_39], %39 {strides = array<i32>} : memref<256x8xf32, #tpu.memory_space<vmem>>, vector<256x8xf32>,
    %c0_40 = arith.constant 0 : index
    %c2 = arith.constant 2 : index
    %c0_41 = arith.constant 0 : index
    %41 = vector.load %arg10[%c0_40, %c2, %c0_41] : memref<18x24x8xbf16, #tpu.memory_space<vmem>>, vector<16x16x8xbf16>
    %42 = vector.shape_cast %41 : vector<16x16x8xbf16> to vector<256x8xbf16>
    %c2_42 = arith.constant 2 : index
    %c0_43 = arith.constant 0 : index
    %c0_44 = arith.constant 0 : index
    %43 = vector.load %arg5[%c2_42, %c0_43, %c0_44] : memref<9x8x8xbf16, #tpu.memory_space<vmem>>, vector<1x8x8xbf16>
    %44 = vector.shape_cast %43 : vector<1x8x8xbf16> to vector<8x8xbf16>
    %cst_45 = arith.constant dense<0.000000e+00> : vector<256x8xf32>
    %45 = tpu.matmul %42, %44, %cst_45 {dimension_numbers = #tpu.dot_dimension_numbers<[1], [0], [0], [1], [0, 0, 1, 1], [], []>} : vector<256x8xbf16>, vector<8x8xbf16>, vector<256x8xf32> -> vector<256x8xf32>
    %c0_46 = arith.constant 0 : index
    %c0_47 = arith.constant 0 : index
    %46 = vector.load %arg11[%c0_46, %c0_47] : memref<256x8xf32, #tpu.memory_space<vmem>>, vector<256x8xf32>
    %47 = arith.addf %46, %45 : vector<256x8xf32>
    %c0_48 = arith.constant 0 : index
    %c0_49 = arith.constant 0 : index
    %48 = vector.load %arg11[%c0_48, %c0_49] : memref<256x8xf32, #tpu.memory_space<vmem>>, vector<256x8xf32>
    tpu.vector_store %arg11[%c0_48, %c0_49], %47 {strides = array<i32>} : memref<256x8xf32, #tpu.memory_space<vmem>>, vector<256x8xf32>,
    %c1_50 = arith.constant 1 : index
    %c0_51 = arith.constant 0 : index
    %c0_52 = arith.constant 0 : index
    %49 = vector.load %arg10[%c1_50, %c0_51, %c0_52] : memref<18x24x8xbf16, #tpu.memory_space<vmem>>, vector<16x16x8xbf16>
    %50 = vector.shape_cast %49 : vector<16x16x8xbf16> to vector<256x8xbf16>
    %c3 = arith.constant 3 : index
    %c0_53 = arith.constant 0 : index
    %c0_54 = arith.constant 0 : index
    %51 = vector.load %arg5[%c3, %c0_53, %c0_54] : memref<9x8x8xbf16, #tpu.memory_space<vmem>>, vector<1x8x8xbf16>
    %52 = vector.shape_cast %51 : vector<1x8x8xbf16> to vector<8x8xbf16>
    %cst_55 = arith.constant dense<0.000000e+00> : vector<256x8xf32>
    %53 = tpu.matmul %50, %52, %cst_55 {dimension_numbers = #tpu.dot_dimension_numbers<[1], [0], [0], [1], [0, 0, 1, 1], [], []>} : vector<256x8xbf16>, vector<8x8xbf16>, vector<256x8xf32> -> vector<256x8xf32>
    %c0_56 = arith.constant 0 : index
    %c0_57 = arith.constant 0 : index
    %54 = vector.load %arg11[%c0_56, %c0_57] : memref<256x8xf32, #tpu.memory_space<vmem>>, vector<256x8xf32>
    %55 = arith.addf %54, %53 : vector<256x8xf32>
    %c0_58 = arith.constant 0 : index
    %c0_59 = arith.constant 0 : index
    %56 = vector.load %arg11[%c0_58, %c0_59] : memref<256x8xf32, #tpu.memory_space<vmem>>, vector<256x8xf32>
    tpu.vector_store %arg11[%c0_58, %c0_59], %55 {strides = array<i32>} : memref<256x8xf32, #tpu.memory_space<vmem>>, vector<256x8xf32>,
    %c1_60 = arith.constant 1 : index
    %c1_61 = arith.constant 1 : index
    %c0_62 = arith.constant 0 : index
    %57 = vector.load %arg10[%c1_60, %c1_61, %c0_62] : memref<18x24x8xbf16, #tpu.memory_space<vmem>>, vector<16x16x8xbf16>
    %58 = vector.shape_cast %57 : vector<16x16x8xbf16> to vector<256x8xbf16>
    %c4 = arith.constant 4 : index
    %c0_63 = arith.constant 0 : index
    %c0_64 = arith.constant 0 : index
    %59 = vector.load %arg5[%c4, %c0_63, %c0_64] : memref<9x8x8xbf16, #tpu.memory_space<vmem>>, vector<1x8x8xbf16>
    %60 = vector.shape_cast %59 : vector<1x8x8xbf16> to vector<8x8xbf16>
    %cst_65 = arith.constant dense<0.000000e+00> : vector<256x8xf32>
    %61 = tpu.matmul %58, %60, %cst_65 {dimension_numbers = #tpu.dot_dimension_numbers<[1], [0], [0], [1], [0, 0, 1, 1], [], []>} : vector<256x8xbf16>, vector<8x8xbf16>, vector<256x8xf32> -> vector<256x8xf32>
    %c0_66 = arith.constant 0 : index
    %c0_67 = arith.constant 0 : index
    %62 = vector.load %arg11[%c0_66, %c0_67] : memref<256x8xf32, #tpu.memory_space<vmem>>, vector<256x8xf32>
    %63 = arith.addf %62, %61 : vector<256x8xf32>
    %c0_68 = arith.constant 0 : index
    %c0_69 = arith.constant 0 : index
    %64 = vector.load %arg11[%c0_68, %c0_69] : memref<256x8xf32, #tpu.memory_space<vmem>>, vector<256x8xf32>
    tpu.vector_store %arg11[%c0_68, %c0_69], %63 {strides = array<i32>} : memref<256x8xf32, #tpu.memory_space<vmem>>, vector<256x8xf32>,
    %c1_70 = arith.constant 1 : index
    %c2_71 = arith.constant 2 : index
    %c0_72 = arith.constant 0 : index
    %65 = vector.load %arg10[%c1_70, %c2_71, %c0_72] : memref<18x24x8xbf16, #tpu.memory_space<vmem>>, vector<16x16x8xbf16>
    %66 = vector.shape_cast %65 : vector<16x16x8xbf16> to vector<256x8xbf16>
    %c5 = arith.constant 5 : index
    %c0_73 = arith.constant 0 : index
    %c0_74 = arith.constant 0 : index
    %67 = vector.load %arg5[%c5, %c0_73, %c0_74] : memref<9x8x8xbf16, #tpu.memory_space<vmem>>, vector<1x8x8xbf16>
    %68 = vector.shape_cast %67 : vector<1x8x8xbf16> to vector<8x8xbf16>
    %cst_75 = arith.constant dense<0.000000e+00> : vector<256x8xf32>
    %69 = tpu.matmul %66, %68, %cst_75 {dimension_numbers = #tpu.dot_dimension_numbers<[1], [0], [0], [1], [0, 0, 1, 1], [], []>} : vector<256x8xbf16>, vector<8x8xbf16>, vector<256x8xf32> -> vector<256x8xf32>
    %c0_76 = arith.constant 0 : index
    %c0_77 = arith.constant 0 : index
    %70 = vector.load %arg11[%c0_76, %c0_77] : memref<256x8xf32, #tpu.memory_space<vmem>>, vector<256x8xf32>
    %71 = arith.addf %70, %69 : vector<256x8xf32>
    %c0_78 = arith.constant 0 : index
    %c0_79 = arith.constant 0 : index
    %72 = vector.load %arg11[%c0_78, %c0_79] : memref<256x8xf32, #tpu.memory_space<vmem>>, vector<256x8xf32>
    tpu.vector_store %arg11[%c0_78, %c0_79], %71 {strides = array<i32>} : memref<256x8xf32, #tpu.memory_space<vmem>>, vector<256x8xf32>,
    %c2_80 = arith.constant 2 : index
    %c0_81 = arith.constant 0 : index
    %c0_82 = arith.constant 0 : index
    %73 = vector.load %arg10[%c2_80, %c0_81, %c0_82] : memref<18x24x8xbf16, #tpu.memory_space<vmem>>, vector<16x16x8xbf16>
    %74 = vector.shape_cast %73 : vector<16x16x8xbf16> to vector<256x8xbf16>
    %c6 = arith.constant 6 : index
    %c0_83 = arith.constant 0 : index
    %c0_84 = arith.constant 0 : index
    %75 = vector.load %arg5[%c6, %c0_83, %c0_84] : memref<9x8x8xbf16, #tpu.memory_space<vmem>>, vector<1x8x8xbf16>
    %76 = vector.shape_cast %75 : vector<1x8x8xbf16> to vector<8x8xbf16>
    %cst_85 = arith.constant dense<0.000000e+00> : vector<256x8xf32>
    %77 = tpu.matmul %74, %76, %cst_85 {dimension_numbers = #tpu.dot_dimension_numbers<[1], [0], [0], [1], [0, 0, 1, 1], [], []>} : vector<256x8xbf16>, vector<8x8xbf16>, vector<256x8xf32> -> vector<256x8xf32>
    %c0_86 = arith.constant 0 : index
    %c0_87 = arith.constant 0 : index
    %78 = vector.load %arg11[%c0_86, %c0_87] : memref<256x8xf32, #tpu.memory_space<vmem>>, vector<256x8xf32>
    %79 = arith.addf %78, %77 : vector<256x8xf32>
    %c0_88 = arith.constant 0 : index
    %c0_89 = arith.constant 0 : index
    %80 = vector.load %arg11[%c0_88, %c0_89] : memref<256x8xf32, #tpu.memory_space<vmem>>, vector<256x8xf32>
    tpu.vector_store %arg11[%c0_88, %c0_89], %79 {strides = array<i32>} : memref<256x8xf32, #tpu.memory_space<vmem>>, vector<256x8xf32>,
    %c2_90 = arith.constant 2 : index
    %c1_91 = arith.constant 1 : index
    %c0_92 = arith.constant 0 : index
    %81 = vector.load %arg10[%c2_90, %c1_91, %c0_92] : memref<18x24x8xbf16, #tpu.memory_space<vmem>>, vector<16x16x8xbf16>
    %82 = vector.shape_cast %81 : vector<16x16x8xbf16> to vector<256x8xbf16>
    %c7 = arith.constant 7 : index
    %c0_93 = arith.constant 0 : index
    %c0_94 = arith.constant 0 : index
    %83 = vector.load %arg5[%c7, %c0_93, %c0_94] : memref<9x8x8xbf16, #tpu.memory_space<vmem>>, vector<1x8x8xbf16>
    %84 = vector.shape_cast %83 : vector<1x8x8xbf16> to vector<8x8xbf16>
    %cst_95 = arith.constant dense<0.000000e+00> : vector<256x8xf32>
    %85 = tpu.matmul %82, %84, %cst_95 {dimension_numbers = #tpu.dot_dimension_numbers<[1], [0], [0], [1], [0, 0, 1, 1], [], []>} : vector<256x8xbf16>, vector<8x8xbf16>, vector<256x8xf32> -> vector<256x8xf32>
    %c0_96 = arith.constant 0 : index
    %c0_97 = arith.constant 0 : index
    %86 = vector.load %arg11[%c0_96, %c0_97] : memref<256x8xf32, #tpu.memory_space<vmem>>, vector<256x8xf32>
    %87 = arith.addf %86, %85 : vector<256x8xf32>
    %c0_98 = arith.constant 0 : index
    %c0_99 = arith.constant 0 : index
    %88 = vector.load %arg11[%c0_98, %c0_99] : memref<256x8xf32, #tpu.memory_space<vmem>>, vector<256x8xf32>
    tpu.vector_store %arg11[%c0_98, %c0_99], %87 {strides = array<i32>} : memref<256x8xf32, #tpu.memory_space<vmem>>, vector<256x8xf32>,
    %c2_100 = arith.constant 2 : index
    %c2_101 = arith.constant 2 : index
    %c0_102 = arith.constant 0 : index
    %89 = vector.load %arg10[%c2_100, %c2_101, %c0_102] : memref<18x24x8xbf16, #tpu.memory_space<vmem>>, vector<16x16x8xbf16>
    %90 = vector.shape_cast %89 : vector<16x16x8xbf16> to vector<256x8xbf16>
    %c8 = arith.constant 8 : index
    %c0_103 = arith.constant 0 : index
    %c0_104 = arith.constant 0 : index
    %91 = vector.load %arg5[%c8, %c0_103, %c0_104] : memref<9x8x8xbf16, #tpu.memory_space<vmem>>, vector<1x8x8xbf16>
    %92 = vector.shape_cast %91 : vector<1x8x8xbf16> to vector<8x8xbf16>
    %cst_105 = arith.constant dense<0.000000e+00> : vector<256x8xf32>
    %93 = tpu.matmul %90, %92, %cst_105 {dimension_numbers = #tpu.dot_dimension_numbers<[1], [0], [0], [1], [0, 0, 1, 1], [], []>} : vector<256x8xbf16>, vector<8x8xbf16>, vector<256x8xf32> -> vector<256x8xf32>
    %c0_106 = arith.constant 0 : index
    %c0_107 = arith.constant 0 : index
    %94 = vector.load %arg11[%c0_106, %c0_107] : memref<256x8xf32, #tpu.memory_space<vmem>>, vector<256x8xf32>
    %95 = arith.addf %94, %93 : vector<256x8xf32>
    %c0_108 = arith.constant 0 : index
    %c0_109 = arith.constant 0 : index
    %96 = vector.load %arg11[%c0_108, %c0_109] : memref<256x8xf32, #tpu.memory_space<vmem>>, vector<256x8xf32>
    tpu.vector_store %arg11[%c0_108, %c0_109], %95 {strides = array<i32>} : memref<256x8xf32, #tpu.memory_space<vmem>>, vector<256x8xf32>,
    %c0_110 = arith.constant 0 : index
    %c0_111 = arith.constant 0 : index
    %97 = vector.load %arg11[%c0_110, %c0_111] : memref<256x8xf32, #tpu.memory_space<vmem>>, vector<256x8xf32>
    %c0_112 = arith.constant 0 : index
    %c0_113 = arith.constant 0 : index
    %98 = vector.load %arg6[%c0_112, %c0_113] : memref<1x8xf32, #tpu.memory_space<vmem>>, vector<1x8xf32>
    %99 = vector.broadcast %98 : vector<1x8xf32> to vector<256x8xf32>
    %100 = arith.addf %97, %99 : vector<256x8xf32>
    %cst_114 = arith.constant 0.000000e+00 : f32
    %101 = vector.broadcast %cst_114 : f32 to vector<256x8xf32>
    %102 = arith.maximumf %100, %101 : vector<256x8xf32>
    %103 = arith.truncf %102 : vector<256x8xf32> to vector<256x8xbf16>
    %c1_i32 = arith.constant 1 : i32
    %104 = arith.addi %1, %c1_i32 : i32
    %c0_i32_115 = arith.constant 0 : i32
    %105 = arith.addi %104, %c0_i32_115 : i32
    %c0_116 = arith.constant 0 : index
    %106 = arith.index_cast %105 : i32 to index
    %c0_117 = arith.constant 0 : index
    %c0_118 = arith.constant 0 : index
    %107 = vector.load %arg2[%c0_116, %106, %c0_117, %c0_118] : memref<1x18x24x4xbf16, #tpu.memory_space<vmem>>, vector<1x16x24x4xbf16>
    %108 = vector.shape_cast %107 : vector<1x16x24x4xbf16> to vector<16x24x4xbf16>
    %109 = vector.extract_strided_slice %108 {offsets = [0, 1, 0], sizes = [16, 16, 4], strides = [1, 1, 1]} : vector<16x24x4xbf16> to vector<16x16x4xbf16>
    %110 = vector.shape_cast %109 : vector<16x16x4xbf16> to vector<256x4xbf16>
    %111 = tpu.concatenate %103, %110 in 1 : vector<256x8xbf16>, vector<256x4xbf16> -> vector<256x12xbf16>
    %c0_119 = arith.constant 0 : index
    %c0_120 = arith.constant 0 : index
    %112 = vector.load %arg7[%c0_119, %c0_120] : memref<12x16xbf16, #tpu.memory_space<vmem>>, vector<12x16xbf16>
    %cst_121 = arith.constant dense<0.000000e+00> : vector<256x16xf32>
    %113 = tpu.matmul %111, %112, %cst_121 {dimension_numbers = #tpu.dot_dimension_numbers<[1], [0], [0], [1], [0, 0, 1, 1], [], []>} : vector<256x12xbf16>, vector<12x16xbf16>, vector<256x16xf32> -> vector<256x16xf32>
    %c0_122 = arith.constant 0 : index
    %c0_123 = arith.constant 0 : index
    %114 = vector.load %arg8[%c0_122, %c0_123] : memref<1x16xf32, #tpu.memory_space<vmem>>, vector<1x16xf32>
    %115 = vector.broadcast %114 : vector<1x16xf32> to vector<256x16xf32>
    %116 = arith.addf %113, %115 : vector<256x16xf32>
    %cst_124 = arith.constant 0.000000e+00 : f32
    %117 = vector.broadcast %cst_124 : f32 to vector<256x16xf32>
    %118 = arith.maximumf %116, %117 : vector<256x16xf32>
    %119 = vector.shape_cast %118 : vector<256x16xf32> to vector<16x16x16xf32>
    %c0_125 = arith.constant 0 : index
    %c0_126 = arith.constant 0 : index
    %c0_127 = arith.constant 0 : index
    %c0_128 = arith.constant 0 : index
    %120 = vector.load %arg9[%c0_125, %c0_126, %c0_127, %c0_128] : memref<1x16x16x16xf32, #tpu.memory_space<vmem>>, vector<1x16x16x16xf32>
    %121 = vector.shape_cast %120 : vector<1x16x16x16xf32> to vector<16x16x16xf32>
    %122 = vector.shape_cast %119 : vector<16x16x16xf32> to vector<1x16x16x16xf32>
    tpu.vector_store %arg9[%c0_125, %c0_126, %c0_127, %c0_128], %122 {strides = array<i32>} : memref<1x16x16x16xf32, #tpu.memory_space<vmem>>, vector<1x16x16x16xf32>,
    return
  }
  func.func @transform_0(%arg0: i32, %arg1: i32) -> (i32, i32, i32, i32) {
    %c0_i32 = arith.constant 0 : i32
    %c0_i32_0 = arith.constant 0 : i32
    %c0_i32_1 = arith.constant 0 : i32
    %c0_i32_2 = arith.constant 0 : i32
    return %arg0, %c0_i32, %c0_i32_0, %c0_i32_1 : i32, i32, i32, i32
  }
  func.func @transform_1(%arg0: i32, %arg1: i32) -> (i32, i32) {
    %c0_i32 = arith.constant 0 : i32
    %c0_i32_0 = arith.constant 0 : i32
    %c0_i32_1 = arith.constant 0 : i32
    return %c0_i32, %c0_i32_0 : i32, i32
  }
  func.func @transform_2(%arg0: i32, %arg1: i32) -> (i32, i32) {
    %c0_i32 = arith.constant 0 : i32
    %c0_i32_0 = arith.constant 0 : i32
    %c0_i32_1 = arith.constant 0 : i32
    return %c0_i32, %c0_i32_0 : i32, i32
  }
  func.func @transform_3(%arg0: i32, %arg1: i32) -> (i32, i32, i32) {
    %c0_i32 = arith.constant 0 : i32
    %c0_i32_0 = arith.constant 0 : i32
    %c0_i32_1 = arith.constant 0 : i32
    %c0_i32_2 = arith.constant 0 : i32
    return %c0_i32, %c0_i32_0, %c0_i32_1 : i32, i32, i32
  }
  func.func @transform_4(%arg0: i32, %arg1: i32) -> (i32, i32) {
    %c0_i32 = arith.constant 0 : i32
    %c0_i32_0 = arith.constant 0 : i32
    %c0_i32_1 = arith.constant 0 : i32
    return %c0_i32, %c0_i32_0 : i32, i32
  }
  func.func @transform_5(%arg0: i32, %arg1: i32) -> (i32, i32) {
    %c0_i32 = arith.constant 0 : i32
    %c0_i32_0 = arith.constant 0 : i32
    %c0_i32_1 = arith.constant 0 : i32
    return %c0_i32, %c0_i32_0 : i32, i32
  }
  func.func @transform_6(%arg0: i32, %arg1: i32) -> (i32, i32) {
    %c0_i32 = arith.constant 0 : i32
    %c0_i32_0 = arith.constant 0 : i32
    %c0_i32_1 = arith.constant 0 : i32
    return %c0_i32, %c0_i32_0 : i32, i32
  }
  func.func @transform_7(%arg0: i32, %arg1: i32) -> (i32, i32, i32, i32) {
    %c0_i32 = arith.constant 0 : i32
    %c0_i32_0 = arith.constant 0 : i32
    %c0_i32_1 = arith.constant 0 : i32
    return %arg0, %arg1, %c0_i32, %c0_i32_0 : i32, i32, i32, i32
  }
}

</mosaic_0001>

<bundles_post_ra>
// kernel: tpu_custom_call.1
= control target key start
LH: loop header
LB: loop body
LE: loop exit
PB: predicated region body
PF: predicated region fallthrough
CT: control target
= control target key end

     0   :  { %s12440_s0 = inlined_call_operand.hbm [shape: bf16[2,18,24,4], index: 0, kind: input, shape index: {}]   ;;  %s12441_s1 = inlined_call_operand.hbm [shape: bf16[4,8], index: 1, kind: input, shape index: {}]   ;;  %s12442_s2 = inlined_call_operand.hbm [shape: f32[1,8], index: 2, kind: input, shape index: {}]   ;;  %s12443_s3 = inlined_call_operand.hbm [shape: bf16[9,8,8], index: 3, kind: input, shape index: {}]   ;;  %s12444_s4 = inlined_call_operand.hbm [shape: f32[1,8], index: 4, kind: input, shape index: {}]   ;;  %s12445_s5 = inlined_call_operand.hbm [shape: bf16[12,16], index: 5, kind: input, shape index: {}]   ;;  %s12446_s6 = inlined_call_operand.hbm [shape: f32[1,16], index: 6, kind: input, shape index: {}]   ;;  %s12447_s7 = inlined_call_operand.hbm [shape: f32[2,16,16,16], index: 7, kind: output, shape index: {}]  }
   0x1   :  { %12455 = sst [smem:[#allocation65_spill]] %s12441_s1 }
   0x2   :  { %12456 = sst [smem:[#allocation66_spill]] %s12442_s2 }
   0x3   :  { %12457 = sst [smem:[#allocation67_spill]] %s12443_s3 }
   0x4   :  { %12 = vsyncpa [#allocation5], 0 }
   0x5   :  { %14 = vsyncpa [#allocation5 + $0x1], 0 }
   0x6   :  { %15 = vsyncpa [#allocation8], 0 }
   0x7   :  { %16 = vsyncpa [#allocation11], 0 }
   0x8   :  { %17 = vsyncpa [#allocation14], 0 }
   0x9   :  { %18 = vsyncpa [#allocation6], 0 }
   0xa   :  { %20 = vsyncpa [#allocation6 + $0x1], 0  ;;  %s9625_s24 = smov 0   ;;  %s9627_s25 = smov 0  }
   0xb   :  { %s9629_s26 = smov 0   ;;  %s9631_s27 = smov 0  }
   0xc   :  { %s9633_s28 = smov 0   ;;  %s9635_s29 = smov 0  }
   0xd LB: > { %s12451_s30 = sadd.s32 4294967295, %s9568_s29   ;;  %p7800_p0 = scmp.ge.s32.totalorder %s9568_s29, 1  ;;  %s9568_s29 = sphi %s9635_s29, %s26_s29   ;;  %s9564_s28 = sphi %s9633_s28, %s12605_s28   ;;  %s9560_s27 = sphi %s9631_s27, %s12604_s27   ;;  %s9556_s26 = sphi %s9629_s26, %s12603_s26   ;;  %s9552_s25 = sphi %s9627_s25, %s12602_s25   ;;  %s9548_s24 = sphi %s9625_s24, %s12601_s24  }
   0xe   : > { %p9659_p1 = scmp.eq.s32.totalorder %s12451_s30, 0  ;;  %p223_p2 = scmp.lt.s32.totalorder %s9568_s29, 3 }
   0xf   : > { %s9570_s10 = smov [#allocation7]   ;;  %s9571_s12 = smov [#allocation10]  }
  0x10   : > { %s12458_s8 = scalar_select %p9659_p1, 1, 0 }
  0x11   : > { %p9664_p3 = pnand %p7800_p0, %p223_p2  ;;  %s236_s11 = sshll.u32 %s9570_s10, 4  ;;  %s237_s11 = int_to_ptr.vmem [resolvable:$true] %s236_s11 }
  0x12   : > { %s257_s13 = sshll.u32 %s9571_s12, 4  ;;  %s9572_s15 = smov [#allocation13]   ;;  %s9677_s13 = int_to_ptr.vmem [resolvable:$true] %s257_s13 }
  0x13   : > { %s12459_s9 = scalar_select %p9664_p3, 1, 0 }
  0x14   : > { %p9097_p5 = pneg %p9664_p3  ;;  %s9679_s16 = sshll.u32 %s9572_s15, 4  ;;  %s282_s16 = int_to_ptr.vmem [resolvable:$true] %s9679_s16 }
  0x15   : > { %s12461_s1 = sld [smem:[#allocation65_spill]] }
  0x16   : > { %p9673_p6 = pnand %p9097_p5, %p9659_p1 }
  0x18   : > { %p9689_p8 = pneg %p9673_p6 }
  0x1b   : > { %s9276_s19 = scalar_lea.hbm %s12461_s1, 32 }
  0x1c   : > { %p9277_p7 = scmp.ne.s32.totalorder %s12461_s1, %s9276_s19  ;;  %p9283_p11 = scmp.lt.u32.totalorder %s9276_s19, %s12461_s1 }
  0x1e   : > { %p9279_p9 = pnand %p9689_p8, %p9277_p7 }
  0x20   : > { %p9280_p10 = pneg %p9279_p9 }
  0x22   : > { %p9285_p12 = pnand %p9283_p11, %p9280_p10 }
  0x24   : > { %9288 = shalt.err (!%p9285_p12)
}
  0x25   : > { %s9289_s12 = scalar_lea.vmem %s237_s11, 32  ;;  %p9297_p5 = scmp.lt.s32.totalorder %s237_s11, %s237_s11 }
  0x26   : > { %p9290_p13 = scmp.ne.s32.totalorder %s237_s11, %s9289_s12  ;;  %p9298_p4 = scmp.lt.s32.totalorder %s9289_s12, %s9289_s12 }
  0x28   : > { %p9292_p0 = pnand %p9290_p13, %p9689_p8  ;;  %p9299_p3 = por %p9298_p4, %p9297_p5 }
  0x2a   : > { %p9293_p2 = pneg %p9292_p0 }
  0x2c   : > { %p9300_p1 = pnand %p9299_p3, %p9293_p2 }
  0x2e   : > { %9303 = shalt.err (!%p9300_p1)
}
  0x2f   : > { %9100 = dma.hbm_to_vmem [thread:$0]  (!%p9673_p6), %s12461_s1, 32, %s237_s11, [#allocation8]  }
  0x30   : > { %s12463_s3 = sld [smem:[#allocation67_spill]] }
  0x36   : > { %s9304_s20 = scalar_lea.hbm %s12463_s3, 576 }
  0x37   : > { %p9305_p7 = scmp.ne.s32.totalorder %s12463_s3, %s9304_s20  ;;  %p9311_p1 = scmp.lt.u32.totalorder %s9304_s20, %s12463_s3 }
  0x39   : > { %p9307_p9 = pnand %p9305_p7, %p9689_p8 }
  0x3b   : > { %p9308_p4 = pneg %p9307_p9 }
  0x3d   : > { %p9313_p3 = pnand %p9311_p1, %p9308_p4 }
  0x3f   : > { %9316 = shalt.err (!%p9313_p3)
}
  0x40   : > { %s9317_s11 = scalar_lea.vmem %s9677_s13, 576  ;;  %p9325_p13 = scmp.lt.s32.totalorder %s9677_s13, %s9677_s13 }
  0x41   : > { %p9318_p10 = scmp.ne.s32.totalorder %s9677_s13, %s9317_s11  ;;  %p9326_p0 = scmp.lt.s32.totalorder %s9317_s11, %s9317_s11 }
  0x43   : > { %p9320_p11 = pnand %p9318_p10, %p9689_p8  ;;  %p9327_p2 = por %p9326_p0, %p9325_p13 }
  0x45   : > { %p9321_p12 = pneg %p9320_p11 }
  0x47   : > { %p9328_p5 = pnand %p9327_p2, %p9321_p12 }
  0x49   : > { %9331 = shalt.err (!%p9328_p5)
}
  0x4a   : > { %s12452_s15 = smov 64   ;;  %s12453_s17 = smov 4  }
  0x4b   : > { %9106 = dma.hbm_to_vmem [thread:$0]  (!%p9673_p6), %s12463_s3, 576, %s9677_s13, [#allocation11], %s12452_s15, %s12452_s15, %s12453_s17  }
  0x4c   : > { %s9332_s23 = scalar_lea.hbm %s12445_s5, 128 }
  0x4d   : > { %p9333_p7 = scmp.ne.s32.totalorder %s12445_s5, %s9332_s23  ;;  %p9339_p1 = scmp.lt.u32.totalorder %s9332_s23, %s12445_s5 }
  0x4f   : > { %p9335_p9 = pnand %p9333_p7, %p9689_p8 }
  0x51   : > { %p9336_p4 = pneg %p9335_p9 }
  0x53   : > { %p9341_p3 = pnand %p9339_p1, %p9336_p4 }
  0x55   : > { %9344 = shalt.err (!%p9341_p3)
}
  0x56   : > { %s9345_s18 = scalar_lea.vmem %s282_s16, 128  ;;  %p9353_p13 = scmp.lt.s32.totalorder %s282_s16, %s282_s16 }
  0x57   : > { %p9346_p10 = scmp.ne.s32.totalorder %s282_s16, %s9345_s18  ;;  %p9354_p0 = scmp.lt.s32.totalorder %s9345_s18, %s9345_s18 }
  0x59   : > { %p9348_p11 = pnand %p9346_p10, %p9689_p8  ;;  %p9355_p2 = por %p9354_p0, %p9353_p13 }
  0x5b   : > { %p9349_p12 = pneg %p9348_p11 }
  0x5d   : > { %p9356_p5 = pnand %p9355_p2, %p9349_p12 }
  0x5f   : > { %9359 = shalt.err (!%p9356_p5)
}
  0x60   : > { %9112 = dma.hbm_to_vmem [thread:$0]  (!%p9673_p6), %s12445_s5, 128, %s282_s16, [#allocation14], %s12452_s15, %s12452_s15, %s12453_s17  }
  0x61   : > { %s9575_s19 = smov [#allocation9]   ;;  %s9576_s21 = smov [#allocation12]  }
  0x62   : > { %s247_s20 = sshll.u32 %s9575_s19, 4  ;;  %s271_s23 = sshll.u32 %s9576_s21, 4  ;;  %s248_s20 = int_to_ptr.vmem [resolvable:$true] %s247_s20  ;;  %s272_s23 = int_to_ptr.vmem [resolvable:$true] %s271_s23 }
  0x63   : > { %s12464_s2 = sld [smem:[#allocation66_spill]] }
  0x69   : > { %s9360_s11 = scalar_lea.hbm %s12464_s2, 16 }
  0x6a   : > { %p9361_p7 = scmp.ne.s32.totalorder %s12464_s2, %s9360_s11  ;;  %p9367_p1 = scmp.lt.u32.totalorder %s9360_s11, %s12464_s2 }
  0x6c   : > { %p9363_p9 = pnand %p9361_p7, %p9689_p8 }
  0x6e   : > { %p9364_p4 = pneg %p9363_p9 }
  0x70   : > { %p9369_p3 = pnand %p9367_p1, %p9364_p4 }
  0x72   : > { %9372 = shalt.err (!%p9369_p3)
}
  0x73   : > { %s9373_s16 = scalar_lea.vmem %s248_s20, 16  ;;  %s9380_s13 = scalar_lea.vmem %s248_s20, 32 }
  0x74   : > { %p9374_p10 = scmp.ne.s32.totalorder %s248_s20, %s9373_s16  ;;  %p9381_p13 = scmp.lt.s32.totalorder %s248_s20, %s248_s20 }
  0x75   : > { %p9382_p0 = scmp.lt.s32.totalorder %s9380_s13, %s9373_s16 }
  0x76   : > { %p9376_p11 = pnand %p9374_p10, %p9689_p8 }
  0x77   : > { %p9383_p2 = por %p9382_p0, %p9381_p13 }
  0x78   : > { %p9377_p12 = pneg %p9376_p11 }
  0x7a   : > { %p9384_p5 = pnand %p9383_p2, %p9377_p12 }
  0x7c   : > { %9387 = shalt.err (!%p9384_p5)
}
  0x7d   : > { %9103 = dma.hbm_to_vmem [thread:$0]  (!%p9673_p6), %s12464_s2, 16, %s248_s20, [#allocation8]  }
  0x7e   : > { %s9388_s10 = scalar_lea.hbm %s12444_s4, 16 }
  0x7f   : > { %p9389_p7 = scmp.ne.s32.totalorder %s12444_s4, %s9388_s10  ;;  %p9395_p1 = scmp.lt.u32.totalorder %s9388_s10, %s12444_s4 }
  0x81   : > { %p9391_p9 = pnand %p9389_p7, %p9689_p8 }
  0x83   : > { %p9392_p4 = pneg %p9391_p9 }
  0x85   : > { %p9397_p3 = pnand %p9395_p1, %p9392_p4 }
  0x87   : > { %9400 = shalt.err (!%p9397_p3)
}
  0x88   : > { %s9401_s16 = scalar_lea.vmem %s272_s23, 16  ;;  %s9408_s20 = scalar_lea.vmem %s272_s23, 32 }
  0x89   : > { %p9402_p10 = scmp.ne.s32.totalorder %s272_s23, %s9401_s16  ;;  %p9409_p13 = scmp.lt.s32.totalorder %s272_s23, %s272_s23 }
  0x8a   : > { %p9410_p0 = scmp.lt.s32.totalorder %s9408_s20, %s9401_s16 }
  0x8b   : > { %p9404_p11 = pnand %p9402_p10, %p9689_p8 }
  0x8c   : > { %p9411_p2 = por %p9410_p0, %p9409_p13 }
  0x8d   : > { %p9405_p12 = pneg %p9404_p11 }
  0x8f   : > { %p9412_p5 = pnand %p9411_p2, %p9405_p12 }
  0x91   : > { %9415 = shalt.err (!%p9412_p5)
}
  0x92   : > { %9109 = dma.hbm_to_vmem [thread:$0]  (!%p9673_p6), %s12444_s4, 16, %s272_s23, [#allocation11]  }
  0x93   : > { %s9577_s19 = smov [#allocation15]   ;;  %s9416_s12 = scalar_lea.hbm %s12446_s6, 16 }
  0x94   : > { %s295_s3 = sshll.u32 %s9577_s19, 4  ;;  %p9417_p7 = scmp.ne.s32.totalorder %s12446_s6, %s9416_s12  ;;  %s296_s3 = int_to_ptr.vmem [resolvable:$true] %s295_s3 }
  0x95   : > { %p9423_p1 = scmp.lt.u32.totalorder %s9416_s12, %s12446_s6 }
  0x96   : > { %p9419_p9 = pnand %p9417_p7, %p9689_p8 }
  0x98   : > { %p9420_p4 = pneg %p9419_p9 }
  0x9a   : > { %p9425_p3 = pnand %p9423_p1, %p9420_p4 }
  0x9c   : > { %9428 = shalt.err (!%p9425_p3)
}
  0x9d   : > { %s9429_s23 = scalar_lea.vmem %s296_s3, 16  ;;  %s9436_s20 = scalar_lea.vmem %s296_s3, 32 }
  0x9e   : > { %p9430_p10 = scmp.ne.s32.totalorder %s296_s3, %s9429_s23  ;;  %p9437_p13 = scmp.lt.s32.totalorder %s296_s3, %s296_s3 }
  0x9f   : > { %p9438_p0 = scmp.lt.s32.totalorder %s9436_s20, %s9429_s23 }
  0xa0   : > { %p9432_p11 = pnand %p9430_p10, %p9689_p8 }
  0xa1   : > { %p9439_p2 = por %p9438_p0, %p9437_p13 }
  0xa2   : > { %p9433_p12 = pneg %p9432_p11 }
  0xa4   : > { %p9440_p5 = pnand %p9439_p2, %p9433_p12 }
  0xa6   : > { %9443 = shalt.err (!%p9440_p5)
}
  0xa7   : > { %9115 = dma.hbm_to_vmem [thread:$0]  (!%p9673_p6), %s12446_s6, 16, %s296_s3, [#allocation14]  }
  0xa8   : > { %s7799_s22 = sadd.s32 4294967294, %s9568_s29   ;;  %s38_s19 = sadd.s32 1, %s9564_s28 }
  0xa9   : > { %p40_p8 = scmp.ge.s32.totalorder %s38_s19, 2  ;;  %s45_s14 = sadd.s32 1, %s9556_s26 }
  0xaa   : > { %p52_p7 = scmp.ne.s32.totalorder %s9556_s26, %s9552_s25  ;;  %p53_p9 = scmp.eq.s32.totalorder %s9568_s29, 0 }
  0xab   : > { %s12607_s19 = smov (%p40_p8, %s38_s19), 0  ;;  %p58_p1 = scmp.ne.s32.totalorder %s9552_s25, %s9548_s24 }
  0xac   : > { %p9815_p4 = por %p53_p9, %p52_p7  ;;  %s42_s3 = ssub.s32 %s9564_s28, %s12607_s19 }
  0xad   : > { %s12466_s10 = sadd.s32 4294967295, %s9568_s29   ;;  %p43_p3 = scmp.eq.s32.totalorder %s42_s3, 0 }
  0xae   : > { %p210_p6 = scmp.eq.s32.totalorder %s12466_s10, 1  ;;  %p12467_p10 = scmp.ne.s32.totalorder %s12458_s8, 0 }
  0xaf   : > { %p216_p13 = scmp.eq.s32.totalorder %s7799_s22, 1  ;;  %p9130_p2 = scmp.lt.s32.totalorder %s9568_s29, 2 }
  0xb0   : > { %p9827_p11 = por %p12467_p10, %p58_p1  ;;  %p9831_p12 = por %p210_p6, %p52_p7 }
  0xb1   : > { %s9836_s18 = scalar_select %p43_p3, %s9556_s26, %s45_s14  }
  0xb2   : > { %s12469_s11 = scalar_select %p9831_p12, 1, 0 }
  0xb3   : > { %p9838_p0 = por %p216_p13, %p58_p1  ;;  %s306_s16 = sand.u32 1, %s9556_s26  }
  0xb4   : > { %s9067_s23 = smul.u32 3456, %s9564_s28  ;;  %p9847_p5 = pnand %p9130_p2, %p9815_p4 }
  0xb5   : > { %s12470_s30 = scalar_select %p9838_p0, 1, 0 }
  0xb6   : > { %s9066_s20 = smul.u32 216, %s306_s16  ;;  %s9854_s22 = scalar_lea.hbm %s12440_s0, %s9067_s23 }
  0xb7   : > { %s9858_s21 = scalar_lea.sflag [#allocation5], %s306_s16  ;;  %s9444_s15 = scalar_lea.hbm %s9854_s22, 3456 }
  0xb8   : > { %s310_s14 = scalar_lea.vmem [#allocation4], %s9066_s20  ;;  %p9445_p8 = scmp.ne.s32.totalorder %s9854_s22, %s9444_s15 }
  0xb9   : > { %s317_s10 = sshll.u32 %s310_s14, 4  ;;  %p9446_p7 = pneg %p9847_p5  ;;  %s9856_s10 = int_to_ptr.vmem [resolvable:$true] %s317_s10 }
  0xba   : > { %s9449_s3 = scalar_lea.hbm %s12440_s0, 6912  ;;  %p9450_p1 = scmp.lt.u32.totalorder %s9854_s22, %s12440_s0 }
  0xbb   : > { %p9447_p9 = pnand %p9446_p7, %p9445_p8  ;;  %p9451_p6 = scmp.lt.u32.totalorder %s9449_s3, %s9444_s15 }
  0xbc   : > { %p9453_p10 = scmp.lt.u32.totalorder %s9444_s15, %s9854_s22 }
  0xbd   : > { %p9448_p4 = pneg %p9447_p9  ;;  %p9452_p3 = por %p9451_p6, %p9450_p1 }
  0xbf   : > { %p9454_p13 = por %p9453_p10, %p9452_p3 }
  0xc1   : > { %p9455_p2 = pnand %p9454_p13, %p9448_p4 }
  0xc3   : > { %9458 = shalt.err (!%p9455_p2)
}
  0xc4   : > { %s9459_s16 = scalar_lea.vmem %s9856_s10, 3456  ;;  %s9578_s20 = smov [#allocation4]  }
  0xc5   : > { %p9460_p8 = scmp.ne.s32.totalorder %s9856_s10, %s9459_s16  ;;  %s9464_s14 = sshll.u32 %s9578_s20, 4  ;;  %s9465_s14 = int_to_ptr.vmem [resolvable:$false] %s9464_s14 }
  0xc6   : > { %s9466_s2 = scalar_lea.vmem %s9465_s14, 6912  ;;  %p9467_p12 = scmp.lt.s32.totalorder %s9856_s10, %s9465_s14 }
  0xc7   : > { %p9462_p9 = pnand %p9460_p8, %p9446_p7  ;;  %p9468_p1 = scmp.lt.s32.totalorder %s9466_s2, %s9459_s16 }
  0xc9   : > { %p9463_p0 = pneg %p9462_p9  ;;  %p9469_p6 = por %p9468_p1, %p9467_p12 }
  0xcb   : > { %p9470_p3 = pnand %p9469_p6, %p9463_p0 }
  0xcd   : > { %9473 = shalt.err (!%p9470_p3)
}
  0xce   : > { %s12472_s15 = smov 4   ;;  %s12473_s17 = smov 64  }
  0xcf   : > { %9119 = dma.hbm_to_vmem [thread:$0]  (!%p9847_p5), %s9854_s22, 3456, %s9856_s10, %s9858_s21, %s12473_s17, %s12473_s17, %s12472_s15  }
  0xd0   : > { %p12474_p7 = scmp.ne.s32.totalorder %s12459_s9, 0 }
  0xd2   : > { %329 = sbr.rel (%p12474_p7) target bundleno = 1448 (0x5a8), region = 48 }
  0xd9   : > { %s9892_s23 = sand.u32 1, %s9552_s25  }
  0xda   : > { %s9068_s1 = smul.u32 216, %s9892_s23  ;;  %s332_s3 = scalar_lea.sflag [#allocation5], %s9892_s23 }
  0xdc   : > { %s9896_s16 = scalar_lea.vmem [#allocation4], %s9068_s1 }
  0xdd   : > { %9527 = dma.done.wait (%p9827_p11), %s332_s3, 3456  }
  0xde   : > { %9529 = vsyncadd (%p9827_p11), %s332_s3, 4294963840  ;;  %p12475_p12 = scmp.ne.s32.totalorder %s12458_s8, 0 }
  0xe0   : > { %9531 = dma.done.wait (%p12475_p12), [#allocation8], 48  }
  0xe1   : > { %9533 = vsyncadd (%p12475_p12), [#allocation8], 4294967248 }
  0xe2   : > { %9535 = dma.done.wait (%p12475_p12), [#allocation11], 592  }
  0xe3   : > { %9537 = vsyncadd (%p12475_p12), [#allocation11], 4294966704 }
  0xe4   : > { %9539 = dma.done.wait (%p12475_p12), [#allocation14], 144  }
  0xe5   : > { %9541 = vsyncadd (%p12475_p12), [#allocation14], 4294967152  ;;  %v9579_v0 = vmov 0.0   ;;  %vm9580_vm0 = vmmov 0   ;;  %vm675_vm1 = vcmask 1041408   ;;  %v9199_v3 = vld [vmem:[%s9896_s16] sm:$0xff]  }
  0xe6   : > { %8603 = vmatprep.subr.bf16.mxu0 %v9579_v0  ;;  %8605 = vmatprep.mubr.msk.bf16.mxu0 %vm9580_vm0, %v9579_v0  ;;  %v450_v1 = vld [vmem:[#allocation7] sm:$0x3]  ;;  %vm593_vm2 = vcmask 31744   ;;  %v9200_v4 = vld [vmem:[%s9896_s16 + $0x8] sm:$0xff]   ;;  %v9203_v7 = vld [vmem:[%s9896_s16 + $0x20] sm:$0xff]   ;;  %vm1557_vm3 = vcmask 1043456  }
  0xe7   : > { %v677_v2 = vsel %vm675_vm1, %v450_v1, 0  ;;  %v9201_v5 = vld [vmem:[%s9896_s16 + $0x10] sm:$0xff]   ;;  %v9202_v6 = vld [vmem:[%s9896_s16 + $0x18] sm:$0xff]   ;;  %v9204_v8 = vld [vmem:[%s9896_s16 + $0x28] sm:$0xff]   ;;  %vm1216_vm4 = vcmask 60416   ;;  %vm1271_vm5 = vcmask 57344  }
  0xe8   : > { %8604 = vmatpush3.bf16.msra.mxu0 %v677_v2  ;;  %v9205_v9 = vld [vmem:[%s9896_s16 + $0x30] sm:$0xff]   ;;  %v9206_v10 = vld [vmem:[%s9896_s16 + $0x38] sm:$0xff]   ;;  %v9207_v11 = vld [vmem:[%s9896_s16 + $0x40] sm:$0xff]   ;;  %vm1272_vm6 = vsmask.f32 256  ;;  %v9581_v47 = vmov 0  }
  0xe9   : > { %v9208_v12 = vld [vmem:[%s9896_s16 + $0x48] sm:$0xff]   ;;  %v9209_v13 = vld [vmem:[%s9896_s16 + $0x50] sm:$0xff]   ;;  %v9210_v14 = vld [vmem:[%s9896_s16 + $0x58] sm:$0xff]   ;;  %vm1328_vm8 = vsmask.f32 7938  ;;  %vm1508_vm10 = vcmask 64512  }
  0xea   : > { %v9211_v15 = vld [vmem:[%s9896_s16 + $0x60] sm:$0xff]   ;;  %v9212_v16 = vld [vmem:[%s9896_s16 + $0x68] sm:$0xff]   ;;  %v9213_v17 = vld [vmem:[%s9896_s16 + $0x70] sm:$0xff]   ;;  %vm1802_vm11 = vsmask.f32 3328  ;;  %vm2643_vm14 = vcmask 1042432  }
  0xeb   : > { %8606 = vmatmul.mubr.msk.bf16.vlgmr.msra.gmra.mrb[0].mxu0 %vm593_vm2, %v9199_v3  ;;  %v1427_v18 = vld [vmem:[#allocation10] sm:$0xf]  ;;  %v9215_v21 = vld [vmem:[%s9896_s16 + $0x80] sm:$0xff]   ;;  %v9216_v22 = vld [vmem:[%s9896_s16 + $0x88] sm:$0xff]   ;;  %vm1803_vm12 = vsmask.f32 7440 }
  0xec   : > { %8609 = vmatprep.mubr.msk.bf16.mxu0 %vm9580_vm0, %v9579_v0  ;;  %9055 = vmatprep.subr.msk.bf16.mxu0 %vm1557_vm3, %v1427_v18  ;;  %v1559_v19 = vsel %vm1557_vm3, %v1427_v18, 0  ;;  %v9214_v20 = vld [vmem:[%s9896_s16 + $0x78] sm:$0xff]   ;;  %v9217_v23 = vld [vmem:[%s9896_s16 + $0x90] sm:$0xff]   ;;  %v9996_v24 = vld [vmem:[#allocation10 + $0x10] sm:$0xf]  ;;  %vm2644_vm15 = vcmask 1046532  }
  0xed   : > { %9056 = vmatprep.subr.msk.bf16.mxu1 %vm1557_vm3, %v1427_v18  ;;  %8714 = vmatpush3.bf16.msra.mxu0 %v1559_v19  ;;  %v9218_v25 = vld [vmem:[%s9896_s16 + $0x98] sm:$0xff]   ;;  %v9219_v26 = vld [vmem:[%s9896_s16 + $0xa0] sm:$0xff]   ;;  %v9220_v27 = vld [vmem:[%s9896_s16 + $0xa8] sm:$0xff]   ;;  %s9582_s8 = smov 8   ;;  %vm7404_vm1 = vcmask 1045504   ;;  %s7816_s9 = sshll.u32 %s9892_s23, 8 }
  0xee   : > { %9054 = vmatpush3.bf16.msra.mxu1 %v1559_v19  ;;  %9060 = vmatprep.subr.msk.bf16.mxu0 %vm1557_vm3, %v9996_v24  ;;  %v9221_v28 = vld [vmem:[%s9896_s16 + $0xb0] sm:$0xff]   ;;  %v9222_v29 = vld [vmem:[%s9896_s16 + $0xb8] sm:$0xff]   ;;  %v9223_v30 = vld [vmem:[%s9896_s16 + $0xc0] sm:$0xff]   ;;  %s12289_s12 = scalar_lea.vmem [#allocation16], %s7816_s9  ;;  %s8404_s13 = sshll.u32 %s9560_s27, 12 }
  0xef   : > { %v9224_v31 = vld [vmem:[%s9896_s16 + $0xc8] sm:$0xff]   ;;  %v9225_v32 = vld [vmem:[%s9896_s16 + $0xd0] sm:$0xff]   ;;  %vm10041_vm7 = vmand %vm1271_vm5, %vm1272_vm6  ;;  %s7651_s22 = sshll.u32 %s12289_s12, 4  ;;  %s12382_s20 = scalar_lea.hbm %s12447_s7, %s8404_s13  ;;  %s12386_s22 = int_to_ptr.vmem [resolvable:$true] %s7651_s22 }
  0xf0   : > { %v10030_v33 = vld [vmem:[#allocation9] ss:$0 sm:$0xff]  ;;  %vm10054_vm9 = vmand %vm1271_vm5, %vm1328_vm8  ;;  %s7635_s27 = scalar_lea.sflag [#allocation6], %s9892_s23  ;;  %s9474_s14 = scalar_lea.vmem %s12386_s22, 4096 }
  0xf1   : > { %vm10104_vm13 = vmor %vm1802_vm11, %vm1803_vm12  ;;  %p9475_p11 = scmp.ne.s32.totalorder %s12386_s22, %s9474_s14  ;;  %p12598_p0 = scmp.ne.s32.totalorder %s12469_s11, 0 }
  0xf2   : > { %s9583_s2 = smov [#allocation16]  }
  0xf3   : > { %8610 = vmatmul.mubr.msk.bf16.gmra.mrb[4].mxu0 %vm593_vm2, %v9200_v4  ;;  %p9476_p5 = pnand %p9475_p11, %p12598_p0  ;;  %s9478_s15 = sshll.u32 %s9583_s2, 4  ;;  %s9479_s15 = int_to_ptr.vmem [resolvable:$false] %s9478_s15 }
  0xf4   : > { %8613 = vmatprep.mubr.msk.bf16.mxu0 %vm9580_vm0, %v9579_v0  ;;  %s9480_s17 = scalar_lea.vmem %s9479_s15, 8192  ;;  %p9481_p10 = scmp.lt.s32.totalorder %s12386_s22, %s9479_s15 }
  0xf5   : > { %p9477_p4 = pneg %p9476_p5  ;;  %p9482_p13 = scmp.lt.s32.totalorder %s9480_s17, %s9474_s14 }
  0xf7   : > { %p9483_p2 = por %p9482_p13, %p9481_p10 }
  0xf9   : > { %p9484_p8 = pnand %p9483_p2, %p9477_p4 }
  0xfb   : > { %8614 = vmatmul.mubr.msk.bf16.gmra.mrb[8].mxu0 %vm593_vm2, %v9201_v5 }
  0xfc   : > { %8617 = vmatprep.mubr.msk.bf16.mxu0 %vm9580_vm0, %v9579_v0 }
 0x103   : > { %8618 = vmatmul.mubr.msk.bf16.gmra.mrb[12].mxu0 %vm593_vm2, %v9202_v6 }
 0x104   : > { %8621 = vmatprep.mubr.msk.bf16.mxu0 %vm9580_vm0, %v9579_v0 }
 0x10b   : > { %8622 = vmatmul.mubr.msk.bf16.gmra.mrb[16].mxu0 %vm593_vm2, %v9203_v7 }
 0x10c   : > { %8625 = vmatprep.mubr.msk.bf16.mxu0 %vm9580_vm0, %v9579_v0 }
 0x113   : > { %8626 = vmatmul.mubr.msk.bf16.gmra.mrb[20].mxu0 %vm593_vm2, %v9204_v8 }
 0x114   : > { %8629 = vmatprep.mubr.msk.bf16.mxu0 %vm9580_vm0, %v9579_v0 }
 0x11b   : > { %8630 = vmatmul.mubr.msk.bf16.gmra.mrb[24].mxu0 %vm593_vm2, %v9205_v9 }
 0x11c   : > { %8633 = vmatprep.mubr.msk.bf16.mxu0 %vm9580_vm0, %v9579_v0 }
 0x123   : > { %8634 = vmatmul.mubr.msk.bf16.gmra.mrb[28].mxu0 %vm593_vm2, %v9206_v10 }
 0x124   : > { %8637 = vmatprep.mubr.msk.bf16.mxu0 %vm9580_vm0, %v9579_v0 }
 0x12b   : > { %8638 = vmatmul.mubr.msk.bf16.gmra.mrb[32].mxu0 %vm593_vm2, %v9207_v11 }
 0x12c   : > { %8641 = vmatprep.mubr.msk.bf16.mxu0 %vm9580_vm0, %v9579_v0 }
 0x133   : > { %8642 = vmatmul.mubr.msk.bf16.gmra.mrb[36].mxu0 %vm593_vm2, %v9208_v12 }
 0x134   : > { %8645 = vmatprep.mubr.msk.bf16.mxu0 %vm9580_vm0, %v9579_v0 }
 0x13b   : > { %8646 = vmatmul.mubr.msk.bf16.gmra.mrb[40].mxu0 %vm593_vm2, %v9209_v13 }
 0x13c   : > { %8649 = vmatprep.mubr.msk.bf16.mxu0 %vm9580_vm0, %v9579_v0 }
 0x143   : > { %8650 = vmatmul.mubr.msk.bf16.gmra.mrb[44].mxu0 %vm593_vm2, %v9210_v14 }
 0x144   : > { %8653 = vmatprep.mubr.msk.bf16.mxu0 %vm9580_vm0, %v9579_v0 }
 0x14b   : > { %8654 = vmatmul.mubr.msk.bf16.gmra.mrb[48].mxu0 %vm593_vm2, %v9211_v15 }
 0x14c   : > { %8657 = vmatprep.mubr.msk.bf16.mxu0 %vm9580_vm0, %v9579_v0 }
 0x153   : > { %8658 = vmatmul.mubr.msk.bf16.gmra.mrb[52].mxu0 %vm593_vm2, %v9212_v16 }
 0x154   : > { %8661 = vmatprep.mubr.msk.bf16.mxu0 %vm9580_vm0, %v9579_v0 }
 0x15b   : > { %8662 = vmatmul.mubr.msk.bf16.gmra.mrb[56].mxu0 %vm593_vm2, %v9213_v17 }
 0x15c   : > { %8665 = vmatprep.mubr.msk.bf16.mxu0 %vm9580_vm0, %v9579_v0 }
 0x163   : > { %8666 = vmatmul.mubr.msk.bf16.gmra.mrb[60].mxu0 %vm593_vm2, %v9214_v20 }
 0x164   : > { %8669 = vmatprep.mubr.msk.bf16.mxu0 %vm9580_vm0, %v9579_v0 }
 0x16b   : > { %8670 = vmatmul.mubr.msk.bf16.gmra.mrb[64].mxu0 %vm593_vm2, %v9215_v21 }
 0x16c   : > { %8673 = vmatprep.mubr.msk.bf16.mxu0 %vm9580_vm0, %v9579_v0 }
 0x173   : > { %8674 = vmatmul.mubr.msk.bf16.gmra.mrb[68].mxu0 %vm593_vm2, %v9216_v22 }
 0x174   : > { %8677 = vmatprep.mubr.msk.bf16.mxu0 %vm9580_vm0, %v9579_v0 }
 0x17b   : > { %8678 = vmatmul.mubr.msk.bf16.gmra.mrb[72].mxu0 %vm593_vm2, %v9217_v23 }
 0x17c   : > { %8681 = vmatprep.mubr.msk.bf16.mxu0 %vm9580_vm0, %v9579_v0 }
 0x183   : > { %8682 = vmatmul.mubr.msk.bf16.gmra.mrb[76].mxu0 %vm593_vm2, %v9218_v25 }
 0x184   : > { %8685 = vmatprep.mubr.msk.bf16.mxu0 %vm9580_vm0, %v9579_v0 }
 0x18b   : > { %8686 = vmatmul.mubr.msk.bf16.gmra.mrb[80].mxu0 %vm593_vm2, %v9219_v26 }
 0x18c   : > { %8689 = vmatprep.mubr.msk.bf16.mxu0 %vm9580_vm0, %v9579_v0 }
 0x193   : > { %8690 = vmatmul.mubr.msk.bf16.gmra.mrb[84].mxu0 %vm593_vm2, %v9220_v27  ;;  %v4070_v27 = vsel %vm1557_vm3, %v9996_v24, 0 }
 0x194   : > { %8693 = vmatprep.mubr.msk.bf16.mxu0 %vm9580_vm0, %v9579_v0 }
 0x19b   : > { %8694 = vmatmul.mubr.msk.bf16.gmra.mrb[88].mxu0 %vm593_vm2, %v9221_v28 }
 0x19c   : > { %8697 = vmatprep.mubr.msk.bf16.mxu0 %vm9580_vm0, %v9579_v0 }
 0x1a3   : > { %8698 = vmatmul.mubr.msk.bf16.gmra.mrb[92].mxu0 %vm593_vm2, %v9222_v29 }
 0x1a4   : > { %8701 = vmatprep.mubr.msk.bf16.mxu0 %vm9580_vm0, %v9579_v0 }
 0x1ab   : > { %8702 = vmatmul.mubr.msk.bf16.gmra.mrb[96].mxu0 %vm593_vm2, %v9223_v30 }
 0x1ac   : > { %8705 = vmatprep.mubr.msk.bf16.mxu0 %vm9580_vm0, %v9579_v0 }
 0x1b3   : > { %8706 = vmatmul.mubr.msk.bf16.gmra.mrb[100].mxu0 %vm593_vm2, %v9224_v31 }
 0x1b4   : > { %8709 = vmatprep.mubr.msk.bf16.mxu0 %vm9580_vm0, %v9579_v0  ;;  %vm10726_vm0 = vmor %vm2643_vm14, %vm2644_vm15 }
 0x1bb   : > { %8710 = vmatmul.mubr.msk.bf16.gmra.mrb[104].mxu0 %vm593_vm2, %v9225_v32  ;;  %vm7371_vm2 = vcmask 97280  }
 0x1be   : > { %v713_v34 = vpop.f32.mrb[0].mxu0 }
 0x1bf   : > { %v714_v35 = vadd.f32 %v10030_v33, %v713_v34  ;;  %v8607_v36 = vpop.f32.mrb[1].mxu0 }
 0x1c0   : > { %v716_v37 = vpop.f32.mrb[2].mxu0 }
 0x1c1   : > { %v928_v38 = vmax.f32 %v714_v35, 0.0  ;;  %v717_v39 = vadd.f32 %v10030_v33, %v716_v37  ;;  %v8608_v40 = vpop.f32.mrb[3].mxu0 }
 0x1c3   : > { %v8350_v41 = vpack.c.bf16 %v928_v38, %v928_v38  ;;  %v929_v42 = vmax.f32 %v717_v39, 0.0 }
 0x1c5   : > { %1217 = vst.msk [vmem:[#allocation2] sm:$0xf] %vm1216_vm4, %v8350_v41  ;;  %v8351_v43 = vpack.c.bf16 %v929_v42, %v929_v42 }
 0x1c6   : > { %v721_v44 = vpop.f32.mrb[4].mxu0 }
 0x1c7   : > { %1218 = vst.msk [vmem:[#allocation2 + $0x4] sm:$0xf] %vm1216_vm4, %v8351_v43  ;;  %v722_v45 = vadd.f32 %v10030_v33, %v721_v44  ;;  %v8611_v46 = vpop.f32.mrb[5].mxu0 }
 0x1c8   : > { %1389 = vst.msk [vmem:[#allocation2 + $0x4] sm:$0xf] %vm1216_vm4, %v9581_v47  ;;  %v724_v48 = vpop.f32.mrb[6].mxu0 }
 0x1c9   : > { %v930_v49 = vmax.f32 %v722_v45, 0.0  ;;  %v725_v50 = vadd.f32 %v10030_v33, %v724_v48  ;;  %v8612_v51 = vpop.f32.mrb[7].mxu0 }
 0x1cb   : > { %v8352_v53 = vpack.c.bf16 %v930_v49, %v930_v49  ;;  %v931_v54 = vmax.f32 %v725_v50, 0.0 }
 0x1cc   : > { %v1274_v55 = vld [vmem:[#allocation2] sm:$0x1] }
 0x1cd   : > { %v1275_v56 = vsel %vm10041_vm7, 0, %v1274_v55  ;;  %1219 = vst.msk [vmem:[#allocation2 + $0x8] sm:$0xf] %vm1216_vm4, %v8352_v53  ;;  %v8353_v57 = vpack.c.bf16 %v931_v54, %v931_v54 }
 0x1ce   : > { %1276 = vst [vmem:[#allocation2] sm:$0x1] %v1275_v56  ;;  %v729_v58 = vpop.f32.mrb[8].mxu0 }
 0x1cf   : > { %1388 = vst.msk [vmem:[#allocation2] sm:$0xf] %vm1216_vm4, %v9581_v47  ;;  %1220 = vst.msk [vmem:[#allocation2 + $0xc] sm:$0xf] %vm1216_vm4, %v8353_v57  ;;  %v730_v59 = vadd.f32 %v10030_v33, %v729_v58  ;;  %v8615_v60 = vpop.f32.mrb[9].mxu0 }
 0x1d0   : > { %v732_v61 = vpop.f32.mrb[10].mxu0 }
 0x1d1   : > { %v932_v62 = vmax.f32 %v730_v59, 0.0  ;;  %v733_v63 = vadd.f32 %v10030_v33, %v732_v61  ;;  %v8616_v0 = vpop.f32.mrb[11].mxu0 }
 0x1d3   : > { %v8354_v2 = vpack.c.bf16 %v932_v62, %v932_v62  ;;  %v933_v3 = vmax.f32 %v733_v63, 0.0 }
 0x1d4   : > { %v1330_v4 = vld [vmem:[#allocation2 + $0x8] sm:$0x1] }
 0x1d5   : > { %v1331_v5 = vsel %vm10054_vm9, 0, %v1330_v4  ;;  %1221 = vst.msk [vmem:[#allocation2 + $0x10] sm:$0xf] %vm1216_vm4, %v8354_v2  ;;  %v8355_v6 = vpack.c.bf16 %v933_v3, %v933_v3 }
 0x1d6   : > { %1332 = vst [vmem:[#allocation2 + $0x8] sm:$0x1] %v1331_v5  ;;  %v1277_v7 = vld [vmem:[#allocation2 + $0xc] sm:$0x1]  ;;  %v737_v8 = vpop.f32.mrb[12].mxu0  ;;  %v9226_v9 = vld [vmem:[#allocation2] sm:$0xff]  }
 0x1d7   : > { %1390 = vst.msk [vmem:[#allocation2 + $0x8] sm:$0xf] %vm1216_vm4, %v9581_v47  ;;  %v1278_v10 = vsel %vm10041_vm7, 0, %v1277_v7  ;;  %1222 = vst.msk [vmem:[#allocation2 + $0x14] sm:$0xf] %vm1216_vm4, %v8355_v6  ;;  %v738_v11 = vadd.f32 %v10030_v33, %v737_v8  ;;  %v8619_v12 = vpop.f32.mrb[13].mxu0  ;;  %8715 = vmatprep.mubr.msk.bf16.mxu0 %vm1508_vm10, %v9226_v9 }
 0x1d8   : > { %1279 = vst [vmem:[#allocation2 + $0xc] sm:$0x1] %v1278_v10  ;;  %v740_v13 = vpop.f32.mrb[14].mxu0 }
 0x1d9   : > { %v934_v14 = vmax.f32 %v738_v11, 0.0  ;;  %v741_v15 = vadd.f32 %v10030_v33, %v740_v13  ;;  %v8620_v16 = vpop.f32.mrb[15].mxu0 }
 0x1da   : > { %v10097_v16 = vld [vmem:[#allocation10 + $0x4] sm:$0xf] }
 0x1db   : > { %v8356_v17 = vpack.c.bf16 %v934_v14, %v934_v14  ;;  %v935_v18 = vmax.f32 %v741_v15, 0.0  ;;  %9057 = vmatprep.subr.msk.bf16.mxu1 %vm1557_vm3, %v10097_v16 }
 0x1dc   : > { %v3540_v35 = vld [vmem:[#allocation2 + $0x10] sm:$0xf] }
 0x1dd   : > { %1223 = vst.msk [vmem:[#allocation2 + $0x18] sm:$0xf] %vm1216_vm4, %v8356_v17  ;;  %v8357_v19 = vpack.c.bf16 %v935_v18, %v935_v18  ;;  %v3597_v40 = vshll.u32 %v3540_v35, 16  ;;  %v3601_v41 = vshrl.u32 %v3540_v35, 16 }
 0x1de   : > { %v1333_v20 = vld [vmem:[#allocation2 + $0x14] sm:$0x1]  ;;  %v745_v21 = vpop.f32.mrb[16].mxu0 }
 0x1df   : > { %v1334_v22 = vsel %vm10054_vm9, 0, %v1333_v20  ;;  %1224 = vst.msk [vmem:[#allocation2 + $0x1c] sm:$0xf] %vm1216_vm4, %v8357_v19  ;;  %v746_v23 = vadd.f32 %v10030_v33, %v745_v21  ;;  %v8623_v25 = vpop.f32.mrb[17].mxu0  ;;  %v9227_v26 = vld [vmem:[#allocation2 + $0xc] sm:$0xff]   ;;  %v10084_v54 = vrot.slane %v3597_v40, 5 }
 0x1e0   : > { %1335 = vst [vmem:[#allocation2 + $0x14] sm:$0x1] %v1334_v22  ;;  %v748_v28 = vpop.f32.mrb[18].mxu0  ;;  %8716 = vmatmul.mubr.msk.bf16.vlgmr.msra.gmra.mrb[108].mxu0 %vm1508_vm10, %v9227_v26  ;;  %v3539_v37 = vld [vmem:[#allocation2 + $0xc] sm:$0xf]  ;;  %v3603_v55 = vrot.slane %v3601_v41, 4 }
 0x1e1   : > { %v936_v29 = vmax.f32 %v746_v23, 0.0  ;;  %v749_v30 = vadd.f32 %v10030_v33, %v748_v28  ;;  %v8624_v31 = vpop.f32.mrb[19].mxu0  ;;  %8850 = vmatpush3.bf16.msra.mxu0 %v4070_v27  ;;  %v3588_v44 = vshrl.u32 %v3539_v37, 16  ;;  %v3591_v45 = vshll.u32 %v3539_v37, 16 }
 0x1e2   : > { %v3604_v13 = vor.u32 %v3603_v55, %v10084_v54 }
 0x1e3   : > { %v8358_v32 = vpack.c.bf16 %v936_v29, %v936_v29  ;;  %v937_v34 = vmax.f32 %v749_v30, 0.0  ;;  %v3590_v58 = vrot.slane %v3588_v44, 4  ;;  %v3593_v59 = vrot.slane %v3591_v45, 5 }
 0x1e4   : > { %v1280_v36 = vld [vmem:[#allocation2 + $0x18] sm:$0x1]  ;;  %v3605_v28 = vrot.slane %v3604_v13, 4 }
 0x1e5   : > { %v1281_v38 = vsel %vm10041_vm7, 0, %v1280_v36  ;;  %1225 = vst.msk [vmem:[#allocation2 + $0x20] sm:$0xf] %vm1216_vm4, %v8358_v32  ;;  %v8359_v24 = vpack.c.bf16 %v937_v34, %v937_v34  ;;  %v3594_v12 = vor.u32 %v3593_v59, %v3590_v58 }
 0x1e6   : > { %1282 = vst [vmem:[#allocation2 + $0x18] sm:$0x1] %v1281_v38  ;;  %v753_v39 = vpop.f32.mrb[20].mxu0  ;;  %v3543_v53 = vld [vmem:[#allocation2 + $0x1c] sm:$0xf] }
 0x1e7   : > { %1226 = vst.msk [vmem:[#allocation2 + $0x24] sm:$0xf] %vm1216_vm4, %v8359_v24  ;;  %v754_v42 = vadd.f32 %v10030_v33, %v753_v39  ;;  %v8627_v43 = vpop.f32.mrb[21].mxu0  ;;  %v3541_v51 = vld [vmem:[#allocation2 + $0x14] sm:$0x1]  ;;  %v3621_v62 = vshll.u32 %v3543_v53, 16 }
 0x1e8   : > { %v756_v46 = vpop.f32.mrb[22].mxu0  ;;  %v3607_v61 = vshll.u32 %v3541_v51, 16  ;;  %v3625_v63 = vshrl.u32 %v3543_v53, 16  ;;  %v3595_v27 = vrot.slane %v3594_v12, 4 }
 0x1e9   : > { %v938_v48 = vmax.f32 %v754_v42, 0.0  ;;  %v757_v49 = vadd.f32 %v10030_v33, %v756_v46  ;;  %v8628_v50 = vpop.f32.mrb[23].mxu0  ;;  %v10095_v15 = vrot.slane %v3621_v62, 5 }
 0x1ea   : > { %v3609_v20 = vrot.slane %v3607_v61, 5  ;;  %v3627_v21 = vrot.slane %v3625_v63, 4  ;;  %v3600_v45 = vsel %vm10104_vm13, %v3595_v27, %v10084_v54 }
 0x1eb   : > { %v8360_v56 = vpack.c.bf16 %v938_v48, %v938_v48  ;;  %v939_v57 = vmax.f32 %v757_v49, 0.0 }
 0x1ec   : > { %v1336_v60 = vld [vmem:[#allocation2 + $0x20] sm:$0x1]  ;;  %v3610_v32 = vsel %vm10104_vm13, %v3605_v28, %v3609_v20  ;;  %v3628_v35 = vor.u32 %v3627_v21, %v10095_v15 }
 0x1ed   : > { %v1337_v0 = vsel %vm10054_vm9, 0, %v1336_v60  ;;  %1227 = vst.msk [vmem:[#allocation2 + $0x28] sm:$0xf] %vm1216_vm4, %v8360_v56  ;;  %v8361_v2 = vpack.c.bf16 %v939_v57, %v939_v57  ;;  %v9228_v3 = vld [vmem:[#allocation2 + $0x18] sm:$0xff]   ;;  %v8070_v48 = vcombine.low %v3600_v45, %v3610_v32 }
 0x1ee   : > { %v3542_v4 = vld [vmem:[#allocation2 + $0x18] sm:$0xf]  ;;  %1338 = vst [vmem:[#allocation2 + $0x20] sm:$0x1] %v1337_v0  ;;  %v1283_v5 = vld [vmem:[#allocation2 + $0x24] sm:$0x1]  ;;  %8719 = vmatprep.mubr.msk.bf16.mxu0 %vm1508_vm10, %v9228_v3 }
 0x1ef   : > { %v761_v6 = vpop.f32.mrb[24].mxu0  ;;  %v3612_v7 = vshrl.u32 %v3542_v4, 16  ;;  %v3615_v8 = vshll.u32 %v3542_v4, 16  ;;  %v1284_v9 = vsel %vm10041_vm7, 0, %v1283_v5  ;;  %1228 = vst.msk [vmem:[#allocation2 + $0x2c] sm:$0xf] %vm1216_vm4, %v8361_v2 }
 0x1f0   : > { %v762_v10 = vadd.f32 %v10030_v33, %v761_v6  ;;  %v8631_v11 = vpop.f32.mrb[25].mxu0  ;;  %1285 = vst [vmem:[#allocation2 + $0x24] sm:$0x1] %v1284_v9  ;;  %v3629_v59 = vrot.slane %v3628_v35, 4 }
 0x1f1   : > { %v764_v14 = vpop.f32.mrb[26].mxu0  ;;  %v3614_v22 = vrot.slane %v3612_v7, 4  ;;  %v3617_v23 = vrot.slane %v3615_v8, 5 }
 0x1f2   : > { %v940_v17 = vmax.f32 %v762_v10, 0.0  ;;  %v765_v18 = vadd.f32 %v10030_v33, %v764_v14  ;;  %v8632_v19 = vpop.f32.mrb[27].mxu0 }
 0x1f3   : > { %v3618_v38 = vor.u32 %v3617_v23, %v3614_v22 }
 0x1f4   : > { %v8362_v25 = vpack.c.bf16 %v940_v17, %v940_v17  ;;  %v941_v26 = vmax.f32 %v765_v18, 0.0  ;;  %v3546_v30 = vld [vmem:[#allocation2 + $0x28] sm:$0xf] }
 0x1f5   : > { %v3544_v34 = vld [vmem:[#allocation2 + $0x20] sm:$0x1]  ;;  %v3645_v39 = vshll.u32 %v3546_v30, 16  ;;  %v3649_v40 = vshrl.u32 %v3546_v30, 16  ;;  %v3619_v58 = vrot.slane %v3618_v38, 4 }
 0x1f6   : > { %1229 = vst.msk [vmem:[#allocation2 + $0x30] sm:$0xf] %vm1216_vm4, %v8362_v25  ;;  %v8363_v31 = vpack.c.bf16 %v941_v26, %v941_v26  ;;  %v1339_v36 = vld [vmem:[#allocation2 + $0x2c] sm:$0x1]  ;;  %v769_v37 = vpop.f32.mrb[28].mxu0  ;;  %v3631_v24 = vshll.u32 %v3544_v34, 16 }
 0x1f7   : > { %v1340_v41 = vsel %vm10054_vm9, 0, %v1339_v36  ;;  %v770_v42 = vadd.f32 %v10030_v33, %v769_v37  ;;  %v8635_v43 = vpop.f32.mrb[29].mxu0  ;;  %v9229_v44 = vld [vmem:[#allocation2 + $0x24] sm:$0xff]   ;;  %v3647_v60 = vrot.slane %v3645_v39, 5  ;;  %v3651_v61 = vrot.slane %v3649_v40, 4 }
 0x1f8   : > { %1230 = vst.msk [vmem:[#allocation2 + $0x34] sm:$0xf] %vm1216_vm4, %v8363_v31  ;;  %1341 = vst [vmem:[#allocation2 + $0x2c] sm:$0x1] %v1340_v41  ;;  %v772_v46 = vpop.f32.mrb[30].mxu0  ;;  %v3633_v49 = vrot.slane %v3631_v24, 5  ;;  %8720 = vmatmul.mubr.msk.bf16.gmra.mrb[112].mxu0 %vm1508_vm10, %v9229_v44  ;;  %v3624_v7 = vsel %vm10104_vm13, %v3619_v58, %v10095_v15 }
 0x1f9   : > { %v3545_v50 = vld [vmem:[#allocation2 + $0x24] sm:$0xf]  ;;  %v942_v51 = vmax.f32 %v770_v42, 0.0  ;;  %v773_v53 = vadd.f32 %v10030_v33, %v772_v46  ;;  %v8636_v55 = vpop.f32.mrb[31].mxu0  ;;  %8851 = vmatprep.mubr.msk.bf16.mxu0 %vm1508_vm10, %v8070_v48  ;;  %v3652_v9 = vor.u32 %v3651_v61, %v3647_v60 }
 0x1fa   : > { %v3636_v56 = vshrl.u32 %v3545_v50, 16  ;;  %v3639_v57 = vshll.u32 %v3545_v50, 16  ;;  %v3634_v2 = vsel %vm10104_vm13, %v3629_v59, %v3633_v49 }
 0x1fb   : > { %v8364_v54 = vpack.c.bf16 %v942_v51, %v942_v51  ;;  %v943_v62 = vmax.f32 %v773_v53, 0.0  ;;  %v8071_v12 = vcombine.low %v3624_v7, %v3634_v2  ;;  %v3653_v22 = vrot.slane %v3652_v9, 4 }
 0x1fc   : > { %v3638_v63 = vrot.slane %v3636_v56, 4  ;;  %v3641_v3 = vrot.slane %v3639_v57, 5  ;;  %v2288_v9 = vsel %vm1557_vm3, %v10097_v16, 0 }
 0x1fd   : > { %v1286_v0 = vld [vmem:[#allocation2 + $0x30] sm:$0x1]  ;;  %1231 = vst.msk [vmem:[#allocation2 + $0x38] sm:$0xf] %vm1216_vm4, %v8364_v54  ;;  %v8365_v4 = vpack.c.bf16 %v943_v62, %v943_v62 }
 0x1fe   : > { %v1287_v5 = vsel %vm10041_vm7, 0, %v1286_v0  ;;  %v777_v6 = vpop.f32.mrb[32].mxu0  ;;  %v3642_v8 = vor.u32 %v3641_v3, %v3638_v63 }
 0x1ff   : > { %1288 = vst [vmem:[#allocation2 + $0x30] sm:$0x1] %v1287_v5  ;;  %1232 = vst.msk [vmem:[#allocation2 + $0x3c] sm:$0xf] %vm1216_vm4, %v8365_v4  ;;  %v778_v10 = vadd.f32 %v10030_v33, %v777_v6  ;;  %v8639_v11 = vpop.f32.mrb[33].mxu0 }
 0x200   : > { %v3547_v13 = vld [vmem:[#allocation2 + $0x2c] sm:$0x1]  ;;  %v780_v14 = vpop.f32.mrb[34].mxu0  ;;  %v3643_v17 = vrot.slane %v3642_v8, 4  ;;  %8852 = vmatmul.mubr.msk.bf16.vlgmr.msra.gmra.mrb[116].mxu0 %vm1508_vm10, %v8071_v12  ;;  %v3549_v15 = vld [vmem:[#allocation2 + $0x34] sm:$0xf] }
 0x201   : > { %v3655_v18 = vshll.u32 %v3547_v13, 16  ;;  %v944_v19 = vmax.f32 %v778_v10, 0.0  ;;  %v781_v20 = vadd.f32 %v10030_v33, %v780_v14  ;;  %v8640_v21 = vpop.f32.mrb[35].mxu0  ;;  %v3669_v31 = vshll.u32 %v3549_v15, 16 }
 0x202   : > { %v3648_v28 = vsel %vm10104_vm13, %v3643_v17, %v3647_v60  ;;  %v3673_v32 = vshrl.u32 %v3549_v15, 16 }
 0x203   : > { %v3657_v23 = vrot.slane %v3655_v18, 5  ;;  %v8366_v25 = vpack.c.bf16 %v944_v19, %v944_v19  ;;  %v945_v26 = vmax.f32 %v781_v20, 0.0  ;;  %v3671_v49 = vrot.slane %v3669_v31, 5 }
 0x204   : > { %v1342_v27 = vld [vmem:[#allocation2 + $0x38] sm:$0x1]  ;;  %v3675_v50 = vrot.slane %v3673_v32, 4 }
 0x205   : > { %v3658_v30 = vsel %vm10104_vm13, %v3653_v22, %v3657_v23  ;;  %v1343_v34 = vsel %vm10054_vm9, 0, %v1342_v27  ;;  %1233 = vst.msk [vmem:[#allocation2 + $0x40] sm:$0xf] %vm1216_vm4, %v8366_v25  ;;  %v8367_v35 = vpack.c.bf16 %v945_v26, %v945_v26 }
 0x206   : > { %v8072_v36 = vcombine.low %v3648_v28, %v3658_v30  ;;  %v9230_v37 = vld [vmem:[#allocation2 + $0x30] sm:$0xff]   ;;  %1344 = vst [vmem:[#allocation2 + $0x38] sm:$0x1] %v1343_v34  ;;  %v1289_v24 = vld [vmem:[#allocation2 + $0x3c] sm:$0x1]  ;;  %v785_v39 = vpop.f32.mrb[36].mxu0  ;;  %v3676_v59 = vor.u32 %v3675_v50, %v3671_v49 }
 0x207   : > { %v3548_v38 = vld [vmem:[#allocation2 + $0x30] sm:$0xf]  ;;  %v1290_v42 = vsel %vm10041_vm7, 0, %v1289_v24  ;;  %1234 = vst.msk [vmem:[#allocation2 + $0x44] sm:$0xf] %vm1216_vm4, %v8367_v35  ;;  %v786_v43 = vadd.f32 %v10030_v33, %v785_v39  ;;  %v8643_v44 = vpop.f32.mrb[37].mxu0  ;;  %8723 = vmatprep.mubr.msk.bf16.mxu1 %vm1508_vm10, %v9230_v37 }
 0x208   : > { %v3660_v40 = vshrl.u32 %v3548_v38, 16  ;;  %v3663_v41 = vshll.u32 %v3548_v38, 16  ;;  %8855 = vmatprep.mubr.msk.bf16.mxu0 %vm1508_vm10, %v8072_v36  ;;  %1291 = vst [vmem:[#allocation2 + $0x3c] sm:$0x1] %v1290_v42  ;;  %v788_v45 = vpop.f32.mrb[38].mxu0  ;;  %v3677_v11 = vrot.slane %v3676_v59, 4 }
 0x209   : > { %v946_v51 = vmax.f32 %v786_v43, 0.0  ;;  %v789_v53 = vadd.f32 %v10030_v33, %v788_v45  ;;  %v8644_v55 = vpop.f32.mrb[39].mxu0  ;;  %v10167_v42 = vld [vmem:[#allocation10 + $0x8] sm:$0xf] }
 0x20a   : > { %v3662_v46 = vrot.slane %v3660_v40, 4  ;;  %v3665_v48 = vrot.slane %v3663_v41, 5 }
 0x20b   : > { %v8368_v57 = vpack.c.bf16 %v946_v51, %v946_v51  ;;  %v947_v58 = vmax.f32 %v789_v53, 0.0 }
 0x20c   : > { %v3666_v56 = vor.u32 %v3665_v48, %v3662_v46  ;;  %v3552_v60 = vld [vmem:[#allocation2 + $0x40] sm:$0xf] }
 0x20d   : > { %1235 = vst.msk [vmem:[#allocation2 + $0x48] sm:$0xf] %vm1216_vm4, %v8368_v57  ;;  %v8369_v61 = vpack.c.bf16 %v947_v58, %v947_v58  ;;  %v3550_v54 = vld [vmem:[#allocation2 + $0x38] sm:$0x1]  ;;  %v3693_v3 = vshll.u32 %v3552_v60, 16  ;;  %v3697_v4 = vshrl.u32 %v3552_v60, 16 }
 0x20e   : > { %v3667_v62 = vrot.slane %v3666_v56, 4  ;;  %v1345_v63 = vld [vmem:[#allocation2 + $0x44] sm:$0x1]  ;;  %v793_v0 = vpop.f32.mrb[40].mxu0  ;;  %v3679_v2 = vshll.u32 %v3550_v54, 16 }
 0x20f   : > { %v1346_v5 = vsel %vm10054_vm9, 0, %v1345_v63  ;;  %1236 = vst.msk [vmem:[#allocation2 + $0x4c] sm:$0xf] %vm1216_vm4, %v8369_v61  ;;  %v794_v6 = vadd.f32 %v10030_v33, %v793_v0  ;;  %v8647_v7 = vpop.f32.mrb[41].mxu0  ;;  %v9231_v8 = vld [vmem:[#allocation2 + $0x3c] sm:$0xff]   ;;  %v3695_v16 = vrot.slane %v3693_v3, 5 }
 0x210   : > { %1347 = vst [vmem:[#allocation2 + $0x44] sm:$0x1] %v1346_v5  ;;  %v796_v10 = vpop.f32.mrb[42].mxu0  ;;  %v3681_v12 = vrot.slane %v3679_v2, 5  ;;  %v3551_v13 = vld [vmem:[#allocation2 + $0x3c] sm:$0xf]  ;;  %8724 = vmatmul.mubr.msk.bf16.vlgmr.msra.gmra.mrb[0].mxu1 %vm1508_vm10, %v9231_v8  ;;  %v3672_v21 = vsel %vm10104_vm13, %v3667_v62, %v3671_v49 }
 0x211   : > { %v948_v14 = vmax.f32 %v794_v6, 0.0  ;;  %v797_v17 = vadd.f32 %v10030_v33, %v796_v10  ;;  %v8648_v18 = vpop.f32.mrb[43].mxu0  ;;  %v3684_v19 = vshrl.u32 %v3551_v13, 16  ;;  %v3687_v20 = vshll.u32 %v3551_v13, 16  ;;  %8748 = vmatpush3.bf16.msra.mxu1 %v2288_v9 }
 0x212   : > { %v3682_v15 = vsel %vm10104_vm13, %v3677_v11, %v3681_v12  ;;  %v3699_v22 = vrot.slane %v3697_v4, 4  ;;  %9058 = vmatprep.subr.msk.bf16.mxu1 %vm1557_vm3, %v10167_v42 }
 0x213   : > { %v8370_v23 = vpack.c.bf16 %v948_v14, %v948_v14  ;;  %v949_v25 = vmax.f32 %v797_v17, 0.0  ;;  %v8073_v26 = vcombine.low %v3672_v21, %v3682_v15  ;;  %v3686_v27 = vrot.slane %v3684_v19, 4 }
 0x214   : > { %v1292_v28 = vld [vmem:[#allocation2 + $0x48] sm:$0x1]  ;;  %v3689_v30 = vrot.slane %v3687_v20, 5  ;;  %v3700_v36 = vor.u32 %v3699_v22, %v3695_v16 }
 0x215   : > { %v1293_v31 = vsel %vm10041_vm7, 0, %v1292_v28  ;;  %1237 = vst.msk [vmem:[#allocation2 + $0x50] sm:$0xf] %vm1216_vm4, %v8370_v23  ;;  %v8371_v32 = vpack.c.bf16 %v949_v25, %v949_v25  ;;  %8856 = vmatmul.mubr.msk.bf16.gmra.mrb[120].mxu0 %vm1508_vm10, %v8073_v26 }
 0x216   : > { %1294 = vst [vmem:[#allocation2 + $0x48] sm:$0x1] %v1293_v31  ;;  %v801_v34 = vpop.f32.mrb[44].mxu0  ;;  %v3690_v35 = vor.u32 %v3689_v30, %v3686_v27  ;;  %v3555_v46 = vld [vmem:[#allocation2 + $0x4c] sm:$0xf]  ;;  %v3701_v48 = vrot.slane %v3700_v36, 4 }
 0x217   : > { %1238 = vst.msk [vmem:[#allocation2 + $0x54] sm:$0xf] %vm1216_vm4, %v8371_v32  ;;  %v802_v37 = vadd.f32 %v10030_v33, %v801_v34  ;;  %v8651_v38 = vpop.f32.mrb[45].mxu0  ;;  %v3553_v24 = vld [vmem:[#allocation2 + $0x44] sm:$0x1]  ;;  %v3717_v57 = vshll.u32 %v3555_v46, 16 }
 0x218   : > { %v804_v39 = vpop.f32.mrb[46].mxu0  ;;  %v3691_v40 = vrot.slane %v3690_v35, 4  ;;  %v3703_v41 = vshll.u32 %v3553_v24, 16  ;;  %v3721_v58 = vshrl.u32 %v3555_v46, 16  ;;  %v10187_v30 = vld [vmem:[#allocation10 + $0x18] sm:$0xf] }
 0x219   : > { %v950_v43 = vmax.f32 %v802_v37, 0.0  ;;  %v805_v44 = vadd.f32 %v10030_v33, %v804_v39  ;;  %v8652_v45 = vpop.f32.mrb[47].mxu0  ;;  %v3719_v10 = vrot.slane %v3717_v57, 5  ;;  %9062 = vmatprep.subr.msk.bf16.mxu0 %vm1557_vm3, %v10187_v30 }
 0x21a   : > { %v3705_v49 = vrot.slane %v3703_v41, 5  ;;  %v3696_v55 = vsel %vm10104_vm13, %v3691_v40, %v3695_v16  ;;  %v3723_v11 = vrot.slane %v3721_v58, 4 }
 0x21b   : > { %v8372_v50 = vpack.c.bf16 %v950_v43, %v950_v43  ;;  %v951_v51 = vmax.f32 %v805_v44, 0.0 }
 0x21c   : > { %v1348_v53 = vld [vmem:[#allocation2 + $0x50] sm:$0x1]  ;;  %v3706_v56 = vsel %vm10104_vm13, %v3701_v48, %v3705_v49  ;;  %v3724_v20 = vor.u32 %v3723_v11, %v3719_v10 }
 0x21d   : > { %v1349_v59 = vsel %vm10054_vm9, 0, %v1348_v53  ;;  %1239 = vst.msk [vmem:[#allocation2 + $0x58] sm:$0xf] %vm1216_vm4, %v8372_v50  ;;  %v8373_v60 = vpack.c.bf16 %v951_v51, %v951_v51  ;;  %v8074_v61 = vcombine.low %v3696_v55, %v3706_v56  ;;  %v9232_v54 = vld [vmem:[#allocation2 + $0x48] sm:$0xff]  }
 0x21e   : > { %v3554_v62 = vld [vmem:[#allocation2 + $0x48] sm:$0xf]  ;;  %1350 = vst [vmem:[#allocation2 + $0x50] sm:$0x1] %v1349_v59  ;;  %v1295_v63 = vld [vmem:[#allocation2 + $0x54] sm:$0x1]  ;;  %8727 = vmatprep.mubr.msk.bf16.mxu1 %vm1508_vm10, %v9232_v54 }
 0x21f   : > { %v809_v0 = vpop.f32.mrb[48].mxu0  ;;  %v3708_v2 = vshrl.u32 %v3554_v62, 16  ;;  %v3711_v3 = vshll.u32 %v3554_v62, 16  ;;  %v1296_v4 = vsel %vm10041_vm7, 0, %v1295_v63  ;;  %1240 = vst.msk [vmem:[#allocation2 + $0x5c] sm:$0xf] %vm1216_vm4, %v8373_v60  ;;  %8859 = vmatprep.mubr.msk.bf16.mxu0 %vm1508_vm10, %v8074_v61 }
 0x220   : > { %v810_v5 = vadd.f32 %v10030_v33, %v809_v0  ;;  %v8655_v6 = vpop.f32.mrb[49].mxu0  ;;  %1297 = vst [vmem:[#allocation2 + $0x54] sm:$0x1] %v1296_v4  ;;  %v3725_v37 = vrot.slane %v3724_v20, 4 }
 0x221   : > { %v812_v7 = vpop.f32.mrb[50].mxu0  ;;  %v3710_v8 = vrot.slane %v3708_v2, 4  ;;  %v3713_v9 = vrot.slane %v3711_v3, 5 }
 0x222   : > { %v952_v12 = vmax.f32 %v810_v5, 0.0  ;;  %v813_v13 = vadd.f32 %v10030_v33, %v812_v7  ;;  %v8656_v14 = vpop.f32.mrb[51].mxu0 }
 0x223   : > { %v3714_v17 = vor.u32 %v3713_v9, %v3710_v8 }
 0x224   : > { %v8374_v18 = vpack.c.bf16 %v952_v12, %v952_v12  ;;  %v953_v19 = vmax.f32 %v813_v13, 0.0  ;;  %v3558_v21 = vld [vmem:[#allocation2 + $0x58] sm:$0xf] }
 0x225   : > { %v3556_v16 = vld [vmem:[#allocation2 + $0x50] sm:$0x1]  ;;  %v3715_v22 = vrot.slane %v3714_v17, 4  ;;  %v3741_v23 = vshll.u32 %v3558_v21, 16  ;;  %v3745_v25 = vshrl.u32 %v3558_v21, 16 }
 0x226   : > { %1241 = vst.msk [vmem:[#allocation2 + $0x60] sm:$0xf] %vm1216_vm4, %v8374_v18  ;;  %v8375_v15 = vpack.c.bf16 %v953_v19, %v953_v19  ;;  %v1351_v26 = vld [vmem:[#allocation2 + $0x5c] sm:$0x1]  ;;  %v817_v27 = vpop.f32.mrb[52].mxu0  ;;  %v3727_v28 = vshll.u32 %v3556_v16, 16 }
 0x227   : > { %v1352_v31 = vsel %vm10054_vm9, 0, %v1351_v26  ;;  %v818_v32 = vadd.f32 %v10030_v33, %v817_v27  ;;  %v8659_v34 = vpop.f32.mrb[53].mxu0  ;;  %v9233_v35 = vld [vmem:[#allocation2 + $0x54] sm:$0xff]   ;;  %v3720_v45 = vsel %vm10104_vm13, %v3715_v22, %v3719_v10  ;;  %v3743_v48 = vrot.slane %v3741_v23, 5 }
 0x228   : > { %1242 = vst.msk [vmem:[#allocation2 + $0x64] sm:$0xf] %vm1216_vm4, %v8375_v15  ;;  %1353 = vst [vmem:[#allocation2 + $0x5c] sm:$0x1] %v1352_v31  ;;  %v820_v36 = vpop.f32.mrb[54].mxu0  ;;  %v3729_v38 = vrot.slane %v3727_v28, 5  ;;  %8728 = vmatmul.mubr.msk.bf16.gmra.mrb[4].mxu1 %vm1508_vm10, %v9233_v35 }
 0x229   : > { %v3557_v24 = vld [vmem:[#allocation2 + $0x54] sm:$0xf]  ;;  %v954_v39 = vmax.f32 %v818_v32, 0.0  ;;  %v821_v40 = vadd.f32 %v10030_v33, %v820_v36  ;;  %v8660_v41 = vpop.f32.mrb[55].mxu0  ;;  %v3747_v49 = vrot.slane %v3745_v25, 4 }
 0x22a   : > { %v3732_v43 = vshrl.u32 %v3557_v24, 16  ;;  %v3735_v44 = vshll.u32 %v3557_v24, 16  ;;  %v3730_v46 = vsel %vm10104_vm13, %v3725_v37, %v3729_v38  ;;  %v1757_v34 = vld [vmem:[#allocation2 + $0xc] sm:$0xf] }
 0x22b   : > { %v8376_v50 = vpack.c.bf16 %v954_v39, %v954_v39  ;;  %v955_v51 = vmax.f32 %v821_v40, 0.0  ;;  %v8075_v53 = vcombine.low %v3720_v45, %v3730_v46  ;;  %v3748_v54 = vor.u32 %v3747_v49, %v3743_v48 }
 0x22c   : > { %v3734_v55 = vrot.slane %v3732_v43, 4  ;;  %v3737_v57 = vrot.slane %v3735_v44, 5  ;;  %v10222_v44 = vld [vmem:[#allocation2 + $0x10] sm:$0xf] }
 0x22d   : > { %v1298_v56 = vld [vmem:[#allocation2 + $0x60] sm:$0x1]  ;;  %1243 = vst.msk [vmem:[#allocation2 + $0x68] sm:$0xf] %vm1216_vm4, %v8376_v50  ;;  %v8377_v59 = vpack.c.bf16 %v955_v51, %v955_v51  ;;  %8860 = vmatmul.mubr.msk.bf16.gmra.mrb[124].mxu0 %vm1508_vm10, %v8075_v53  ;;  %v3749_v9 = vrot.slane %v3748_v54, 4  ;;  %v1833_v51 = vshll.u32 %v1757_v34, 16 }
 0x22e   : > { %v1299_v58 = vsel %vm10041_vm7, 0, %v1298_v56  ;;  %v825_v60 = vpop.f32.mrb[56].mxu0  ;;  %v3738_v61 = vor.u32 %v3737_v57, %v3734_v55  ;;  %v1839_v57 = vshll.u32 %v10222_v44, 16 }
 0x22f   : > { %1300 = vst [vmem:[#allocation2 + $0x60] sm:$0x1] %v1299_v58  ;;  %1244 = vst.msk [vmem:[#allocation2 + $0x6c] sm:$0xf] %vm1216_vm4, %v8377_v59  ;;  %v826_v62 = vadd.f32 %v10030_v33, %v825_v60  ;;  %v8663_v63 = vpop.f32.mrb[57].mxu0 }
 0x230   : > { %v3559_v0 = vld [vmem:[#allocation2 + $0x5c] sm:$0x1]  ;;  %v828_v2 = vpop.f32.mrb[58].mxu0  ;;  %v3739_v3 = vrot.slane %v3738_v61, 4  ;;  %v3561_v8 = vld [vmem:[#allocation2 + $0x64] sm:$0xf] }
 0x231   : > { %v3751_v4 = vshll.u32 %v3559_v0, 16  ;;  %v956_v5 = vmax.f32 %v826_v62, 0.0  ;;  %v829_v6 = vadd.f32 %v10030_v33, %v828_v2  ;;  %v8664_v7 = vpop.f32.mrb[59].mxu0  ;;  %v3765_v18 = vshll.u32 %v3561_v8, 16 }
 0x232   : > { %v3744_v14 = vsel %vm10104_vm13, %v3739_v3, %v3743_v48  ;;  %v3769_v19 = vshrl.u32 %v3561_v8, 16  ;;  %v1830_v48 = vshrl.u32 %v1757_v34, 16  ;;  %v1835_v8 = vrot.slane %v1833_v51, 5 }
 0x233   : > { %v3753_v10 = vrot.slane %v3751_v4, 5  ;;  %v8378_v11 = vpack.c.bf16 %v956_v5, %v956_v5  ;;  %v957_v12 = vmax.f32 %v829_v6, 0.0  ;;  %v3767_v38 = vrot.slane %v3765_v18, 5 }
 0x234   : > { %v1354_v13 = vld [vmem:[#allocation2 + $0x68] sm:$0x1]  ;;  %v3771_v24 = vrot.slane %v3769_v19, 4  ;;  %v1832_v3 = vrot.slane %v1830_v48, 4  ;;  %v5059_v34 = vsel %vm1557_vm3, %v10187_v30, 0 }
 0x235   : > { %v3754_v17 = vsel %vm10104_vm13, %v3749_v9, %v3753_v10  ;;  %v1355_v20 = vsel %vm10054_vm9, 0, %v1354_v13  ;;  %1245 = vst.msk [vmem:[#allocation2 + $0x70] sm:$0xf] %vm1216_vm4, %v8378_v11  ;;  %v8379_v21 = vpack.c.bf16 %v957_v12, %v957_v12  ;;  %v10230_v10 = vld [vmem:[#allocation9] ss:$0 sm:$0xff]  ;;  %8918 = vmatpush3.bf16.msra.mxu0 %v5059_v34 }
 0x236   : > { %v8076_v15 = vcombine.low %v3744_v14, %v3754_v17  ;;  %v9234_v16 = vld [vmem:[#allocation2 + $0x60] sm:$0xff]   ;;  %1356 = vst [vmem:[#allocation2 + $0x68] sm:$0x1] %v1355_v20  ;;  %v1301_v23 = vld [vmem:[#allocation2 + $0x6c] sm:$0x1]  ;;  %v833_v25 = vpop.f32.mrb[60].mxu0  ;;  %v3772_v49 = vor.u32 %v3771_v24, %v3767_v38 }
 0x237   : > { %v3560_v22 = vld [vmem:[#allocation2 + $0x60] sm:$0xf]  ;;  %v1302_v28 = vsel %vm10041_vm7, 0, %v1301_v23  ;;  %1246 = vst.msk [vmem:[#allocation2 + $0x74] sm:$0xf] %vm1216_vm4, %v8379_v21  ;;  %v834_v31 = vadd.f32 %v10030_v33, %v833_v25  ;;  %v8667_v32 = vpop.f32.mrb[61].mxu0  ;;  %8731 = vmatprep.mubr.msk.bf16.mxu1 %vm1508_vm10, %v9234_v16 }
 0x238   : > { %v3756_v26 = vshrl.u32 %v3560_v22, 16  ;;  %v3759_v27 = vshll.u32 %v3560_v22, 16  ;;  %8863 = vmatprep.mubr.msk.bf16.mxu0 %vm1508_vm10, %v8076_v15  ;;  %1303 = vst [vmem:[#allocation2 + $0x6c] sm:$0x1] %v1302_v28  ;;  %v836_v35 = vpop.f32.mrb[62].mxu0  ;;  %v3773_v5 = vrot.slane %v3772_v49, 4  ;;  %v1836_v32 = vor.u32 %v1835_v8, %v1832_v3 }
 0x239   : > { %v958_v39 = vmax.f32 %v834_v31, 0.0  ;;  %v837_v40 = vadd.f32 %v10030_v33, %v836_v35  ;;  %v8668_v41 = vpop.f32.mrb[63].mxu0  ;;  %v1760_v20 = vld [vmem:[#allocation2 + $0x18] sm:$0xf]  ;;  %v1759_v31 = vld [vmem:[#allocation2 + $0x14] sm:$0x1] }
 0x23a   : > { %v3758_v36 = vrot.slane %v3756_v26, 4  ;;  %v3761_v37 = vrot.slane %v3759_v27, 5  ;;  %v1843_v26 = vshrl.u32 %v10222_v44, 16  ;;  %v1857_v24 = vshll.u32 %v1760_v20, 16  ;;  %v1761_v30 = vld [vmem:[#allocation2 + $0x1c] sm:$0xf] }
 0x23b   : > { %v8380_v45 = vpack.c.bf16 %v958_v39, %v958_v39  ;;  %v959_v46 = vmax.f32 %v837_v40, 0.0 }
 0x23c   : > { %v3762_v43 = vor.u32 %v3761_v37, %v3758_v36  ;;  %v3564_v50 = vld [vmem:[#allocation2 + $0x70] sm:$0xf]  ;;  %v1845_v48 = vrot.slane %v1843_v26, 4 }
 0x23d   : > { %1247 = vst.msk [vmem:[#allocation2 + $0x78] sm:$0xf] %vm1216_vm4, %v8380_v45  ;;  %v8381_v53 = vpack.c.bf16 %v959_v46, %v959_v46  ;;  %v3562_v55 = vld [vmem:[#allocation2 + $0x68] sm:$0x1]  ;;  %v3789_v61 = vshll.u32 %v3564_v50, 16  ;;  %v3793_v54 = vshrl.u32 %v3564_v50, 16 }
 0x23e   : > { %v3763_v56 = vrot.slane %v3762_v43, 4  ;;  %v1357_v58 = vld [vmem:[#allocation2 + $0x74] sm:$0x1]  ;;  %v841_v59 = vpop.f32.mrb[64].mxu0  ;;  %v3775_v60 = vshll.u32 %v3562_v55, 16  ;;  %v10247_v43 = vrot.slane %v1839_v57, 5 }
 0x23f   : > { %v1358_v62 = vsel %vm10054_vm9, 0, %v1357_v58  ;;  %1248 = vst.msk [vmem:[#allocation2 + $0x7c] sm:$0xf] %vm1216_vm4, %v8381_v53  ;;  %v842_v63 = vadd.f32 %v10030_v33, %v841_v59  ;;  %v8671_v0 = vpop.f32.mrb[65].mxu0  ;;  %v9235_v2 = vld [vmem:[#allocation2 + $0x6c] sm:$0xff]   ;;  %v3791_v18 = vrot.slane %v3789_v61, 5 }
 0x240   : > { %1359 = vst [vmem:[#allocation2 + $0x74] sm:$0x1] %v1358_v62  ;;  %v844_v4 = vpop.f32.mrb[66].mxu0  ;;  %v3777_v6 = vrot.slane %v3775_v60, 5  ;;  %v3563_v7 = vld [vmem:[#allocation2 + $0x6c] sm:$0xf]  ;;  %8732 = vmatmul.mubr.msk.bf16.gmra.mrb[8].mxu1 %vm1508_vm10, %v9235_v2  ;;  %v3768_v33 = vsel %vm10104_vm13, %v3763_v56, %v3767_v38 }
 0x241   : > { %v960_v9 = vmax.f32 %v842_v63, 0.0  ;;  %v845_v11 = vadd.f32 %v10230_v10, %v844_v4  ;;  %v8672_v12 = vpop.f32.mrb[67].mxu0  ;;  %v3780_v13 = vshrl.u32 %v3563_v7, 16  ;;  %v3783_v14 = vshll.u32 %v3563_v7, 16  ;;  %v1762_v62 = vld [vmem:[#allocation2 + $0x20] sm:$0x1] }
 0x242   : > { %v3778_v17 = vsel %vm10104_vm13, %v3773_v5, %v3777_v6  ;;  %v3795_v19 = vrot.slane %v3793_v54, 4  ;;  %v1854_v38 = vshrl.u32 %v1760_v20, 16  ;;  %v10250_v55 = vrot.slane %v1836_v32, 4  ;;  %v1763_v7 = vld [vmem:[#allocation2 + $0x24] sm:$0xf] }
 0x243   : > { %v8382_v21 = vpack.c.bf16 %v960_v9, %v960_v9  ;;  %v961_v15 = vmax.f32 %v845_v11, 0.0  ;;  %v8077_v16 = vcombine.low %v3768_v33, %v3778_v17  ;;  %v3782_v22 = vrot.slane %v3780_v13, 4 }
 0x244   : > { %v1304_v23 = vld [vmem:[#allocation2 + $0x78] sm:$0x1]  ;;  %v3785_v25 = vrot.slane %v3783_v14, 5  ;;  %v3796_v37 = vor.u32 %v3795_v19, %v3791_v18  ;;  %v1849_v56 = vshll.u32 %v1759_v31, 16  ;;  %v1856_v60 = vrot.slane %v1854_v38, 4 }
 0x245   : > { %v1305_v27 = vsel %vm10041_vm7, 0, %v1304_v23  ;;  %1249 = vst.msk [vmem:[#allocation2 + $0x80] sm:$0xf] %vm1216_vm4, %v8382_v21  ;;  %v8383_v28 = vpack.c.bf16 %v961_v15, %v961_v15  ;;  %8864 = vmatmul.mubr.msk.bf16.gmra.mrb[128].mxu0 %vm1508_vm10, %v8077_v16  ;;  %v1859_v61 = vrot.slane %v1857_v24, 5  ;;  %v1863_v63 = vshll.u32 %v1761_v30, 16 }
 0x246   : > { %1306 = vst [vmem:[#allocation2 + $0x78] sm:$0x1] %v1305_v27  ;;  %v849_v35 = vpop.f32.mrb[68].mxu0  ;;  %v3786_v36 = vor.u32 %v3785_v25, %v3782_v22  ;;  %v3567_v53 = vld [vmem:[#allocation2 + $0x7c] sm:$0xf]  ;;  %v3797_v58 = vrot.slane %v3796_v37, 4  ;;  %v1846_v14 = vor.u32 %v1845_v48, %v10247_v43 }
 0x247   : > { %1250 = vst.msk [vmem:[#allocation2 + $0x84] sm:$0xf] %vm1216_vm4, %v8383_v28  ;;  %v850_v39 = vadd.f32 %v10230_v10, %v849_v35  ;;  %v8675_v40 = vpop.f32.mrb[69].mxu0  ;;  %v3565_v41 = vld [vmem:[#allocation2 + $0x74] sm:$0x1]  ;;  %v1867_v0 = vshrl.u32 %v1761_v30, 16  ;;  %v1860_v21 = vor.u32 %v1859_v61, %v1856_v60 }
 0x248   : > { %v852_v44 = vpop.f32.mrb[70].mxu0  ;;  %v3787_v45 = vrot.slane %v3786_v36, 4  ;;  %v3799_v46 = vshll.u32 %v3565_v41, 16  ;;  %v3813_v5 = vshll.u32 %v3567_v53, 16  ;;  %v3817_v6 = vshrl.u32 %v3567_v53, 16 }
 0x249   : > { %v962_v49 = vmax.f32 %v850_v39, 0.0  ;;  %v853_v50 = vadd.f32 %v10230_v10, %v852_v44  ;;  %v8676_v51 = vpop.f32.mrb[71].mxu0  ;;  %v1851_v20 = vrot.slane %v1849_v56, 5  ;;  %v1754_v23 = vld [vmem:[#allocation2] sm:$0xf]  ;;  %v1873_v25 = vshll.u32 %v1762_v62, 16 }
 0x24a   : > { %v3801_v59 = vrot.slane %v3799_v46, 5  ;;  %v3792_v3 = vsel %vm10104_vm13, %v3787_v45, %v3791_v18  ;;  %v1878_v26 = vshrl.u32 %v1763_v7, 16  ;;  %v3815_v32 = vrot.slane %v3813_v5, 5  ;;  %v10271_v45 = vld [vmem:[#allocation2 + $0x28] sm:$0xf] }
 0x24b   : > { %v8384_v54 = vpack.c.bf16 %v962_v49, %v962_v49  ;;  %v963_v57 = vmax.f32 %v853_v50, 0.0  ;;  %v3819_v34 = vrot.slane %v3817_v6, 4  ;;  %v1847_v38 = vrot.slane %v1846_v14, 4 }
 0x24c   : > { %v1360_v2 = vld [vmem:[#allocation2 + $0x80] sm:$0x1]  ;;  %v3802_v4 = vsel %vm10104_vm13, %v3797_v58, %v3801_v59  ;;  %v1881_v24 = vshll.u32 %v1763_v7, 16  ;;  %v10267_v40 = vrot.slane %v1860_v21, 4  ;;  %v10269_v41 = vrot.slane %v1863_v63, 5 }
 0x24d   : > { %v1361_v8 = vsel %vm10054_vm9, 0, %v1360_v2  ;;  %1251 = vst.msk [vmem:[#allocation2 + $0x88] sm:$0xf] %vm1216_vm4, %v8384_v54  ;;  %v8385_v9 = vpack.c.bf16 %v963_v57, %v963_v57  ;;  %v8078_v11 = vcombine.low %v3792_v3, %v3802_v4  ;;  %v9236_v12 = vld [vmem:[#allocation2 + $0x78] sm:$0xff]   ;;  %v1869_v44 = vrot.slane %v1867_v0, 4 }
 0x24e   : > { %v3566_v13 = vld [vmem:[#allocation2 + $0x78] sm:$0xf]  ;;  %1362 = vst [vmem:[#allocation2 + $0x80] sm:$0x1] %v1361_v8  ;;  %v1307_v33 = vld [vmem:[#allocation2 + $0x84] sm:$0x1]  ;;  %8735 = vmatprep.mubr.msk.bf16.mxu1 %vm1508_vm10, %v9236_v12  ;;  %v3820_v50 = vor.u32 %v3819_v34, %v3815_v32  ;;  %v1852_v56 = vsel %vm10104_vm13, %v1847_v38, %v1851_v20  ;;  %v1842_v4 = vsel %vm10104_vm13, %v10250_v55, %v10247_v43 }
 0x24f   : > { %v857_v17 = vpop.f32.mrb[72].mxu0  ;;  %v3804_v18 = vshrl.u32 %v3566_v13, 16  ;;  %v3807_v19 = vshll.u32 %v3566_v13, 16  ;;  %v1308_v15 = vsel %vm10041_vm7, 0, %v1307_v33  ;;  %1252 = vst.msk [vmem:[#allocation2 + $0x8c] sm:$0xf] %vm1216_vm4, %v8385_v9  ;;  %8867 = vmatprep.mubr.msk.bf16.mxu0 %vm1508_vm10, %v8078_v11  ;;  %v10293_v11 = vcombine.low %v1842_v4, %v1852_v56 }
 0x250   : > { %v858_v16 = vadd.f32 %v10230_v10, %v857_v17  ;;  %v8679_v22 = vpop.f32.mrb[73].mxu0  ;;  %1309 = vst [vmem:[#allocation2 + $0x84] sm:$0x1] %v1308_v15  ;;  %v1806_v30 = vshrl.u32 %v1754_v23, 16  ;;  %v10273_v49 = vrot.slane %v1873_v25, 5  ;;  %v1809_v53 = vshll.u32 %v1754_v23, 16 }
 0x251   : > { %v860_v27 = vpop.f32.mrb[74].mxu0  ;;  %v3806_v28 = vrot.slane %v3804_v18, 4  ;;  %v3809_v31 = vrot.slane %v3807_v19, 5  ;;  %v10277_v58 = vrot.slane %v1878_v26, 4  ;;  %v10280_v54 = vrot.slane %v1881_v24, 5 }
 0x252   : > { %v964_v35 = vmax.f32 %v858_v16, 0.0  ;;  %v861_v36 = vadd.f32 %v10230_v10, %v860_v27  ;;  %v8680_v37 = vpop.f32.mrb[75].mxu0  ;;  %v1887_v57 = vshll.u32 %v10271_v45, 16  ;;  %v10291_v9 = vrot.slane %v1806_v30, 4  ;;  %v1755_v25 = vld [vmem:[#allocation2 + $0x4] sm:$0xf] }
 0x253   : > { %v3810_v39 = vor.u32 %v3809_v31, %v3806_v28  ;;  %v3821_v13 = vrot.slane %v3820_v50, 4  ;;  %v1811_v17 = vrot.slane %v1809_v53, 5  ;;  %v1870_v43 = vor.u32 %v1869_v44, %v10269_v41  ;;  %v10321_v53 = vld [vmem:[#allocation2 + $0x34] sm:$0xf] }
 0x254   : > { %v8386_v46 = vpack.c.bf16 %v964_v35, %v964_v35  ;;  %v965_v48 = vmax.f32 %v861_v36, 0.0  ;;  %v3570_v51 = vld [vmem:[#allocation2 + $0x88] sm:$0xf]  ;;  %v1866_v37 = vsel %vm10104_vm13, %v10267_v40, %v10269_v41  ;;  %v1884_v38 = vor.u32 %v10280_v54, %v10277_v58 }
 0x255   : > { %v3568_v60 = vld [vmem:[#allocation2 + $0x80] sm:$0x1]  ;;  %v3811_v61 = vrot.slane %v3810_v39, 4  ;;  %v3837_v2 = vshll.u32 %v3570_v51, 16  ;;  %v3841_v3 = vshrl.u32 %v3570_v51, 16  ;;  %v1815_v44 = vshll.u32 %v1755_v25, 16 }
 0x256   : > { %1253 = vst.msk [vmem:[#allocation2 + $0x90] sm:$0xf] %vm1216_vm4, %v8386_v46  ;;  %v8387_v59 = vpack.c.bf16 %v965_v48, %v965_v48  ;;  %v1363_v62 = vld [vmem:[#allocation2 + $0x8c] sm:$0x1]  ;;  %v865_v63 = vpop.f32.mrb[76].mxu0  ;;  %v3823_v0 = vshll.u32 %v3568_v60, 16  ;;  %v1812_v60 = vor.u32 %v1811_v17, %v10291_v9 }
 0x257   : > { %v1364_v5 = vsel %vm10054_vm9, 0, %v1363_v62  ;;  %v866_v6 = vadd.f32 %v10230_v10, %v865_v63  ;;  %v8683_v7 = vpop.f32.mrb[77].mxu0  ;;  %v9237_v8 = vld [vmem:[#allocation2 + $0x84] sm:$0xff]   ;;  %v3816_v15 = vsel %vm10104_vm13, %v3811_v61, %v3815_v32  ;;  %v10302_v22 = vrot.slane %v3837_v2, 5  ;;  %v10314_v48 = vld [vmem:[#allocation2 + $0x2c] sm:$0x1] }
 0x258   : > { %1254 = vst.msk [vmem:[#allocation2 + $0x94] sm:$0xf] %vm1216_vm4, %v8387_v59  ;;  %1365 = vst [vmem:[#allocation2 + $0x8c] sm:$0x1] %v1364_v5  ;;  %v868_v12 = vpop.f32.mrb[78].mxu0  ;;  %v3825_v14 = vrot.slane %v3823_v0, 5  ;;  %8736 = vmatmul.mubr.msk.bf16.gmra.mrb[12].mxu1 %vm1508_vm10, %v9237_v8 }
 0x259   : > { %v3569_v33 = vld [vmem:[#allocation2 + $0x84] sm:$0xf]  ;;  %v966_v55 = vmax.f32 %v866_v6, 0.0  ;;  %v869_v18 = vadd.f32 %v10230_v10, %v868_v12  ;;  %v8684_v19 = vpop.f32.mrb[79].mxu0  ;;  %v3843_v23 = vrot.slane %v3841_v3, 4  ;;  %v1871_v32 = vrot.slane %v1870_v43, 4 }
 0x25a   : > { %v3828_v20 = vshrl.u32 %v3569_v33, 16  ;;  %v3831_v21 = vshll.u32 %v3569_v33, 16  ;;  %v3826_v16 = vsel %vm10104_vm13, %v3821_v13, %v3825_v14  ;;  %v1756_v36 = vld [vmem:[#allocation2 + $0x8] sm:$0x1]  ;;  %v1819_v46 = vshrl.u32 %v1755_v25, 16 }
 0x25b   : > { %v8388_v26 = vpack.c.bf16 %v966_v55, %v966_v55  ;;  %v967_v27 = vmax.f32 %v869_v18, 0.0  ;;  %v8079_v28 = vcombine.low %v3816_v15, %v3826_v16  ;;  %v3844_v40 = vor.u32 %v3843_v23, %v10302_v22  ;;  %v1766_v43 = vld [vmem:[#allocation2 + $0x30] sm:$0xf]  ;;  %v10346_v15 = vld [vmem:[#allocation2 + $0x3c] sm:$0xf] }
 0x25c   : > { %v3830_v31 = vrot.slane %v3828_v20, 4  ;;  %v3833_v35 = vrot.slane %v3831_v21, 5  ;;  %v1876_v41 = vsel %vm10104_vm13, %v1871_v32, %v10273_v49  ;;  %v1891_v51 = vshrl.u32 %v10271_v45, 16 }
 0x25d   : > { %v1310_v34 = vld [vmem:[#allocation2 + $0x90] sm:$0x1]  ;;  %1255 = vst.msk [vmem:[#allocation2 + $0x98] sm:$0xf] %vm1216_vm4, %v8388_v26  ;;  %v8389_v39 = vpack.c.bf16 %v967_v27, %v967_v27  ;;  %8868 = vmatmul.mubr.msk.bf16.gmra.mrb[132].mxu0 %vm1508_vm10, %v8079_v28  ;;  %v1825_v61 = vshll.u32 %v1756_v36, 16  ;;  %v10326_v54 = vrot.slane %v1887_v57, 5  ;;  %v10352_v36 = vcombine.low %v1866_v37, %v1876_v41 }
 0x25e   : > { %v1311_v24 = vsel %vm10041_vm7, 0, %v1310_v34  ;;  %v873_v30 = vpop.f32.mrb[80].mxu0  ;;  %v3834_v50 = vor.u32 %v3833_v35, %v3830_v31  ;;  %v10328_v2 = vrot.slane %v1884_v38, 4  ;;  %v1897_v45 = vshll.u32 %v10314_v48, 16 }
 0x25f   : > { %1312 = vst [vmem:[#allocation2 + $0x90] sm:$0x1] %v1311_v24  ;;  %1256 = vst.msk [vmem:[#allocation2 + $0x9c] sm:$0xf] %vm1216_vm4, %v8389_v39  ;;  %v874_v56 = vadd.f32 %v10230_v10, %v873_v30  ;;  %v8687_v58 = vpop.f32.mrb[81].mxu0  ;;  %v10332_v6 = vrot.slane %v1815_v44, 5 }
 0x260   : > { %v3571_v59 = vld [vmem:[#allocation2 + $0x8c] sm:$0x1]  ;;  %v876_v62 = vpop.f32.mrb[82].mxu0  ;;  %v3835_v63 = vrot.slane %v3834_v50, 4  ;;  %v3573_v5 = vld [vmem:[#allocation2 + $0x94] sm:$0xf] }
 0x261   : > { %v3847_v0 = vshll.u32 %v3571_v59, 16  ;;  %v968_v49 = vmax.f32 %v874_v56, 0.0  ;;  %v877_v3 = vadd.f32 %v10230_v10, %v876_v62  ;;  %v8688_v4 = vpop.f32.mrb[83].mxu0  ;;  %v1821_v7 = vrot.slane %v1819_v46, 4 }
 0x262   : > { %v3845_v8 = vrot.slane %v3844_v40, 4  ;;  %v10334_v12 = vrot.slane %v1891_v51, 4  ;;  %v1911_v57 = vshll.u32 %v10321_v53, 16  ;;  %v10337_v33 = vrot.slane %v1812_v60, 4 }
 0x263   : > { %v3849_v9 = vrot.slane %v3847_v0, 5  ;;  %v8390_v13 = vpack.c.bf16 %v968_v49, %v968_v49  ;;  %v969_v14 = vmax.f32 %v877_v3, 0.0  ;;  %v10339_v17 = vrot.slane %v1825_v61, 5  ;;  %v10377_v0 = vld [vmem:[#allocation10 + $0x20] sm:$0xf] }
 0x264   : > { %v1366_v55 = vld [vmem:[#allocation2 + $0x98] sm:$0x1]  ;;  %v3840_v18 = vsel %vm10104_vm13, %v3835_v63, %v10302_v22  ;;  %v3861_v20 = vshll.u32 %v3573_v5, 16  ;;  %v3865_v21 = vshrl.u32 %v3573_v5, 16  ;;  %v1822_v28 = vor.u32 %v1821_v7, %v10332_v6  ;;  %v10375_v63 = vld [vmem:[#allocation2 + $0x40] sm:$0xf]  ;;  %9064 = vmatprep.subr.msk.bf16.mxu0 %vm1557_vm3, %v10377_v0 }
 0x265   : > { %v3850_v19 = vsel %vm10104_vm13, %v3845_v8, %v3849_v9  ;;  %v1367_v16 = vsel %vm10054_vm9, 0, %v1366_v55  ;;  %1257 = vst.msk [vmem:[#allocation2 + $0xa0] sm:$0xf] %vm1216_vm4, %v8390_v13  ;;  %v8391_v23 = vpack.c.bf16 %v969_v14, %v969_v14  ;;  %v1902_v32 = vshrl.u32 %v1766_v43, 16 }
 0x266   : > { %v8080_v25 = vcombine.low %v3840_v18, %v3850_v19  ;;  %v9238_v26 = vld [vmem:[#allocation2 + $0x90] sm:$0xff]   ;;  %1368 = vst [vmem:[#allocation2 + $0x98] sm:$0x1] %v1367_v16  ;;  %v1313_v22 = vld [vmem:[#allocation2 + $0x9c] sm:$0x1]  ;;  %v881_v31 = vpop.f32.mrb[84].mxu0 }
 0x267   : > { %v3572_v27 = vld [vmem:[#allocation2 + $0x90] sm:$0xf]  ;;  %v1314_v38 = vsel %vm10041_vm7, 0, %v1313_v22  ;;  %1258 = vst.msk [vmem:[#allocation2 + $0xa4] sm:$0xf] %vm1216_vm4, %v8391_v23  ;;  %v882_v24 = vadd.f32 %v10230_v10, %v881_v31  ;;  %v8691_v39 = vpop.f32.mrb[85].mxu0  ;;  %8739 = vmatprep.mubr.msk.bf16.mxu1 %vm1508_vm10, %v9238_v26 }
 0x268   : > { %v3852_v34 = vshrl.u32 %v3572_v27, 16  ;;  %v3855_v35 = vshll.u32 %v3572_v27, 16  ;;  %8871 = vmatprep.mubr.msk.bf16.mxu0 %vm1508_vm10, %v8080_v25  ;;  %v1905_v44 = vshll.u32 %v1766_v43, 16  ;;  %v1915_v46 = vshrl.u32 %v10321_v53, 16  ;;  %1315 = vst [vmem:[#allocation2 + $0x9c] sm:$0x1] %v1314_v38 }
 0x269   : > { %v884_v48 = vpop.f32.mrb[86].mxu0  ;;  %v10361_v50 = vrot.slane %v3861_v20, 5  ;;  %v3867_v40 = vrot.slane %v3865_v21, 4  ;;  %v970_v41 = vmax.f32 %v882_v24, 0.0  ;;  %v10364_v58 = vrot.slane %v1822_v28, 4 }
 0x26a   : > { %v3854_v37 = vrot.slane %v3852_v34, 4  ;;  %v3857_v30 = vrot.slane %v3855_v35, 5  ;;  %v885_v51 = vadd.f32 %v10230_v10, %v884_v48  ;;  %v8692_v56 = vpop.f32.mrb[87].mxu0  ;;  %v1926_v59 = vshrl.u32 %v10346_v15, 16 }
 0x26b   : > { %v1890_v53 = vsel %vm10104_vm13, %v10328_v2, %v10326_v54  ;;  %v10371_v61 = vrot.slane %v1897_v45, 5  ;;  %v10373_v62 = vrot.slane %v1911_v57, 5  ;;  %v8392_v49 = vpack.c.bf16 %v970_v41, %v970_v41 }
 0x26c   : > { %v3858_v60 = vor.u32 %v3857_v30, %v3854_v37  ;;  %v971_v3 = vmax.f32 %v885_v51, 0.0  ;;  %v10379_v4 = vrot.slane %v1902_v32, 4  ;;  %v10381_v5 = vrot.slane %v1905_v44, 5  ;;  %v3576_v8 = vld [vmem:[#allocation2 + $0xa0] sm:$0xf] }
 0x26d   : > { %v3868_v7 = vor.u32 %v3867_v40, %v10361_v50  ;;  %v1894_v45 = vor.u32 %v10334_v12, %v10326_v54  ;;  %v10388_v9 = vrot.slane %v1915_v46, 4  ;;  %v1929_v57 = vshll.u32 %v10346_v15, 16  ;;  %1259 = vst.msk [vmem:[#allocation2 + $0xa8] sm:$0xf] %vm1216_vm4, %v8392_v49  ;;  %v3574_v14 = vld [vmem:[#allocation2 + $0x98] sm:$0x1] }
 0x26e   : > { %v8393_v13 = vpack.c.bf16 %v971_v3, %v971_v3  ;;  %v3859_v43 = vrot.slane %v3858_v60, 4  ;;  %v10392_v55 = vrot.slane %v1926_v59, 4  ;;  %v1935_v18 = vshll.u32 %v10375_v63, 16  ;;  %v1369_v19 = vld [vmem:[#allocation2 + $0xa4] sm:$0x1]  ;;  %v889_v20 = vpop.f32.mrb[88].mxu0 }
 0x26f   : > { %v3871_v21 = vshll.u32 %v3574_v14, 16  ;;  %v3885_v16 = vshll.u32 %v3576_v8, 16  ;;  %v3889_v23 = vshrl.u32 %v3576_v8, 16  ;;  %v1818_v12 = vsel %vm10104_vm13, %v10337_v33, %v10332_v6  ;;  %v8695_v26 = vpop.f32.mrb[89].mxu0  ;;  %v9239_v27 = vld [vmem:[#allocation2 + $0x9c] sm:$0xff]  }
 0x270   : > { %v1370_v15 = vsel %vm10054_vm9, 0, %v1369_v19  ;;  %1260 = vst.msk [vmem:[#allocation2 + $0xac] sm:$0xf] %vm1216_vm4, %v8393_v13  ;;  %v890_v25 = vadd.f32 %v10230_v10, %v889_v20  ;;  %v1828_v28 = vsel %vm10104_vm13, %v10364_v58, %v10339_v17  ;;  %v1939_v22 = vshrl.u32 %v10375_v63, 16  ;;  %v892_v31 = vpop.f32.mrb[90].mxu0  ;;  %8740 = vmatmul.mubr.msk.bf16.gmra.mrb[16].mxu1 %vm1508_vm10, %v9239_v27 }
 0x271   : > { %1371 = vst [vmem:[#allocation2 + $0xa4] sm:$0x1] %v1370_v15  ;;  %v3869_v34 = vrot.slane %v3868_v7, 4  ;;  %v3873_v6 = vrot.slane %v3871_v21, 5  ;;  %v3575_v33 = vld [vmem:[#allocation2 + $0x9c] sm:$0xf]  ;;  %v1908_v35 = vor.u32 %v10381_v5, %v10379_v4  ;;  %v893_v24 = vadd.f32 %v10230_v10, %v892_v31 }
 0x272   : > { %v1931_v32 = vrot.slane %v1929_v57, 5  ;;  %v972_v38 = vmax.f32 %v890_v25, 0.0  ;;  %v8696_v39 = vpop.f32.mrb[91].mxu0  ;;  %v3876_v44 = vshrl.u32 %v3575_v33, 16  ;;  %v3879_v46 = vshll.u32 %v3575_v33, 16 }
 0x273   : > { %v1768_v17 = vld [vmem:[#allocation2 + $0x38] sm:$0x1]  ;;  %v3864_v48 = vsel %vm10104_vm13, %v3859_v43, %v10361_v50  ;;  %v3874_v37 = vsel %vm10104_vm13, %v3869_v34, %v3873_v6  ;;  %v3887_v30 = vrot.slane %v3885_v16, 5  ;;  %v3891_v40 = vrot.slane %v3889_v23, 4  ;;  %v10427_v7 = vld [vmem:[#allocation2 + $0x44] sm:$0x1] }
 0x274   : > { %v8394_v41 = vpack.c.bf16 %v972_v38, %v972_v38  ;;  %v973_v51 = vmax.f32 %v893_v24, 0.0  ;;  %v8081_v56 = vcombine.low %v3864_v48, %v3874_v37  ;;  %v3878_v58 = vrot.slane %v3876_v44, 4  ;;  %v1316_v59 = vld [vmem:[#allocation2 + $0xa8] sm:$0x1]  ;;  %v10432_v43 = vld [vmem:[#allocation2 + $0x4c] sm:$0xf] }
 0x275   : > { %v3881_v60 = vrot.slane %v3879_v46, 5  ;;  %v1895_v63 = vrot.slane %v1894_v45, 4  ;;  %v1918_v49 = vor.u32 %v10388_v9, %v10373_v62  ;;  %v1921_v3 = vshll.u32 %v1768_v17, 16  ;;  %v1772_v23 = vld [vmem:[#allocation2 + $0x48] sm:$0xf] }
 0x276   : > { %v1317_v4 = vsel %vm10041_vm7, 0, %v1316_v59  ;;  %1261 = vst.msk [vmem:[#allocation2 + $0xb0] sm:$0xf] %vm1216_vm4, %v8394_v41  ;;  %v8395_v50 = vpack.c.bf16 %v973_v51, %v973_v51  ;;  %8872 = vmatmul.mubr.msk.bf16.gmra.mrb[136].mxu0 %vm1508_vm10, %v8081_v56  ;;  %v10425_v5 = vsel %vm1557_vm3, %v10167_v42, 0  ;;  %v1932_v8 = vor.u32 %v1931_v32, %v10392_v55  ;;  %v897_v45 = vpop.f32.mrb[92].mxu0 }
 0x277   : > { %1318 = vst [vmem:[#allocation2 + $0xa8] sm:$0x1] %v1317_v4  ;;  %v3882_v9 = vor.u32 %v3881_v60, %v3878_v58  ;;  %v3892_v57 = vor.u32 %v3891_v40, %v3887_v30  ;;  %v10430_v13 = vrot.slane %v1935_v18, 5  ;;  %v1941_v14 = vrot.slane %v1939_v22, 4  ;;  %v8699_v20 = vpop.f32.mrb[93].mxu0 }
 0x278   : > { %1262 = vst.msk [vmem:[#allocation2 + $0xb4] sm:$0xf] %vm1216_vm4, %v8395_v50  ;;  %v898_v19 = vadd.f32 %v10230_v10, %v897_v45  ;;  %v3577_v42 = vld [vmem:[#allocation2 + $0xa4] sm:$0x1]  ;;  %v10436_v21 = vcombine.low %v1818_v12, %v1828_v28  ;;  %v1900_v55 = vsel %vm10104_vm13, %v1895_v63, %v10371_v61  ;;  %v10441_v16 = vrot.slane %v1908_v35, 4  ;;  %v900_v18 = vpop.f32.mrb[94].mxu0 }
 0x279   : > { %v3883_v15 = vrot.slane %v3882_v9, 4  ;;  %v3895_v25 = vshll.u32 %v3577_v42, 16  ;;  %v10443_v26 = vrot.slane %v1918_v49, 4  ;;  %v10445_v27 = vrot.slane %v1921_v3, 5  ;;  %v8700_v34 = vpop.f32.mrb[95].mxu0 }
 0x27a   : > { %v974_v22 = vmax.f32 %v898_v19, 0.0  ;;  %v901_v31 = vadd.f32 %v10230_v10, %v900_v18  ;;  %v3579_v12 = vld [vmem:[#allocation2 + $0xac] sm:$0xf]  ;;  %v10448_v28 = vrot.slane %v1932_v8, 4  ;;  %v1945_v6 = vshll.u32 %v10427_v7, 16 }
 0x27b   : > { %v3893_v61 = vrot.slane %v3892_v57, 4  ;;  %v3897_v33 = vrot.slane %v3895_v25, 5  ;;  %v1942_v35 = vor.u32 %v1941_v14, %v10430_v13  ;;  %v1950_v32 = vshrl.u32 %v1772_v23, 16  ;;  %v10467_v60 = vld [vmem:[#allocation2 + $0x50] sm:$0x1] }
 0x27c   : > { %v8396_v38 = vpack.c.bf16 %v974_v22, %v974_v22  ;;  %v975_v24 = vmax.f32 %v901_v31, 0.0  ;;  %v1953_v39 = vshll.u32 %v1772_v23, 16  ;;  %v1959_v44 = vshll.u32 %v10432_v43, 16  ;;  %v10474_v8 = vld [vmem:[#allocation2 + $0x54] sm:$0xf] }
 0x27d   : > { %v1372_v46 = vld [vmem:[#allocation2 + $0xb0] sm:$0x1]  ;;  %v3888_v17 = vsel %vm10104_vm13, %v3883_v15, %v3887_v30  ;;  %v3898_v48 = vsel %vm10104_vm13, %v3893_v61, %v3897_v33  ;;  %v3909_v37 = vshll.u32 %v3579_v12, 16  ;;  %v3913_v40 = vshrl.u32 %v3579_v12, 16  ;;  %v10486_v57 = vld [vmem:[#allocation2 + $0x58] sm:$0xf] }
 0x27e   : > { %v1373_v41 = vsel %vm10054_vm9, 0, %v1372_v46  ;;  %1263 = vst.msk [vmem:[#allocation2 + $0xb8] sm:$0xf] %vm1216_vm4, %v8396_v38  ;;  %v8397_v51 = vpack.c.bf16 %v975_v24, %v975_v24  ;;  %v8082_v56 = vcombine.low %v3888_v17, %v3898_v48  ;;  %v9240_v58 = vld [vmem:[#allocation2 + $0xa8] sm:$0xff]   ;;  %v10465_v30 = vcombine.low %v1890_v53, %v1900_v55  ;;  %v905_v49 = vpop.f32.mrb[96].mxu0 }
 0x27f   : > { %v3578_v59 = vld [vmem:[#allocation2 + $0xa8] sm:$0xf]  ;;  %1374 = vst [vmem:[#allocation2 + $0xb0] sm:$0x1] %v1373_v41  ;;  %v1319_v63 = vld [vmem:[#allocation2 + $0xb4] sm:$0x1]  ;;  %v1924_v50 = vsel %vm10104_vm13, %v10443_v26, %v10445_v27  ;;  %8743 = vmatprep.mubr.msk.bf16.mxu1 %vm1508_vm10, %v9240_v58  ;;  %v906_v2 = vadd.f32 %v10230_v10, %v905_v49 }
 0x280   : > { %v3900_v3 = vshrl.u32 %v3578_v59, 16  ;;  %v3903_v4 = vshll.u32 %v3578_v59, 16  ;;  %v1963_v7 = vshrl.u32 %v10432_v43, 16  ;;  %v1320_v54 = vsel %vm10041_vm7, 0, %v1319_v63  ;;  %1264 = vst.msk [vmem:[#allocation2 + $0xbc] sm:$0xf] %vm1216_vm4, %v8397_v51  ;;  %8875 = vmatprep.mubr.msk.bf16.mxu0 %vm1508_vm10, %v8082_v56 }
 0x281   : > { %v8703_v53 = vpop.f32.mrb[97].mxu0  ;;  %v10482_v45 = vrot.slane %v1942_v35, 4  ;;  %v10484_v9 = vrot.slane %v1945_v6, 5  ;;  %1321 = vst [vmem:[#allocation2 + $0xb4] sm:$0x1] %v1320_v54  ;;  %v3911_v20 = vrot.slane %v3909_v37, 5 }
 0x282   : > { %v908_v14 = vpop.f32.mrb[98].mxu0  ;;  %v3902_v43 = vrot.slane %v3900_v3, 4  ;;  %v3905_v19 = vrot.slane %v3903_v4, 5  ;;  %v3915_v42 = vrot.slane %v3913_v40, 4  ;;  %v976_v55 = vmax.f32 %v906_v2, 0.0 }
 0x283   : > { %v909_v23 = vadd.f32 %v10230_v10, %v908_v14  ;;  %v8704_v18 = vpop.f32.mrb[99].mxu0  ;;  %v1952_v15 = vrot.slane %v1950_v32, 4  ;;  %v1955_v25 = vrot.slane %v1953_v39, 5  ;;  %v10489_v27 = vrot.slane %v1959_v44, 5  ;;  %v10494_v33 = vld [vmem:[#allocation2 + $0x60] sm:$0xf] }
 0x284   : > { %v3906_v26 = vor.u32 %v3905_v19, %v3902_v43  ;;  %v1965_v22 = vrot.slane %v1963_v7, 4  ;;  %v1969_v31 = vshll.u32 %v10467_v60, 16  ;;  %v8398_v34 = vpack.c.bf16 %v976_v55, %v976_v55 }
 0x285   : > { %v977_v12 = vmax.f32 %v909_v23, 0.0  ;;  %v1974_v6 = vshrl.u32 %v10474_v8, 16  ;;  %v1977_v61 = vshll.u32 %v10474_v8, 16  ;;  %v3916_v35 = vor.u32 %v3915_v42, %v3911_v20  ;;  %v3582_v38 = vld [vmem:[#allocation2 + $0xb8] sm:$0xf] }
 0x286   : > { %v1914_v32 = vsel %vm10104_vm13, %v10441_v16, %v10373_v62  ;;  %v1983_v24 = vshll.u32 %v10486_v57, 16  ;;  %v1987_v39 = vshrl.u32 %v10486_v57, 16  ;;  %1265 = vst.msk [vmem:[#allocation2 + $0xc0] sm:$0xf] %vm1216_vm4, %v8398_v34  ;;  %v3580_v46 = vld [vmem:[#allocation2 + $0xb0] sm:$0x1]  ;;  %v1956_v49 = vor.u32 %v1955_v25, %v1952_v15 }
 0x287   : > { %v8399_v44 = vpack.c.bf16 %v977_v12, %v977_v12  ;;  %v3907_v17 = vrot.slane %v3906_v26, 4  ;;  %v3933_v48 = vshll.u32 %v3582_v38, 16  ;;  %v3937_v37 = vshrl.u32 %v3582_v38, 16  ;;  %v1375_v40 = vld [vmem:[#allocation2 + $0xbc] sm:$0x1]  ;;  %v913_v41 = vpop.f32.mrb[100].mxu0 }
 0x288   : > { %v3919_v51 = vshll.u32 %v3580_v46, 16  ;;  %v10503_v56 = vcombine.low %v1914_v32, %v1924_v50  ;;  %v1998_v58 = vshrl.u32 %v10494_v33, 16  ;;  %v2001_v62 = vshll.u32 %v10494_v33, 16  ;;  %v9241_v60 = vld [vmem:[#allocation2 + $0xb4] sm:$0xff]   ;;  %v8707_v54 = vpop.f32.mrb[101].mxu0 }
 0x289   : > { %v1376_v16 = vsel %vm10054_vm9, 0, %v1375_v40  ;;  %1266 = vst.msk [vmem:[#allocation2 + $0xc4] sm:$0xf] %vm1216_vm4, %v8399_v44  ;;  %v914_v59 = vadd.f32 %v10230_v10, %v913_v41  ;;  %v3581_v63 = vld [vmem:[#allocation2 + $0xb4] sm:$0xf]  ;;  %v1966_v3 = vor.u32 %v1965_v22, %v10489_v27  ;;  %v3917_v4 = vrot.slane %v3916_v35, 4  ;;  %8744 = vmatmul.mubr.msk.bf16.gmra.mrb[20].mxu1 %vm1508_vm10, %v9241_v60 }
 0x28a   : > { %1377 = vst [vmem:[#allocation2 + $0xbc] sm:$0x1] %v1376_v16  ;;  %v3921_v50 = vrot.slane %v3919_v51, 5  ;;  %v3924_v7 = vshrl.u32 %v3581_v63, 16  ;;  %v3927_v8 = vshll.u32 %v3581_v63, 16  ;;  %v3912_v53 = vsel %vm10104_vm13, %v3907_v17, %v3911_v20  ;;  %v916_v43 = vpop.f32.mrb[102].mxu0  ;;  %8749 = vmatprep.mubr.msk.bf16.mxu1 %vm1508_vm10, %v10436_v21 }
 0x28b   : > { %v978_v2 = vmax.f32 %v914_v59, 0.0  ;;  %v10515_v57 = vrot.slane %v3933_v48, 5  ;;  %v3939_v14 = vrot.slane %v3937_v37, 4  ;;  %v917_v23 = vadd.f32 %v10230_v10, %v916_v43  ;;  %v8708_v18 = vpop.f32.mrb[103].mxu0  ;;  %v1779_v22 = vld [vmem:[#allocation2 + $0x64] sm:$0xf] }
 0x28c   : > { %v3922_v19 = vsel %vm10104_vm13, %v3917_v4, %v3921_v50  ;;  %v3926_v42 = vrot.slane %v3924_v7, 4  ;;  %v3929_v55 = vrot.slane %v3927_v8, 5  ;;  %v10522_v26 = vrot.slane %v1956_v49, 4  ;;  %v10541_v17 = vld [vmem:[#allocation2 + $0x5c] sm:$0x1] }
 0x28d   : > { %v8400_v15 = vpack.c.bf16 %v978_v2, %v978_v2  ;;  %v8083_v25 = vcombine.low %v3912_v53, %v3922_v19  ;;  %v10524_v20 = vrot.slane %v1969_v31, 5  ;;  %v1322_v34 = vld [vmem:[#allocation2 + $0xc0] sm:$0x1]  ;;  %v10526_v33 = vrot.slane %v1966_v3, 4  ;;  %v10561_v3 = vld [vmem:[#allocation10 + $0xc] sm:$0xf] }
 0x28e   : > { %v3930_v12 = vor.u32 %v3929_v55, %v3926_v42  ;;  %v10528_v35 = vrot.slane %v1974_v6, 4  ;;  %v979_v38 = vmax.f32 %v917_v23, 0.0  ;;  %v1323_v21 = vsel %vm10041_vm7, 0, %v1322_v34  ;;  %v921_v40 = vpop.f32.mrb[104].mxu0  ;;  %v1781_v23 = vld [vmem:[#allocation2 + $0x6c] sm:$0xf] }
 0x28f   : > { %1267 = vst.msk [vmem:[#allocation2 + $0xc8] sm:$0xf] %vm1216_vm4, %v8400_v15  ;;  %8876 = vmatmul.mubr.msk.bf16.gmra.mrb[140].mxu0 %vm1508_vm10, %v8083_v25  ;;  %v10534_v32 = vrot.slane %v1977_v61, 5  ;;  %v10536_v44 = vrot.slane %v1983_v24, 5  ;;  %v10538_v31 = vrot.slane %v1987_v39, 4  ;;  %v3940_v46 = vor.u32 %v3939_v14, %v10515_v57  ;;  %v8711_v16 = vpop.f32.mrb[105].mxu0 }
 0x290   : > { %1324 = vst [vmem:[#allocation2 + $0xc0] sm:$0x1] %v1323_v21  ;;  %v10543_v6 = vrot.slane %v1998_v58, 4  ;;  %v10545_v48 = vrot.slane %v2001_v62, 5  ;;  %v8401_v37 = vpack.c.bf16 %v979_v38, %v979_v38  ;;  %v1938_v61 = vsel %vm10104_vm13, %v10448_v28, %v10430_v13  ;;  %v3585_v39 = vld [vmem:[#allocation2 + $0xc4] sm:$0xf] }
 0x291   : > { %v3583_v41 = vld [vmem:[#allocation2 + $0xbc] sm:$0x1]  ;;  %v1948_v24 = vsel %vm10104_vm13, %v10482_v45, %v10484_v9  ;;  %v2007_v51 = vshll.u32 %v1779_v22, 16  ;;  %v922_v58 = vadd.f32 %v10230_v10, %v921_v40  ;;  %v3931_v62 = vrot.slane %v3930_v12, 4  ;;  %v924_v49 = vpop.f32.mrb[106].mxu0  ;;  %8750 = vmatmul.mubr.msk.bf16.vlgmr.msra.gmra.mrb[24].mxu1 %vm1508_vm10, %v10293_v11 }
 0x292   : > { %v3943_v59 = vshll.u32 %v3583_v41, 16  ;;  %v1962_v60 = vsel %vm10104_vm13, %v10522_v26, %v10489_v27  ;;  %v2011_v63 = vshrl.u32 %v1779_v22, 16  ;;  %1268 = vst.msk [vmem:[#allocation2 + $0xcc] sm:$0xf] %vm1216_vm4, %v8401_v37  ;;  %v1980_v4 = vor.u32 %v10534_v32, %v10528_v35  ;;  %v8712_v54 = vpop.f32.mrb[107].mxu0  ;;  %8782 = vmatpush3.bf16.msra.mxu1 %v10425_v5  ;;  %8753 = vmatprep.mubr.msk.bf16.mxu1 %vm1508_vm10, %v10352_v36 }
 0x293   : > { %v1990_v50 = vor.u32 %v10538_v31, %v10536_v44  ;;  %v980_v7 = vmax.f32 %v922_v58, 0.0  ;;  %v925_v8 = vadd.f32 %v10230_v10, %v924_v49  ;;  %v3941_v2 = vrot.slane %v3940_v46, 4  ;;  %v1780_v11 = vld [vmem:[#allocation2 + $0x68] sm:$0x1]  ;;  %9059 = vmatprep.subr.msk.bf16.mxu1 %vm1557_vm3, %v10561_v3  ;;  %v1782_v22 = vld [vmem:[#allocation2 + $0x70] sm:$0xf] }
 0x294   : > { %v3945_v53 = vrot.slane %v3943_v59, 5  ;;  %v3957_v14 = vshll.u32 %v3585_v39, 16  ;;  %v3961_v43 = vshrl.u32 %v3585_v39, 16  ;;  %v1993_v19 = vshll.u32 %v10541_v17, 16  ;;  %v1784_v49 = vld [vmem:[#allocation2 + $0x78] sm:$0xf] }
 0x295   : > { %v2004_v42 = vor.u32 %v10545_v48, %v10543_v6  ;;  %v8402_v55 = vpack.c.bf16 %v980_v7, %v980_v7  ;;  %v981_v18 = vmax.f32 %v925_v8, 0.0  ;;  %v3936_v36 = vsel %vm10104_vm13, %v3931_v62, %v10515_v57  ;;  %v1787_v9 = vld [vmem:[#allocation2 + $0x84] sm:$0xf] }
 0x296   : > { %v1378_v10 = vld [vmem:[#allocation2 + $0xc8] sm:$0x1]  ;;  %v3946_v5 = vsel %vm10104_vm13, %v3941_v2, %v3945_v53  ;;  %v10583_v15 = vrot.slane %v2007_v51, 5  ;;  %v2013_v25 = vrot.slane %v2011_v63, 4  ;;  %v2017_v38 = vshll.u32 %v1780_v11, 16 }
 0x297   : > { %v1379_v34 = vsel %vm10054_vm9, 0, %v1378_v10  ;;  %v8084_v12 = vcombine.low %v3936_v36, %v3946_v5  ;;  %v3584_v35 = vld [vmem:[#allocation2 + $0xc0] sm:$0xf]  ;;  %1269 = vst.msk [vmem:[#allocation2 + $0xd0] sm:$0xf] %vm1216_vm4, %v8402_v55  ;;  %v8403_v21 = vpack.c.bf16 %v981_v18, %v981_v18  ;;  %v10588_v57 = vrot.slane %v3957_v14, 5 }
 0x298   : > { %1380 = vst [vmem:[#allocation2 + $0xc8] sm:$0x1] %v1379_v34  ;;  %v3948_v32 = vshrl.u32 %v3584_v35, 16  ;;  %v3951_v31 = vshll.u32 %v3584_v35, 16  ;;  %v3963_v46 = vrot.slane %v3961_v43, 4  ;;  %v2022_v6 = vshrl.u32 %v1781_v23, 16 }
 0x299   : > { %1393 = vst.msk [vmem:[#allocation2 + $0xd0] sm:$0xf] %vm1216_vm4, %v9581_v47  ;;  %8879 = vmatprep.mubr.msk.bf16.mxu0 %vm1508_vm10, %v8084_v12  ;;  %v1325_v17 = vld [vmem:[#allocation2 + $0xcc] sm:$0x1]  ;;  %v2025_v48 = vshll.u32 %v1781_v23, 16  ;;  %v2031_v37 = vshll.u32 %v1782_v22, 16  ;;  %v2014_v51 = vor.u32 %v2013_v25, %v10583_v15  ;;  %8754 = vmatmul.mubr.msk.bf16.gmra.mrb[28].mxu1 %vm1508_vm10, %v10465_v30  ;;  %v1972_v16 = vsel %vm10104_vm13, %v10526_v33, %v10524_v20 }
 0x29a   : > { %v2035_v40 = vshrl.u32 %v1782_v22, 16  ;;  %1270 = vst.msk [vmem:[#allocation2 + $0xd4] sm:$0xf] %vm1216_vm4, %v8403_v21  ;;  %v3950_v41 = vrot.slane %v3948_v32, 4  ;;  %v3953_v39 = vrot.slane %v3951_v31, 5  ;;  %v1326_v58 = vsel %vm10041_vm7, 0, %v1325_v17  ;;  %8757 = vmatprep.mubr.msk.bf16.mxu1 %vm1508_vm10, %v10503_v56 }
 0x29b   : > { %v10603_v62 = vrot.slane %v1980_v4, 4  ;;  %v10605_v59 = vrot.slane %v1990_v50, 4  ;;  %v10607_v63 = vrot.slane %v1993_v19, 5  ;;  %1327 = vst [vmem:[#allocation2 + $0xcc] sm:$0x1] %v1326_v58  ;;  %v3964_v7 = vor.u32 %v3963_v46, %v10588_v57  ;;  %v9242_v17 = vld [vmem:[#allocation2 + $0x18] sm:$0xff]  }
 0x29c   : > { %v3954_v52 = vor.u32 %v3953_v39, %v3950_v41  ;;  %v10612_v30 = vrot.slane %v2004_v42, 4  ;;  %v10614_v8 = vrot.slane %v2017_v38, 5  ;;  %1392 = vst.msk [vmem:[#allocation2 + $0xcc] sm:$0xf] %vm1216_vm4, %v9581_v47  ;;  %v1785_v20 = vld [vmem:[#allocation2 + $0x7c] sm:$0xf]  ;;  %v7963_v11 = vcombine.low %v1938_v61, %v1948_v24 }
 0x29d   : > { %v2024_v33 = vrot.slane %v2022_v6, 4  ;;  %v2027_v4 = vrot.slane %v2025_v48, 5  ;;  %v10618_v50 = vrot.slane %v2031_v37, 5  ;;  %v2037_v54 = vrot.slane %v2035_v40, 4  ;;  %v1783_v14 = vld [vmem:[#allocation2 + $0x74] sm:$0x1] }
 0x29e   : > { %v3955_v2 = vrot.slane %v3954_v52, 4  ;;  %v2015_v53 = vrot.slane %v2014_v51, 4  ;;  %v2046_v56 = vshrl.u32 %v1784_v49, 16  ;;  %v2049_v43 = vshll.u32 %v1784_v49, 16  ;;  %v1788_v36 = vld [vmem:[#allocation2 + $0x88] sm:$0xf] }
 0x29f   : > { %v7964_v19 = vcombine.low %v1962_v60, %v1972_v16  ;;  %v3586_v42 = vld [vmem:[#allocation2 + $0xc8] sm:$0x1]  ;;  %v2055_v55 = vshll.u32 %v1785_v20, 16  ;;  %v2059_v23 = vshrl.u32 %v1785_v20, 16  ;;  %v3965_v18 = vrot.slane %v3964_v7, 4 }
 0x2a0   : > { %v3967_v10 = vshll.u32 %v3586_v42, 16  ;;  %v1986_v45 = vsel %vm10104_vm13, %v10603_v62, %v10536_v44  ;;  %v1996_v13 = vsel %vm10104_vm13, %v10605_v59, %v10607_v63  ;;  %v2028_v61 = vor.u32 %v2027_v4, %v2024_v33  ;;  %v1786_v60 = vld [vmem:[#allocation2 + $0x80] sm:$0x1]  ;;  %v1790_v34 = vld [vmem:[#allocation2 + $0x90] sm:$0xf] }
 0x2a1   : > { %v1381_v28 = vld [vmem:[#allocation2 + $0xd4] sm:$0x1]  ;;  %v2038_v27 = vor.u32 %v2037_v54, %v10618_v50  ;;  %v2041_v26 = vshll.u32 %v1783_v14, 16  ;;  %v3960_v44 = vsel %vm10104_vm13, %v3955_v2, %v10588_v57  ;;  %v2048_v25 = vrot.slane %v2046_v56, 4  ;;  %8758 = vmatmul.mubr.msk.bf16.gmra.mrb[32].mxu1 %vm1508_vm10, %v7963_v11  ;;  %v1789_v39 = vld [vmem:[#allocation2 + $0x8c] sm:$0x1] }
 0x2a2   : > { %v1382_v24 = vsel %vm10054_vm9, 0, %v1381_v28  ;;  %v3969_v5 = vrot.slane %v3967_v10, 5  ;;  %v2051_v22 = vrot.slane %v2049_v43, 5  ;;  %v10652_v12 = vrot.slane %v2055_v55, 5  ;;  %8761 = vmatprep.mubr.msk.bf16.mxu1 %vm1508_vm10, %v7964_v19  ;;  %v1791_v37 = vld [vmem:[#allocation2 + $0x94] sm:$0xf] }
 0x2a3   : > { %1383 = vst [vmem:[#allocation2 + $0xd4] sm:$0x1] %v1382_v24  ;;  %v2061_v1 = vrot.slane %v2059_v23, 4  ;;  %v2070_v35 = vshrl.u32 %v1787_v9, 16  ;;  %v2073_v38 = vshll.u32 %v1787_v9, 16  ;;  %v2010_v32 = vsel %vm10104_vm13, %v10612_v30, %v10583_v15  ;;  %v9243_v10 = vld [vmem:[#allocation2 + $0x24] sm:$0xff]  }
 0x2a4   : > { %1394 = vst.msk [vmem:[#allocation2 + $0xd4] sm:$0xf] %vm1216_vm4, %v9581_v47  ;;  %v3970_v21 = vsel %vm10104_vm13, %v3965_v18, %v3969_v5  ;;  %v2079_v31 = vshll.u32 %v1788_v36, 16  ;;  %v2083_v57 = vshrl.u32 %v1788_v36, 16  ;;  %v2020_v47 = vsel %vm10104_vm13, %v2015_v53, %v10614_v8  ;;  %v1792_v43 = vld [vmem:[#allocation2 + $0x98] sm:$0x1] }
 0x2a5   : > { %v8085_v46 = vcombine.low %v3960_v44, %v3970_v21  ;;  %v2029_v6 = vrot.slane %v2028_v61, 4  ;;  %v2039_v48 = vrot.slane %v2038_v27, 4  ;;  %v2043_v40 = vrot.slane %v2041_v26, 5  ;;  %v1793_v23 = vld [vmem:[#allocation2 + $0x9c] sm:$0xf] }
 0x2a6   : > { %v2065_v41 = vshll.u32 %v1786_v60, 16  ;;  %v2094_v51 = vshrl.u32 %v1790_v34, 16  ;;  %v2097_v58 = vshll.u32 %v1790_v34, 16  ;;  %v2052_v16 = vor.u32 %v2051_v22, %v2048_v25  ;;  %v1794_v18 = vld [vmem:[#allocation2 + $0xa0] sm:$0xf] }
 0x2a7   : > { %8880 = vmatmul.mubr.msk.bf16.gmra.mrb[144].mxu0 %vm1508_vm10, %v8085_v46  ;;  %v2062_v15 = vor.u32 %v2061_v1, %v10652_v12  ;;  %v2072_v62 = vrot.slane %v2070_v35, 4  ;;  %v2075_v59 = vrot.slane %v2073_v38, 5  ;;  %v10667_v63 = vrot.slane %v2079_v31, 5  ;;  %v1796_v27 = vld [vmem:[#allocation2 + $0xa8] sm:$0xf] }
 0x2a8   : > { %8919 = vmatprep.mubr.msk.bf16.mxu0 %vm1508_vm10, %v9242_v17  ;;  %v2085_v49 = vrot.slane %v2083_v57, 4  ;;  %v2103_v52 = vshll.u32 %v1791_v37, 16  ;;  %v2107_v7 = vshrl.u32 %v1791_v37, 16  ;;  %v7965_v30 = vcombine.low %v1986_v45, %v1996_v13  ;;  %v9244_v45 = vld [vmem:[#allocation2 + $0x30] sm:$0xff]   ;;  %v1797_v26 = vld [vmem:[#allocation2 + $0xac] sm:$0xf] }
 0x2a9   : > { %v7966_v8 = vcombine.low %v2010_v32, %v2020_v47  ;;  %v2089_v20 = vshll.u32 %v1789_v39, 16  ;;  %v2044_v33 = vsel %vm10104_vm13, %v2039_v48, %v2043_v40  ;;  %v2067_v4 = vrot.slane %v2065_v41, 5  ;;  %v1795_v35 = vld [vmem:[#allocation2 + $0xa4] sm:$0x1]  ;;  %v9245_v47 = vld [vmem:[#allocation2 + $0x3c] sm:$0xff]  }
 0x2aa   : > { %v2096_v54 = vrot.slane %v2094_v51, 4  ;;  %v2099_v2 = vrot.slane %v2097_v58, 5  ;;  %8762 = vmatmul.mubr.msk.bf16.gmra.mrb[36].mxu1 %vm1508_vm10, %v7965_v30  ;;  %v2034_v53 = vsel %vm10104_vm13, %v2029_v6, %v10618_v50  ;;  %v2053_v14 = vrot.slane %v2052_v16, 4  ;;  %v1798_v51 = vld [vmem:[#allocation2 + $0xb0] sm:$0x1] }
 0x2ab   : > { %v2063_v56 = vrot.slane %v2062_v15, 4  ;;  %8765 = vmatprep.mubr.msk.bf16.mxu1 %vm1508_vm10, %v7966_v8  ;;  %v2076_v11 = vor.u32 %v2075_v59, %v2072_v62  ;;  %v2086_v19 = vor.u32 %v2085_v49, %v10667_v63  ;;  %v10677_v42 = vrot.slane %v2103_v52, 5  ;;  %v1799_v58 = vld [vmem:[#allocation2 + $0xb4] sm:$0xf]  ;;  %v1800_v49 = vld [vmem:[#allocation2 + $0xb8] sm:$0xf] }
 0x2ac   : > { %v2109_v55 = vrot.slane %v2107_v7, 4  ;;  %v7967_v13 = vcombine.low %v2034_v53, %v2044_v33  ;;  %v2091_v28 = vrot.slane %v2089_v20, 5  ;;  %v2100_v9 = vor.u32 %v2099_v2, %v2096_v54  ;;  %v9246_v7 = vld [vmem:[#allocation2 + $0x48] sm:$0xff]  }
 0x2ad   : > { %v2068_v50 = vsel %vm10104_vm13, %v2063_v56, %v2067_v4  ;;  %v2113_v61 = vshll.u32 %v1792_v43, 16  ;;  %v6415_v24 = vsel %vm1557_vm3, %v10377_v0, 0  ;;  %v2118_v60 = vshrl.u32 %v1793_v23, 16 }
 0x2ae   : > { %v2121_v36 = vshll.u32 %v1793_v23, 16  ;;  %v2127_v44 = vshll.u32 %v1794_v18, 16  ;;  %v2131_v5 = vshrl.u32 %v1794_v18, 16  ;;  %v2058_v25 = vsel %vm10104_vm13, %v2053_v14, %v10652_v12 }
 0x2af   : > { %8920 = vmatmul.mubr.msk.bf16.vlgmr.msra.gmra.mrb[148].mxu0 %vm1508_vm10, %v9243_v10  ;;  %v2077_v22 = vrot.slane %v2076_v11, 4  ;;  %v2087_v34 = vrot.slane %v2086_v19, 4  ;;  %v2110_v1 = vor.u32 %v2109_v55, %v10677_v42  ;;  %v2142_v38 = vshrl.u32 %v1796_v27, 16  ;;  %v2548_v10 = vld [vmem:[#allocation2 + $0x4] sm:$0xf] }
 0x2b0   : > { %8923 = vmatprep.mubr.msk.bf16.mxu0 %vm1508_vm10, %v9244_v45  ;;  %8986 = vmatpush3.bf16.msra.mxu0 %v6415_v24  ;;  %v2145_v0 = vshll.u32 %v1796_v27, 16  ;;  %v2151_v21 = vshll.u32 %v1797_v26, 16  ;;  %v2155_v32 = vshrl.u32 %v1797_v26, 16  ;;  %v7968_v31 = vcombine.low %v2058_v25, %v2068_v50  ;;  %v1801_v50 = vld [vmem:[#allocation2 + $0xbc] sm:$0x1] }
 0x2b1   : > { %v2092_v57 = vsel %vm10104_vm13, %v2087_v34, %v2091_v28  ;;  %v2101_v46 = vrot.slane %v2100_v9, 4  ;;  %v2115_v17 = vrot.slane %v2113_v61, 5  ;;  %v2120_v12 = vrot.slane %v2118_v60, 4  ;;  %v2549_v34 = vld [vmem:[#allocation2 + $0x8] sm:$0x1] }
 0x2b2   : > { %8766 = vmatmul.mubr.msk.bf16.gmra.mrb[40].mxu1 %vm1508_vm10, %v7967_v13  ;;  %v2123_v6 = vrot.slane %v2121_v36, 5  ;;  %v10692_v48 = vrot.slane %v2127_v44, 5  ;;  %v2133_v37 = vrot.slane %v2131_v5, 4  ;;  %v2082_v40 = vsel %vm10104_vm13, %v2077_v22, %v10667_v63  ;;  %v9248_v5 = vld [vmem:[#allocation2 + $0x60] sm:$0xff]  }
 0x2b3   : > { %8769 = vmatprep.mubr.msk.bf16.mxu1 %vm1508_vm10, %v7968_v31  ;;  %v2111_v41 = vrot.slane %v2110_v1, 4  ;;  %v2137_v39 = vshll.u32 %v1795_v35, 16  ;;  %v2144_v16 = vrot.slane %v2142_v38, 4  ;;  %v2147_v15 = vrot.slane %v2145_v0, 5  ;;  %v8717_v52 = vpop.f32.mrb[108].mxu0 }
 0x2b4   : > { %v2153_v62 = vrot.slane %v2151_v21, 5  ;;  %v2157_v59 = vrot.slane %v2155_v32, 4  ;;  %v7969_v30 = vcombine.low %v2082_v40, %v2092_v57  ;;  %1724 = vst.msk [vmem:[#allocation3 + $0x10] sm:$0xff] %vm1508_vm10, %v8717_v52  ;;  %v1595_v8 = vpop.f32.mrb[109].mxu0  ;;  %v2124_v20 = vor.u32 %v2123_v6, %v2120_v12  ;;  %v2547_v22 = vld [vmem:[#allocation2] sm:$0xe] }
 0x2b5   : > { %v2116_v63 = vsel %vm10104_vm13, %v2111_v41, %v2115_v17  ;;  %v2134_v33 = vor.u32 %v2133_v37, %v10692_v48  ;;  %v2161_v4 = vshll.u32 %v1798_v51, 16  ;;  %1722 = vst.msk [vmem:[#allocation3] sm:$0xff] %vm1508_vm10, %v1595_v8  ;;  %v8718_v54 = vpop.f32.mrb[110].mxu0  ;;  %v2166_v2 = vshrl.u32 %v1799_v58, 16  ;;  %v2551_v12 = vld [vmem:[#allocation2 + $0x10] sm:$0xf] }
 0x2b6   : > { %v2169_v53 = vshll.u32 %v1799_v58, 16  ;;  %v2175_v14 = vshll.u32 %v1800_v49, 16  ;;  %v2179_v56 = vshrl.u32 %v1800_v49, 16  ;;  %1725 = vst.msk [vmem:[#allocation3 + $0x18] sm:$0xff] %vm1508_vm10, %v8718_v54  ;;  %v1598_v43 = vpop.f32.mrb[111].mxu0  ;;  %v2106_v11 = vsel %vm10104_vm13, %v2101_v46, %v10677_v42  ;;  %v9247_v42 = vld [vmem:[#allocation2 + $0x54] sm:$0xff]  }
 0x2b7   : > { %8924 = vmatmul.mubr.msk.bf16.gmra.mrb[152].mxu0 %vm1508_vm10, %v9245_v47  ;;  %v2139_v19 = vrot.slane %v2137_v39, 5  ;;  %v2148_v55 = vor.u32 %v2147_v15, %v2144_v16  ;;  %v2158_v23 = vor.u32 %v2157_v59, %v2153_v62  ;;  %1723 = vst.msk [vmem:[#allocation3 + $0x8] sm:$0xff] %vm1508_vm10, %v1598_v43  ;;  %v7970_v18 = vcombine.low %v2106_v11, %v2116_v63  ;;  %v9249_v40 = vld [vmem:[#allocation2 + $0x6c] sm:$0xff]   ;;  %v2554_v51 = vld [vmem:[#allocation2 + $0x1c] sm:$0xf]  ;;  %v9251_v54 = vld [vmem:[#allocation2 + $0x84] sm:$0xff]  }
 0x2b8   : > { %8927 = vmatprep.mubr.msk.bf16.mxu0 %vm1508_vm10, %v9246_v7  ;;  %v2125_v45 = vrot.slane %v2124_v20, 4  ;;  %v2135_v13 = vrot.slane %v2134_v33, 4  ;;  %v2163_v28 = vrot.slane %v2161_v4, 5  ;;  %v2168_v9 = vrot.slane %v2166_v2, 4  ;;  %v9250_v58 = vld [vmem:[#allocation2 + $0x78] sm:$0xff]  }
 0x2b9   : > { %v2171_v61 = vrot.slane %v2169_v53, 5  ;;  %v2177_v27 = vrot.slane %v2175_v14, 5  ;;  %v2181_v26 = vrot.slane %v2179_v56, 4  ;;  %v2149_v60 = vrot.slane %v2148_v55, 4  ;;  %v2552_v15 = vld [vmem:[#allocation2 + $0x14] sm:$0x1] }
 0x2ba   : > { %8770 = vmatmul.mubr.msk.bf16.gmra.mrb[44].mxu1 %vm1508_vm10, %v7969_v30  ;;  %v2140_v24 = vsel %vm10104_vm13, %v2135_v13, %v2139_v19  ;;  %v2159_v36 = vrot.slane %v2158_v23, 4  ;;  %v2648_v44 = vrot.slane %v2548_v10, 5  ;;  %v2185_v25 = vshll.u32 %v1801_v50, 16  ;;  %v2555_v52 = vld [vmem:[#allocation2 + $0x20] sm:$0x1]  ;;  %v9252_v56 = vld [vmem:[#allocation2 + $0x90] sm:$0xff]  }
 0x2bb   : > { %8773 = vmatprep.mubr.msk.bf16.mxu1 %vm1508_vm10, %v7970_v18  ;;  %v2130_v1 = vsel %vm10104_vm13, %v2125_v45, %v10692_v48  ;;  %v2172_v0 = vor.u32 %v2171_v61, %v2168_v9  ;;  %v2182_v21 = vor.u32 %v2181_v26, %v2177_v27  ;;  %v2154_v32 = vsel %vm10104_vm13, %v2149_v60, %v2153_v62  ;;  %v2550_v30 = vld [vmem:[#allocation2 + $0xc] sm:$0xe]  ;;  %v2553_v4 = vld [vmem:[#allocation2 + $0x18] sm:$0xe]  ;;  %v2557_v53 = vld [vmem:[#allocation2 + $0x28] sm:$0xf] }
 0x2bc   : > { %v2164_v35 = vsel %vm10104_vm13, %v2159_v36, %v2163_v28  ;;  %v7971_v38 = vcombine.low %v2130_v1, %v2140_v24  ;;  %v7990_v31 = vrot.slane %v2547_v22, 9  ;;  %v2650_v57 = vrot.slane %v2648_v44, 4  ;;  %v2560_v19 = vld [vmem:[#allocation2 + $0x34] sm:$0xf]  ;;  %v2558_v10 = vld [vmem:[#allocation2 + $0x2c] sm:$0x1] }
 0x2bd   : > { %v2651_v46 = vrot.slane %v2549_v34, 5  ;;  %v7972_v17 = vcombine.low %v2154_v32, %v2164_v35  ;;  %v2187_v47 = vrot.slane %v2185_v25, 5  ;;  %v2173_v6 = vrot.slane %v2172_v0, 4  ;;  %v2561_v50 = vld [vmem:[#allocation2 + $0x38] sm:$0x1] }
 0x2be   : > { %v2183_v48 = vrot.slane %v2182_v21, 4  ;;  %v2649_v41 = vsel %vm10726_vm0, %v7990_v31, %v2648_v44  ;;  %v2655_v49 = vrot.slane %v2551_v12, 5  ;;  %v2662_v8 = vrot.slane %v2554_v51, 5  ;;  %v10758_v36 = vld [vmem:[#allocation10 + $0x14] sm:$0xf] }
 0x2bf   : > { %8928 = vmatmul.mubr.msk.bf16.gmra.mrb[156].mxu0 %vm1508_vm10, %v9247_v42  ;;  %v2652_v39 = vsel %vm10726_vm0, %v2650_v57, %v2651_v46  ;;  %v2178_v62 = vsel %vm10104_vm13, %v2173_v6, %v2177_v27  ;;  %v2658_v63 = vrot.slane %v2552_v15, 5  ;;  %v2665_v20 = vrot.slane %v2555_v52, 5  ;;  %v2556_v44 = vld [vmem:[#allocation2 + $0x24] sm:$0xe]  ;;  %v2559_v22 = vld [vmem:[#allocation2 + $0x30] sm:$0xe] }
 0x2c0   : > { %8931 = vmatprep.mubr.msk.bf16.mxu0 %vm1508_vm10, %v9248_v5  ;;  %v2188_v16 = vsel %vm10104_vm13, %v2183_v48, %v2187_v47  ;;  %v8006_v59 = vcombine.low %v2649_v41, %v2652_v39  ;;  %v2657_v33 = vrot.slane %v2655_v49, 4  ;;  %v2664_v2 = vrot.slane %v2662_v8, 4  ;;  %v2563_v1 = vld [vmem:[#allocation2 + $0x40] sm:$0xf]  ;;  %v2566_v32 = vld [vmem:[#allocation2 + $0x4c] sm:$0xf] }
 0x2c1   : > { %v7973_v7 = vcombine.low %v2178_v62, %v2188_v16  ;;  %v7991_v43 = vrot.slane %v2550_v30, 9  ;;  %v7992_v23 = vrot.slane %v2553_v4, 9  ;;  %v2669_v28 = vrot.slane %v2557_v53, 5  ;;  %v2567_v48 = vld [vmem:[#allocation2 + $0x50] sm:$0x1] }
 0x2c2   : > { %8774 = vmatmul.mubr.msk.bf16.gmra.mrb[48].mxu1 %vm1508_vm10, %v7971_v38  ;;  %v2659_v11 = vsel %vm10726_vm0, %v2657_v33, %v2658_v63  ;;  %v2666_v18 = vsel %vm10726_vm0, %v2664_v2, %v2665_v20  ;;  %v3280_v27 = vsel %vm1557_vm3, %v10561_v3, 0  ;;  %v2676_v42 = vrot.slane %v2560_v19, 5  ;;  %v9253_v3 = vld [vmem:[#allocation2 + $0x9c] sm:$0xff]   ;;  %v9254_v38 = vld [vmem:[#allocation2 + $0xa8] sm:$0xff]   ;;  %v2569_v33 = vld [vmem:[#allocation2 + $0x58] sm:$0xf] }
 0x2c3   : > { %8777 = vmatprep.mubr.msk.bf16.mxu1 %vm1508_vm10, %v7972_v17  ;;  %v2656_v13 = vsel %vm10726_vm0, %v7991_v43, %v2655_v49  ;;  %v2663_v26 = vsel %vm10726_vm0, %v7992_v23, %v2662_v8  ;;  %v2672_v60 = vrot.slane %v2558_v10, 5  ;;  %v2679_v5 = vrot.slane %v2561_v50, 5  ;;  %v2564_v17 = vld [vmem:[#allocation2 + $0x44] sm:$0x1]  ;;  %v6109_v15 = vld [vmem:[#allocation2 + $0x1c] sm:$0xf] }
 0x2c4   : > { %v8007_v61 = vcombine.low %v2656_v13, %v2659_v11  ;;  %v8008_v24 = vcombine.low %v2663_v26, %v2666_v18  ;;  %v2671_v25 = vrot.slane %v2669_v28, 4  ;;  %v2678_v34 = vrot.slane %v2676_v42, 4  ;;  %v2562_v62 = vld [vmem:[#allocation2 + $0x3c] sm:$0xe]  ;;  %v2565_v52 = vld [vmem:[#allocation2 + $0x48] sm:$0xe] }
 0x2c5   : > { %v7993_v0 = vrot.slane %v2556_v44, 9  ;;  %v7994_v57 = vrot.slane %v2559_v22, 9  ;;  %v2683_v6 = vrot.slane %v2563_v1, 5  ;;  %v2690_v51 = vrot.slane %v2566_v32, 5  ;;  %v6110_v30 = vld [vmem:[#allocation2 + $0x20] sm:$0x1] }
 0x2c6   : > { %v2673_v21 = vsel %vm10726_vm0, %v2671_v25, %v2672_v60  ;;  %v2680_v46 = vsel %vm10726_vm0, %v2678_v34, %v2679_v5  ;;  %v2686_v16 = vrot.slane %v2564_v17, 5  ;;  %v9255_v8 = vld [vmem:[#allocation2 + $0xb4] sm:$0xff]   ;;  %v6206_v20 = vrot.slane %v6109_v15, 5  ;;  %v2572_v2 = vld [vmem:[#allocation2 + $0x64] sm:$0xf]  ;;  %v9257_v26 = vld [vmem:[#allocation2 + $0xcc] sm:$0xff]  }
 0x2c7   : > { %8932 = vmatmul.mubr.msk.bf16.gmra.mrb[160].mxu0 %vm1508_vm10, %v9249_v40  ;;  %v2670_v12 = vsel %vm10726_vm0, %v7993_v0, %v2669_v28  ;;  %v2677_v39 = vsel %vm10726_vm0, %v7994_v57, %v2676_v42  ;;  %v2685_v49 = vrot.slane %v2683_v6, 4  ;;  %v2692_v63 = vrot.slane %v2690_v51, 4  ;;  %v2570_v43 = vld [vmem:[#allocation2 + $0x5c] sm:$0x1]  ;;  %v6108_v19 = vld [vmem:[#allocation2 + $0x18] sm:$0xe] }
 0x2c8   : > { %8935 = vmatprep.mubr.msk.bf16.mxu0 %vm1508_vm10, %v9250_v58  ;;  %v8009_v41 = vcombine.low %v2670_v12, %v2673_v21  ;;  %v8010_v58 = vcombine.low %v2677_v39, %v2680_v46  ;;  %v7995_v4 = vrot.slane %v2562_v62, 9  ;;  %v7996_v53 = vrot.slane %v2565_v52, 9  ;;  %v2573_v23 = vld [vmem:[#allocation2 + $0x68] sm:$0x1]  ;;  %v6113_v44 = vld [vmem:[#allocation2 + $0x2c] sm:$0x1] }
 0x2c9   : > { %v2704_v13 = vrot.slane %v2572_v2, 5  ;;  %v10794_v28 = vld [vmem:[#allocation2 + $0x28] sm:$0xf]  ;;  %v8214_v42 = vrot.slane %v6108_v19, 9  ;;  %v2707_v60 = vrot.slane %v2573_v23, 5  ;;  %v6216_v12 = vrot.slane %v6113_v44, 5 }
 0x2ca   : > { %8778 = vmatmul.mubr.msk.bf16.gmra.mrb[52].mxu1 %vm1508_vm10, %v7973_v7  ;;  %v9256_v7 = vld [vmem:[#allocation2 + $0xc0] sm:$0xff]   ;;  %v2684_v11 = vsel %vm10726_vm0, %v7995_v4, %v2683_v6  ;;  %v2691_v10 = vsel %vm10726_vm0, %v7996_v53, %v2690_v51  ;;  %v6213_v22 = vrot.slane %v10794_v28, 5  ;;  %v10806_v21 = vld [vmem:[#allocation2 + $0x70] sm:$0xf] }
 0x2cb   : > { %8783 = vmatprep.mubr.msk.bf16.mxu1 %vm1508_vm10, %v8006_v59  ;;  %v8721_v14 = vpop.f32.mrb[112].mxu0  ;;  %v2693_v59 = vrot.slane %v2567_v48, 5  ;;  %v2571_v25 = vld [vmem:[#allocation2 + $0x60] sm:$0xe]  ;;  %v6207_v34 = vsel %vm10726_vm0, %v8214_v42, %v6206_v20  ;;  %v2706_v1 = vrot.slane %v2704_v13, 4 }
 0x2cc   : > { %1728 = vst.msk [vmem:[#allocation3 + $0x30] sm:$0xff] %vm1508_vm10, %v8721_v14  ;;  %v1611_v55 = vpop.f32.mrb[113].mxu0  ;;  %v6114_v6 = vld [vmem:[#allocation2 + $0x30] sm:$0xe]  ;;  %v10810_v48 = vld [vmem:[#allocation2 + $0x7c] sm:$0xf] }
 0x2cd   : > { %1726 = vst.msk [vmem:[#allocation3 + $0x20] sm:$0xff] %vm1508_vm10, %v1611_v55  ;;  %v8722_v45 = vpop.f32.mrb[114].mxu0  ;;  %v2694_v14 = vsel %vm10726_vm0, %v2692_v63, %v2693_v59  ;;  %v2697_v55 = vrot.slane %v2569_v33, 5  ;;  %v7998_v39 = vrot.slane %v2571_v25, 9  ;;  %v2708_v51 = vsel %vm10726_vm0, %v2706_v1, %v2707_v60  ;;  %v2579_v52 = vld [vmem:[#allocation2 + $0x80] sm:$0x1] }
 0x2ce   : > { %1729 = vst.msk [vmem:[#allocation3 + $0x38] sm:$0xff] %vm1508_vm10, %v8722_v45  ;;  %v1614_v9 = vpop.f32.mrb[115].mxu0  ;;  %v6208_v45 = vrot.slane %v6206_v20, 4  ;;  %v8012_v50 = vcombine.low %v2691_v10, %v2694_v14  ;;  %v6215_v59 = vrot.slane %v6213_v22, 4  ;;  %v2574_v20 = vld [vmem:[#allocation2 + $0x6c] sm:$0xe] }
 0x2cf   : > { %8936 = vmatmul.mubr.msk.bf16.gmra.mrb[164].mxu0 %vm1508_vm10, %v9251_v54  ;;  %1727 = vst.msk [vmem:[#allocation3 + $0x28] sm:$0xff] %vm1508_vm10, %v1614_v9  ;;  %v2687_v54 = vsel %vm10726_vm0, %v2685_v49, %v2686_v16  ;;  %v2568_v9 = vld [vmem:[#allocation2 + $0x54] sm:$0xe]  ;;  %v2699_v5 = vrot.slane %v2697_v55, 4  ;;  %v2576_v16 = vld [vmem:[#allocation2 + $0x74] sm:$0x1] }
 0x2d0   : > { %8939 = vmatprep.mubr.msk.bf16.mxu0 %vm1508_vm10, %v9252_v56  ;;  %v6209_v56 = vrot.slane %v6110_v30, 5  ;;  %v8011_v18 = vcombine.low %v2684_v11, %v2687_v54  ;;  %v7997_v46 = vrot.slane %v2568_v9, 9  ;;  %v2711_v49 = vrot.slane %v10806_v21, 5  ;;  %v10825_v4 = vld [vmem:[#allocation2 + $0x40] sm:$0xf] }
 0x2d1   : > { %v2718_v33 = vrot.slane %v10810_v48, 5  ;;  %v6217_v14 = vsel %vm10726_vm0, %v6215_v59, %v6216_v12  ;;  %v6121_v11 = vld [vmem:[#allocation2 + $0x4c] sm:$0xf]  ;;  %v6119_v10 = vld [vmem:[#allocation2 + $0x44] sm:$0x1] }
 0x2d2   : > { %8784 = vmatmul.mubr.msk.bf16.vlgmr.msra.gmra.mrb[56].mxu1 %vm1508_vm10, %v8007_v61  ;;  %v2700_v61 = vrot.slane %v2570_v43, 5  ;;  %v2698_v62 = vsel %vm10726_vm0, %v7997_v46, %v2697_v55  ;;  %v2577_v43 = vld [vmem:[#allocation2 + $0x78] sm:$0xe]  ;;  %v8216_v55 = vrot.slane %v6114_v6, 9  ;;  %v2713_v28 = vrot.slane %v2711_v49, 4 }
 0x2d3   : > { %8816 = vmatpush3.bf16.msra.mxu1 %v3280_v27  ;;  %8787 = vmatprep.mubr.msk.bf16.mxu1 %vm1508_vm10, %v8008_v24  ;;  %v10764_v35 = vpop.f32.mrb[116].mxu0  ;;  %v10796_v27 = vld [vmem:[#allocation2 + $0x34] sm:$0xf]  ;;  %v6210_v24 = vsel %vm10726_vm0, %v6208_v45, %v6209_v56  ;;  %v2714_v56 = vrot.slane %v2576_v16, 5  ;;  %v6122_v9 = vld [vmem:[#allocation2 + $0x50] sm:$0x1] }
 0x2d4   : > { %9061 = vmatprep.subr.msk.bf16.mxu1 %vm1557_vm3, %v10758_v36  ;;  %12484 = vst [vmem:[#allocation22_spill] sm:$0xff] %v10764_v35  ;;  %v10769_v31 = vpop.f32.mrb[117].mxu0  ;;  %v6220_v0 = vrot.slane %v10796_v27, 5  ;;  %v8230_v57 = vcombine.low %v6207_v34, %v6210_v24  ;;  %v2701_v17 = vsel %vm10726_vm0, %v2699_v5, %v2700_v61  ;;  %v2720_v42 = vrot.slane %v2718_v33, 4  ;;  %v2581_v60 = vld [vmem:[#allocation2 + $0x88] sm:$0xf] }
 0x2d5   : > { %12485 = vst [vmem:[#allocation23_spill] sm:$0xff] %v10769_v31  ;;  %v10774_v47 = vpop.f32.mrb[118].mxu0  ;;  %v8013_v30 = vcombine.low %v2698_v62, %v2701_v17  ;;  %v6234_v24 = vrot.slane %v6121_v11, 5  ;;  %v7999_v5 = vrot.slane %v2574_v20, 9  ;;  %v2715_v25 = vsel %vm10726_vm0, %v2713_v28, %v2714_v56  ;;  %v6120_v46 = vld [vmem:[#allocation2 + $0x48] sm:$0xe] }
 0x2d6   : > { %12486 = vst [vmem:[#allocation24_spill] sm:$0xff] %v10774_v47  ;;  %v10778_v40 = vpop.f32.mrb[119].mxu0  ;;  %v6222_v63 = vrot.slane %v6220_v0, 4  ;;  %v8000_v34 = vrot.slane %v2577_v43, 9  ;;  %v6237_v21 = vrot.slane %v6122_v9, 5  ;;  %v2725_v17 = vrot.slane %v2581_v60, 5 }
 0x2d7   : > { %8940 = vmatmul.mubr.msk.bf16.gmra.mrb[168].mxu0 %vm1508_vm10, %v9253_v3  ;;  %12487 = vst [vmem:[#allocation25_spill] sm:$0xff] %v10778_v40  ;;  %v6116_v3 = vld [vmem:[#allocation2 + $0x38] sm:$0x1]  ;;  %v6127_v59 = vld [vmem:[#allocation2 + $0x64] sm:$0xf] }
 0x2d8   : > { %8943 = vmatprep.mubr.msk.bf16.mxu0 %vm1508_vm10, %v9254_v38  ;;  %v6111_v38 = vld [vmem:[#allocation2 + $0x24] sm:$0xe]  ;;  %v2585_v12 = vld [vmem:[#allocation2 + $0x98] sm:$0x1]  ;;  %v2719_v48 = vsel %vm10726_vm0, %v8000_v34, %v2718_v33  ;;  %v2727_v20 = vrot.slane %v2725_v17, 4  ;;  %v6248_v43 = vrot.slane %v6127_v59, 5 }
 0x2d9   : > { %v8215_v53 = vrot.slane %v6111_v38, 9  ;;  %v6117_v38 = vld [vmem:[#allocation2 + $0x3c] sm:$0xe]  ;;  %v2583_v33 = vld [vmem:[#allocation2 + $0x90] sm:$0xe] }
 0x2da   : > { %8788 = vmatmul.mubr.msk.bf16.gmra.mrb[60].mxu1 %vm1508_vm10, %v8009_v41  ;;  %v8217_v16 = vrot.slane %v6117_v38, 9  ;;  %v10867_v11 = vld [vmem:[#allocation2 + $0xa0] sm:$0xf]  ;;  %v8002_v28 = vrot.slane %v2583_v33, 9  ;;  %v6123_v9 = vld [vmem:[#allocation2 + $0x54] sm:$0xe] }
 0x2db   : > { %8791 = vmatprep.mubr.msk.bf16.mxu1 %vm1508_vm10, %v8010_v58  ;;  %v6223_v58 = vrot.slane %v6116_v3, 5  ;;  %v6230_v3 = vrot.slane %v6119_v10, 5  ;;  %v6126_v60 = vld [vmem:[#allocation2 + $0x60] sm:$0xe]  ;;  %v2593_v33 = vld [vmem:[#allocation2 + $0xb8] sm:$0xf] }
 0x2dc   : > { %v5346_v35 = vld [vmem:[#allocation2 + $0x88] sm:$0xf] }
 0x2dd   : > { %v6224_v23 = vsel %vm10726_vm0, %v6222_v63, %v6223_v58 }
 0x2df   : > { %8944 = vmatmul.mubr.msk.bf16.gmra.mrb[172].mxu0 %vm1508_vm10, %v9255_v8  ;;  %v2705_v8 = vsel %vm10726_vm0, %v7998_v39, %v2704_v13  ;;  %v6214_v13 = vsel %vm10726_vm0, %v8215_v53, %v6213_v22  ;;  %v2584_v22 = vld [vmem:[#allocation2 + $0x94] sm:$0xf] }
 0x2e0   : > { %8947 = vmatprep.mubr.msk.bf16.mxu0 %vm1508_vm10, %v9256_v7  ;;  %v8014_v2 = vcombine.low %v2705_v8, %v2708_v51  ;;  %v8231_v27 = vcombine.low %v6214_v13, %v6217_v14  ;;  %v2732_v39 = vrot.slane %v2584_v22, 5  ;;  %v6124_v51 = vld [vmem:[#allocation2 + $0x58] sm:$0xf]  ;;  %v6125_v8 = vld [vmem:[#allocation2 + $0x5c] sm:$0x1]  ;;  %v6250_v22 = vrot.slane %v6248_v43, 4 }
 0x2e1   : > { %v6244_v10 = vrot.slane %v6125_v8, 5  ;;  %v10871_v13 = vld [vmem:[#allocation2 + $0xac] sm:$0xf] }
 0x2e2   : > { %8792 = vmatmul.mubr.msk.bf16.gmra.mrb[64].mxu1 %vm1508_vm10, %v8011_v18  ;;  %v2721_v18 = vrot.slane %v2579_v52, 5  ;;  %v2734_v56 = vrot.slane %v2732_v39, 4  ;;  %v2746_v34 = vrot.slane %v10871_v13, 5 }
 0x2e3   : > { %8795 = vmatprep.mubr.msk.bf16.mxu1 %vm1508_vm10, %v8012_v50  ;;  %v8725_v32 = vpop.f32.mrb[0].mxu1  ;;  %v6227_v50 = vrot.slane %v10825_v4, 5  ;;  %v6241_v4 = vrot.slane %v6124_v51, 5  ;;  %v2589_v51 = vld [vmem:[#allocation2 + $0xa8] sm:$0xe] }
 0x2e4   : > { %1732 = vst.msk [vmem:[#allocation3 + $0x50] sm:$0xff] %vm1508_vm10, %v8725_v32  ;;  %v1627_v41 = vpop.f32.mrb[1].mxu1  ;;  %v2722_v1 = vsel %vm10726_vm0, %v2720_v42, %v2721_v18  ;;  %v2582_v32 = vld [vmem:[#allocation2 + $0x8c] sm:$0x1]  ;;  %v2748_v59 = vrot.slane %v2746_v34, 4 }
 0x2e5   : > { %1730 = vst.msk [vmem:[#allocation3 + $0x40] sm:$0xff] %vm1508_vm10, %v1627_v41  ;;  %v8726_v15 = vpop.f32.mrb[2].mxu1  ;;  %v6236_v41 = vrot.slane %v6234_v24, 4  ;;  %v8016_v58 = vcombine.low %v2719_v48, %v2722_v1  ;;  %v2728_v62 = vrot.slane %v2582_v32, 5  ;;  %v6228_v63 = vsel %vm10726_vm0, %v8217_v16, %v6227_v50  ;;  %v10883_v1 = vld [vmem:[#allocation2 + $0x70] sm:$0xf] }
 0x2e6   : > { %1733 = vst.msk [vmem:[#allocation3 + $0x58] sm:$0xff] %vm1508_vm10, %v8726_v15  ;;  %v1630_v7 = vpop.f32.mrb[3].mxu1  ;;  %v6131_v48 = vld [vmem:[#allocation2 + $0x74] sm:$0x1]  ;;  %v6134_v16 = vld [vmem:[#allocation2 + $0x80] sm:$0x1] }
 0x2e7   : > { %8948 = vmatmul.mubr.msk.bf16.gmra.mrb[176].mxu0 %vm1508_vm10, %v9257_v26  ;;  %1731 = vst.msk [vmem:[#allocation3 + $0x48] sm:$0xff] %vm1508_vm10, %v1630_v7  ;;  %v6221_v26 = vsel %vm10726_vm0, %v8216_v55, %v6220_v0  ;;  %v2712_v0 = vsel %vm10726_vm0, %v7999_v5, %v2711_v49  ;;  %v8218_v49 = vrot.slane %v6120_v46, 9  ;;  %v6238_v52 = vsel %vm10726_vm0, %v6236_v41, %v6237_v21  ;;  %v2580_v7 = vld [vmem:[#allocation2 + $0x84] sm:$0xe]  ;;  %v2591_v5 = vld [vmem:[#allocation2 + $0xb0] sm:$0x1] }
 0x2e8   : > { %8987 = vmatprep.mubr.msk.bf16.mxu0 %vm1508_vm10, %v8230_v57  ;;  %v10828_v54 = vpop.f32.mrb[120].mxu0  ;;  %v8232_v44 = vcombine.low %v6221_v26, %v6224_v23  ;;  %v6229_v57 = vrot.slane %v6227_v50, 4  ;;  %v8015_v6 = vcombine.low %v2712_v0, %v2715_v25  ;;  %v8001_v23 = vrot.slane %v2580_v7, 9  ;;  %v2588_v26 = vld [vmem:[#allocation2 + $0xa4] sm:$0x1] }
 0x2e9   : > { %12488 = vst [vmem:[#allocation26_spill] sm:$0xff] %v10828_v54  ;;  %v10832_v19 = vpop.f32.mrb[121].mxu0  ;;  %v6235_v14 = vsel %vm10726_vm0, %v8218_v49, %v6234_v24  ;;  %v2729_v18 = vsel %vm10726_vm0, %v2727_v20, %v2728_v62  ;;  %v6243_v24 = vrot.slane %v6241_v4, 4  ;;  %v8219_v21 = vrot.slane %v6123_v9, 9  ;;  %v6129_v49 = vld [vmem:[#allocation2 + $0x6c] sm:$0xe] }
 0x2ea   : > { %12489 = vst [vmem:[#allocation27_spill] sm:$0xff] %v10832_v19  ;;  %8796 = vmatmul.mubr.msk.bf16.gmra.mrb[68].mxu1 %vm1508_vm10, %v8013_v30  ;;  %v10837_v45 = vpop.f32.mrb[122].mxu0  ;;  %v6231_v15 = vsel %vm10726_vm0, %v6229_v57, %v6230_v3  ;;  %v2735_v30 = vrot.slane %v2585_v12, 5  ;;  %v8234_v55 = vcombine.low %v6235_v14, %v6238_v52  ;;  %v2726_v42 = vsel %vm10726_vm0, %v8001_v23, %v2725_v17  ;;  %v10887_v57 = vld [vmem:[#allocation2 + $0x7c] sm:$0xf] }
 0x2eb   : > { %12490 = vst [vmem:[#allocation28_spill] sm:$0xff] %v10837_v45  ;;  %8799 = vmatprep.mubr.msk.bf16.mxu1 %vm1508_vm10, %v8014_v2  ;;  %v10843_v61 = vpop.f32.mrb[123].mxu0  ;;  %v6128_v2 = vld [vmem:[#allocation2 + $0x68] sm:$0x1]  ;;  %v8233_v53 = vcombine.low %v6228_v63, %v6231_v15  ;;  %v8017_v25 = vcombine.low %v2726_v42, %v2729_v18  ;;  %v2733_v3 = vsel %vm10726_vm0, %v8002_v28, %v2732_v39  ;;  %v2742_v0 = vrot.slane %v2588_v26, 5 }
 0x2ec   : > { %12491 = vst [vmem:[#allocation29_spill] sm:$0xff] %v10843_v61  ;;  %v2736_v50 = vsel %vm10726_vm0, %v2734_v56, %v2735_v30  ;;  %v6245_v32 = vsel %vm10726_vm0, %v6243_v24, %v6244_v10  ;;  %v8220_v46 = vrot.slane %v6126_v60, 9  ;;  %v2586_v12 = vld [vmem:[#allocation2 + $0x9c] sm:$0xe]  ;;  %v6242_v41 = vsel %vm10726_vm0, %v8219_v21, %v6241_v4  ;;  %v2594_v56 = vld [vmem:[#allocation2 + $0xbc] sm:$0x1] }
 0x2ed   : > { %v8018_v38 = vcombine.low %v2733_v3, %v2736_v50  ;;  %v8235_v15 = vcombine.low %v6242_v41, %v6245_v32  ;;  %v6262_v52 = vrot.slane %v10887_v57, 5  ;;  %v8003_v8 = vrot.slane %v2586_v12, 9  ;;  %v6132_v23 = vld [vmem:[#allocation2 + $0x78] sm:$0xe]  ;;  %v6136_v9 = vld [vmem:[#allocation2 + $0x88] sm:$0xf] }
 0x2ee   : > { %v6249_v62 = vsel %vm10726_vm0, %v8220_v46, %v6248_v43  ;;  %v6258_v20 = vrot.slane %v6131_v48, 5  ;;  %v6265_v14 = vrot.slane %v6134_v16, 5  ;;  %v8221_v28 = vrot.slane %v6129_v49, 9 }
 0x2ef   : > { %8988 = vmatmul.mubr.msk.bf16.vlgmr.msra.gmra.mrb[180].mxu0 %vm1508_vm10, %v8231_v27  ;;  %v6251_v27 = vrot.slane %v6128_v2, 5  ;;  %v8004_v2 = vrot.slane %v2589_v51, 9  ;;  %v6264_v50 = vrot.slane %v6262_v52, 4  ;;  %v2753_v24 = vrot.slane %v2593_v33, 5  ;;  %v6135_v51 = vld [vmem:[#allocation2 + $0x84] sm:$0xe] }
 0x2f0   : > { %8991 = vmatprep.mubr.msk.bf16.mxu0 %vm1508_vm10, %v8232_v44  ;;  %v2739_v44 = vrot.slane %v10867_v11, 5  ;;  %v2756_v60 = vrot.slane %v2594_v56, 5  ;;  %v6269_v32 = vrot.slane %v6136_v9, 5 }
 0x2f1   : > { %v6252_v17 = vsel %vm10726_vm0, %v6250_v22, %v6251_v27  ;;  %v2747_v13 = vsel %vm10726_vm0, %v8004_v2, %v2746_v34  ;;  %v6266_v3 = vsel %vm10726_vm0, %v6264_v50, %v6265_v14  ;;  %v2592_v22 = vld [vmem:[#allocation2 + $0xb4] sm:$0xe]  ;;  %v6137_v34 = vld [vmem:[#allocation2 + $0x8c] sm:$0x1]  ;;  %v2755_v21 = vrot.slane %v2753_v24, 4  ;;  %v9259_v50 = vld [vmem:[#allocation2 + $0x18] sm:$0xff]  }
 0x2f2   : > { %8800 = vmatmul.mubr.msk.bf16.gmra.mrb[72].mxu1 %vm1508_vm10, %v8015_v6  ;;  %v2749_v6 = vrot.slane %v2591_v5, 5  ;;  %v2741_v39 = vrot.slane %v2739_v44, 4  ;;  %v8236_v30 = vcombine.low %v6249_v62, %v6252_v17  ;;  %v2740_v11 = vsel %vm10726_vm0, %v8003_v8, %v2739_v44  ;;  %v6139_v44 = vld [vmem:[#allocation2 + $0x94] sm:$0xf]  ;;  %v6138_v62 = vld [vmem:[#allocation2 + $0x90] sm:$0xe] }
 0x2f3   : > { %8803 = vmatprep.mubr.msk.bf16.mxu1 %vm1508_vm10, %v8016_v58  ;;  %v6255_v58 = vrot.slane %v10883_v1, 5  ;;  %v6276_v12 = vrot.slane %v6139_v44, 5  ;;  %v8005_v48 = vrot.slane %v2592_v22, 9  ;;  %v2757_v41 = vsel %vm10726_vm0, %v2755_v21, %v2756_v60  ;;  %v6146_v14 = vld [vmem:[#allocation2 + $0xb0] sm:$0x1] }
 0x2f4   : > { %v2743_v63 = vsel %vm10726_vm0, %v2741_v39, %v2742_v0  ;;  %v6140_v0 = vld [vmem:[#allocation2 + $0x98] sm:$0x1]  ;;  %v6272_v39 = vrot.slane %v6137_v34, 5  ;;  %v6150_v60 = vld [vmem:[#allocation2 + $0xc0] sm:$0xe] }
 0x2f5   : > { %v8019_v10 = vcombine.low %v2740_v11, %v2743_v63  ;;  %v2754_v16 = vsel %vm10726_vm0, %v8005_v48, %v2753_v24  ;;  %v6278_v49 = vrot.slane %v6276_v12, 4  ;;  %v6145_v63 = vld [vmem:[#allocation2 + $0xac] sm:$0xf]  ;;  %v6152_v34 = vld [vmem:[#allocation2 + $0xc8] sm:$0x1] }
 0x2f6   : > { %v6290_v11 = vrot.slane %v6145_v63, 5  ;;  %v6307_v48 = vrot.slane %v6152_v34, 5  ;;  %v9262_v63 = vld [vmem:[#allocation2 + $0x3c] sm:$0xff]   ;;  %v4337_v34 = vld [vmem:[#allocation2 + $0x2c] sm:$0x1] }
 0x2f7   : > { %8992 = vmatmul.mubr.msk.bf16.gmra.mrb[184].mxu0 %vm1508_vm10, %v8233_v53  ;;  %v2750_v53 = vsel %vm10726_vm0, %v2748_v59, %v2749_v6  ;;  %v8021_v59 = vcombine.low %v2754_v16, %v2757_v41 }
 0x2f8   : > { %8995 = vmatprep.mubr.msk.bf16.mxu0 %vm1508_vm10, %v8234_v55  ;;  %v6257_v55 = vrot.slane %v6255_v58, 4  ;;  %v8020_v26 = vcombine.low %v2747_v13, %v2750_v53  ;;  %v6144_v13 = vld [vmem:[#allocation2 + $0xa8] sm:$0xe]  ;;  %v6292_v24 = vrot.slane %v6290_v11, 4 }
 0x2f9   : > { %v8226_v22 = vrot.slane %v6144_v13, 9  ;;  %v4331_v13 = vld [vmem:[#allocation2 + $0x14] sm:$0x1] }
 0x2fa   : > { %8804 = vmatmul.mubr.msk.bf16.gmra.mrb[76].mxu1 %vm1508_vm10, %v8017_v25  ;;  %v6259_v42 = vsel %vm10726_vm0, %v6257_v55, %v6258_v20  ;;  %v8222_v25 = vrot.slane %v6132_v23, 9  ;;  %v8224_v20 = vrot.slane %v6138_v62, 9 }
 0x2fb   : > { %8807 = vmatprep.mubr.msk.bf16.mxu1 %vm1508_vm10, %v8018_v38  ;;  %v8729_v7 = vpop.f32.mrb[4].mxu1  ;;  %v6256_v38 = vsel %vm10726_vm0, %v8221_v28, %v6255_v58  ;;  %v6279_v58 = vrot.slane %v6140_v0, 5  ;;  %v6293_v28 = vrot.slane %v6146_v14, 5  ;;  %v6149_v0 = vld [vmem:[#allocation2 + $0xbc] sm:$0x1] }
 0x2fc   : > { %1736 = vst.msk [vmem:[#allocation3 + $0x70] sm:$0xff] %vm1508_vm10, %v8729_v7  ;;  %v1643_v4 = vpop.f32.mrb[5].mxu1  ;;  %v8237_v46 = vcombine.low %v6256_v38, %v6259_v42  ;;  %v6263_v17 = vsel %vm10726_vm0, %v8222_v25, %v6262_v52  ;;  %v6142_v52 = vld [vmem:[#allocation2 + $0xa0] sm:$0xf]  ;;  %v9258_v7 = vld [vmem:[#allocation2 + $0xc] sm:$0xff]   ;;  %v9260_v42 = vld [vmem:[#allocation2 + $0x24] sm:$0xff]  }
 0x2fd   : > { %1734 = vst.msk [vmem:[#allocation3 + $0x60] sm:$0xff] %vm1508_vm10, %v1643_v4  ;;  %v8730_v43 = vpop.f32.mrb[6].mxu1  ;;  %v8238_v6 = vcombine.low %v6263_v17, %v6266_v3  ;;  %v6280_v33 = vsel %vm10726_vm0, %v6278_v49, %v6279_v58  ;;  %v6143_v4 = vld [vmem:[#allocation2 + $0xa4] sm:$0x1]  ;;  %v6283_v53 = vrot.slane %v6142_v52, 5  ;;  %v6294_v21 = vsel %vm10726_vm0, %v6292_v24, %v6293_v28  ;;  %v9261_v52 = vld [vmem:[#allocation2 + $0x30] sm:$0xff]  }
 0x2fe   : > { %1737 = vst.msk [vmem:[#allocation3 + $0x78] sm:$0xff] %vm1508_vm10, %v8730_v43  ;;  %v1646_v18 = vpop.f32.mrb[7].mxu1  ;;  %v6277_v43 = vsel %vm10726_vm0, %v8224_v20, %v6276_v12  ;;  %v6286_v23 = vrot.slane %v6143_v4, 5  ;;  %v10953_v38 = vld [vmem:[#allocation10 + $0x1c] sm:$0xf]  ;;  %v8228_v12 = vrot.slane %v6150_v60, 9 }
 0x2ff   : > { %8996 = vmatmul.mubr.msk.bf16.gmra.mrb[188].mxu0 %vm1508_vm10, %v8235_v15  ;;  %1735 = vst.msk [vmem:[#allocation3 + $0x68] sm:$0xff] %vm1508_vm10, %v1646_v18  ;;  %v6271_v15 = vrot.slane %v6269_v32, 4  ;;  %v8240_v55 = vcombine.low %v6277_v43, %v6280_v33  ;;  %v6151_v18 = vld [vmem:[#allocation2 + $0xc4] sm:$0xf]  ;;  %v6285_v9 = vrot.slane %v6283_v53, 4  ;;  %v6300_v58 = vrot.slane %v6149_v0, 5 }
 0x300   : > { %8999 = vmatprep.mubr.msk.bf16.mxu0 %vm1508_vm10, %v8236_v30  ;;  %v10913_v27 = vpop.f32.mrb[124].mxu0  ;;  %v8223_v30 = vrot.slane %v6135_v51, 9  ;;  %v6304_v44 = vrot.slane %v6151_v18, 5  ;;  %v4333_v18 = vld [vmem:[#allocation2 + $0x1c] sm:$0xf] }
 0x301   : > { %12492 = vst [vmem:[#allocation30_spill] sm:$0xff] %v10913_v27  ;;  %v10917_v5 = vpop.f32.mrb[125].mxu0  ;;  %v6273_v8 = vsel %vm10726_vm0, %v6271_v15, %v6272_v39  ;;  %v6287_v3 = vsel %vm10726_vm0, %v6285_v9, %v6286_v23  ;;  %v6147_v15 = vld [vmem:[#allocation2 + $0xb4] sm:$0xe]  ;;  %v4330_v23 = vld [vmem:[#allocation2 + $0x10] sm:$0xf] }
 0x302   : > { %12493 = vst [vmem:[#allocation31_spill] sm:$0xff] %v10917_v5  ;;  %8808 = vmatmul.mubr.msk.bf16.gmra.mrb[80].mxu1 %vm1508_vm10, %v8019_v10  ;;  %v10922_v1 = vpop.f32.mrb[126].mxu0  ;;  %v6270_v2 = vsel %vm10726_vm0, %v8223_v30, %v6269_v32  ;;  %v6141_v10 = vld [vmem:[#allocation2 + $0x9c] sm:$0xe]  ;;  %v6148_v32 = vld [vmem:[#allocation2 + $0xb8] sm:$0xf] }
 0x303   : > { %12494 = vst [vmem:[#allocation32_spill] sm:$0xff] %v10922_v1  ;;  %8811 = vmatprep.mubr.msk.bf16.mxu1 %vm1508_vm10, %v8020_v26  ;;  %v10927_v57 = vpop.f32.mrb[127].mxu0  ;;  %v8239_v56 = vcombine.low %v6270_v2, %v6273_v8  ;;  %v4636_v26 = vsel %vm1557_vm3, %v10758_v36, 0  ;;  %v8225_v25 = vrot.slane %v6141_v10, 9  ;;  %v6297_v51 = vrot.slane %v6148_v32, 5  ;;  %v9265_v9 = vld [vmem:[#allocation2 + $0x60] sm:$0xff]  }
 0x304   : > { %12495 = vst [vmem:[#allocation33_spill] sm:$0xff] %v10927_v57  ;;  %v8227_v20 = vrot.slane %v6147_v15, 9  ;;  %v4329_v10 = vld [vmem:[#allocation2 + $0xc] sm:$0xe]  ;;  %v4427_v28 = vrot.slane %v4330_v23, 5 }
 0x305   : > { %v6284_v36 = vsel %vm10726_vm0, %v8225_v25, %v6283_v53  ;;  %v4334_v24 = vld [vmem:[#allocation2 + $0x20] sm:$0x1]  ;;  %v10995_v60 = vld [vmem:[#allocation2 + $0x24] sm:$0xe]  ;;  %v9266_v25 = vld [vmem:[#allocation2 + $0x6c] sm:$0xff]  }
 0x306   : > { %v8241_v17 = vcombine.low %v6284_v36, %v6287_v3  ;;  %v6298_v53 = vsel %vm10726_vm0, %v8227_v20, %v6297_v51  ;;  %v8102_v3 = vrot.slane %v4329_v10, 9  ;;  %v4429_v32 = vrot.slane %v4427_v28, 4  ;;  %v4338_v36 = vld [vmem:[#allocation2 + $0x30] sm:$0xe]  ;;  %v4343_v15 = vld [vmem:[#allocation2 + $0x44] sm:$0x1] }
 0x307   : > { %9000 = vmatmul.mubr.msk.bf16.gmra.mrb[192].mxu0 %vm1508_vm10, %v8237_v46  ;;  %v6291_v46 = vsel %vm10726_vm0, %v8226_v22, %v6290_v11  ;;  %v9263_v11 = vld [vmem:[#allocation2 + $0x48] sm:$0xff]   ;;  %v4430_v22 = vrot.slane %v4331_v13, 5  ;;  %v4458_v23 = vrot.slane %v4343_v15, 5 }
 0x308   : > { %9003 = vmatprep.mubr.msk.bf16.mxu0 %vm1508_vm10, %v8238_v6  ;;  %v6306_v6 = vrot.slane %v6304_v44, 4  ;;  %v8242_v39 = vcombine.low %v6291_v46, %v6294_v21  ;;  %v4340_v46 = vld [vmem:[#allocation2 + $0x38] sm:$0x1]  ;;  %v9268_v13 = vld [vmem:[#allocation2 + $0x84] sm:$0xff]  }
 0x309   : > { %v4368_v1 = vld [vmem:[#allocation2 + $0xa8] sm:$0xe] }
 0x30a   : > { %8812 = vmatmul.mubr.msk.bf16.gmra.mrb[84].mxu1 %vm1508_vm10, %v8021_v59  ;;  %v6299_v59 = vrot.slane %v6297_v51, 4  ;;  %v6308_v30 = vsel %vm10726_vm0, %v6306_v6, %v6307_v48  ;;  %v4437_v6 = vrot.slane %v4334_v24, 5  ;;  %v11005_v48 = vsel %vm1557_vm3, %v10953_v38, 0  ;;  %v4347_v24 = vld [vmem:[#allocation2 + $0x54] sm:$0xe] }
 0x30b   : > { %8817 = vmatprep.mubr.msk.bf16.mxu1 %vm1508_vm10, %v9258_v7  ;;  %v6305_v7 = vsel %vm10726_vm0, %v8228_v12, %v6304_v44  ;;  %v10997_v44 = vld [vmem:[#allocation2 + $0x34] sm:$0xf]  ;;  %v8104_v51 = vrot.slane %v10995_v60, 9  ;;  %v4349_v60 = vld [vmem:[#allocation2 + $0x5c] sm:$0x1] }
 0x30c   : > { %v6301_v33 = vsel %vm10726_vm0, %v6299_v59, %v6300_v58  ;;  %v8244_v14 = vcombine.low %v6305_v7, %v6308_v30  ;;  %v4444_v58 = vrot.slane %v4337_v34, 5  ;;  %v11019_v30 = vsel %vm10726_vm0, %v8102_v3, %v4427_v28 }
 0x30d   : > { %v8243_v43 = vcombine.low %v6298_v53, %v6301_v33  ;;  %v11022_v33 = vld [vmem:[#allocation2 + $0x58] sm:$0xf]  ;;  %v4472_v15 = vrot.slane %v4349_v60, 5  ;;  %v4358_v60 = vld [vmem:[#allocation2 + $0x80] sm:$0x1] }
 0x30e   : > { %v4469_v34 = vrot.slane %v11022_v33, 5  ;;  %v4357_v33 = vld [vmem:[#allocation2 + $0x7c] sm:$0xf] }
 0x30f   : > { %9004 = vmatmul.mubr.msk.bf16.gmra.mrb[196].mxu0 %vm1508_vm10, %v8239_v56 }
 0x310   : > { %9007 = vmatprep.mubr.msk.bf16.mxu0 %vm1508_vm10, %v8240_v55  ;;  %v9264_v55 = vld [vmem:[#allocation2 + $0x54] sm:$0xff]  }
 0x312   : > { %8818 = vmatmul.mubr.msk.bf16.vlgmr.msra.gmra.mrb[88].mxu1 %vm1508_vm10, %v9259_v50  ;;  %v10993_v50 = vld [vmem:[#allocation2 + $0x28] sm:$0xf] }
 0x313   : > { %8884 = vmatpush3.bf16.msra.mxu1 %v4636_v26  ;;  %8821 = vmatprep.mubr.msk.bf16.mxu1 %vm1508_vm10, %v9260_v42  ;;  %v8733_v41 = vpop.f32.mrb[8].mxu1  ;;  %v4332_v26 = vld [vmem:[#allocation2 + $0x18] sm:$0xe]  ;;  %v4434_v42 = vrot.slane %v4333_v18, 5  ;;  %v4441_v21 = vrot.slane %v10993_v50, 5 }
 0x314   : > { %9063 = vmatprep.subr.msk.bf16.mxu1 %vm1557_vm3, %v10953_v38  ;;  %1740 = vst.msk [vmem:[#allocation3 + $0x90] sm:$0xff] %vm1508_vm10, %v8733_v41  ;;  %v1659_v16 = vpop.f32.mrb[9].mxu1  ;;  %v8103_v0 = vrot.slane %v4332_v26, 9  ;;  %v4448_v41 = vrot.slane %v10997_v44, 5  ;;  %v11029_v18 = vld [vmem:[#allocation2 + $0x64] sm:$0xf] }
 0x315   : > { %1738 = vst.msk [vmem:[#allocation3 + $0x80] sm:$0xff] %vm1508_vm10, %v1659_v16  ;;  %v8734_v62 = vpop.f32.mrb[10].mxu1  ;;  %v4436_v12 = vrot.slane %v4434_v42, 4  ;;  %v4341_v16 = vld [vmem:[#allocation2 + $0x3c] sm:$0xe]  ;;  %v4443_v59 = vrot.slane %v4441_v21, 4 }
 0x316   : > { %1741 = vst.msk [vmem:[#allocation3 + $0x98] sm:$0xff] %vm1508_vm10, %v8734_v62  ;;  %v1662_v49 = vpop.f32.mrb[11].mxu1  ;;  %v11014_v62 = vsel %vm10726_vm0, %v4429_v32, %v4430_v22  ;;  %v11036_v50 = vsel %vm10726_vm0, %v8103_v0, %v4434_v42  ;;  %v8106_v26 = vrot.slane %v4341_v16, 9  ;;  %v4352_v42 = vld [vmem:[#allocation2 + $0x68] sm:$0x1]  ;;  %vm7601_vm3 = vcmask 130048  }
 0x317   : > { %9008 = vmatmul.mubr.msk.bf16.gmra.mrb[200].mxu0 %vm1508_vm10, %v8241_v17  ;;  %1739 = vst.msk [vmem:[#allocation3 + $0x88] sm:$0xff] %vm1508_vm10, %v1662_v49  ;;  %v11000_v17 = vld [vmem:[#allocation2 + $0x40] sm:$0xf]  ;;  %v4451_v49 = vrot.slane %v4340_v46, 5 }
 0x318   : > { %9011 = vmatprep.mubr.msk.bf16.mxu0 %vm1508_vm10, %v8242_v39  ;;  %v10975_v8 = vpop.f32.mrb[128].mxu0  ;;  %v11008_v39 = vld [vmem:[#allocation2 + $0x4c] sm:$0xf]  ;;  %v4455_v38 = vrot.slane %v11000_v17, 5  ;;  %v4476_v17 = vrot.slane %v11029_v18, 5 }
 0x319   : > { %12496 = vst [vmem:[#allocation34_spill] sm:$0xff] %v10975_v8  ;;  %v10979_v4 = vpop.f32.mrb[129].mxu0  ;;  %v4462_v20 = vrot.slane %v11008_v39, 5  ;;  %v11059_v39 = vsel %vm10726_vm0, %v8104_v51, %v4441_v21  ;;  %v4479_v51 = vrot.slane %v4352_v42, 5  ;;  %v4356_v18 = vld [vmem:[#allocation2 + $0x78] sm:$0xe] }
 0x31a   : > { %12497 = vst [vmem:[#allocation35_spill] sm:$0xff] %v10979_v4  ;;  %8822 = vmatmul.mubr.msk.bf16.gmra.mrb[92].mxu1 %vm1508_vm10, %v9261_v52  ;;  %v10982_v2 = vpop.f32.mrb[130].mxu0  ;;  %v4344_v52 = vld [vmem:[#allocation2 + $0x48] sm:$0xe]  ;;  %v4457_v3 = vrot.slane %v4455_v38, 4  ;;  %v9270_v21 = vld [vmem:[#allocation2 + $0x9c] sm:$0xff]  }
 0x31b   : > { %12498 = vst [vmem:[#allocation36_spill] sm:$0xff] %v10982_v2  ;;  %8825 = vmatprep.mubr.msk.bf16.mxu1 %vm1508_vm10, %v9262_v63  ;;  %v10987_v56 = vpop.f32.mrb[131].mxu0  ;;  %v4346_v63 = vld [vmem:[#allocation2 + $0x50] sm:$0x1]  ;;  %v4464_v46 = vrot.slane %v4462_v20, 4  ;;  %v9271_v8 = vld [vmem:[#allocation2 + $0xa8] sm:$0xff]  }
 0x31c   : > { %12499 = vst [vmem:[#allocation37_spill] sm:$0xff] %v10987_v56  ;;  %v4465_v22 = vrot.slane %v4346_v63, 5  ;;  %v11067_v16 = vsel %vm10726_vm0, %v4457_v3, %v4458_v23  ;;  %v4355_v63 = vld [vmem:[#allocation2 + $0x74] sm:$0x1]  ;;  %v5324_v4 = vld [vmem:[#allocation2 + $0x30] sm:$0xf] }
 0x31d   : > { %v9269_v3 = vld [vmem:[#allocation2 + $0x90] sm:$0xff]   ;;  %v4486_v42 = vrot.slane %v4355_v63, 5  ;;  %v5319_v63 = vld [vmem:[#allocation2 + $0x1c] sm:$0xf] }
 0x31f   : > { %9012 = vmatmul.mubr.msk.bf16.gmra.mrb[204].mxu0 %vm1508_vm10, %v8243_v43  ;;  %v11027_v43 = vsel %vm10726_vm0, %v4436_v12, %v4437_v6  ;;  %v4354_v12 = vld [vmem:[#allocation2 + $0x70] sm:$0xf] }
 0x320   : > { %9015 = vmatprep.mubr.msk.bf16.mxu0 %vm1508_vm10, %v8244_v14  ;;  %v9267_v14 = vld [vmem:[#allocation2 + $0x78] sm:$0xff]   ;;  %v4483_v23 = vrot.slane %v4354_v12, 5 }
 0x321   : > { %v5318_v12 = vld [vmem:[#allocation2 + $0x18] sm:$0xf] }
 0x322   : > { %8826 = vmatmul.mubr.msk.bf16.gmra.mrb[96].mxu1 %vm1508_vm10, %v9263_v11  ;;  %v8105_v11 = vrot.slane %v4338_v36, 9  ;;  %v8107_v36 = vrot.slane %v4344_v52, 9  ;;  %v5367_v28 = vshrl.u32 %v5318_v12, 16 }
 0x323   : > { %8829 = vmatprep.mubr.msk.bf16.mxu1 %vm1508_vm10, %v9264_v55  ;;  %v4450_v55 = vrot.slane %v4448_v41, 4 }
 0x32a   : > { %8830 = vmatmul.mubr.msk.bf16.gmra.mrb[100].mxu1 %vm1508_vm10, %v9265_v9  ;;  %v11040_v9 = vsel %vm10726_vm0, %v4443_v59, %v4444_v58  ;;  %v11063_v58 = vsel %vm10726_vm0, %v8105_v11, %v4448_v41  ;;  %v4350_v59 = vld [vmem:[#allocation2 + $0x60] sm:$0xe]  ;;  %v11078_v41 = vsel %vm10726_vm0, %v8106_v26, %v4455_v38  ;;  %v8108_v11 = vrot.slane %v4347_v24, 9 }
 0x32b   : > { %8833 = vmatprep.mubr.msk.bf16.mxu1 %vm1508_vm10, %v9266_v25  ;;  %v8737_v7 = vpop.f32.mrb[12].mxu1  ;;  %v11045_v25 = vsel %vm10726_vm0, %v4450_v55, %v4451_v49  ;;  %v4353_v49 = vld [vmem:[#allocation2 + $0x6c] sm:$0xe]  ;;  %v4471_v55 = vrot.slane %v4469_v34, 4  ;;  %v11090_v38 = vsel %vm10726_vm0, %v8107_v36, %v4462_v20  ;;  %v4478_v26 = vrot.slane %v4476_v17, 4 }
 0x32c   : > { %1744 = vst.msk [vmem:[#allocation3 + $0xb0] sm:$0xff] %vm1508_vm10, %v8737_v7  ;;  %v1675_v53 = vpop.f32.mrb[13].mxu1  ;;  %v8110_v24 = vrot.slane %v4353_v49, 9  ;;  %v11100_v20 = vsel %vm10726_vm0, %v8108_v11, %v4469_v34  ;;  %v4361_v49 = vld [vmem:[#allocation2 + $0x8c] sm:$0x1]  ;;  %v4493_v7 = vrot.slane %v4358_v60, 5 }
 0x32d   : > { %1742 = vst.msk [vmem:[#allocation3 + $0xa0] sm:$0xff] %vm1508_vm10, %v1675_v53  ;;  %v8738_v10 = vpop.f32.mrb[14].mxu1  ;;  %v5376_v60 = vshll.u32 %v5319_v63, 16 }
 0x32e   : > { %1745 = vst.msk [vmem:[#allocation3 + $0xb8] sm:$0xff] %vm1508_vm10, %v8738_v10  ;;  %v1678_v44 = vpop.f32.mrb[15].mxu1  ;;  %v5321_v10 = vld [vmem:[#allocation2 + $0x24] sm:$0xf]  ;;  %v11114_v11 = vsel %vm10726_vm0, %v8110_v24, %v4483_v23 }
 0x32f   : > { %1743 = vst.msk [vmem:[#allocation3 + $0xa8] sm:$0xff] %vm1508_vm10, %v1678_v44  ;;  %v4360_v44 = vld [vmem:[#allocation2 + $0x88] sm:$0xf]  ;;  %v5391_v24 = vshrl.u32 %v5321_v10, 16  ;;  %v11138_v56 = vrot.slane %v5376_v60, 5 }
 0x330   : > { %v11049_v32 = vpop.f32.mrb[132].mxu0  ;;  %v4497_v0 = vrot.slane %v4360_v44, 5  ;;  %v5380_v44 = vshrl.u32 %v5319_v63, 16  ;;  %v5320_v63 = vld [vmem:[#allocation2 + $0x20] sm:$0x1] }
 0x331   : > { %12500 = vst [vmem:[#allocation38_spill] sm:$0xff] %v11049_v32  ;;  %v11054_v6 = vpop.f32.mrb[133].mxu0 }
 0x332   : > { %12501 = vst [vmem:[#allocation39_spill] sm:$0xff] %v11054_v6  ;;  %8834 = vmatmul.mubr.msk.bf16.gmra.mrb[104].mxu1 %vm1508_vm10, %v9267_v14  ;;  %v11069_v52 = vpop.f32.mrb[134].mxu0  ;;  %v11084_v14 = vsel %vm10726_vm0, %v4464_v46, %v4465_v22  ;;  %v11094_v22 = vsel %vm10726_vm0, %v4471_v55, %v4472_v15  ;;  %v4490_v46 = vrot.slane %v4357_v33, 5  ;;  %v11108_v15 = vsel %vm10726_vm0, %v4478_v26, %v4479_v51 }
 0x333   : > { %12502 = vst [vmem:[#allocation40_spill] sm:$0xff] %v11069_v52  ;;  %8837 = vmatprep.mubr.msk.bf16.mxu1 %vm1508_vm10, %v9268_v13  ;;  %v11080_v53 = vpop.f32.mrb[135].mxu0  ;;  %v8109_v13 = vrot.slane %v4350_v59, 9  ;;  %v4359_v59 = vld [vmem:[#allocation2 + $0x84] sm:$0xe]  ;;  %v4485_v33 = vrot.slane %v4483_v23, 4 }
 0x334   : > { %12503 = vst [vmem:[#allocation41_spill] sm:$0xff] %v11080_v53  ;;  %v8111_v55 = vrot.slane %v4356_v18, 9  ;;  %v5370_v51 = vshll.u32 %v5318_v12, 16  ;;  %v4500_v18 = vrot.slane %v4361_v49, 5  ;;  %v4492_v23 = vrot.slane %v4490_v46, 4 }
 0x335   : > { %v11104_v36 = vsel %vm10726_vm0, %v8109_v13, %v4476_v17  ;;  %v4362_v17 = vld [vmem:[#allocation2 + $0x90] sm:$0xe]  ;;  %v4363_v13 = vld [vmem:[#allocation2 + $0x94] sm:$0xf]  ;;  %v11122_v34 = vsel %vm10726_vm0, %v4485_v33, %v4486_v42  ;;  %v5394_v53 = vshll.u32 %v5321_v10, 16  ;;  %v8112_v52 = vrot.slane %v4359_v59, 9 }
 0x336   : > { %v4499_v6 = vrot.slane %v4497_v0, 4  ;;  %v8113_v12 = vrot.slane %v4362_v17, 9  ;;  %v4504_v32 = vrot.slane %v4363_v13, 5  ;;  %v11126_v26 = vsel %vm10726_vm0, %v8111_v55, %v4490_v46  ;;  %v4364_v17 = vld [vmem:[#allocation2 + $0x98] sm:$0x1] }
 0x337   : > { %v11130_v49 = vsel %vm10726_vm0, %v4492_v23, %v4493_v7  ;;  %v5369_v42 = vrot.slane %v5367_v28, 4  ;;  %v5372_v33 = vrot.slane %v5370_v51, 5  ;;  %v4365_v13 = vld [vmem:[#allocation2 + $0x9c] sm:$0xe]  ;;  %v5382_v46 = vrot.slane %v5380_v44, 4  ;;  %v9272_v10 = vld [vmem:[#allocation2 + $0xb4] sm:$0xff]  }
 0x338   : > { %v11136_v59 = vsel %vm10726_vm0, %v4499_v6, %v4500_v18  ;;  %v5393_v55 = vrot.slane %v5391_v24, 4  ;;  %v5396_v2 = vrot.slane %v5394_v53, 5  ;;  %v11144_v51 = vsel %vm10726_vm0, %v8112_v52, %v4497_v0  ;;  %v5323_v52 = vld [vmem:[#allocation2 + $0x2c] sm:$0x1] }
 0x339   : > { %v5386_v18 = vshll.u32 %v5320_v63, 16  ;;  %v11148_v60 = vsel %vm10726_vm0, %v8113_v12, %v4504_v32  ;;  %v4507_v44 = vrot.slane %v4364_v17, 5  ;;  %v8114_v53 = vrot.slane %v4365_v13, 9  ;;  %v4369_v63 = vld [vmem:[#allocation2 + $0xac] sm:$0xf] }
 0x33a   : > { %8838 = vmatmul.mubr.msk.bf16.gmra.mrb[108].mxu1 %vm1508_vm10, %v9269_v3  ;;  %v5322_v3 = vld [vmem:[#allocation2 + $0x28] sm:$0xf]  ;;  %v5373_v24 = vor.u32 %v5372_v33, %v5369_v42  ;;  %v4506_v57 = vrot.slane %v4504_v32, 4  ;;  %v5383_v0 = vor.u32 %v5382_v46, %v11138_v56  ;;  %v5397_v12 = vor.u32 %v5396_v2, %v5393_v55  ;;  %v4367_v33 = vld [vmem:[#allocation2 + $0xa4] sm:$0x1] }
 0x33b   : > { %8841 = vmatprep.mubr.msk.bf16.mxu1 %vm1508_vm10, %v9270_v21  ;;  %v4366_v21 = vld [vmem:[#allocation2 + $0xa0] sm:$0xf]  ;;  %v5400_v7 = vshll.u32 %v5322_v3, 16  ;;  %v5404_v23 = vshrl.u32 %v5322_v3, 16  ;;  %v5325_v3 = vld [vmem:[#allocation2 + $0x34] sm:$0xf] }
 0x33c   : > { %v4511_v6 = vrot.slane %v4366_v21, 5  ;;  %v5415_v21 = vshrl.u32 %v5324_v4, 16  ;;  %v5418_v42 = vshll.u32 %v5324_v4, 16  ;;  %v5388_v13 = vrot.slane %v5386_v18, 5  ;;  %v5327_v55 = vld [vmem:[#allocation2 + $0x3c] sm:$0xf] }
 0x33d   : > { %v11155_v5 = vrot.slane %v5400_v7, 5  ;;  %v5406_v17 = vrot.slane %v5404_v23, 4  ;;  %v5424_v32 = vshll.u32 %v5325_v3, 16  ;;  %v5428_v28 = vshrl.u32 %v5325_v3, 16  ;;  %v9273_v7 = vld [vmem:[#allocation2 + $0xc0] sm:$0xff]  }
 0x33e   : > { %v11163_v46 = vsel %vm10726_vm0, %v4506_v57, %v4507_v44  ;;  %v5374_v61 = vrot.slane %v5373_v24, 4  ;;  %v5410_v2 = vshll.u32 %v5323_v52, 16  ;;  %v8115_v23 = vrot.slane %v4368_v1, 9  ;;  %v5328_v44 = vld [vmem:[#allocation2 + $0x40] sm:$0xf] }
 0x33f   : > { %v4518_v45 = vrot.slane %v4369_v63, 5  ;;  %v5417_v19 = vrot.slane %v5415_v21, 4  ;;  %v4514_v3 = vrot.slane %v4367_v33, 5  ;;  %v11167_v54 = vrot.slane %v5397_v12, 4  ;;  %v5326_v1 = vld [vmem:[#allocation2 + $0x38] sm:$0x1] }
 0x340   : > { %v5407_v57 = vor.u32 %v5406_v17, %v11155_v5  ;;  %v11173_v52 = vrot.slane %v5424_v32, 5  ;;  %v5439_v21 = vshrl.u32 %v5327_v55, 16  ;;  %v5379_v17 = vsel %vm10104_vm13, %v5374_v61, %v11138_v56  ;;  %v5329_v33 = vld [vmem:[#allocation2 + $0x44] sm:$0x1] }
 0x341   : > { %v11190_v32 = vrot.slane %v4518_v45, 4  ;;  %v12507_v61 = vcombine.low %v11019_v30, %v11014_v62 }
 0x342   : > { %8842 = vmatmul.mubr.msk.bf16.gmra.mrb[112].mxu1 %vm1508_vm10, %v9271_v8  ;;  %v11159_v8 = vsel %vm10726_vm0, %v8114_v53, %v4511_v6  ;;  %v5384_v53 = vrot.slane %v5383_v0, 4  ;;  %v5430_v0 = vrot.slane %v5428_v28, 4  ;;  %v11188_v28 = vsel %vm10726_vm0, %v8115_v23, %v4518_v45 }
 0x343   : > { %8845 = vmatprep.mubr.msk.bf16.mxu1 %vm1508_vm10, %v9272_v10  ;;  %v8741_v27 = vpop.f32.mrb[16].mxu1  ;;  %v4513_v10 = vrot.slane %v4511_v6, 4  ;;  %v5420_v6 = vrot.slane %v5418_v42, 5  ;;  %v5412_v42 = vrot.slane %v5410_v2, 5  ;;  %v5403_v2 = vsel %vm10104_vm13, %v11167_v54, %v11155_v5 }
 0x344   : > { %1748 = vst.msk [vmem:[#allocation3 + $0xd0] sm:$0xff] %vm1508_vm10, %v8741_v27  ;;  %v1691_v4 = vpop.f32.mrb[17].mxu1  ;;  %v5389_v27 = vsel %vm10104_vm13, %v5384_v53, %v5388_v13  ;;  %v5448_v53 = vshll.u32 %v5328_v44, 16  ;;  %v5434_v45 = vshll.u32 %v5326_v1, 16  ;;  %v5431_v62 = vor.u32 %v5430_v0, %v11173_v52 }
 0x345   : > { %1746 = vst.msk [vmem:[#allocation3 + $0xc0] sm:$0xff] %vm1508_vm10, %v1691_v4  ;;  %v8742_v18 = vpop.f32.mrb[18].mxu1  ;;  %v5442_v4 = vshll.u32 %v5327_v55, 16  ;;  %v11198_v56 = vcombine.low %v5379_v17, %v5389_v27  ;;  %v5421_v55 = vor.u32 %v5420_v6, %v5417_v19  ;;  %v5441_v30 = vrot.slane %v5439_v21, 4  ;;  %v5333_v27 = vld [vmem:[#allocation2 + $0x54] sm:$0xf] }
 0x346   : > { %1749 = vst.msk [vmem:[#allocation3 + $0xd8] sm:$0xff] %vm1508_vm10, %v8742_v18  ;;  %v1694_v24 = vpop.f32.mrb[19].mxu1  ;;  %v5452_v18 = vshrl.u32 %v5328_v44, 16  ;;  %v11208_v44 = vsel %vm10726_vm0, %v4513_v10, %v4514_v3  ;;  %v11211_v17 = vld [vmem:[#allocation2 + $0xb4] sm:$0xe]  ;;  %v11213_v19 = vrot.slane %v5448_v53, 5  ;;  %v12509_v10 = vcombine.low %v11036_v50, %v11027_v43 }
 0x347   : > { %1747 = vst.msk [vmem:[#allocation3 + $0xc8] sm:$0xff] %vm1508_vm10, %v1694_v24  ;;  %v5330_v24 = vld [vmem:[#allocation2 + $0x48] sm:$0xf]  ;;  %v5436_v0 = vrot.slane %v5434_v45, 5  ;;  %v5332_v21 = vld [vmem:[#allocation2 + $0x50] sm:$0x1] }
 0x348   : > { %v5466_v54 = vshll.u32 %v5330_v24, 16  ;;  %v5454_v5 = vrot.slane %v5452_v18, 4 }
 0x349   : > { %v11176_v63 = vpop.f32.mrb[136].mxu0 }
 0x34a   : > { %12504 = vst [vmem:[#allocation42_spill] sm:$0xff] %v11176_v63  ;;  %v11183_v13 = vpop.f32.mrb[137].mxu0  ;;  %8846 = vmatmul.mubr.msk.bf16.gmra.mrb[116].mxu1 %vm1508_vm10, %v9273_v7  ;;  %v5331_v7 = vld [vmem:[#allocation2 + $0x4c] sm:$0xf]  ;;  %v5463_v63 = vshrl.u32 %v5330_v24, 16  ;;  %v5490_v24 = vshll.u32 %v5333_v27, 16 }
 0x34b   : > { %12505 = vst [vmem:[#allocation43_spill] sm:$0xff] %v11183_v13  ;;  %v11192_v12 = vpop.f32.mrb[138].mxu0  ;;  %8885 = vmatprep.mubr.msk.bf16.mxu1 %vm1508_vm10, %v12507_v61  ;;  %v5444_v61 = vrot.slane %v5442_v4, 5  ;;  %v5458_v13 = vshll.u32 %v5329_v33, 16  ;;  %v5472_v6 = vshll.u32 %v5331_v7, 16  ;;  %v5476_v1 = vshrl.u32 %v5331_v7, 16 }
 0x34c   : > { %12506 = vst [vmem:[#allocation44_spill] sm:$0xff] %v11192_v12  ;;  %v11204_v23 = vpop.f32.mrb[139].mxu0  ;;  %v5408_v12 = vrot.slane %v5407_v57, 4  ;;  %v11219_v57 = vrot.slane %v5421_v55, 4  ;;  %v8116_v4 = vrot.slane %v11211_v17, 9  ;;  %v5432_v33 = vrot.slane %v5431_v62, 4 }
 0x34d   : > { %12508 = vst [vmem:[#allocation45_spill] sm:$0xff] %v11204_v23  ;;  %v5487_v23 = vshrl.u32 %v5333_v27, 16  ;;  %v5445_v53 = vor.u32 %v5444_v61, %v5441_v30  ;;  %v5460_v40 = vrot.slane %v5458_v13, 5  ;;  %v5465_v18 = vrot.slane %v5463_v63, 4  ;;  %v5334_v7 = vld [vmem:[#allocation2 + $0x58] sm:$0xf] }
 0x34e   : > { %v5413_v3 = vsel %vm10104_vm13, %v5408_v12, %v5412_v42  ;;  %v5468_v47 = vrot.slane %v5466_v54, 5  ;;  %v4372_v12 = vld [vmem:[#allocation2 + $0xb8] sm:$0xf]  ;;  %v5455_v42 = vor.u32 %v5454_v5, %v11213_v19  ;;  %v11227_v55 = vrot.slane %v5472_v6, 5  ;;  %v4370_v63 = vld [vmem:[#allocation2 + $0xb0] sm:$0x1] }
 0x34f   : > { %v5478_v45 = vrot.slane %v5476_v1, 4  ;;  %v5482_v17 = vshll.u32 %v5332_v21, 16  ;;  %v12510_v13 = vcombine.low %v11059_v39, %v11040_v9  ;;  %v11234_v62 = vcombine.low %v5403_v2, %v5413_v3  ;;  %v6153_v30 = vld [vmem:[#allocation2 + $0xcc] sm:$0xe]  ;;  %v6154_v27 = vld [vmem:[#allocation2 + $0xd0] sm:$0xf] }
 0x350   : > { %v5427_v43 = vsel %vm10104_vm13, %v11219_v57, %v11173_v52  ;;  %v5437_v50 = vsel %vm10104_vm13, %v5432_v33, %v5436_v0  ;;  %v5489_v61 = vrot.slane %v5487_v23, 4  ;;  %v6155_v54 = vld [vmem:[#allocation2 + $0xd4] sm:$0x1]  ;;  %v8229_v5 = vrot.slane %v6153_v30, 9  ;;  %v4373_v39 = vld [vmem:[#allocation2 + $0xbc] sm:$0x1] }
 0x351   : > { %v6311_v9 = vrot.slane %v6154_v27, 5  ;;  %v5469_v6 = vor.u32 %v5468_v47, %v5465_v18  ;;  %v5496_v1 = vshll.u32 %v5334_v7, 16  ;;  %v5500_v2 = vshrl.u32 %v5334_v7, 16  ;;  %v5335_v7 = vld [vmem:[#allocation2 + $0x5c] sm:$0x1] }
 0x352   : > { %8886 = vmatmul.mubr.msk.bf16.vlgmr.msra.gmra.mrb[120].mxu1 %vm1508_vm10, %v12509_v10  ;;  %v6314_v10 = vrot.slane %v6155_v54, 5  ;;  %v5446_v3 = vrot.slane %v5445_v53, 4  ;;  %v5456_v21 = vrot.slane %v5455_v42, 4  ;;  %v4525_v0 = vrot.slane %v4372_v12, 5 }
 0x353   : > { %8952 = vmatpush3.bf16.msra.mxu1 %v11005_v48  ;;  %8889 = vmatprep.mubr.msk.bf16.mxu1 %vm1508_vm10, %v12510_v13  ;;  %v5492_v48 = vrot.slane %v5490_v24, 5  ;;  %v6312_v52 = vsel %vm10726_vm0, %v8229_v5, %v6311_v9  ;;  %v6313_v57 = vrot.slane %v6311_v9, 4  ;;  %v4521_v13 = vrot.slane %v4370_v63, 5  ;;  %v5336_v24 = vld [vmem:[#allocation2 + $0x60] sm:$0xf] }
 0x354   : > { %v5479_v33 = vor.u32 %v5478_v45, %v11227_v55  ;;  %v5484_v23 = vrot.slane %v5482_v17, 5  ;;  %v4528_v31 = vrot.slane %v4373_v39, 5  ;;  %v5461_v30 = vsel %vm10104_vm13, %v5456_v21, %v5460_v40  ;;  %v5337_v17 = vld [vmem:[#allocation2 + $0x64] sm:$0xf]  ;;  %v5338_v39 = vld [vmem:[#allocation2 + $0x68] sm:$0x1] }
 0x355   : > { %v5493_v47 = vor.u32 %v5492_v48, %v5489_v61  ;;  %v6315_v18 = vsel %vm10726_vm0, %v6313_v57, %v6314_v10  ;;  %v5470_v53 = vrot.slane %v5469_v6, 4  ;;  %v11249_v42 = vrot.slane %v5496_v1, 5  ;;  %v11290_v21 = vld [vmem:[#allocation2 + $0x70] sm:$0xf] }
 0x356   : > { %v5502_v27 = vrot.slane %v5500_v2, 4  ;;  %v8245_v54 = vcombine.low %v6312_v52, %v6315_v18  ;;  %v12511_v12 = vcombine.low %v11063_v58, %v11045_v25  ;;  %v4527_v45 = vrot.slane %v4525_v0, 4  ;;  %v11282_v2 = vld [vmem:[#allocation2 + $0xc8] sm:$0x1]  ;;  %v5342_v18 = vld [vmem:[#allocation2 + $0x78] sm:$0xf] }
 0x357   : > { %v5451_v40 = vsel %vm10104_vm13, %v5446_v3, %v11213_v19  ;;  %v5511_v63 = vshrl.u32 %v5336_v24, 16  ;;  %v5514_v61 = vshll.u32 %v5336_v24, 16  ;;  %v12512_v48 = vcombine.low %v11078_v41, %v11067_v16  ;;  %v4374_v41 = vld [vmem:[#allocation2 + $0xc0] sm:$0xe] }
 0x358   : > { %v11264_v5 = vsel %vm10726_vm0, %v8116_v4, %v4525_v0  ;;  %v11266_v25 = vcombine.low %v5427_v43, %v5437_v50  ;;  %v11268_v58 = vcombine.low %v5451_v40, %v5461_v30  ;;  %v5480_v9 = vrot.slane %v5479_v33, 4  ;;  %9016 = vmatmul.mubr.msk.bf16.gmra.mrb[208].mxu0 %vm1508_vm10, %v8245_v54  ;;  %v4375_v4 = vld [vmem:[#allocation2 + $0xc4] sm:$0xf]  ;;  %v5339_v50 = vld [vmem:[#allocation2 + $0x6c] sm:$0xf] }
 0x359   : > { %v11274_v19 = vsel %vm10726_vm0, %v11190_v32, %v4521_v13  ;;  %v11278_v16 = vsel %vm10726_vm0, %v4527_v45, %v4528_v31  ;;  %v11280_v6 = vrot.slane %v5493_v47, 4  ;;  %v5506_v43 = vshll.u32 %v5335_v7, 16  ;;  %v5343_v45 = vld [vmem:[#allocation2 + $0x7c] sm:$0xf]  ;;  %v2452_v7 = vld [vmem:[#allocation3 + $0x8] sm:$0xff] }
 0x35a   : > { %8890 = vmatmul.mubr.msk.bf16.gmra.mrb[124].mxu1 %vm1508_vm10, %v12511_v12  ;;  %v5475_v10 = vsel %vm10104_vm13, %v5470_v53, %v11227_v55  ;;  %v5485_v32 = vsel %vm10104_vm13, %v5480_v9, %v5484_v23  ;;  %v5503_v3 = vor.u32 %v5502_v27, %v11249_v42  ;;  %v5520_v31 = vshll.u32 %v5337_v17, 16 }
 0x35b   : > { %8893 = vmatprep.mubr.msk.bf16.mxu1 %vm1508_vm10, %v12512_v48  ;;  %v5513_v57 = vrot.slane %v5511_v63, 4  ;;  %v5516_v13 = vrot.slane %v5514_v61, 5  ;;  %v5524_v0 = vshrl.u32 %v5337_v17, 16  ;;  %v5530_v33 = vshll.u32 %v5338_v39, 16 }
 0x35c   : > { %v8745_v1 = vpop.f32.mrb[20].mxu1  ;;  %v8117_v30 = vrot.slane %v4374_v41, 9  ;;  %v4532_v47 = vrot.slane %v4375_v4, 5  ;;  %v11300_v27 = vcombine.low %v5475_v10, %v5485_v32  ;;  %v11306_v12 = vrot.slane %v5506_v43, 5  ;;  %v5345_v10 = vld [vmem:[#allocation2 + $0x84] sm:$0xf] }
 0x35d   : > { %1752 = vst.msk [vmem:[#allocation3 + $0xf0] sm:$0xff] %vm1508_vm10, %v8745_v1  ;;  %v1707_v52 = vpop.f32.mrb[21].mxu1  ;;  %v5504_v17 = vrot.slane %v5503_v3, 4  ;;  %v11311_v63 = vrot.slane %v5520_v31, 5  ;;  %v5535_v61 = vshrl.u32 %v5339_v50, 16  ;;  %v5538_v48 = vshll.u32 %v5339_v50, 16 }
 0x35e   : > { %1750 = vst.msk [vmem:[#allocation3 + $0xe0] sm:$0xff] %vm1508_vm10, %v1707_v52  ;;  %v8746_v24 = vpop.f32.mrb[22].mxu1  ;;  %12513 = vst [vmem:[#allocation46_spill] sm:$0xff] %v11300_v27  ;;  %v12516_v39 = vcombine.low %v11090_v38, %v11084_v14  ;;  %v5517_v41 = vor.u32 %v5516_v13, %v5513_v57  ;;  %v5526_v4 = vrot.slane %v5524_v0, 4  ;;  %v11319_v43 = vrot.slane %v5530_v33, 5  ;;  %v2453_v50 = vld [vmem:[#allocation3 + $0x10] sm:$0xff] }
 0x35f   : > { %1753 = vst.msk [vmem:[#allocation3 + $0xf8] sm:$0xff] %vm1508_vm10, %v8746_v24  ;;  %v1710_v53 = vpop.f32.mrb[23].mxu1  ;;  %v5544_v1 = vshll.u32 %v11290_v21, 16  ;;  %v12518_v3 = vcombine.low %v11100_v20, %v11094_v22  ;;  %v11330_v14 = vsel %vm10726_vm0, %v8117_v30, %v4532_v47  ;;  %v4534_v38 = vrot.slane %v4532_v47, 4  ;;  %v2451_v13 = vld [vmem:[#allocation3] sm:$0xff] }
 0x360   : > { %1751 = vst.msk [vmem:[#allocation3 + $0xe8] sm:$0xff] %vm1508_vm10, %v1710_v53  ;;  %v5548_v31 = vshrl.u32 %v11290_v21, 16  ;;  %v5559_v52 = vshrl.u32 %v5342_v18, 16  ;;  %v5509_v0 = vsel %vm10104_vm13, %v5504_v17, %v11306_v12  ;;  %v5341_v33 = vld [vmem:[#allocation2 + $0x74] sm:$0x1]  ;;  %v5562_v22 = vshll.u32 %v5342_v18, 16 }
 0x361   : > { %v5568_v20 = vshll.u32 %v5343_v45, 16  ;;  %v5572_v24 = vshrl.u32 %v5343_v45, 16  ;;  %v5540_v30 = vrot.slane %v5538_v48, 5  ;;  %v5583_v23 = vshrl.u32 %v5345_v10, 16  ;;  %v5344_v12 = vld [vmem:[#allocation2 + $0x80] sm:$0x1] }
 0x362   : > { %v11309_v40 = vpop.f32.mrb[140].mxu0  ;;  %8894 = vmatmul.mubr.msk.bf16.gmra.mrb[128].mxu1 %vm1508_vm10, %v12516_v39  ;;  %v2454_v39 = vld [vmem:[#allocation3 + $0x18] sm:$0xff]  ;;  %v5586_v47 = vshll.u32 %v5345_v10, 16  ;;  %v11338_v54 = vrot.slane %v5517_v41, 4  ;;  %v5554_v45 = vshll.u32 %v5341_v33, 16  ;;  %v5564_v10 = vrot.slane %v5562_v22, 5 }
 0x363   : > { %12514 = vst [vmem:[#allocation47_spill] sm:$0xff] %v11309_v40  ;;  %v11313_v9 = vpop.f32.mrb[141].mxu0  ;;  %8897 = vmatprep.mubr.msk.bf16.mxu1 %vm1508_vm10, %v12518_v3  ;;  %v5537_v3 = vrot.slane %v5535_v61, 4  ;;  %v5561_v40 = vrot.slane %v5559_v52, 4  ;;  %v5574_v41 = vrot.slane %v5572_v24, 4  ;;  %v5585_v27 = vrot.slane %v5583_v23, 4 }
 0x364   : > { %12515 = vst [vmem:[#allocation48_spill] sm:$0xff] %v11313_v9  ;;  %v11322_v32 = vpop.f32.mrb[142].mxu0  ;;  %v8751_v53 = vpop.f32.mrb[24].mxu1  ;;  %v5550_v9 = vrot.slane %v5548_v31, 4  ;;  %v12520_v31 = vcombine.low %v11104_v36, %v11108_v15  ;;  %v5578_v33 = vshll.u32 %v5344_v12, 16  ;;  %v5592_v22 = vshll.u32 %v5346_v35, 16 }
 0x365   : > { %12517 = vst [vmem:[#allocation49_spill] sm:$0xff] %v11322_v32  ;;  %v11333_v57 = vpop.f32.mrb[143].mxu0  ;;  %v2485_v55 = vadd.f32 %v8751_v53, %v2453_v50  ;;  %v2324_v21 = vpop.f32.mrb[25].mxu1  ;;  %v11341_v32 = vrot.slane %v5544_v1, 5  ;;  %v11344_v50 = vrot.slane %v5568_v20, 5  ;;  %v5541_v1 = vor.u32 %v5540_v30, %v5537_v3  ;;  %v2455_v3 = vld [vmem:[#allocation3 + $0x20] sm:$0xff] }
 0x366   : > { %12519 = vst [vmem:[#allocation50_spill] sm:$0xff] %v11333_v57  ;;  %v5527_v57 = vor.u32 %v5526_v4, %v11311_v63  ;;  %v2483_v17 = vadd.f32 %v2451_v13, %v2324_v21  ;;  %v8752_v18 = vpop.f32.mrb[26].mxu1  ;;  %v5348_v53 = vld [vmem:[#allocation2 + $0x90] sm:$0xf]  ;;  %v5588_v13 = vrot.slane %v5586_v47, 5  ;;  %v12522_v23 = vcombine.low %v11114_v11, %v11122_v34 }
 0x367   : > { %2517 = vst.msk [vmem:[#allocation3 + $0x10] sm:$0xff] %vm1508_vm10, %v2485_v55  ;;  %v2486_v61 = vadd.f32 %v8752_v18, %v2454_v39  ;;  %v2327_v48 = vpop.f32.mrb[27].mxu1  ;;  %v12521_v55 = vsel %vm10104_vm13, %v11280_v6, %v11249_v42  ;;  %v5551_v15 = vor.u32 %v5550_v9, %v11341_v32  ;;  %v5607_v20 = vshrl.u32 %v5348_v53, 16  ;;  %v2457_v39 = vld [vmem:[#allocation3 + $0x30] sm:$0xff]  ;;  %v2458_v9 = vld [vmem:[#allocation3 + $0x38] sm:$0xff] }
 0x368   : > { %2515 = vst.msk [vmem:[#allocation3] sm:$0xff] %vm1508_vm10, %v2483_v17  ;;  %v2484_v4 = vadd.f32 %v2452_v7, %v2327_v48  ;;  %v11357_v52 = vcombine.low %v12521_v55, %v5509_v0  ;;  %v5596_v7 = vshrl.u32 %v5346_v35, 16  ;;  %v5528_v36 = vrot.slane %v5527_v57, 4  ;;  %v5347_v47 = vld [vmem:[#allocation2 + $0x8c] sm:$0x1] }
 0x369   : > { %2518 = vst.msk [vmem:[#allocation3 + $0x18] sm:$0xff] %vm1508_vm10, %v2486_v61  ;;  %v5610_v24 = vshll.u32 %v5348_v53, 16  ;;  %v12523_v42 = vrot.slane %v11282_v2, 5  ;;  %v5523_v35 = vsel %vm10104_vm13, %v11338_v54, %v11311_v63  ;;  %v5565_v34 = vor.u32 %v5564_v10, %v5561_v40  ;;  %v5349_v54 = vld [vmem:[#allocation2 + $0x94] sm:$0xf] }
 0x36a   : > { %8898 = vmatmul.mubr.msk.bf16.gmra.mrb[132].mxu1 %vm1508_vm10, %v12520_v31  ;;  %2516 = vst.msk [vmem:[#allocation3 + $0x8] sm:$0xff] %vm1508_vm10, %v2484_v4  ;;  %v5575_v11 = vor.u32 %v5574_v41, %v11344_v50  ;;  %v5533_v0 = vsel %vm10104_vm13, %v5528_v36, %v11319_v43  ;;  %v5542_v30 = vrot.slane %v5541_v1, 4  ;;  %v5556_v2 = vrot.slane %v5554_v45, 5  ;;  %v5350_v48 = vld [vmem:[#allocation2 + $0x98] sm:$0x1]  ;;  %v2456_v45 = vld [vmem:[#allocation3 + $0x28] sm:$0xff] }
 0x36b   : > { %8901 = vmatprep.mubr.msk.bf16.mxu1 %vm1508_vm10, %v12522_v23  ;;  %v11369_v6 = vsel %vm10726_vm0, %v4534_v38, %v12523_v42  ;;  %v5589_v37 = vor.u32 %v5588_v13, %v5585_v27  ;;  %v5580_v12 = vrot.slane %v5578_v33, 5  ;;  %v11379_v17 = vrot.slane %v5592_v22, 5  ;;  %v5351_v22 = vld [vmem:[#allocation2 + $0x9c] sm:$0xf]  ;;  %v2461_v42 = vld [vmem:[#allocation3 + $0x50] sm:$0xff] }
 0x36c   : > { %v8755_v57 = vpop.f32.mrb[28].mxu1  ;;  %v5598_v18 = vrot.slane %v5596_v7, 4  ;;  %v5552_v61 = vrot.slane %v5551_v15, 4  ;;  %v5609_v10 = vrot.slane %v5607_v20, 4  ;;  %v5612_v41 = vrot.slane %v5610_v24, 5 }
 0x36d   : > { %v2489_v38 = vadd.f32 %v8755_v57, %v2457_v39  ;;  %v2340_v21 = vpop.f32.mrb[29].mxu1  ;;  %v5566_v4 = vrot.slane %v5565_v34, 4  ;;  %v5576_v27 = vrot.slane %v5575_v11, 4  ;;  %v5602_v1 = vshll.u32 %v5347_v47, 16  ;;  %v2459_v34 = vld [vmem:[#allocation3 + $0x40] sm:$0xff]  ;;  %v2462_v47 = vld [vmem:[#allocation3 + $0x58] sm:$0xff] }
 0x36e   : > { %v2487_v40 = vadd.f32 %v2455_v3, %v2340_v21  ;;  %v8756_v63 = vpop.f32.mrb[30].mxu1  ;;  %v5557_v31 = vsel %vm10104_vm13, %v5552_v61, %v5556_v2  ;;  %v11385_v55 = vrot.slane %v5589_v37, 4  ;;  %v5616_v33 = vshll.u32 %v5349_v54, 16  ;;  %v5352_v57 = vld [vmem:[#allocation2 + $0xa0] sm:$0xf] }
 0x36f   : > { %2521 = vst.msk [vmem:[#allocation3 + $0x30] sm:$0xff] %vm1508_vm10, %v2489_v38  ;;  %v2490_v43 = vadd.f32 %v8756_v63, %v2458_v9  ;;  %v2343_v53 = vpop.f32.mrb[31].mxu1  ;;  %v12524_v7 = vcombine.low %v11126_v26, %v11130_v49  ;;  %v5581_v23 = vsel %vm10104_vm13, %v5576_v27, %v5580_v12  ;;  %v5599_v36 = vor.u32 %v5598_v18, %v11379_v17  ;;  %v5354_v37 = vld [vmem:[#allocation2 + $0xa8] sm:$0xf]  ;;  %v2460_v12 = vld [vmem:[#allocation3 + $0x48] sm:$0xff] }
 0x370   : > { %2519 = vst.msk [vmem:[#allocation3 + $0x20] sm:$0xff] %vm1508_vm10, %v2487_v40  ;;  %v2488_v13 = vadd.f32 %v2456_v45, %v2343_v53  ;;  %v5620_v15 = vshrl.u32 %v5349_v54, 16  ;;  %v5626_v20 = vshll.u32 %v5350_v48, 16  ;;  %v12525_v24 = vcombine.low %v11144_v51, %v11136_v59  ;;  %v5355_v40 = vld [vmem:[#allocation2 + $0xac] sm:$0xf] }
 0x371   : > { %2522 = vst.msk [vmem:[#allocation3 + $0x38] sm:$0xff] %vm1508_vm10, %v2490_v43  ;;  %v8133_v39 = vcombine.low %v11330_v14, %v11369_v6  ;;  %v11402_v26 = vcombine.low %v5523_v35, %v5533_v0  ;;  %v5547_v49 = vsel %vm10104_vm13, %v5542_v30, %v11341_v32  ;;  %v5613_v3 = vor.u32 %v5612_v41, %v5609_v10 }
 0x372   : > { %8902 = vmatmul.mubr.msk.bf16.gmra.mrb[136].mxu1 %vm1508_vm10, %v12524_v7  ;;  %2520 = vst.msk [vmem:[#allocation3 + $0x28] sm:$0xff] %vm1508_vm10, %v2488_v13  ;;  %v11407_v11 = vcombine.low %v5547_v49, %v5557_v31  ;;  %v5571_v59 = vsel %vm10104_vm13, %v5566_v4, %v11344_v50  ;;  %v5604_v51 = vrot.slane %v5602_v1, 5  ;;  %v5631_v9 = vshrl.u32 %v5351_v22, 16  ;;  %v5357_v1 = vld [vmem:[#allocation2 + $0xb4] sm:$0xf] }
 0x373   : > { %8905 = vmatprep.mubr.msk.bf16.mxu1 %vm1508_vm10, %v12525_v24  ;;  %v11412_v35 = vcombine.low %v5571_v59, %v5581_v23  ;;  %v5595_v32 = vsel %vm10104_vm13, %v11385_v55, %v11379_v17  ;;  %v11418_v0 = vrot.slane %v5616_v33, 5  ;;  %v5634_v30 = vshll.u32 %v5351_v22, 16  ;;  %v5358_v17 = vld [vmem:[#allocation2 + $0xb8] sm:$0xf]  ;;  %v11434_v33 = vld [vmem:[#allocation2 + $0xa4] sm:$0x1] }
 0x374   : > { %v8759_v2 = vpop.f32.mrb[32].mxu1  ;;  %v5600_v50 = vrot.slane %v5599_v36, 4  ;;  %v11420_v18 = vrot.slane %v5620_v15, 4  ;;  %v11422_v54 = vrot.slane %v5626_v20, 5  ;;  %v11424_v48 = vrot.slane %v5613_v3, 4 }
 0x375   : > { %v2493_v38 = vadd.f32 %v8759_v2, %v2461_v42  ;;  %v2356_v21 = vpop.f32.mrb[33].mxu1  ;;  %v5640_v10 = vshll.u32 %v5352_v57, 16  ;;  %v5644_v41 = vshrl.u32 %v5352_v57, 16  ;;  %v11427_v45 = vrot.slane %v5631_v9, 4  ;;  %v5360_v3 = vld [vmem:[#allocation2 + $0xc0] sm:$0xf] }
 0x376   : > { %v2491_v63 = vadd.f32 %v2459_v34, %v2356_v21  ;;  %v8760_v61 = vpop.f32.mrb[34].mxu1  ;;  %v5655_v4 = vshrl.u32 %v5354_v37, 16  ;;  %v5658_v27 = vshll.u32 %v5354_v37, 16  ;;  %v5605_v55 = vsel %vm10104_vm13, %v5600_v50, %v5604_v51  ;;  %v2465_v34 = vld [vmem:[#allocation3 + $0x70] sm:$0xff]  ;;  %v5356_v51 = vld [vmem:[#allocation2 + $0xb0] sm:$0x1] }
 0x377   : > { %2525 = vst.msk [vmem:[#allocation3 + $0x50] sm:$0xff] %vm1508_vm10, %v2493_v38  ;;  %v2494_v43 = vadd.f32 %v8760_v61, %v2462_v47  ;;  %v2359_v53 = vpop.f32.mrb[35].mxu1  ;;  %v11436_v22 = vrot.slane %v5634_v30, 5  ;;  %v5664_v7 = vshll.u32 %v5355_v40, 16  ;;  %v12526_v23 = vcombine.low %v11148_v60, %v11163_v46  ;;  %v5361_v50 = vld [vmem:[#allocation2 + $0xc4] sm:$0xf] }
 0x378   : > { %2523 = vst.msk [vmem:[#allocation3 + $0x40] sm:$0xff] %vm1508_vm10, %v2491_v63  ;;  %v2492_v13 = vadd.f32 %v2460_v12, %v2359_v53  ;;  %v5623_v15 = vor.u32 %v11420_v18, %v11418_v0  ;;  %v5668_v20 = vshrl.u32 %v5355_v40, 16  ;;  %v5688_v24 = vshll.u32 %v5358_v17, 16 }
 0x379   : > { %2526 = vst.msk [vmem:[#allocation3 + $0x58] sm:$0xff] %vm1508_vm10, %v2494_v43  ;;  %v5692_v49 = vshrl.u32 %v5358_v17, 16  ;;  %v12527_v42 = vcombine.low %v11159_v8, %v11208_v44  ;;  %v11454_v46 = vrot.slane %v5640_v10, 5  ;;  %v5646_v59 = vrot.slane %v5644_v41, 4  ;;  %v5359_v44 = vld [vmem:[#allocation2 + $0xbc] sm:$0x1] }
 0x37a   : > { %v11430_v31 = vpop.f32.mrb[144].mxu0  ;;  %8906 = vmatmul.mubr.msk.bf16.gmra.mrb[140].mxu1 %vm1508_vm10, %v12526_v23  ;;  %2524 = vst.msk [vmem:[#allocation3 + $0x48] sm:$0xff] %vm1508_vm10, %v2492_v13  ;;  %v5679_v57 = vshrl.u32 %v5357_v1, 16  ;;  %v5682_v9 = vshll.u32 %v5357_v1, 16  ;;  %v11458_v47 = vcombine.low %v5595_v32, %v5605_v55  ;;  %v5650_v30 = vshll.u32 %v11434_v33, 16  ;;  %v2463_v32 = vld [vmem:[#allocation3 + $0x60] sm:$0xff] }
 0x37b   : > { %v11443_v36 = vpop.f32.mrb[145].mxu0  ;;  %8909 = vmatprep.mubr.msk.bf16.mxu1 %vm1508_vm10, %v12527_v42  ;;  %v11461_v37 = vrot.slane %v5655_v4, 4  ;;  %v11463_v8 = vrot.slane %v5658_v27, 5  ;;  %v5637_v21 = vor.u32 %v11436_v22, %v11427_v45  ;;  %v11467_v12 = vrot.slane %v5664_v7, 5  ;;  %v2466_v4 = vld [vmem:[#allocation3 + $0x78] sm:$0xff]  ;;  %v2464_v33 = vld [vmem:[#allocation3 + $0x68] sm:$0xff] }
 0x37c   : > { %v11452_v60 = vpop.f32.mrb[146].mxu0  ;;  %v5703_v18 = vshrl.u32 %v5360_v3, 16  ;;  %v5706_v40 = vshll.u32 %v5360_v3, 16  ;;  %v5670_v10 = vrot.slane %v5668_v20, 4  ;;  %v11469_v41 = vrot.slane %v5688_v24, 5 }
 0x37d   : > { %v11456_v2 = vpop.f32.mrb[147].mxu0  ;;  %v8763_v38 = vpop.f32.mrb[36].mxu1  ;;  %v5694_v17 = vrot.slane %v5692_v49, 4  ;;  %v5647_v27 = vor.u32 %v5646_v59, %v11454_v46  ;;  %v5681_v1 = vrot.slane %v5679_v57, 4  ;;  %v5684_v13 = vrot.slane %v5682_v9, 5 }
 0x37e   : > { %v2497_v63 = vadd.f32 %v8763_v38, %v2465_v34  ;;  %v2372_v61 = vpop.f32.mrb[37].mxu1  ;;  %v5674_v22 = vshll.u32 %v5356_v51, 16  ;;  %v5698_v7 = vshll.u32 %v5359_v44, 16  ;;  %v5712_v23 = vshll.u32 %v5361_v50, 16  ;;  %v5362_v38 = vld [vmem:[#allocation2 + $0xc8] sm:$0x1] }
 0x37f   : > { %v2495_v43 = vadd.f32 %v2463_v32, %v2372_v61  ;;  %v8764_v53 = vpop.f32.mrb[38].mxu1  ;;  %v5705_v49 = vrot.slane %v5703_v18, 4  ;;  %v5708_v3 = vrot.slane %v5706_v40, 5  ;;  %v5716_v42 = vshrl.u32 %v5361_v50, 16 }
 0x380   : > { %2529 = vst.msk [vmem:[#allocation3 + $0x70] sm:$0xff] %vm1508_vm10, %v2497_v63  ;;  %v2498_v45 = vadd.f32 %v8764_v53, %v2466_v4  ;;  %v2375_v55 = vpop.f32.mrb[39].mxu1  ;;  %v12528_v59 = vcombine.low %v11188_v28, %v11274_v19  ;;  %v5624_v51 = vrot.slane %v5623_v15, 4  ;;  %v5661_v57 = vor.u32 %v11463_v8, %v11461_v37 }
 0x381   : > { %2527 = vst.msk [vmem:[#allocation3 + $0x60] sm:$0xff] %vm1508_vm10, %v2495_v43  ;;  %v2496_v20 = vadd.f32 %v2464_v33, %v2375_v55  ;;  %v5671_v9 = vor.u32 %v5670_v10, %v11467_v12  ;;  %v5695_v44 = vor.u32 %v5694_v17, %v11469_v41  ;;  %v12529_v18 = vcombine.low %v11264_v5, %v11278_v16  ;;  %v2469_v16 = vld [vmem:[#allocation3 + $0x90] sm:$0xff] }
 0x382   : > { %v11474_v24 = vpop.f32.mrb[148].mxu0  ;;  %2530 = vst.msk [vmem:[#allocation3 + $0x78] sm:$0xff] %vm1508_vm10, %v2498_v45  ;;  %8910 = vmatmul.mubr.msk.bf16.gmra.mrb[144].mxu1 %vm1508_vm10, %v12528_v59  ;;  %v5619_v28 = vsel %vm10104_vm13, %v11424_v48, %v11418_v0  ;;  %v5638_v19 = vrot.slane %v5637_v21, 4  ;;  %v5652_v15 = vrot.slane %v5650_v30, 5  ;;  %v5685_v37 = vor.u32 %v5684_v13, %v5681_v1  ;;  %v2467_v30 = vld [vmem:[#allocation3 + $0x80] sm:$0xff]  ;;  %v2470_v21 = vld [vmem:[#allocation3 + $0x98] sm:$0xff] }
 0x383   : > { %v11477_v34 = vpop.f32.mrb[149].mxu0  ;;  %2528 = vst.msk [vmem:[#allocation3 + $0x68] sm:$0xff] %vm1508_vm10, %v2496_v20  ;;  %8913 = vmatprep.mubr.msk.bf16.mxu1 %vm1508_vm10, %v12529_v18  ;;  %v5629_v40 = vsel %vm10104_vm13, %v5624_v51, %v11422_v54  ;;  %v5648_v63 = vrot.slane %v5647_v27, 4  ;;  %v5676_v61 = vrot.slane %v5674_v22, 5  ;;  %v5700_v32 = vrot.slane %v5698_v7, 5 }
 0x384   : > { %v11488_v50 = vpop.f32.mrb[150].mxu0  ;;  %v5709_v10 = vor.u32 %v5708_v3, %v5705_v49  ;;  %v11503_v17 = vrot.slane %v5712_v23, 5  ;;  %v5718_v43 = vrot.slane %v5716_v42, 4  ;;  %v5722_v53 = vshll.u32 %v5362_v38, 16  ;;  %v5363_v22 = vld [vmem:[#allocation2 + $0xcc] sm:$0xf] }
 0x385   : > { %v11498_v8 = vpop.f32.mrb[151].mxu0  ;;  %v8767_v5 = vpop.f32.mrb[40].mxu1  ;;  %v5662_v4 = vrot.slane %v5661_v57, 4  ;;  %v5672_v1 = vrot.slane %v5671_v9, 4  ;;  %v5696_v13 = vrot.slane %v5695_v44, 4  ;;  %v11505_v54 = vcombine.low %v5619_v28, %v5629_v40  ;;  %v2468_v49 = vld [vmem:[#allocation3 + $0x88] sm:$0xff] }
 0x386   : > { %v2501_v0 = vadd.f32 %v8767_v5, %v2469_v16  ;;  %v2388_v48 = vpop.f32.mrb[41].mxu1  ;;  %v5643_v27 = vsel %vm10104_vm13, %v5638_v19, %v11454_v46  ;;  %v5686_v33 = vrot.slane %v5685_v37, 4  ;;  %v5364_v7 = vld [vmem:[#allocation2 + $0xd0] sm:$0xf]  ;;  %v5653_v3 = vsel %vm10104_vm13, %v5648_v63, %v5652_v15  ;;  %v5365_v28 = vld [vmem:[#allocation2 + $0xd4] sm:$0x1] }
 0x387   : > { %v2499_v45 = vadd.f32 %v2467_v30, %v2388_v48  ;;  %v8768_v55 = vpop.f32.mrb[42].mxu1  ;;  %v5677_v42 = vsel %vm10104_vm13, %v5672_v1, %v5676_v61  ;;  %v5701_v59 = vsel %vm10104_vm13, %v5696_v13, %v5700_v32  ;;  %v11520_v57 = vrot.slane %v5709_v10, 4  ;;  %v8264_v61 = vld [vmem:[%s9896_s16 + $0x10] sm:$0xf]  ;;  %v8265_v16 = vld [vmem:[%s9896_s16 + $0x14] sm:$0xf] }
 0x388   : > { %2533 = vst.msk [vmem:[#allocation3 + $0x90] sm:$0xff] %vm1508_vm10, %v2501_v0  ;;  %v2502_v23 = vadd.f32 %v8768_v55, %v2470_v21  ;;  %v2391_v20 = vpop.f32.mrb[43].mxu1  ;;  %v5719_v9 = vor.u32 %v5718_v43, %v11503_v17  ;;  %v11523_v44 = vrot.slane %v5722_v53, 5  ;;  %v5667_v18 = vsel %vm10104_vm13, %v5662_v4, %v11467_v12  ;;  %v8263_v12 = vld [vmem:[%s9896_s16 + $0xc] sm:$0xf]  ;;  %v2473_v0 = vld [vmem:[#allocation3 + $0xb0] sm:$0xff] }
 0x389   : > { %2531 = vst.msk [vmem:[#allocation3 + $0x80] sm:$0xff] %vm1508_vm10, %v2499_v45  ;;  %v2500_v46 = vadd.f32 %v2468_v49, %v2391_v20  ;;  %v5727_v19 = vshrl.u32 %v5363_v22, 16  ;;  %v5730_v15 = vshll.u32 %v5363_v22, 16  ;;  %v5736_v37 = vshll.u32 %v5364_v7, 16  ;;  %v2471_v13 = vld [vmem:[#allocation3 + $0xa0] sm:$0xff] }
 0x38a   : > { %v11518_v51 = vpop.f32.mrb[152].mxu0  ;;  %2534 = vst.msk [vmem:[#allocation3 + $0x98] sm:$0xff] %vm1508_vm10, %v2502_v23  ;;  %8914 = vmatmul.mubr.msk.bf16.gmra.mrb[148].mxu1 %vm1508_vm10, %v8133_v39  ;;  %v11540_v63 = vcombine.low %v5643_v27, %v5653_v3  ;;  %v11542_v14 = vcombine.low %v5667_v18, %v5677_v42  ;;  %v5691_v6 = vsel %vm10104_vm13, %v5686_v33, %v11469_v41  ;;  %v5740_v39 = vshrl.u32 %v5364_v7, 16  ;;  %v2474_v7 = vld [vmem:[#allocation3 + $0xb8] sm:$0xff] }
 0x38b   : > { %v11526_v38 = vpop.f32.mrb[153].mxu0  ;;  %2532 = vst.msk [vmem:[#allocation3 + $0x88] sm:$0xff] %vm1508_vm10, %v2500_v46  ;;  %8953 = vmatprep.mubr.msk.bf16.mxu1 %vm1508_vm10, %v11198_v56  ;;  %v11551_v5 = vcombine.low %v5691_v6, %v5701_v59  ;;  %v6846_v10 = vshrl.u32 %v8263_v12, 16  ;;  %v6849_v43 = vshll.u32 %v8263_v12, 16  ;;  %v6855_v53 = vshll.u32 %v8264_v61, 16  ;;  %v2472_v59 = vld [vmem:[#allocation3 + $0xa8] sm:$0xff] }
 0x38c   : > { %v11536_v40 = vpop.f32.mrb[154].mxu0  ;;  %v11554_v48 = vrot.slane %v5719_v9, 4  ;;  %v5746_v30 = vshll.u32 %v5365_v28, 16  ;;  %v6859_v21 = vshrl.u32 %v8264_v61, 16  ;;  %v6865_v4 = vshll.u32 %v8265_v16, 16 }
 0x38d   : > { %v11549_v32 = vpop.f32.mrb[155].mxu0  ;;  %v8771_v56 = vpop.f32.mrb[44].mxu1  ;;  %v6848_v45 = vrot.slane %v6846_v10, 4  ;;  %v6851_v55 = vrot.slane %v6849_v43, 5  ;;  %v6857_v27 = vrot.slane %v6855_v53, 5  ;;  %v11556_v23 = vrot.slane %v5727_v19, 4 }
 0x38e   : > { %v2505_v1 = vadd.f32 %v8771_v56, %v2473_v0  ;;  %v2404_v41 = vpop.f32.mrb[45].mxu1  ;;  %v11558_v20 = vrot.slane %v5730_v15, 5  ;;  %v6861_v49 = vrot.slane %v6859_v21, 4  ;;  %v11561_v46 = vrot.slane %v5736_v37, 5  ;;  %v8266_v61 = vld [vmem:[%s9896_s16 + $0x18] sm:$0xf] }
 0x38f   : > { %v2503_v33 = vadd.f32 %v2471_v13, %v2404_v41  ;;  %v8772_v22 = vpop.f32.mrb[46].mxu1  ;;  %v11563_v9 = vrot.slane %v5740_v39, 4  ;;  %v6852_v18 = vor.u32 %v6851_v55, %v6848_v45  ;;  %v6867_v12 = vrot.slane %v6865_v4, 5  ;;  %v8267_v16 = vld [vmem:[%s9896_s16 + $0x1c] sm:$0xf] }
 0x390   : > { %2537 = vst.msk [vmem:[#allocation3 + $0xb0] sm:$0xff] %vm1508_vm10, %v2505_v1  ;;  %v2506_v3 = vadd.f32 %v8772_v22, %v2474_v7  ;;  %v2407_v42 = vpop.f32.mrb[47].mxu1  ;;  %v6862_v6 = vor.u32 %v6861_v49, %v6857_v27  ;;  %v11583_v10 = vrot.slane %v5746_v30, 5  ;;  %v8268_v53 = vld [vmem:[%s9896_s16 + $0x20] sm:$0xf]  ;;  %v6870_v56 = vshrl.u32 %v8266_v61, 16 }
 0x391   : > { %2535 = vst.msk [vmem:[#allocation3 + $0xa0] sm:$0xff] %vm1508_vm10, %v2503_v33  ;;  %v2504_v28 = vadd.f32 %v2472_v59, %v2407_v42  ;;  %v6853_v43 = vrot.slane %v6852_v18, 4  ;;  %v2477_v21 = vld [vmem:[#allocation3 + $0xd0] sm:$0xff]  ;;  %v6873_v4 = vshll.u32 %v8266_v61, 16  ;;  %v6879_v1 = vshll.u32 %v8267_v16, 16 }
 0x392   : > { %v11566_v19 = vpop.f32.mrb[156].mxu0  ;;  %2538 = vst.msk [vmem:[#allocation3 + $0xb8] sm:$0xff] %vm1508_vm10, %v2506_v3  ;;  %8954 = vmatmul.mubr.msk.bf16.vlgmr.msra.gmra.mrb[152].mxu1 %vm1508_vm10, %v11234_v62  ;;  %v6863_v62 = vrot.slane %v6862_v6, 4  ;;  %v6883_v41 = vshrl.u32 %v8267_v16, 16  ;;  %v5733_v30 = vor.u32 %v11558_v20, %v11556_v23  ;;  %v6872_v55 = vrot.slane %v6870_v56, 4  ;;  %v2475_v6 = vld [vmem:[#allocation3 + $0xc0] sm:$0xff] }
 0x393   : > { %v11575_v37 = vpop.f32.mrb[157].mxu0  ;;  %2536 = vst.msk [vmem:[#allocation3 + $0xa8] sm:$0xff] %vm1508_vm10, %v2504_v28  ;;  %8957 = vmatprep.mubr.msk.bf16.mxu1 %vm1508_vm10, %v11266_v25  ;;  %v6858_v45 = vsel %vm10104_vm13, %v6853_v43, %v6857_v27  ;;  %v6889_v33 = vshll.u32 %v8268_v53, 16  ;;  %v8269_v22 = vld [vmem:[%s9896_s16 + $0x24] sm:$0xf]  ;;  %v6875_v49 = vrot.slane %v6873_v4, 5 }
 0x394   : > { %v11587_v0 = vpop.f32.mrb[158].mxu0  ;;  %v6868_v25 = vsel %vm10104_vm13, %v6863_v62, %v6867_v12  ;;  %v6881_v3 = vrot.slane %v6879_v1, 5  ;;  %v6885_v42 = vrot.slane %v6883_v41, 4  ;;  %v8270_v59 = vld [vmem:[%s9896_s16 + $0x28] sm:$0xf]  ;;  %v6894_v20 = vshrl.u32 %v8269_v22, 16 }
 0x395   : > { %v11591_v13 = vpop.f32.mrb[159].mxu0  ;;  %v8775_v7 = vpop.f32.mrb[48].mxu1  ;;  %v8311_v61 = vcombine.low %v6858_v45, %v6868_v25  ;;  %v6891_v23 = vrot.slane %v6889_v33, 5  ;;  %v2478_v43 = vld [vmem:[#allocation3 + $0xd8] sm:$0xff]  ;;  %v6876_v53 = vor.u32 %v6875_v49, %v6872_v55  ;;  %v8271_v15 = vld [vmem:[%s9896_s16 + $0x2c] sm:$0xf]  ;;  %v5743_v49 = vor.u32 %v11563_v9, %v11561_v46 }
 0x396   : > { %v2509_v18 = vadd.f32 %v8775_v7, %v2477_v21  ;;  %v2420_v28 = vpop.f32.mrb[49].mxu1  ;;  %v6886_v56 = vor.u32 %v6885_v42, %v6881_v3  ;;  %v6897_v39 = vshll.u32 %v8269_v22, 16  ;;  %v2476_v4 = vld [vmem:[#allocation3 + $0xc8] sm:$0xff]  ;;  %v6896_v21 = vrot.slane %v6894_v20, 4 }
 0x397   : > { %v2507_v16 = vadd.f32 %v2475_v6, %v2420_v28  ;;  %v8776_v27 = vpop.f32.mrb[50].mxu1  ;;  %7277 = vrot.lane.b32.xlu0 %v8311_v61, %s9582_s8  ;;  %v6903_v1 = vshll.u32 %v8270_v59, 16  ;;  %v6907_v41 = vshrl.u32 %v8270_v59, 16  ;;  %v6877_v55 = vrot.slane %v6876_v53, 4  ;;  %v8272_v20 = vld [vmem:[%s9896_s16 + $0x30] sm:$0xf] }
 0x398   : > { %2541 = vst.msk [vmem:[#allocation3 + $0xd0] sm:$0xff] %vm1508_vm10, %v2509_v18  ;;  %v2510_v12 = vadd.f32 %v8776_v27, %v2478_v43  ;;  %v2423_v62 = vpop.f32.mrb[51].mxu1  ;;  %v6887_v7 = vrot.slane %v6886_v56, 4  ;;  %v6899_v22 = vrot.slane %v6897_v39, 5  ;;  %v6913_v18 = vshll.u32 %v8271_v15, 16  ;;  %v12530_v39 = vld [vmem:[#allocation46_spill] sm:$0xff] }
 0x399   : > { %2539 = vst.msk [vmem:[#allocation3 + $0xc0] sm:$0xff] %vm1508_vm10, %v2507_v16  ;;  %v2508_v45 = vadd.f32 %v2476_v4, %v2423_v62  ;;  %v6905_v42 = vrot.slane %v6903_v1, 5  ;;  %v6909_v59 = vrot.slane %v6907_v41, 4  ;;  %v11619_v6 = vrot.slane %v5733_v30, 4  ;;  %v8273_v16 = vld [vmem:[%s9896_s16 + $0x34] sm:$0xf] }
 0x39a   : > { %v11605_v33 = vpop.f32.mrb[160].mxu0  ;;  %2542 = vst.msk [vmem:[#allocation3 + $0xd8] sm:$0xff] %vm1508_vm10, %v2510_v12  ;;  %8958 = vmatmul.mubr.msk.bf16.gmra.mrb[156].mxu1 %vm1508_vm10, %v11268_v58  ;;  %v6882_v61 = vsel %vm10104_vm13, %v6877_v55, %v6881_v3  ;;  %v6892_v58 = vsel %vm10104_vm13, %v6887_v7, %v6891_v23  ;;  %v6900_v9 = vor.u32 %v6899_v22, %v6896_v21  ;;  %v6915_v53 = vrot.slane %v6913_v18, 5  ;;  %v8274_v56 = vld [vmem:[%s9896_s16 + $0x38] sm:$0xf] }
 0x39b   : > { %v11608_v25 = vpop.f32.mrb[161].mxu0  ;;  %2540 = vst.msk [vmem:[#allocation3 + $0xc8] sm:$0xff] %vm1508_vm10, %v2508_v45  ;;  %8961 = vmatprep.mubr.msk.bf16.mxu1 %vm1508_vm10, %v12530_v39  ;;  %v8312_v15 = vcombine.low %v6882_v61, %v6892_v58  ;;  %v6910_v43 = vor.u32 %v6909_v59, %v6905_v42  ;;  %v6918_v12 = vshrl.u32 %v8272_v20, 16  ;;  %v2481_v4 = vld [vmem:[#allocation3 + $0xf0] sm:$0xff]  ;;  %v6921_v1 = vshll.u32 %v8272_v20, 16  ;;  %v2479_v39 = vld [vmem:[#allocation3 + $0xe0] sm:$0xff] }
 0x39c   : > { %v11615_v28 = vpop.f32.mrb[162].mxu0  ;;  %v6901_v30 = vrot.slane %v6900_v9, 4  ;;  %v6927_v41 = vshll.u32 %v8273_v16, 16  ;;  %v6931_v45 = vshrl.u32 %v8273_v16, 16  ;;  %v6937_v7 = vshll.u32 %v8274_v56, 16  ;;  %v2482_v59 = vld [vmem:[#allocation3 + $0xf8] sm:$0xff] }
 0x39d   : > { %v11627_v27 = vpop.f32.mrb[163].mxu0  ;;  %v8779_v62 = vpop.f32.mrb[52].mxu1  ;;  %7279 = vrot.lane.b32.xlu0 %v8312_v15, %s9582_s8  ;;  %v6911_v23 = vrot.slane %v6910_v43, 4  ;;  %v6920_v21 = vrot.slane %v6918_v12, 4  ;;  %v6923_v58 = vrot.slane %v6921_v1, 5  ;;  %v3020_v12 = vld [vmem:[#allocation3] sm:$0xff] }
 0x39e   : > { %v2513_v3 = vadd.f32 %v8779_v62, %v2481_v4  ;;  %v2436_v55 = vpop.f32.mrb[53].mxu1  ;;  %v6906_v18 = vsel %vm10104_vm13, %v6901_v30, %v6905_v42  ;;  %v6929_v9 = vrot.slane %v6927_v41, 5  ;;  %v2480_v62 = vld [vmem:[#allocation3 + $0xe8] sm:$0xff]  ;;  %v11634_v4 = vrot.slane %v5743_v49, 4 }
 0x39f   : > { %v2511_v22 = vadd.f32 %v2479_v39, %v2436_v55  ;;  %v8780_v61 = vpop.f32.mrb[54].mxu1  ;;  %v6916_v15 = vsel %vm10104_vm13, %v6911_v23, %v6915_v53  ;;  %v6933_v43 = vrot.slane %v6931_v45, 4  ;;  %v6924_v1 = vor.u32 %v6923_v58, %v6920_v21  ;;  %v8278_v41 = vld [vmem:[%s9896_s16 + $0x48] sm:$0xf]  ;;  %v8279_v49 = vld [vmem:[%s9896_s16 + $0x4c] sm:$0xf] }
 0x3a0   : > { %2545 = vst.msk [vmem:[#allocation3 + $0xf0] sm:$0xff] %vm1508_vm10, %v2513_v3  ;;  %v2514_v20 = vadd.f32 %v8780_v61, %v2482_v59  ;;  %v2439_v16 = vpop.f32.mrb[55].mxu1  ;;  %v8313_v30 = vcombine.low %v6906_v18, %v6916_v15  ;;  %v6939_v45 = vrot.slane %v6937_v7, 5  ;;  %v8280_v55 = vld [vmem:[%s9896_s16 + $0x50] sm:$0xf]  ;;  %v6966_v39 = vshrl.u32 %v8278_v41, 16 }
 0x3a1   : > { %2543 = vst.msk [vmem:[#allocation3 + $0xe0] sm:$0xff] %vm1508_vm10, %v2511_v22  ;;  %v2512_v56 = vadd.f32 %v2480_v62, %v2439_v16  ;;  %v6934_v53 = vor.u32 %v6933_v43, %v6929_v9  ;;  %v6969_v23 = vshll.u32 %v8278_v41, 16  ;;  %v3022_v21 = vld [vmem:[#allocation3 + $0x10] sm:$0xff]  ;;  %v6925_v61 = vrot.slane %v6924_v1, 4  ;;  %v8276_v41 = vld [vmem:[%s9896_s16 + $0x40] sm:$0xf] }
 0x3a2   : > { %v11639_v42 = vpop.f32.mrb[164].mxu0  ;;  %2546 = vst.msk [vmem:[#allocation3 + $0xf8] sm:$0xff] %vm1508_vm10, %v2514_v20  ;;  %8962 = vmatmul.mubr.msk.bf16.gmra.mrb[160].mxu1 %vm1508_vm10, %v11357_v52  ;;  %7281 = vrot.lane.b32.xlu1 %v8313_v30, %s9582_s8  ;;  %v6975_v59 = vshll.u32 %v8279_v49, 16  ;;  %v6979_v52 = vshrl.u32 %v8279_v49, 16  ;;  %v6985_v18 = vshll.u32 %v8280_v55, 16  ;;  %v5749_v58 = vsel %vm10104_vm13, %v11634_v4, %v11583_v10 }
 0x3a3   : > { %12531 = vst [vmem:[#allocation46_spill] sm:$0xff] %v11639_v42  ;;  %v11648_v3 = vpop.f32.mrb[165].mxu0  ;;  %2544 = vst.msk [vmem:[#allocation3 + $0xe8] sm:$0xff] %vm1508_vm10, %v2512_v56  ;;  %8965 = vmatprep.mubr.msk.bf16.mxu1 %vm1508_vm10, %v11402_v26  ;;  %v6935_v20 = vrot.slane %v6934_v53, 4  ;;  %v6968_v16 = vrot.slane %v6966_v39, 4  ;;  %v6971_v62 = vrot.slane %v6969_v23, 5  ;;  %v6930_v43 = vsel %vm10104_vm13, %v6925_v61, %v6929_v9 }
 0x3a4   : > { %12532 = vst [vmem:[#allocation51_spill] sm:$0xff] %v11648_v3  ;;  %v11654_v22 = vpop.f32.mrb[166].mxu0  ;;  %v8275_v15 = vld [vmem:[%s9896_s16 + $0x3c] sm:$0xf]  ;;  %v6977_v56 = vrot.slane %v6975_v59, 5  ;;  %v6981_v30 = vrot.slane %v6979_v52, 4 }
 0x3a5   : > { %12533 = vst [vmem:[#allocation52_spill] sm:$0xff] %v11654_v22  ;;  %v11659_v7 = vpop.f32.mrb[167].mxu0  ;;  %v8785_v26 = vpop.f32.mrb[56].mxu1  ;;  %v6987_v1 = vrot.slane %v6985_v18, 5  ;;  %v6972_v10 = vor.u32 %v6971_v62, %v6968_v16  ;;  %v6942_v4 = vshrl.u32 %v8275_v15, 16  ;;  %v3023_v23 = vld [vmem:[#allocation3 + $0x18] sm:$0xff] }
 0x3a6   : > { %12534 = vst [vmem:[#allocation53_spill] sm:$0xff] %v11659_v7  ;;  %v3054_v49 = vadd.f32 %v8785_v26, %v3022_v21  ;;  %v2893_v55 = vpop.f32.mrb[57].mxu1  ;;  %v6940_v7 = vsel %vm10104_vm13, %v6935_v20, %v6939_v45  ;;  %v6982_v3 = vor.u32 %v6981_v30, %v6977_v56  ;;  %v8277_v42 = vld [vmem:[%s9896_s16 + $0x44] sm:$0xf]  ;;  %v6945_v9 = vshll.u32 %v8275_v15, 16  ;;  %v3021_v52 = vld [vmem:[#allocation3 + $0x8] sm:$0xff] }
 0x3a7   : > { %v3052_v53 = vadd.f32 %v3020_v12, %v2893_v55  ;;  %v8786_v39 = vpop.f32.mrb[58].mxu1  ;;  %v8314_v22 = vcombine.low %v6930_v43, %v6940_v7  ;;  %v6973_v21 = vrot.slane %v6972_v10, 4  ;;  %v6944_v18 = vrot.slane %v6942_v4, 4  ;;  %v8286_v55 = vld [vmem:[%s9896_s16 + $0x68] sm:$0xf] }
 0x3a8   : > { %3086 = vst.msk [vmem:[#allocation3 + $0x10] sm:$0xff] %vm1508_vm10, %v3054_v49  ;;  %v3055_v61 = vadd.f32 %v8786_v39, %v3023_v23  ;;  %v2896_v59 = vpop.f32.mrb[59].mxu1  ;;  %v6951_v26 = vshll.u32 %v8276_v41, 16  ;;  %v6983_v12 = vrot.slane %v6982_v3, 4  ;;  %v6947_v7 = vrot.slane %v6945_v9, 5  ;;  %v3026_v9 = vld [vmem:[#allocation3 + $0x30] sm:$0xff] }
 0x3a9   : > { %3084 = vst.msk [vmem:[#allocation3] sm:$0xff] %vm1508_vm10, %v3052_v53  ;;  %v3053_v45 = vadd.f32 %v3021_v52, %v2896_v59  ;;  %7283 = vrot.lane.b32.xlu1 %v8314_v22, %s9582_s8  ;;  %v6955_v16 = vshrl.u32 %v8276_v41, 16  ;;  %v12535_v15 = vsel %vm10104_vm13, %v11554_v48, %v11523_v44  ;;  %v12536_v3 = vsel %vm10104_vm13, %v11520_v57, %v11503_v17  ;;  %v8284_v49 = vld [vmem:[%s9896_s16 + $0x60] sm:$0xf] }
 0x3aa   : > { %v11674_v20 = vpop.f32.mrb[168].mxu0  ;;  %3087 = vst.msk [vmem:[#allocation3 + $0x18] sm:$0xff] %vm1508_vm10, %v3055_v61  ;;  %8966 = vmatmul.mubr.msk.bf16.gmra.mrb[164].mxu1 %vm1508_vm10, %v11407_v11  ;;  %v11692_v22 = vcombine.low %v12536_v3, %v12535_v15  ;;  %v6978_v43 = vsel %vm10104_vm13, %v6973_v21, %v6977_v56  ;;  %v6953_v30 = vrot.slane %v6951_v26, 5  ;;  %v6961_v41 = vshll.u32 %v8277_v42, 16  ;;  %v8285_v56 = vld [vmem:[%s9896_s16 + $0x64] sm:$0xf] }
 0x3ab   : > { %v11678_v62 = vpop.f32.mrb[169].mxu0  ;;  %3085 = vst.msk [vmem:[#allocation3 + $0x8] sm:$0xff] %vm1508_vm10, %v3053_v45  ;;  %8969 = vmatprep.mubr.msk.bf16.mxu1 %vm1508_vm10, %v11412_v35  ;;  %v12537_v17 = vsel %vm10104_vm13, %v11619_v6, %v11561_v46  ;;  %v6988_v44 = vsel %vm10104_vm13, %v6983_v12, %v6987_v1  ;;  %v6948_v48 = vor.u32 %v6947_v7, %v6944_v18  ;;  %v6957_v42 = vrot.slane %v6955_v16, 4  ;;  %v3024_v61 = vld [vmem:[#allocation3 + $0x20] sm:$0xff]  ;;  %v8281_v45 = vld [vmem:[%s9896_s16 + $0x54] sm:$0xf] }
 0x3ac   : > { %v11698_v11 = vpop.f32.mrb[170].mxu0  ;;  %v11707_v57 = vcombine.low %v12537_v17, %v5749_v58  ;;  %v8316_v4 = vcombine.low %v6978_v43, %v6988_v44  ;;  %v6963_v53 = vrot.slane %v6961_v41, 5  ;;  %v7014_v35 = vshrl.u32 %v8284_v49, 16  ;;  %v3027_v16 = vld [vmem:[#allocation3 + $0x38] sm:$0xff]  ;;  %v3025_v44 = vld [vmem:[#allocation3 + $0x28] sm:$0xff] }
 0x3ad   : > { %v11713_v10 = vpop.f32.mrb[171].mxu0  ;;  %v7017_v39 = vshll.u32 %v8284_v49, 16  ;;  %v8789_v23 = vpop.f32.mrb[60].mxu1  ;;  %v6949_v46 = vrot.slane %v6948_v48, 4  ;;  %v6958_v6 = vor.u32 %v6957_v42, %v6953_v30  ;;  %v7023_v58 = vshll.u32 %v8285_v56, 16 }
 0x3ae   : > { %v7027_v59 = vshrl.u32 %v8285_v56, 16  ;;  %v3058_v1 = vadd.f32 %v8789_v23, %v3026_v9  ;;  %v2909_v52 = vpop.f32.mrb[61].mxu1  ;;  %7287 = vrot.lane.b32.xlu1 %v8316_v4, %s9582_s8  ;;  %v7016_v21 = vrot.slane %v7014_v35, 4  ;;  %v7033_v26 = vshll.u32 %v8286_v55, 16  ;;  %v8282_v41 = vld [vmem:[%s9896_s16 + $0x58] sm:$0xf] }
 0x3af   : > { %v7019_v18 = vrot.slane %v7017_v39, 5  ;;  %v3056_v12 = vadd.f32 %v3024_v61, %v2909_v52  ;;  %v8790_v7 = vpop.f32.mrb[62].mxu1  ;;  %v6954_v15 = vsel %vm10104_vm13, %v6949_v46, %v6953_v30  ;;  %v6959_v3 = vrot.slane %v6958_v6, 4  ;;  %v8283_v55 = vld [vmem:[%s9896_s16 + $0x5c] sm:$0xf] }
 0x3b0   : > { %v7025_v43 = vrot.slane %v7023_v58, 5  ;;  %3090 = vst.msk [vmem:[#allocation3 + $0x30] sm:$0xff] %vm1508_vm10, %v3058_v1  ;;  %v3059_v49 = vadd.f32 %v8790_v7, %v3027_v16  ;;  %v2912_v17 = vpop.f32.mrb[63].mxu1  ;;  %v7029_v42 = vrot.slane %v7027_v59, 4  ;;  %v7035_v56 = vrot.slane %v7033_v26, 5 }
 0x3b1   : > { %v7020_v48 = vor.u32 %v7019_v18, %v7016_v21  ;;  %3088 = vst.msk [vmem:[#allocation3 + $0x20] sm:$0xff] %vm1508_vm10, %v3056_v12  ;;  %v3057_v4 = vadd.f32 %v3025_v44, %v2912_v17  ;;  %v6964_v30 = vsel %vm10104_vm13, %v6959_v3, %v6963_v53  ;;  %v6990_v39 = vshrl.u32 %v8281_v45, 16  ;;  %v8290_v9 = vld [vmem:[%s9896_s16 + $0x78] sm:$0xf]  ;;  %v8291_v1 = vld [vmem:[%s9896_s16 + $0x7c] sm:$0xf] }
 0x3b2   : > { %v11723_v35 = vpop.f32.mrb[172].mxu0  ;;  %v6993_v23 = vshll.u32 %v8281_v45, 16  ;;  %3091 = vst.msk [vmem:[#allocation3 + $0x38] sm:$0xff] %vm1508_vm10, %v3059_v49  ;;  %8970 = vmatmul.mubr.msk.bf16.gmra.mrb[168].mxu1 %vm1508_vm10, %v11458_v47  ;;  %v8315_v46 = vcombine.low %v6954_v15, %v6964_v30  ;;  %v7030_v58 = vor.u32 %v7029_v42, %v7025_v43  ;;  %v6999_v59 = vshll.u32 %v8282_v41, 16  ;;  %v3030_v3 = vld [vmem:[#allocation3 + $0x50] sm:$0xff]  ;;  %v3028_v42 = vld [vmem:[#allocation3 + $0x40] sm:$0xff] }
 0x3b3   : > { %v11729_v61 = vpop.f32.mrb[173].mxu0  ;;  %v7021_v6 = vrot.slane %v7020_v48, 4  ;;  %3089 = vst.msk [vmem:[#allocation3 + $0x28] sm:$0xff] %vm1508_vm10, %v3057_v4  ;;  %8973 = vmatprep.mubr.msk.bf16.mxu1 %vm1508_vm10, %v11505_v54  ;;  %v6992_v53 = vrot.slane %v6990_v39, 4  ;;  %v7003_v18 = vshrl.u32 %v8282_v41, 16  ;;  %v7009_v26 = vshll.u32 %v8283_v55, 16 }
 0x3b4   : > { %v11735_v52 = vpop.f32.mrb[174].mxu0  ;;  %v6995_v21 = vrot.slane %v6993_v23, 5  ;;  %7285 = vrot.lane.b32.xlu0 %v8315_v46, %s9582_s8  ;;  %v7031_v12 = vrot.slane %v7030_v58, 4  ;;  %v7001_v7 = vrot.slane %v6999_v59, 5  ;;  %v7062_v16 = vshrl.u32 %v8290_v9, 16  ;;  %v3031_v46 = vld [vmem:[#allocation3 + $0x58] sm:$0xff] }
 0x3b5   : > { %v11739_v45 = vpop.f32.mrb[175].mxu0  ;;  %v7026_v47 = vsel %vm10104_vm13, %v7021_v6, %v7025_v43  ;;  %v8793_v15 = vpop.f32.mrb[64].mxu1  ;;  %v7005_v17 = vrot.slane %v7003_v18, 4  ;;  %v7011_v54 = vrot.slane %v7009_v26, 5  ;;  %v7065_v44 = vshll.u32 %v8290_v9, 16  ;;  %v3029_v6 = vld [vmem:[#allocation3 + $0x48] sm:$0xff] }
 0x3b6   : > { %v6996_v49 = vor.u32 %v6995_v21, %v6992_v53  ;;  %v3062_v41 = vadd.f32 %v8793_v15, %v3030_v3  ;;  %v2925_v48 = vpop.f32.mrb[65].mxu1  ;;  %v7036_v55 = vsel %vm10104_vm13, %v7031_v12, %v7035_v56  ;;  %v8292_v4 = vld [vmem:[%s9896_s16 + $0x80] sm:$0xf]  ;;  %v7064_v30 = vrot.slane %v7062_v16, 4  ;;  %v8287_v21 = vld [vmem:[%s9896_s16 + $0x6c] sm:$0xf] }
 0x3b7   : > { %v7071_v43 = vshll.u32 %v8291_v1, 16  ;;  %v3060_v39 = vadd.f32 %v3028_v42, %v2925_v48  ;;  %v8794_v23 = vpop.f32.mrb[66].mxu1  ;;  %v8318_v58 = vcombine.low %v7026_v47, %v7036_v55  ;;  %v7006_v53 = vor.u32 %v7005_v17, %v7001_v7  ;;  %v8288_v12 = vld [vmem:[%s9896_s16 + $0x70] sm:$0xf]  ;;  %v8289_v48 = vld [vmem:[%s9896_s16 + $0x74] sm:$0xf] }
 0x3b8   : > { %v6997_v59 = vrot.slane %v6996_v49, 4  ;;  %3094 = vst.msk [vmem:[#allocation3 + $0x50] sm:$0xff] %vm1508_vm10, %v3062_v41  ;;  %v3063_v9 = vadd.f32 %v8794_v23, %v3031_v46  ;;  %v2928_v18 = vpop.f32.mrb[67].mxu1  ;;  %v7067_v26 = vrot.slane %v7065_v44, 5  ;;  %v7075_v56 = vshrl.u32 %v8291_v1, 16 }
 0x3b9   : > { %v11749_v15 = vrot.slane %v7071_v43, 5  ;;  %3092 = vst.msk [vmem:[#allocation3 + $0x40] sm:$0xff] %vm1508_vm10, %v3060_v39  ;;  %v3061_v16 = vadd.f32 %v3029_v6, %v2928_v18  ;;  %7291 = vrot.lane.b32.xlu1 %v8318_v58, %s9582_s8  ;;  %v7007_v49 = vrot.slane %v7006_v53, 4  ;;  %v7081_v17 = vshll.u32 %v8292_v4, 16  ;;  %v8296_v23 = vld [vmem:[%s9896_s16 + $0x90] sm:$0xf] }
 0x3ba   : > { %v11753_v3 = vpop.f32.mrb[176].mxu0  ;;  %v7002_v47 = vsel %vm10104_vm13, %v6997_v59, %v7001_v7  ;;  %3095 = vst.msk [vmem:[#allocation3 + $0x58] sm:$0xff] %vm1508_vm10, %v3063_v9  ;;  %8974 = vmatmul.mubr.msk.bf16.gmra.mrb[172].mxu1 %vm1508_vm10, %v11540_v63  ;;  %v7068_v44 = vor.u32 %v7067_v26, %v7064_v30  ;;  %v7077_v41 = vrot.slane %v7075_v56, 4  ;;  %v7038_v42 = vshrl.u32 %v8287_v21, 16 }
 0x3bb   : > { %v11761_v1 = vpop.f32.mrb[177].mxu0  ;;  %v7041_v55 = vshll.u32 %v8287_v21, 16  ;;  %3093 = vst.msk [vmem:[#allocation3 + $0x48] sm:$0xff] %vm1508_vm10, %v3061_v16  ;;  %8977 = vmatprep.mubr.msk.bf16.mxu1 %vm1508_vm10, %v11542_v14  ;;  %v7012_v4 = vsel %vm10104_vm13, %v7007_v49, %v7011_v54  ;;  %v7083_v43 = vrot.slane %v7081_v17, 5  ;;  %v7047_v39 = vshll.u32 %v8288_v12, 16  ;;  %v3034_v21 = vld [vmem:[#allocation3 + $0x70] sm:$0xff] }
 0x3bc   : > { %v11767_v7 = vpop.f32.mrb[178].mxu0  ;;  %v7051_v63 = vshrl.u32 %v8288_v12, 16  ;;  %v8317_v30 = vcombine.low %v7002_v47, %v7012_v4  ;;  %v7069_v6 = vrot.slane %v7068_v44, 4  ;;  %v7078_v58 = vor.u32 %v7077_v41, %v11749_v15  ;;  %v3032_v16 = vld [vmem:[#allocation3 + $0x60] sm:$0xff]  ;;  %v3035_v12 = vld [vmem:[#allocation3 + $0x78] sm:$0xff] }
 0x3bd   : > { %v11772_v46 = vpop.f32.mrb[179].mxu0  ;;  %v7040_v59 = vrot.slane %v7038_v42, 4  ;;  %v8797_v53 = vpop.f32.mrb[68].mxu1  ;;  %v7043_v9 = vrot.slane %v7041_v55, 5  ;;  %v7049_v14 = vrot.slane %v7047_v39, 5  ;;  %v7057_v26 = vshll.u32 %v8289_v48, 16 }
 0x3be   : > { %12538 = vst [vmem:[#allocation54_spill] sm:$0xff] %v11772_v46  ;;  %v7053_v18 = vrot.slane %v7051_v63, 4  ;;  %v3066_v54 = vadd.f32 %v8797_v53, %v3034_v21  ;;  %v2941_v56 = vpop.f32.mrb[69].mxu1  ;;  %7289 = vrot.lane.b32.xlu0 %v8317_v30, %s9582_s8  ;;  %v7074_v47 = vsel %vm10104_vm13, %v7069_v6, %v11749_v15  ;;  %v7079_v49 = vrot.slane %v7078_v58, 4  ;;  %v8297_v39 = vld [vmem:[%s9896_s16 + $0x94] sm:$0xf] }
 0x3bf   : > { %v7110_v17 = vshrl.u32 %v8296_v23, 16  ;;  %v3064_v44 = vadd.f32 %v3032_v16, %v2941_v56  ;;  %v8798_v41 = vpop.f32.mrb[70].mxu1  ;;  %v7044_v42 = vor.u32 %v7043_v9, %v7040_v59  ;;  %v7059_v4 = vrot.slane %v7057_v26, 5  ;;  %v8298_v48 = vld [vmem:[%s9896_s16 + $0x98] sm:$0xf]  ;;  %v3033_v30 = vld [vmem:[#allocation3 + $0x68] sm:$0xff] }
 0x3c0   : > { %v7054_v55 = vor.u32 %v7053_v18, %v7049_v14  ;;  %3098 = vst.msk [vmem:[#allocation3 + $0x70] sm:$0xff] %vm1508_vm10, %v3066_v54  ;;  %v3067_v63 = vadd.f32 %v8798_v41, %v3035_v12  ;;  %v2944_v53 = vpop.f32.mrb[71].mxu1  ;;  %v7084_v21 = vsel %vm10104_vm13, %v7079_v49, %v7083_v43  ;;  %v7113_v6 = vshll.u32 %v8296_v23, 16  ;;  %v8293_v58 = vld [vmem:[%s9896_s16 + $0x84] sm:$0xf] }
 0x3c1   : > { %v7112_v15 = vrot.slane %v7110_v17, 4  ;;  %3096 = vst.msk [vmem:[#allocation3 + $0x60] sm:$0xff] %vm1508_vm10, %v3064_v44  ;;  %v3065_v56 = vadd.f32 %v3033_v30, %v2944_v53  ;;  %v8320_v9 = vcombine.low %v7074_v47, %v7084_v21  ;;  %v7045_v18 = vrot.slane %v7044_v42, 4  ;;  %v8294_v16 = vld [vmem:[%s9896_s16 + $0x88] sm:$0xf] }
 0x3c2   : > { %v11786_v59 = vpop.f32.mrb[180].mxu0  ;;  %v7055_v26 = vrot.slane %v7054_v55, 4  ;;  %3099 = vst.msk [vmem:[#allocation3 + $0x78] sm:$0xff] %vm1508_vm10, %v3067_v63  ;;  %8978 = vmatmul.mubr.msk.bf16.gmra.mrb[176].mxu1 %vm1508_vm10, %v11551_v5  ;;  %v7115_v43 = vrot.slane %v7113_v6, 5  ;;  %v7119_v12 = vshll.u32 %v8297_v39, 16  ;;  %v7123_v23 = vshrl.u32 %v8297_v39, 16 }
 0x3c3   : > { %12539 = vst [vmem:[#allocation55_spill] sm:$0xff] %v11786_v59  ;;  %v11790_v54 = vpop.f32.mrb[181].mxu0  ;;  %v7129_v49 = vshll.u32 %v8298_v48, 16  ;;  %3097 = vst.msk [vmem:[#allocation3 + $0x68] sm:$0xff] %vm1508_vm10, %v3065_v56  ;;  %8981 = vmatprep.mubr.msk.bf16.mxu1 %vm1508_vm10, %v11692_v22  ;;  %7295 = vrot.lane.b32.xlu1 %v8320_v9, %s9582_s8  ;;  %v7050_v47 = vsel %vm10104_vm13, %v7045_v18, %v7049_v14  ;;  %v7086_v44 = vshrl.u32 %v8293_v58, 16  ;;  %v7089_v41 = vshll.u32 %v8293_v58, 16 }
 0x3c4   : > { %12540 = vst [vmem:[#allocation56_spill] sm:$0xff] %v11790_v54  ;;  %v11795_v17 = vpop.f32.mrb[182].mxu0  ;;  %v7060_v5 = vsel %vm10104_vm13, %v7055_v26, %v7059_v4  ;;  %v7116_v39 = vor.u32 %v7115_v43, %v7112_v15  ;;  %v7121_v48 = vrot.slane %v7119_v12, 5  ;;  %v7125_v63 = vrot.slane %v7123_v23, 4  ;;  %v8295_v53 = vld [vmem:[%s9896_s16 + $0x8c] sm:$0xf] }
 0x3c5   : > { %12541 = vst [vmem:[#allocation57_spill] sm:$0xff] %v11795_v17  ;;  %v11804_v42 = vpop.f32.mrb[183].mxu0  ;;  %v8319_v55 = vcombine.low %v7050_v47, %v7060_v5  ;;  %v8801_v30 = vpop.f32.mrb[72].mxu1  ;;  %v3038_v22 = vld [vmem:[#allocation3 + $0x90] sm:$0xff]  ;;  %v7131_v21 = vrot.slane %v7129_v49, 5  ;;  %v7088_v6 = vrot.slane %v7086_v44, 4 }
 0x3c6   : > { %12542 = vst [vmem:[#allocation58_spill] sm:$0xff] %v11804_v42  ;;  %v7091_v56 = vrot.slane %v7089_v41, 5  ;;  %v7095_v14 = vshll.u32 %v8294_v16, 16  ;;  %v3070_v9 = vadd.f32 %v8801_v30, %v3038_v22  ;;  %v2957_v18 = vpop.f32.mrb[73].mxu1  ;;  %v3036_v4 = vld [vmem:[#allocation3 + $0x80] sm:$0xff]  ;;  %v7117_v58 = vrot.slane %v7116_v39, 4 }
 0x3c7   : > { %7293 = vrot.lane.b32.xlu0 %v8319_v55, %s9582_s8  ;;  %v7126_v26 = vor.u32 %v7125_v63, %v7121_v48  ;;  %v7099_v47 = vshrl.u32 %v8294_v16, 16  ;;  %v8302_v15 = vld [vmem:[%s9896_s16 + $0xa8] sm:$0xf]  ;;  %v3068_v43 = vadd.f32 %v3036_v4, %v2957_v18  ;;  %v8802_v12 = vpop.f32.mrb[74].mxu1  ;;  %v3039_v23 = vld [vmem:[#allocation3 + $0x98] sm:$0xff]  ;;  %v7105_v49 = vshll.u32 %v8295_v53, 16 }
 0x3c8   : > { %v7092_v5 = vor.u32 %v7091_v56, %v7088_v6  ;;  %v7097_v42 = vrot.slane %v7095_v14, 5  ;;  %v8303_v44 = vld [vmem:[%s9896_s16 + $0xac] sm:$0xf]  ;;  %3102 = vst.msk [vmem:[#allocation3 + $0x90] sm:$0xff] %vm1508_vm10, %v3070_v9  ;;  %v3071_v41 = vadd.f32 %v8802_v12, %v3039_v23  ;;  %v2960_v30 = vpop.f32.mrb[75].mxu1  ;;  %v7122_v55 = vsel %vm10104_vm13, %v7117_v58, %v7121_v48 }
 0x3c9   : > { %v3037_v22 = vld [vmem:[#allocation3 + $0x88] sm:$0xff]  ;;  %v7127_v39 = vrot.slane %v7126_v26, 4  ;;  %v7101_v16 = vrot.slane %v7099_v47, 4  ;;  %3100 = vst.msk [vmem:[#allocation3 + $0x80] sm:$0xff] %vm1508_vm10, %v3068_v43  ;;  %v7107_v56 = vrot.slane %v7105_v49, 5  ;;  %v7158_v14 = vshrl.u32 %v8302_v15, 16 }
 0x3ca   : > { %v8304_v63 = vld [vmem:[%s9896_s16 + $0xb0] sm:$0xf]  ;;  %v3069_v18 = vadd.f32 %v3037_v22, %v2960_v30  ;;  %v11815_v6 = vpop.f32.mrb[184].mxu0  ;;  %v7093_v53 = vrot.slane %v7092_v5, 4  ;;  %v8299_v4 = vld [vmem:[%s9896_s16 + $0x9c] sm:$0xf]  ;;  %8982 = vmatmul.mubr.msk.bf16.gmra.mrb[180].mxu1 %vm1508_vm10, %v11707_v57 }
 0x3cb   : > { %12543 = vst [vmem:[#allocation59_spill] sm:$0xff] %v11815_v6  ;;  %3103 = vst.msk [vmem:[#allocation3 + $0x98] sm:$0xff] %vm1508_vm10, %v3071_v41  ;;  %v11819_v9 = vpop.f32.mrb[185].mxu0  ;;  %v7132_v48 = vsel %vm10104_vm13, %v7127_v39, %v7131_v21  ;;  %v7102_v58 = vor.u32 %v7101_v16, %v7097_v42  ;;  %v7161_v26 = vshll.u32 %v8302_v15, 16  ;;  %v7167_v47 = vshll.u32 %v8303_v44, 16  ;;  %v3042_v39 = vld [vmem:[#allocation3 + $0xb0] sm:$0xff] }
 0x3cc   : > { %12544 = vst [vmem:[#allocation60_spill] sm:$0xff] %v11819_v9  ;;  %v8300_v43 = vld [vmem:[%s9896_s16 + $0xa0] sm:$0xf]  ;;  %3101 = vst.msk [vmem:[#allocation3 + $0x88] sm:$0xff] %vm1508_vm10, %v3069_v18  ;;  %v11827_v12 = vpop.f32.mrb[186].mxu0  ;;  %v8322_v23 = vcombine.low %v7122_v55, %v7132_v48  ;;  %v7098_v5 = vsel %vm10104_vm13, %v7093_v53, %v7097_v42  ;;  %v7160_v49 = vrot.slane %v7158_v14, 4 }
 0x3cd   : > { %12545 = vst [vmem:[#allocation61_spill] sm:$0xff] %v11827_v12  ;;  %v7171_v41 = vshrl.u32 %v8303_v44, 16  ;;  %v11831_v30 = vpop.f32.mrb[187].mxu0  ;;  %v7103_v57 = vrot.slane %v7102_v58, 4  ;;  %v7163_v22 = vrot.slane %v7161_v26, 5  ;;  %v7169_v9 = vrot.slane %v7167_v47, 5 }
 0x3ce   : > { %12546 = vst [vmem:[#allocation62_spill] sm:$0xff] %v11831_v30  ;;  %v7177_v21 = vshll.u32 %v8304_v63, 16  ;;  %v8805_v15 = vpop.f32.mrb[76].mxu1  ;;  %7299 = vrot.lane.b32.xlu1 %v8322_v23, %s9582_s8  ;;  %v7134_v18 = vshrl.u32 %v8299_v4, 16  ;;  %v7137_v12 = vshll.u32 %v8299_v4, 16  ;;  %v7143_v55 = vshll.u32 %v8300_v43, 16 }
 0x3cf   : > { %v7173_v16 = vrot.slane %v7171_v41, 4  ;;  %v3074_v48 = vadd.f32 %v8805_v15, %v3042_v39  ;;  %v2973_v42 = vpop.f32.mrb[77].mxu1  ;;  %v3040_v53 = vld [vmem:[#allocation3 + $0xa0] sm:$0xff]  ;;  %v3043_v44 = vld [vmem:[#allocation3 + $0xb8] sm:$0xff]  ;;  %v7108_v14 = vsel %vm10104_vm13, %v7103_v57, %v7107_v56  ;;  %v7164_v58 = vor.u32 %v7163_v22, %v7160_v49  ;;  %v3041_v54 = vld [vmem:[#allocation3 + $0xa8] sm:$0xff] }
 0x3d0   : > { %v7179_v26 = vrot.slane %v7177_v21, 5  ;;  %v8301_v47 = vld [vmem:[%s9896_s16 + $0xa4] sm:$0xf]  ;;  %v3072_v63 = vadd.f32 %v3040_v53, %v2973_v42  ;;  %v8806_v30 = vpop.f32.mrb[78].mxu1  ;;  %v8321_v6 = vcombine.low %v7098_v5, %v7108_v14  ;;  %v7136_v23 = vrot.slane %v7134_v18, 4 }
 0x3d1   : > { %v7174_v17 = vor.u32 %v7173_v16, %v7169_v9  ;;  %v9274_v41 = vld [vmem:[#allocation13] sm:$0x3f]   ;;  %3106 = vst.msk [vmem:[#allocation3 + $0xb0] sm:$0xff] %vm1508_vm10, %v3074_v48  ;;  %v3075_v15 = vadd.f32 %v8806_v30, %v3043_v44  ;;  %v2976_v39 = vpop.f32.mrb[79].mxu1  ;;  %v7165_v59 = vrot.slane %v7164_v58, 4  ;;  %v7139_v46 = vrot.slane %v7137_v12, 5 }
 0x3d2   : > { %v8308_v4 = vld [vmem:[%s9896_s16 + $0xc0] sm:$0xf]  ;;  %v11839_v56 = vrot.slane %v7143_v55, 5  ;;  %3104 = vst.msk [vmem:[#allocation3 + $0xa0] sm:$0xff] %vm1508_vm10, %v3072_v63  ;;  %v3073_v49 = vadd.f32 %v3041_v54, %v2976_v39  ;;  %v11842_v57 = vpop.f32.mrb[188].mxu0  ;;  %7297 = vrot.lane.b32.xlu0 %v8321_v6, %s9582_s8  ;;  %v7147_v22 = vshrl.u32 %v8300_v43, 16  ;;  %9065 = vmatprep.subr.msk.bf16.mxu1 %vm7404_vm1, %v9274_v41 }
 0x3d3   : > { %v7175_v5 = vrot.slane %v7174_v17, 4  ;;  %v7153_v21 = vshll.u32 %v8301_v47, 16  ;;  %v8309_v16 = vld [vmem:[%s9896_s16 + $0xc4] sm:$0xf]  ;;  %3107 = vst.msk [vmem:[#allocation3 + $0xb8] sm:$0xff] %vm1508_vm10, %v3075_v15  ;;  %v11847_v30 = vpop.f32.mrb[189].mxu0  ;;  %v7170_v12 = vsel %vm10104_vm13, %v7165_v59, %v7169_v9  ;;  %v7140_v18 = vor.u32 %v7139_v46, %v7136_v23 }
 0x3d4   : > { %v8310_v55 = vld [vmem:[%s9896_s16 + $0xc8] sm:$0xf]  ;;  %v7206_v54 = vshrl.u32 %v8308_v4, 16  ;;  %3105 = vst.msk [vmem:[#allocation3 + $0xa8] sm:$0xff] %vm1508_vm10, %v3073_v49  ;;  %v11853_v48 = vpop.f32.mrb[190].mxu0  ;;  %v7149_v6 = vrot.slane %v7147_v22, 4 }
 0x3d5   : > { %12547 = vst [vmem:[#allocation63_spill] sm:$0xff] %v11853_v48  ;;  %v7180_v17 = vsel %vm10104_vm13, %v7175_v5, %v7179_v26  ;;  %v7155_v43 = vrot.slane %v7153_v21, 5  ;;  %v7406_v42 = vsel %vm7404_vm1, %v9274_v41, 0  ;;  %v8305_v53 = vld [vmem:[%s9896_s16 + $0xb4] sm:$0xf]  ;;  %v11858_v44 = vpop.f32.mrb[191].mxu0 }
 0x3d6   : > { %12548 = vst [vmem:[#allocation64_spill] sm:$0xff] %v11858_v44  ;;  %v8324_v14 = vcombine.low %v7170_v12, %v7180_v17  ;;  %v7141_v59 = vrot.slane %v7140_v18, 4  ;;  %9020 = vmatpush3.bf16.msra.mxu1 %v7406_v42  ;;  %v7208_v46 = vrot.slane %v7206_v54, 4  ;;  %v7209_v9 = vshll.u32 %v8308_v4, 16  ;;  %v8809_v58 = vpop.f32.mrb[80].mxu1  ;;  %v3046_v47 = vld [vmem:[#allocation3 + $0xd0] sm:$0xff] }
 0x3d7   : > { %v7150_v63 = vor.u32 %v7149_v6, %v11839_v56  ;;  %v7215_v23 = vshll.u32 %v8309_v16, 16  ;;  %v7219_v15 = vshrl.u32 %v8309_v16, 16  ;;  %v7225_v26 = vshll.u32 %v8310_v55, 16  ;;  %v2989_v49 = vpop.f32.mrb[81].mxu1  ;;  %v3044_v5 = vld [vmem:[#allocation3 + $0xc0] sm:$0xff]  ;;  %v3047_v41 = vld [vmem:[#allocation3 + $0xd8] sm:$0xff] }
 0x3d8   : > { %v3078_v39 = vadd.f32 %v8809_v58, %v3046_v47  ;;  %7303 = vrot.lane.b32.xlu1 %v8324_v14, %s9582_s8  ;;  %v7146_v22 = vsel %vm10104_vm13, %v7141_v59, %v11839_v56  ;;  %v7211_v4 = vrot.slane %v7209_v9, 5  ;;  %v7182_v21 = vshrl.u32 %v8305_v53, 16  ;;  %v8810_v18 = vpop.f32.mrb[82].mxu1  ;;  %v8306_v16 = vld [vmem:[%s9896_s16 + $0xb8] sm:$0xf]  ;;  %v3045_v58 = vld [vmem:[#allocation3 + $0xc8] sm:$0xff] }
 0x3d9   : > { %v3076_v12 = vadd.f32 %v3044_v5, %v2989_v49  ;;  %v7151_v54 = vrot.slane %v7150_v63, 4  ;;  %v7217_v17 = vrot.slane %v7215_v23, 5  ;;  %v7221_v6 = vrot.slane %v7219_v15, 4  ;;  %v2992_v42 = vpop.f32.mrb[83].mxu1  ;;  %v8307_v44 = vld [vmem:[%s9896_s16 + $0xbc] sm:$0xf] }
 0x3da   : > { %3110 = vst.msk [vmem:[#allocation3 + $0xd0] sm:$0xff] %vm1508_vm10, %v3078_v39  ;;  %v3079_v55 = vadd.f32 %v8810_v18, %v3047_v41  ;;  %v7212_v47 = vor.u32 %v7211_v4, %v7208_v46  ;;  %v7227_v14 = vrot.slane %v7225_v26, 5  ;;  %v7184_v48 = vrot.slane %v7182_v21, 4  ;;  %v11869_v59 = vpop.f32.mrb[192].mxu0 }
 0x3db   : > { %3108 = vst.msk [vmem:[#allocation3 + $0xc0] sm:$0xff] %vm1508_vm10, %v3076_v12  ;;  %v3077_v56 = vadd.f32 %v3045_v58, %v2992_v42  ;;  %v7156_v9 = vsel %vm10104_vm13, %v7151_v54, %v7155_v43  ;;  %v7222_v63 = vor.u32 %v7221_v6, %v7217_v17  ;;  %v7185_v23 = vshll.u32 %v8305_v53, 16  ;;  %v11874_v15 = vpop.f32.mrb[193].mxu0  ;;  %v3050_v54 = vld [vmem:[#allocation3 + $0xf0] sm:$0xff]  ;;  %v3048_v58 = vld [vmem:[#allocation3 + $0xe0] sm:$0xff] }
 0x3dc   : > { %3111 = vst.msk [vmem:[#allocation3 + $0xd8] sm:$0xff] %vm1508_vm10, %v3079_v55  ;;  %v8323_v39 = vcombine.low %v7146_v22, %v7156_v9  ;;  %v7213_v49 = vrot.slane %v7212_v47, 4  ;;  %v7191_v46 = vshll.u32 %v8306_v16, 16  ;;  %v7195_v26 = vshrl.u32 %v8306_v16, 16  ;;  %v11877_v5 = vpop.f32.mrb[194].mxu0 }
 0x3dd   : > { %3109 = vst.msk [vmem:[#allocation3 + $0xc8] sm:$0xff] %vm1508_vm10, %v3077_v56  ;;  %v7223_v41 = vrot.slane %v7222_v63, 4  ;;  %v7187_v4 = vrot.slane %v7185_v23, 5  ;;  %v7201_v21 = vshll.u32 %v8307_v44, 16  ;;  %v11879_v12 = vpop.f32.mrb[195].mxu0  ;;  %v8813_v22 = vpop.f32.mrb[84].mxu1 }
 0x3de   : > { %7301 = vrot.lane.b32.xlu0 %v8323_v39, %s9582_s8  ;;  %v7218_v43 = vsel %vm10104_vm13, %v7213_v49, %v7217_v17  ;;  %v7193_v53 = vrot.slane %v7191_v46, 5  ;;  %v7197_v18 = vrot.slane %v7195_v26, 4  ;;  %v3082_v55 = vadd.f32 %v8813_v22, %v3050_v54  ;;  %v3005_v42 = vpop.f32.mrb[85].mxu1  ;;  %v3051_v23 = vld [vmem:[#allocation3 + $0xf8] sm:$0xff]  ;;  %v3049_v46 = vld [vmem:[#allocation3 + $0xe8] sm:$0xff] }
 0x3df   : > { %v7228_v6 = vsel %vm10104_vm13, %v7223_v41, %v7227_v14  ;;  %v7188_v16 = vor.u32 %v7187_v4, %v7184_v48  ;;  %v7203_v56 = vrot.slane %v7201_v21, 5  ;;  %v3080_v9 = vadd.f32 %v3048_v58, %v3005_v42  ;;  %v8814_v63 = vpop.f32.mrb[86].mxu1 }
 0x3e0   : > { %v8326_v47 = vcombine.low %v7218_v43, %v7228_v6  ;;  %v7198_v44 = vor.u32 %v7197_v18, %v7193_v53  ;;  %3114 = vst.msk [vmem:[#allocation3 + $0xf0] sm:$0xff] %vm1508_vm10, %v3082_v55  ;;  %v3083_v17 = vadd.f32 %v8814_v63, %v3051_v23  ;;  %v3008_v49 = vpop.f32.mrb[87].mxu1  ;;  %v3445_v6 = vld [vmem:[#allocation3 + $0x10] sm:$0xff]  ;;  %v3443_v55 = vld [vmem:[#allocation3] sm:$0xff] }
 0x3e1   : > { %v7189_v39 = vrot.slane %v7188_v16, 4  ;;  %3112 = vst.msk [vmem:[#allocation3 + $0xe0] sm:$0xff] %vm1508_vm10, %v3080_v9  ;;  %v3081_v48 = vadd.f32 %v3049_v46, %v3008_v49  ;;  %v3449_v46 = vld [vmem:[#allocation3 + $0x30] sm:$0xff] }
 0x3e2   : > { %7307 = vrot.lane.b32.xlu1 %v8326_v47, %s9582_s8  ;;  %v7199_v26 = vrot.slane %v7198_v44, 4  ;;  %v11889_v14 = vpop.f32.mrb[196].mxu0  ;;  %3115 = vst.msk [vmem:[#allocation3 + $0xf8] sm:$0xff] %vm1508_vm10, %v3083_v17  ;;  %v3446_v47 = vld [vmem:[#allocation3 + $0x18] sm:$0xff] }
 0x3e3   : > { %v7194_v41 = vsel %vm10104_vm13, %v7189_v39, %v7193_v53  ;;  %v11894_v4 = vpop.f32.mrb[197].mxu0  ;;  %3113 = vst.msk [vmem:[#allocation3 + $0xe8] sm:$0xff] %vm1508_vm10, %v3081_v48 }
 0x3e4   : > { %v7204_v21 = vsel %vm10104_vm13, %v7199_v26, %v7203_v56  ;;  %v11899_v43 = vpop.f32.mrb[198].mxu0  ;;  %v3444_v56 = vld [vmem:[#allocation3 + $0x8] sm:$0xff] }
 0x3e5   : > { %v8325_v18 = vcombine.low %v7194_v41, %v7204_v21  ;;  %v11901_v22 = vpop.f32.mrb[199].mxu0  ;;  %v8819_v54 = vpop.f32.mrb[88].mxu1  ;;  %v3447_v41 = vld [vmem:[#allocation3 + $0x20] sm:$0xff] }
 0x3e6   : > { %v3477_v16 = vadd.f32 %v8819_v54, %v3445_v6  ;;  %v3316_v53 = vpop.f32.mrb[89].mxu1  ;;  %v3450_v54 = vld [vmem:[#allocation3 + $0x38] sm:$0xff] }
 0x3e7   : > { %7305 = vrot.lane.b32.xlu0 %v8325_v18, %s9582_s8  ;;  %v3475_v42 = vadd.f32 %v3443_v55, %v3316_v53  ;;  %v8820_v58 = vpop.f32.mrb[90].mxu1  ;;  %v3448_v55 = vld [vmem:[#allocation3 + $0x28] sm:$0xff] }
 0x3e8   : > { %3509 = vst.msk [vmem:[#allocation3 + $0x10] sm:$0xff] %vm1508_vm10, %v3477_v16  ;;  %v3478_v29 = vadd.f32 %v8820_v58, %v3446_v47  ;;  %v3319_v44 = vpop.f32.mrb[91].mxu1 }
 0x3e9   : > { %3507 = vst.msk [vmem:[#allocation3] sm:$0xff] %vm1508_vm10, %v3475_v42  ;;  %v3476_v9 = vadd.f32 %v3444_v56, %v3319_v44  ;;  %v12549_v42 = vld [vmem:[#allocation22_spill] sm:$0xff]  ;;  %v12550_v56 = vld [vmem:[#allocation23_spill] sm:$0xff] }
 0x3ea   : > { %v11906_v63 = vpop.f32.mrb[200].mxu0  ;;  %3510 = vst.msk [vmem:[#allocation3 + $0x18] sm:$0xff] %vm1508_vm10, %v3478_v29 }
 0x3eb   : > { %v11909_v23 = vpop.f32.mrb[201].mxu0  ;;  %3508 = vst.msk [vmem:[#allocation3 + $0x8] sm:$0xff] %vm1508_vm10, %v3476_v9 }
 0x3ec   : > { %v11912_v39 = vpop.f32.mrb[202].mxu0 }
 0x3ed   : > { %v11914_v17 = vpop.f32.mrb[203].mxu0  ;;  %v8823_v49 = vpop.f32.mrb[92].mxu1 }
 0x3ee   : > { %v3481_v26 = vadd.f32 %v8823_v49, %v3449_v46  ;;  %v3332_v48 = vpop.f32.mrb[93].mxu1 }
 0x3ef   : > { %v3479_v21 = vadd.f32 %v3447_v41, %v3332_v48  ;;  %v8824_v18 = vpop.f32.mrb[94].mxu1  ;;  %v4235_v6 = vld [vmem:[#allocation3 + $0x10] sm:$0xff] }
 0x3f0   : > { %3513 = vst.msk [vmem:[#allocation3 + $0x30] sm:$0xff] %vm1508_vm10, %v3481_v26  ;;  %v3482_v16 = vadd.f32 %v8824_v18, %v3450_v54  ;;  %v3335_v53 = vpop.f32.mrb[95].mxu1  ;;  %v4267_v58 = vadd.f32 %v12549_v42, %v4235_v6  ;;  %v4233_v47 = vld [vmem:[#allocation3] sm:$0xff]  ;;  %v12552_v26 = vld [vmem:[#allocation24_spill] sm:$0xff] }
 0x3f1   : > { %3511 = vst.msk [vmem:[#allocation3 + $0x20] sm:$0xff] %vm1508_vm10, %v3479_v21  ;;  %v3480_v29 = vadd.f32 %v3448_v55, %v3335_v53  ;;  %v4265_v9 = vadd.f32 %v4233_v47, %v12550_v56  ;;  %v4236_v49 = vld [vmem:[#allocation3 + $0x18] sm:$0xff]  ;;  %v3453_v53 = vld [vmem:[#allocation3 + $0x50] sm:$0xff] }
 0x3f2   : > { %v11919_v44 = vpop.f32.mrb[204].mxu0  ;;  %3514 = vst.msk [vmem:[#allocation3 + $0x38] sm:$0xff] %vm1508_vm10, %v3482_v16  ;;  %4299 = vst.msk [vmem:[#allocation3 + $0x10] sm:$0xff] %vm1508_vm10, %v4267_v58  ;;  %v4268_v48 = vadd.f32 %v12552_v26, %v4236_v49  ;;  %v4234_v41 = vld [vmem:[#allocation3 + $0x8] sm:$0xff]  ;;  %v12554_v21 = vld [vmem:[#allocation25_spill] sm:$0xff] }
 0x3f3   : > { %v11923_v46 = vpop.f32.mrb[205].mxu0  ;;  %3512 = vst.msk [vmem:[#allocation3 + $0x28] sm:$0xff] %vm1508_vm10, %v3480_v29  ;;  %4297 = vst.msk [vmem:[#allocation3] sm:$0xff] %vm1508_vm10, %v4265_v9  ;;  %v4266_v54 = vadd.f32 %v4234_v41, %v12554_v21  ;;  %v3451_v58 = vld [vmem:[#allocation3 + $0x40] sm:$0xff]  ;;  %v3454_v29 = vld [vmem:[#allocation3 + $0x58] sm:$0xff] }
 0x3f4   : > { %12551 = vst [vmem:[#allocation22_spill] sm:$0xff] %v11923_v46  ;;  %v11928_v18 = vpop.f32.mrb[206].mxu0  ;;  %4300 = vst.msk [vmem:[#allocation3 + $0x18] sm:$0xff] %vm1508_vm10, %v4268_v48  ;;  %v3452_v41 = vld [vmem:[#allocation3 + $0x48] sm:$0xff] }
 0x3f5   : > { %12553 = vst [vmem:[#allocation23_spill] sm:$0xff] %v11928_v18  ;;  %v11932_v6 = vpop.f32.mrb[207].mxu0  ;;  %v8827_v16 = vpop.f32.mrb[96].mxu1  ;;  %4298 = vst.msk [vmem:[#allocation3 + $0x8] sm:$0xff] %vm1508_vm10, %v4266_v54  ;;  %v12556_v21 = vld [vmem:[#allocation26_spill] sm:$0xff]  ;;  %v12557_v46 = vld [vmem:[#allocation27_spill] sm:$0xff] }
 0x3f6   : > { %12555 = vst [vmem:[#allocation24_spill] sm:$0xff] %v11932_v6  ;;  %v3485_v55 = vadd.f32 %v8827_v16, %v3453_v53  ;;  %v3348_v42 = vpop.f32.mrb[97].mxu1  ;;  %v12558_v53 = vld [vmem:[#allocation28_spill] sm:$0xff] }
 0x3f7   : > { %v3483_v47 = vadd.f32 %v3451_v58, %v3348_v42  ;;  %v8828_v56 = vpop.f32.mrb[98].mxu1  ;;  %v4239_v49 = vld [vmem:[#allocation3 + $0x30] sm:$0xff] }
 0x3f8   : > { %3517 = vst.msk [vmem:[#allocation3 + $0x50] sm:$0xff] %vm1508_vm10, %v3485_v55  ;;  %v3486_v9 = vadd.f32 %v8828_v56, %v3454_v29  ;;  %v3351_v26 = vpop.f32.mrb[99].mxu1  ;;  %v4271_v6 = vadd.f32 %v12556_v21, %v4239_v49  ;;  %v4237_v18 = vld [vmem:[#allocation3 + $0x20] sm:$0xff]  ;;  %v3457_v29 = vld [vmem:[#allocation3 + $0x70] sm:$0xff] }
 0x3f9   : > { %3515 = vst.msk [vmem:[#allocation3 + $0x40] sm:$0xff] %vm1508_vm10, %v3483_v47  ;;  %v3484_v48 = vadd.f32 %v3452_v41, %v3351_v26  ;;  %v4269_v54 = vadd.f32 %v4237_v18, %v12557_v46  ;;  %v4240_v16 = vld [vmem:[#allocation3 + $0x38] sm:$0xff]  ;;  %v3455_v49 = vld [vmem:[#allocation3 + $0x60] sm:$0xff] }
 0x3fa   : > { %3518 = vst.msk [vmem:[#allocation3 + $0x58] sm:$0xff] %vm1508_vm10, %v3486_v9  ;;  %4303 = vst.msk [vmem:[#allocation3 + $0x30] sm:$0xff] %vm1508_vm10, %v4271_v6  ;;  %v4272_v42 = vadd.f32 %v12558_v53, %v4240_v16  ;;  %v4238_v58 = vld [vmem:[#allocation3 + $0x28] sm:$0xff]  ;;  %v12559_v55 = vld [vmem:[#allocation29_spill] sm:$0xff] }
 0x3fb   : > { %3516 = vst.msk [vmem:[#allocation3 + $0x48] sm:$0xff] %vm1508_vm10, %v3484_v48  ;;  %4301 = vst.msk [vmem:[#allocation3 + $0x20] sm:$0xff] %vm1508_vm10, %v4269_v54  ;;  %v4270_v56 = vadd.f32 %v4238_v58, %v12559_v55  ;;  %v3458_v26 = vld [vmem:[#allocation3 + $0x78] sm:$0xff]  ;;  %v3456_v54 = vld [vmem:[#allocation3 + $0x68] sm:$0xff] }
 0x3fc   : > { %4304 = vst.msk [vmem:[#allocation3 + $0x38] sm:$0xff] %vm1508_vm10, %v4272_v42  ;;  %v12560_v16 = vld [vmem:[#allocation30_spill] sm:$0xff]  ;;  %v12561_v55 = vld [vmem:[#allocation31_spill] sm:$0xff] }
 0x3fd   : > { %v8831_v47 = vpop.f32.mrb[100].mxu1  ;;  %4302 = vst.msk [vmem:[#allocation3 + $0x28] sm:$0xff] %vm1508_vm10, %v4270_v56 }
 0x3fe   : > { %v3489_v46 = vadd.f32 %v8831_v47, %v3457_v29  ;;  %v3364_v18 = vpop.f32.mrb[101].mxu1  ;;  %v12562_v29 = vld [vmem:[#allocation32_spill] sm:$0xff] }
 0x3ff   : > { %v3487_v9 = vadd.f32 %v3455_v49, %v3364_v18  ;;  %v8832_v6 = vpop.f32.mrb[102].mxu1  ;;  %v4243_v41 = vld [vmem:[#allocation3 + $0x50] sm:$0xff] }
 0x400   : > { %3521 = vst.msk [vmem:[#allocation3 + $0x70] sm:$0xff] %vm1508_vm10, %v3489_v46  ;;  %v3490_v21 = vadd.f32 %v8832_v6, %v3458_v26  ;;  %v3367_v48 = vpop.f32.mrb[103].mxu1  ;;  %v4275_v53 = vadd.f32 %v12560_v16, %v4243_v41  ;;  %v4241_v58 = vld [vmem:[#allocation3 + $0x40] sm:$0xff]  ;;  %v3461_v26 = vld [vmem:[#allocation3 + $0x90] sm:$0xff] }
 0x401   : > { %3519 = vst.msk [vmem:[#allocation3 + $0x60] sm:$0xff] %vm1508_vm10, %v3487_v9  ;;  %v3488_v42 = vadd.f32 %v3456_v54, %v3367_v48  ;;  %v4273_v56 = vadd.f32 %v4241_v58, %v12561_v55  ;;  %v4244_v47 = vld [vmem:[#allocation3 + $0x58] sm:$0xff] }
 0x402   : > { %3522 = vst.msk [vmem:[#allocation3 + $0x78] sm:$0xff] %vm1508_vm10, %v3490_v21  ;;  %4307 = vst.msk [vmem:[#allocation3 + $0x50] sm:$0xff] %vm1508_vm10, %v4275_v53  ;;  %v4276_v18 = vadd.f32 %v12562_v29, %v4244_v47  ;;  %v4242_v49 = vld [vmem:[#allocation3 + $0x48] sm:$0xff]  ;;  %v12563_v46 = vld [vmem:[#allocation33_spill] sm:$0xff] }
 0x403   : > { %3520 = vst.msk [vmem:[#allocation3 + $0x68] sm:$0xff] %vm1508_vm10, %v3488_v42  ;;  %4305 = vst.msk [vmem:[#allocation3 + $0x40] sm:$0xff] %vm1508_vm10, %v4273_v56  ;;  %v4274_v6 = vadd.f32 %v4242_v49, %v12563_v46  ;;  %v3459_v21 = vld [vmem:[#allocation3 + $0x80] sm:$0xff]  ;;  %v3462_v53 = vld [vmem:[#allocation3 + $0x98] sm:$0xff] }
 0x404   : > { %4308 = vst.msk [vmem:[#allocation3 + $0x58] sm:$0xff] %vm1508_vm10, %v4276_v18  ;;  %v3460_v56 = vld [vmem:[#allocation3 + $0x88] sm:$0xff] }
 0x405   : > { %v8835_v9 = vpop.f32.mrb[104].mxu1  ;;  %4306 = vst.msk [vmem:[#allocation3 + $0x48] sm:$0xff] %vm1508_vm10, %v4274_v6  ;;  %v12564_v47 = vld [vmem:[#allocation34_spill] sm:$0xff]  ;;  %v12565_v46 = vld [vmem:[#allocation35_spill] sm:$0xff] }
 0x406   : > { %v3493_v41 = vadd.f32 %v8835_v9, %v3461_v26  ;;  %v3380_v48 = vpop.f32.mrb[105].mxu1  ;;  %v12566_v26 = vld [vmem:[#allocation36_spill] sm:$0xff] }
 0x407   : > { %v3491_v54 = vadd.f32 %v3459_v21, %v3380_v48  ;;  %v8836_v16 = vpop.f32.mrb[106].mxu1  ;;  %v4247_v58 = vld [vmem:[#allocation3 + $0x70] sm:$0xff] }
 0x408   : > { %3525 = vst.msk [vmem:[#allocation3 + $0x90] sm:$0xff] %vm1508_vm10, %v3493_v41  ;;  %v3494_v42 = vadd.f32 %v8836_v16, %v3462_v53  ;;  %v3383_v55 = vpop.f32.mrb[107].mxu1  ;;  %v4279_v29 = vadd.f32 %v12564_v47, %v4247_v58  ;;  %v4245_v49 = vld [vmem:[#allocation3 + $0x60] sm:$0xff]  ;;  %v3465_v53 = vld [vmem:[#allocation3 + $0xb0] sm:$0xff] }
 0x409   : > { %3523 = vst.msk [vmem:[#allocation3 + $0x80] sm:$0xff] %vm1508_vm10, %v3491_v54  ;;  %v3492_v18 = vadd.f32 %v3460_v56, %v3383_v55  ;;  %v4277_v6 = vadd.f32 %v4245_v49, %v12565_v46  ;;  %v4248_v9 = vld [vmem:[#allocation3 + $0x78] sm:$0xff] }
 0x40a   : > { %3526 = vst.msk [vmem:[#allocation3 + $0x98] sm:$0xff] %vm1508_vm10, %v3494_v42  ;;  %4311 = vst.msk [vmem:[#allocation3 + $0x70] sm:$0xff] %vm1508_vm10, %v4279_v29  ;;  %v4280_v48 = vadd.f32 %v12566_v26, %v4248_v9  ;;  %v4246_v21 = vld [vmem:[#allocation3 + $0x68] sm:$0xff]  ;;  %v12567_v41 = vld [vmem:[#allocation37_spill] sm:$0xff] }
 0x40b   : > { %3524 = vst.msk [vmem:[#allocation3 + $0x88] sm:$0xff] %vm1508_vm10, %v3492_v18  ;;  %4309 = vst.msk [vmem:[#allocation3 + $0x60] sm:$0xff] %vm1508_vm10, %v4277_v6  ;;  %v4278_v16 = vadd.f32 %v4246_v21, %v12567_v41  ;;  %v3463_v42 = vld [vmem:[#allocation3 + $0xa0] sm:$0xff]  ;;  %v3466_v29 = vld [vmem:[#allocation3 + $0xb8] sm:$0xff] }
 0x40c   : > { %4312 = vst.msk [vmem:[#allocation3 + $0x78] sm:$0xff] %vm1508_vm10, %v4280_v48  ;;  %v3464_v6 = vld [vmem:[#allocation3 + $0xa8] sm:$0xff] }
 0x40d   : > { %v8839_v54 = vpop.f32.mrb[108].mxu1  ;;  %4310 = vst.msk [vmem:[#allocation3 + $0x68] sm:$0xff] %vm1508_vm10, %v4278_v16  ;;  %v12568_v9 = vld [vmem:[#allocation38_spill] sm:$0xff]  ;;  %v12569_v41 = vld [vmem:[#allocation39_spill] sm:$0xff] }
 0x40e   : > { %v3497_v58 = vadd.f32 %v8839_v54, %v3465_v53  ;;  %v3396_v55 = vpop.f32.mrb[109].mxu1  ;;  %v12570_v53 = vld [vmem:[#allocation40_spill] sm:$0xff] }
 0x40f   : > { %v3495_v56 = vadd.f32 %v3463_v42, %v3396_v55  ;;  %v8840_v47 = vpop.f32.mrb[110].mxu1  ;;  %v4251_v49 = vld [vmem:[#allocation3 + $0x90] sm:$0xff] }
 0x410   : > { %3529 = vst.msk [vmem:[#allocation3 + $0xb0] sm:$0xff] %vm1508_vm10, %v3497_v58  ;;  %v3498_v18 = vadd.f32 %v8840_v47, %v3466_v29  ;;  %v3399_v46 = vpop.f32.mrb[111].mxu1  ;;  %v4283_v26 = vadd.f32 %v12568_v9, %v4251_v49  ;;  %v4249_v21 = vld [vmem:[#allocation3 + $0x80] sm:$0xff]  ;;  %v3469_v29 = vld [vmem:[#allocation3 + $0xd0] sm:$0xff] }
 0x411   : > { %3527 = vst.msk [vmem:[#allocation3 + $0xa0] sm:$0xff] %vm1508_vm10, %v3495_v56  ;;  %v3496_v48 = vadd.f32 %v3464_v6, %v3399_v46  ;;  %v4281_v16 = vadd.f32 %v4249_v21, %v12569_v41  ;;  %v4252_v54 = vld [vmem:[#allocation3 + $0x98] sm:$0xff] }
 0x412   : > { %3530 = vst.msk [vmem:[#allocation3 + $0xb8] sm:$0xff] %vm1508_vm10, %v3498_v18  ;;  %4315 = vst.msk [vmem:[#allocation3 + $0x90] sm:$0xff] %vm1508_vm10, %v4283_v26  ;;  %v4284_v55 = vadd.f32 %v12570_v53, %v4252_v54  ;;  %v4250_v42 = vld [vmem:[#allocation3 + $0x88] sm:$0xff]  ;;  %v12571_v58 = vld [vmem:[#allocation41_spill] sm:$0xff] }
 0x413   : > { %3528 = vst.msk [vmem:[#allocation3 + $0xa8] sm:$0xff] %vm1508_vm10, %v3496_v48  ;;  %4313 = vst.msk [vmem:[#allocation3 + $0x80] sm:$0xff] %vm1508_vm10, %v4281_v16  ;;  %v4282_v47 = vadd.f32 %v4250_v42, %v12571_v58  ;;  %v3467_v18 = vld [vmem:[#allocation3 + $0xc0] sm:$0xff]  ;;  %v3470_v26 = vld [vmem:[#allocation3 + $0xd8] sm:$0xff] }
 0x414   : > { %4316 = vst.msk [vmem:[#allocation3 + $0x98] sm:$0xff] %vm1508_vm10, %v4284_v55  ;;  %v3468_v16 = vld [vmem:[#allocation3 + $0xc8] sm:$0xff] }
 0x415   : > { %v8843_v56 = vpop.f32.mrb[112].mxu1  ;;  %4314 = vst.msk [vmem:[#allocation3 + $0x88] sm:$0xff] %vm1508_vm10, %v4282_v47  ;;  %v12572_v54 = vld [vmem:[#allocation42_spill] sm:$0xff]  ;;  %v12573_v58 = vld [vmem:[#allocation43_spill] sm:$0xff] }
 0x416   : > { %v3501_v49 = vadd.f32 %v8843_v56, %v3469_v29  ;;  %v3412_v46 = vpop.f32.mrb[113].mxu1  ;;  %v12574_v29 = vld [vmem:[#allocation44_spill] sm:$0xff] }
 0x417   : > { %v3499_v6 = vadd.f32 %v3467_v18, %v3412_v46  ;;  %v8844_v9 = vpop.f32.mrb[114].mxu1  ;;  %v4255_v21 = vld [vmem:[#allocation3 + $0xb0] sm:$0xff] }
 0x418   : > { %3533 = vst.msk [vmem:[#allocation3 + $0xd0] sm:$0xff] %vm1508_vm10, %v3501_v49  ;;  %v3502_v48 = vadd.f32 %v8844_v9, %v3470_v26  ;;  %v3415_v41 = vpop.f32.mrb[115].mxu1  ;;  %v4287_v53 = vadd.f32 %v12572_v54, %v4255_v21  ;;  %v4253_v42 = vld [vmem:[#allocation3 + $0xa0] sm:$0xff]  ;;  %v3473_v26 = vld [vmem:[#allocation3 + $0xf0] sm:$0xff] }
 0x419   : > { %3531 = vst.msk [vmem:[#allocation3 + $0xc0] sm:$0xff] %vm1508_vm10, %v3499_v6  ;;  %v3500_v55 = vadd.f32 %v3468_v16, %v3415_v41  ;;  %v4285_v47 = vadd.f32 %v4253_v42, %v12573_v58  ;;  %v4256_v56 = vld [vmem:[#allocation3 + $0xb8] sm:$0xff] }
 0x41a   : > { %3534 = vst.msk [vmem:[#allocation3 + $0xd8] sm:$0xff] %vm1508_vm10, %v3502_v48  ;;  %4319 = vst.msk [vmem:[#allocation3 + $0xb0] sm:$0xff] %vm1508_vm10, %v4287_v53  ;;  %v4288_v46 = vadd.f32 %v12574_v29, %v4256_v56  ;;  %v4254_v18 = vld [vmem:[#allocation3 + $0xa8] sm:$0xff]  ;;  %v12575_v49 = vld [vmem:[#allocation45_spill] sm:$0xff] }
 0x41b   : > { %3532 = vst.msk [vmem:[#allocation3 + $0xc8] sm:$0xff] %vm1508_vm10, %v3500_v55  ;;  %4317 = vst.msk [vmem:[#allocation3 + $0xa0] sm:$0xff] %vm1508_vm10, %v4285_v47  ;;  %v4286_v9 = vadd.f32 %v4254_v18, %v12575_v49  ;;  %v3471_v48 = vld [vmem:[#allocation3 + $0xe0] sm:$0xff]  ;;  %v3474_v53 = vld [vmem:[#allocation3 + $0xf8] sm:$0xff] }
 0x41c   : > { %4320 = vst.msk [vmem:[#allocation3 + $0xb8] sm:$0xff] %vm1508_vm10, %v4288_v46  ;;  %v3472_v47 = vld [vmem:[#allocation3 + $0xe8] sm:$0xff]  ;;  %v12577_v49 = vld [vmem:[#allocation48_spill] sm:$0xff] }
 0x41d   : > { %v8847_v6 = vpop.f32.mrb[116].mxu1  ;;  %4318 = vst.msk [vmem:[#allocation3 + $0xa8] sm:$0xff] %vm1508_vm10, %v4286_v9  ;;  %v12576_v56 = vld [vmem:[#allocation47_spill] sm:$0xff] }
 0x41e   : > { %v3505_v21 = vadd.f32 %v8847_v6, %v3473_v26  ;;  %v3428_v41 = vpop.f32.mrb[117].mxu1  ;;  %v12578_v26 = vld [vmem:[#allocation49_spill] sm:$0xff] }
 0x41f   : > { %v3503_v16 = vadd.f32 %v3471_v48, %v3428_v41  ;;  %v8848_v54 = vpop.f32.mrb[118].mxu1  ;;  %v4259_v42 = vld [vmem:[#allocation3 + $0xd0] sm:$0xff] }
 0x420   : > { %3537 = vst.msk [vmem:[#allocation3 + $0xf0] sm:$0xff] %vm1508_vm10, %v3505_v21  ;;  %v3506_v55 = vadd.f32 %v8848_v54, %v3474_v53  ;;  %v3431_v58 = vpop.f32.mrb[119].mxu1  ;;  %v4291_v29 = vadd.f32 %v12576_v56, %v4259_v42  ;;  %v4257_v18 = vld [vmem:[#allocation3 + $0xc0] sm:$0xff]  ;;  %v4801_v53 = vld [vmem:[#allocation3 + $0x10] sm:$0xff] }
 0x421   : > { %3535 = vst.msk [vmem:[#allocation3 + $0xe0] sm:$0xff] %vm1508_vm10, %v3503_v16  ;;  %v3504_v46 = vadd.f32 %v3472_v47, %v3431_v58  ;;  %v4289_v9 = vadd.f32 %v4257_v18, %v12577_v49  ;;  %v4260_v6 = vld [vmem:[#allocation3 + $0xd8] sm:$0xff]  ;;  %v12579_v21 = vld [vmem:[#allocation50_spill] sm:$0xff] }
 0x422   : > { %3538 = vst.msk [vmem:[#allocation3 + $0xf8] sm:$0xff] %vm1508_vm10, %v3506_v55  ;;  %4323 = vst.msk [vmem:[#allocation3 + $0xd0] sm:$0xff] %vm1508_vm10, %v4291_v29  ;;  %v4292_v41 = vadd.f32 %v12578_v26, %v4260_v6  ;;  %v4258_v48 = vld [vmem:[#allocation3 + $0xc8] sm:$0xff]  ;;  %v4799_v55 = vld [vmem:[#allocation3] sm:$0xff] }
 0x423   : > { %3536 = vst.msk [vmem:[#allocation3 + $0xe8] sm:$0xff] %vm1508_vm10, %v3504_v46  ;;  %4321 = vst.msk [vmem:[#allocation3 + $0xc0] sm:$0xff] %vm1508_vm10, %v4289_v9  ;;  %v4290_v54 = vadd.f32 %v4258_v48, %v12579_v21  ;;  %v4802_v29 = vld [vmem:[#allocation3 + $0x18] sm:$0xff]  ;;  %v4800_v9 = vld [vmem:[#allocation3 + $0x8] sm:$0xff] }
 0x424   : > { %4324 = vst.msk [vmem:[#allocation3 + $0xd8] sm:$0xff] %vm1508_vm10, %v4292_v41 }
 0x425   : > { %v8887_v16 = vpop.f32.mrb[120].mxu1  ;;  %4322 = vst.msk [vmem:[#allocation3 + $0xc8] sm:$0xff] %vm1508_vm10, %v4290_v54 }
 0x426   : > { %v4833_v42 = vadd.f32 %v8887_v16, %v4801_v53  ;;  %v4672_v58 = vpop.f32.mrb[121].mxu1 }
 0x427   : > { %v4831_v47 = vadd.f32 %v4799_v55, %v4672_v58  ;;  %v8888_v56 = vpop.f32.mrb[122].mxu1  ;;  %v4263_v18 = vld [vmem:[#allocation3 + $0xf0] sm:$0xff]  ;;  %v4803_v55 = vld [vmem:[#allocation3 + $0x20] sm:$0xff] }
 0x428   : > { %4865 = vst.msk [vmem:[#allocation3 + $0x10] sm:$0xff] %vm1508_vm10, %v4833_v42  ;;  %v4834_v46 = vadd.f32 %v8888_v56, %v4802_v29  ;;  %v4675_v49 = vpop.f32.mrb[123].mxu1  ;;  %v4295_v6 = vadd.f32 %v11430_v31, %v4263_v18  ;;  %v4261_v26 = vld [vmem:[#allocation3 + $0xe0] sm:$0xff]  ;;  %v4805_v42 = vld [vmem:[#allocation3 + $0x30] sm:$0xff]  ;;  %v4806_v29 = vld [vmem:[#allocation3 + $0x38] sm:$0xff] }
 0x429   : > { %4863 = vst.msk [vmem:[#allocation3] sm:$0xff] %vm1508_vm10, %v4831_v47  ;;  %v4832_v41 = vadd.f32 %v4800_v9, %v4675_v49  ;;  %v4293_v48 = vadd.f32 %v4261_v26, %v11443_v36  ;;  %v4264_v21 = vld [vmem:[#allocation3 + $0xf8] sm:$0xff]  ;;  %v4804_v9 = vld [vmem:[#allocation3 + $0x28] sm:$0xff] }
 0x42a   : > { %4866 = vst.msk [vmem:[#allocation3 + $0x18] sm:$0xff] %vm1508_vm10, %v4834_v46  ;;  %4327 = vst.msk [vmem:[#allocation3 + $0xf0] sm:$0xff] %vm1508_vm10, %v4295_v6  ;;  %v4296_v54 = vadd.f32 %v11452_v60, %v4264_v21  ;;  %v4262_v16 = vld [vmem:[#allocation3 + $0xe8] sm:$0xff] }
 0x42b   : > { %4864 = vst.msk [vmem:[#allocation3 + $0x8] sm:$0xff] %vm1508_vm10, %v4832_v41  ;;  %4325 = vst.msk [vmem:[#allocation3 + $0xe0] sm:$0xff] %vm1508_vm10, %v4293_v48  ;;  %v4294_v31 = vadd.f32 %v4262_v16, %v11456_v2  ;;  %v12020_v47 = vpop.f32.mrb[208].mxu0 }
 0x42c   : > { %4328 = vst.msk [vmem:[#allocation3 + $0xf8] sm:$0xff] %vm1508_vm10, %v4296_v54  ;;  %v12022_v46 = vpop.f32.mrb[209].mxu0 }
 0x42d   : > { %v8891_v53 = vpop.f32.mrb[124].mxu1  ;;  %4326 = vst.msk [vmem:[#allocation3 + $0xe8] sm:$0xff] %vm1508_vm10, %v4294_v31  ;;  %v12028_v54 = vpop.f32.mrb[210].mxu0 }
 0x42e   : > { %v4837_v36 = vadd.f32 %v8891_v53, %v4805_v42  ;;  %v4688_v58 = vpop.f32.mrb[125].mxu1  ;;  %v12033_v53 = vpop.f32.mrb[211].mxu0  ;;  %v4809_v42 = vld [vmem:[#allocation3 + $0x50] sm:$0xff] }
 0x42f   : > { %v4835_v56 = vadd.f32 %v4803_v55, %v4688_v58  ;;  %v8892_v60 = vpop.f32.mrb[126].mxu1  ;;  %v5224_v18 = vld [vmem:[#allocation3 + $0x10] sm:$0xff]  ;;  %v4807_v55 = vld [vmem:[#allocation3 + $0x40] sm:$0xff] }
 0x430   : > { %4869 = vst.msk [vmem:[#allocation3 + $0x30] sm:$0xff] %vm1508_vm10, %v4837_v36  ;;  %v4838_v2 = vadd.f32 %v8892_v60, %v4806_v29  ;;  %v4691_v49 = vpop.f32.mrb[127].mxu1  ;;  %v5256_v6 = vadd.f32 %v11474_v24, %v5224_v18  ;;  %v5222_v26 = vld [vmem:[#allocation3] sm:$0xff]  ;;  %v4810_v60 = vld [vmem:[#allocation3 + $0x58] sm:$0xff] }
 0x431   : > { %4867 = vst.msk [vmem:[#allocation3 + $0x20] sm:$0xff] %vm1508_vm10, %v4835_v56  ;;  %v4836_v41 = vadd.f32 %v4804_v9, %v4691_v49  ;;  %v5254_v48 = vadd.f32 %v5222_v26, %v11477_v34  ;;  %v5225_v21 = vld [vmem:[#allocation3 + $0x18] sm:$0xff]  ;;  %v4808_v49 = vld [vmem:[#allocation3 + $0x48] sm:$0xff] }
 0x432   : > { %4870 = vst.msk [vmem:[#allocation3 + $0x38] sm:$0xff] %vm1508_vm10, %v4838_v2  ;;  %5288 = vst.msk [vmem:[#allocation3 + $0x10] sm:$0xff] %vm1508_vm10, %v5256_v6  ;;  %v5257_v16 = vadd.f32 %v11488_v50, %v5225_v21  ;;  %v5223_v31 = vld [vmem:[#allocation3 + $0x8] sm:$0xff] }
 0x433   : > { %4868 = vst.msk [vmem:[#allocation3 + $0x28] sm:$0xff] %vm1508_vm10, %v4836_v41  ;;  %5286 = vst.msk [vmem:[#allocation3] sm:$0xff] %vm1508_vm10, %v5254_v48  ;;  %v5255_v24 = vadd.f32 %v5223_v31, %v11498_v8  ;;  %v4813_v31 = vld [vmem:[#allocation3 + $0x70] sm:$0xff] }
 0x434   : > { %5289 = vst.msk [vmem:[#allocation3 + $0x18] sm:$0xff] %vm1508_vm10, %v5257_v16 }
 0x435   : > { %v8895_v34 = vpop.f32.mrb[128].mxu1  ;;  %5287 = vst.msk [vmem:[#allocation3 + $0x8] sm:$0xff] %vm1508_vm10, %v5255_v24 }
 0x436   : > { %v4841_v36 = vadd.f32 %v8895_v34, %v4809_v42  ;;  %v4704_v58 = vpop.f32.mrb[129].mxu1  ;;  %v4811_v34 = vld [vmem:[#allocation3 + $0x60] sm:$0xff] }
 0x437   : > { %v4839_v56 = vadd.f32 %v4807_v55, %v4704_v58  ;;  %v8896_v50 = vpop.f32.mrb[130].mxu1  ;;  %v5228_v29 = vld [vmem:[#allocation3 + $0x30] sm:$0xff]  ;;  %v4814_v58 = vld [vmem:[#allocation3 + $0x78] sm:$0xff] }
 0x438   : > { %4873 = vst.msk [vmem:[#allocation3 + $0x50] sm:$0xff] %vm1508_vm10, %v4841_v36  ;;  %v4842_v18 = vadd.f32 %v8896_v50, %v4810_v60  ;;  %v4707_v2 = vpop.f32.mrb[131].mxu1  ;;  %v5260_v8 = vadd.f32 %v11518_v51, %v5228_v29  ;;  %v5226_v9 = vld [vmem:[#allocation3 + $0x20] sm:$0xff]  ;;  %v4812_v50 = vld [vmem:[#allocation3 + $0x68] sm:$0xff] }
 0x439   : > { %4871 = vst.msk [vmem:[#allocation3 + $0x40] sm:$0xff] %vm1508_vm10, %v4839_v56  ;;  %v4840_v6 = vadd.f32 %v4808_v49, %v4707_v2  ;;  %v5258_v26 = vadd.f32 %v5226_v9, %v11526_v38  ;;  %v5229_v41 = vld [vmem:[#allocation3 + $0x38] sm:$0xff] }
 0x43a   : > { %4874 = vst.msk [vmem:[#allocation3 + $0x58] sm:$0xff] %vm1508_vm10, %v4842_v18  ;;  %5292 = vst.msk [vmem:[#allocation3 + $0x30] sm:$0xff] %vm1508_vm10, %v5260_v8  ;;  %v5261_v48 = vadd.f32 %v11536_v40, %v5229_v41  ;;  %v5227_v21 = vld [vmem:[#allocation3 + $0x28] sm:$0xff]  ;;  %v4815_v41 = vld [vmem:[#allocation3 + $0x80] sm:$0xff] }
 0x43b   : > { %4872 = vst.msk [vmem:[#allocation3 + $0x48] sm:$0xff] %vm1508_vm10, %v4840_v6  ;;  %5290 = vst.msk [vmem:[#allocation3 + $0x20] sm:$0xff] %vm1508_vm10, %v5258_v26  ;;  %v5259_v51 = vadd.f32 %v5227_v21, %v11549_v32  ;;  %v4817_v6 = vld [vmem:[#allocation3 + $0x90] sm:$0xff] }
 0x43c   : > { %5293 = vst.msk [vmem:[#allocation3 + $0x38] sm:$0xff] %vm1508_vm10, %v5261_v48 }
 0x43d   : > { %v8899_v16 = vpop.f32.mrb[132].mxu1  ;;  %5291 = vst.msk [vmem:[#allocation3 + $0x28] sm:$0xff] %vm1508_vm10, %v5259_v51  ;;  %v4818_v51 = vld [vmem:[#allocation3 + $0x98] sm:$0xff] }
 0x43e   : > { %v4845_v38 = vadd.f32 %v8899_v16, %v4813_v31  ;;  %v4720_v24 = vpop.f32.mrb[133].mxu1 }
 0x43f   : > { %v4843_v42 = vadd.f32 %v4811_v34, %v4720_v24  ;;  %v8900_v36 = vpop.f32.mrb[134].mxu1  ;;  %v5232_v40 = vld [vmem:[#allocation3 + $0x50] sm:$0xff] }
 0x440   : > { %4877 = vst.msk [vmem:[#allocation3 + $0x70] sm:$0xff] %vm1508_vm10, %v4845_v38  ;;  %v4846_v55 = vadd.f32 %v8900_v36, %v4814_v58  ;;  %v4723_v56 = vpop.f32.mrb[135].mxu1  ;;  %v5264_v32 = vadd.f32 %v11566_v19, %v5232_v40  ;;  %v5230_v60 = vld [vmem:[#allocation3 + $0x40] sm:$0xff]  ;;  %v4816_v38 = vld [vmem:[#allocation3 + $0x88] sm:$0xff] }
 0x441   : > { %4875 = vst.msk [vmem:[#allocation3 + $0x60] sm:$0xff] %vm1508_vm10, %v4843_v42  ;;  %v4844_v29 = vadd.f32 %v4812_v50, %v4723_v56  ;;  %v5262_v18 = vadd.f32 %v5230_v60, %v11575_v37  ;;  %v5233_v2 = vld [vmem:[#allocation3 + $0x58] sm:$0xff]  ;;  %v4821_v56 = vld [vmem:[#allocation3 + $0xb0] sm:$0xff] }
 0x442   : > { %4878 = vst.msk [vmem:[#allocation3 + $0x78] sm:$0xff] %vm1508_vm10, %v4846_v55  ;;  %5296 = vst.msk [vmem:[#allocation3 + $0x50] sm:$0xff] %vm1508_vm10, %v5264_v32  ;;  %v5265_v49 = vadd.f32 %v11587_v0, %v5233_v2  ;;  %v5231_v8 = vld [vmem:[#allocation3 + $0x48] sm:$0xff]  ;;  %v4819_v32 = vld [vmem:[#allocation3 + $0xa0] sm:$0xff] }
 0x443   : > { %4876 = vst.msk [vmem:[#allocation3 + $0x68] sm:$0xff] %vm1508_vm10, %v4844_v29  ;;  %5294 = vst.msk [vmem:[#allocation3 + $0x40] sm:$0xff] %vm1508_vm10, %v5262_v18  ;;  %v5263_v19 = vadd.f32 %v5231_v8, %v11591_v13  ;;  %v4822_v18 = vld [vmem:[#allocation3 + $0xb8] sm:$0xff]  ;;  %v4820_v8 = vld [vmem:[#allocation3 + $0xa8] sm:$0xff] }
 0x444   : > { %5297 = vst.msk [vmem:[#allocation3 + $0x58] sm:$0xff] %vm1508_vm10, %v5265_v49 }
 0x445   : > { %v8903_v9 = vpop.f32.mrb[136].mxu1  ;;  %5295 = vst.msk [vmem:[#allocation3 + $0x48] sm:$0xff] %vm1508_vm10, %v5263_v19  ;;  %v12580_v19 = vld [vmem:[#allocation46_spill] sm:$0xff] }
 0x446   : > { %v4849_v37 = vadd.f32 %v8903_v9, %v4817_v6  ;;  %v4736_v26 = vpop.f32.mrb[137].mxu1 }
 0x447   : > { %v4847_v48 = vadd.f32 %v4815_v41, %v4736_v26  ;;  %v8904_v21 = vpop.f32.mrb[138].mxu1  ;;  %v5236_v0 = vld [vmem:[#allocation3 + $0x70] sm:$0xff] }
 0x448   : > { %4881 = vst.msk [vmem:[#allocation3 + $0x90] sm:$0xff] %vm1508_vm10, %v4849_v37  ;;  %v4850_v16 = vadd.f32 %v8904_v21, %v4818_v51  ;;  %v4739_v31 = vpop.f32.mrb[139].mxu1  ;;  %v5268_v13 = vadd.f32 %v11605_v33, %v5236_v0  ;;  %v5234_v24 = vld [vmem:[#allocation3 + $0x60] sm:$0xff]  ;;  %v12581_v37 = vld [vmem:[#allocation51_spill] sm:$0xff] }
 0x449   : > { %4879 = vst.msk [vmem:[#allocation3 + $0x80] sm:$0xff] %vm1508_vm10, %v4847_v48  ;;  %v4848_v34 = vadd.f32 %v4816_v38, %v4739_v31  ;;  %v5266_v42 = vadd.f32 %v5234_v24, %v11608_v25  ;;  %v5237_v36 = vld [vmem:[#allocation3 + $0x78] sm:$0xff]  ;;  %v4825_v38 = vld [vmem:[#allocation3 + $0xd0] sm:$0xff] }
 0x44a   : > { %4882 = vst.msk [vmem:[#allocation3 + $0x98] sm:$0xff] %vm1508_vm10, %v4850_v16  ;;  %5300 = vst.msk [vmem:[#allocation3 + $0x70] sm:$0xff] %vm1508_vm10, %v5268_v13  ;;  %v5269_v58 = vadd.f32 %v11615_v28, %v5237_v36  ;;  %v5235_v40 = vld [vmem:[#allocation3 + $0x68] sm:$0xff]  ;;  %v12582_v48 = vld [vmem:[#allocation52_spill] sm:$0xff] }
 0x44b   : > { %4880 = vst.msk [vmem:[#allocation3 + $0x88] sm:$0xff] %vm1508_vm10, %v4848_v34  ;;  %5298 = vst.msk [vmem:[#allocation3 + $0x60] sm:$0xff] %vm1508_vm10, %v5266_v42  ;;  %v5267_v33 = vadd.f32 %v5235_v40, %v11627_v27  ;;  %v12583_v0 = vld [vmem:[#allocation53_spill] sm:$0xff] }
 0x44c   : > { %5301 = vst.msk [vmem:[#allocation3 + $0x78] sm:$0xff] %vm1508_vm10, %v5269_v58  ;;  %v4823_v34 = vld [vmem:[#allocation3 + $0xc0] sm:$0xff]  ;;  %v4826_v58 = vld [vmem:[#allocation3 + $0xd8] sm:$0xff] }
 0x44d   : > { %v8907_v55 = vpop.f32.mrb[140].mxu1  ;;  %5299 = vst.msk [vmem:[#allocation3 + $0x68] sm:$0xff] %vm1508_vm10, %v5267_v33 }
 0x44e   : > { %v4853_v25 = vadd.f32 %v8907_v55, %v4821_v56  ;;  %v4752_v50 = vpop.f32.mrb[141].mxu1  ;;  %v4824_v56 = vld [vmem:[#allocation3 + $0xc8] sm:$0xff] }
 0x44f   : > { %v4851_v60 = vadd.f32 %v4819_v32, %v4752_v50  ;;  %v8908_v29 = vpop.f32.mrb[142].mxu1  ;;  %v5240_v28 = vld [vmem:[#allocation3 + $0x90] sm:$0xff] }
 0x450   : > { %4885 = vst.msk [vmem:[#allocation3 + $0xb0] sm:$0xff] %vm1508_vm10, %v4853_v25  ;;  %v4854_v2 = vadd.f32 %v8908_v29, %v4822_v18  ;;  %v4755_v49 = vpop.f32.mrb[143].mxu1  ;;  %v5272_v27 = vadd.f32 %v12580_v19, %v5240_v28  ;;  %v5238_v9 = vld [vmem:[#allocation3 + $0x80] sm:$0xff] }
 0x451   : > { %4883 = vst.msk [vmem:[#allocation3 + $0xa0] sm:$0xff] %vm1508_vm10, %v4851_v60  ;;  %v4852_v6 = vadd.f32 %v4820_v8, %v4755_v49  ;;  %v5270_v26 = vadd.f32 %v5238_v9, %v12581_v37  ;;  %v5241_v41 = vld [vmem:[#allocation3 + $0x98] sm:$0xff]  ;;  %v4829_v49 = vld [vmem:[#allocation3 + $0xf0] sm:$0xff]  ;;  %v4827_v19 = vld [vmem:[#allocation3 + $0xe0] sm:$0xff] }
 0x452   : > { %4886 = vst.msk [vmem:[#allocation3 + $0xb8] sm:$0xff] %vm1508_vm10, %v4854_v2  ;;  %5304 = vst.msk [vmem:[#allocation3 + $0x90] sm:$0xff] %vm1508_vm10, %v5272_v27  ;;  %v5273_v21 = vadd.f32 %v12582_v48, %v5241_v41  ;;  %v5239_v51 = vld [vmem:[#allocation3 + $0x88] sm:$0xff] }
 0x453   : > { %4884 = vst.msk [vmem:[#allocation3 + $0xa8] sm:$0xff] %vm1508_vm10, %v4852_v6  ;;  %5302 = vst.msk [vmem:[#allocation3 + $0x80] sm:$0xff] %vm1508_vm10, %v5270_v26  ;;  %v5271_v16 = vadd.f32 %v5239_v51, %v12583_v0  ;;  %v4830_v6 = vld [vmem:[#allocation3 + $0xf8] sm:$0xff]  ;;  %v4828_v41 = vld [vmem:[#allocation3 + $0xe8] sm:$0xff] }
 0x454   : > { %5305 = vst.msk [vmem:[#allocation3 + $0x98] sm:$0xff] %vm1508_vm10, %v5273_v21 }
 0x455   : > { %v8911_v31 = vpop.f32.mrb[144].mxu1  ;;  %5303 = vst.msk [vmem:[#allocation3 + $0x88] sm:$0xff] %vm1508_vm10, %v5271_v16 }
 0x456   : > { %v4857_v13 = vadd.f32 %v8911_v31, %v4825_v38  ;;  %v4768_v24 = vpop.f32.mrb[145].mxu1 }
 0x457   : > { %v4855_v42 = vadd.f32 %v4823_v34, %v4768_v24  ;;  %v8912_v36 = vpop.f32.mrb[146].mxu1  ;;  %v5244_v40 = vld [vmem:[#allocation3 + $0xb0] sm:$0xff]  ;;  %v6012_v34 = vld [vmem:[#allocation3] sm:$0xff] }
 0x458   : > { %4889 = vst.msk [vmem:[#allocation3 + $0xd0] sm:$0xff] %vm1508_vm10, %v4857_v13  ;;  %v4858_v33 = vadd.f32 %v8912_v36, %v4826_v58  ;;  %v4771_v55 = vpop.f32.mrb[147].mxu1  ;;  %v5276_v25 = vadd.f32 %v11674_v20, %v5244_v40  ;;  %v5242_v50 = vld [vmem:[#allocation3 + $0xa0] sm:$0xff]  ;;  %v6014_v13 = vld [vmem:[#allocation3 + $0x10] sm:$0xff]  ;;  %v6015_v58 = vld [vmem:[#allocation3 + $0x18] sm:$0xff] }
 0x459   : > { %4887 = vst.msk [vmem:[#allocation3 + $0xc0] sm:$0xff] %vm1508_vm10, %v4855_v42  ;;  %v4856_v32 = vadd.f32 %v4824_v56, %v4771_v55  ;;  %v5274_v60 = vadd.f32 %v5242_v50, %v11678_v62  ;;  %v5245_v29 = vld [vmem:[#allocation3 + $0xb8] sm:$0xff]  ;;  %v6013_v55 = vld [vmem:[#allocation3 + $0x8] sm:$0xff] }
 0x45a   : > { %4890 = vst.msk [vmem:[#allocation3 + $0xd8] sm:$0xff] %vm1508_vm10, %v4858_v33  ;;  %5308 = vst.msk [vmem:[#allocation3 + $0xb0] sm:$0xff] %vm1508_vm10, %v5276_v25  ;;  %v5277_v18 = vadd.f32 %v11698_v11, %v5245_v29  ;;  %v5243_v28 = vld [vmem:[#allocation3 + $0xa8] sm:$0xff] }
 0x45b   : > { %4888 = vst.msk [vmem:[#allocation3 + $0xc8] sm:$0xff] %vm1508_vm10, %v4856_v32  ;;  %5306 = vst.msk [vmem:[#allocation3 + $0xa0] sm:$0xff] %vm1508_vm10, %v5274_v60  ;;  %v5275_v20 = vadd.f32 %v5243_v28, %v11713_v10 }
 0x45c   : > { %5309 = vst.msk [vmem:[#allocation3 + $0xb8] sm:$0xff] %vm1508_vm10, %v5277_v18  ;;  %v12584_v18 = vld [vmem:[#allocation54_spill] sm:$0xff] }
 0x45d   : > { %v8915_v2 = vpop.f32.mrb[148].mxu1  ;;  %5307 = vst.msk [vmem:[#allocation3 + $0xa8] sm:$0xff] %vm1508_vm10, %v5275_v20  ;;  %v6018_v20 = vld [vmem:[#allocation3 + $0x30] sm:$0xff] }
 0x45e   : > { %v4861_v62 = vadd.f32 %v8915_v2, %v4829_v49  ;;  %v4784_v8 = vpop.f32.mrb[149].mxu1  ;;  %v6016_v49 = vld [vmem:[#allocation3 + $0x20] sm:$0xff] }
 0x45f   : > { %v4859_v27 = vadd.f32 %v4827_v19, %v4784_v8  ;;  %v8916_v9 = vpop.f32.mrb[150].mxu1  ;;  %v5248_v11 = vld [vmem:[#allocation3 + $0xd0] sm:$0xff] }
 0x460   : > { %4893 = vst.msk [vmem:[#allocation3 + $0xf0] sm:$0xff] %vm1508_vm10, %v4861_v62  ;;  %v4862_v37 = vadd.f32 %v8916_v9, %v4830_v6  ;;  %v4787_v26 = vpop.f32.mrb[151].mxu1  ;;  %v5280_v10 = vadd.f32 %v11723_v35, %v5248_v11  ;;  %v5246_v48 = vld [vmem:[#allocation3 + $0xc0] sm:$0xff] }
 0x461   : > { %4891 = vst.msk [vmem:[#allocation3 + $0xe0] sm:$0xff] %vm1508_vm10, %v4859_v27  ;;  %v4860_v21 = vadd.f32 %v4828_v41, %v4787_v26  ;;  %v5278_v51 = vadd.f32 %v5246_v48, %v11729_v61  ;;  %v5249_v0 = vld [vmem:[#allocation3 + $0xd8] sm:$0xff]  ;;  %v12585_v27 = vld [vmem:[#allocation55_spill] sm:$0xff] }
 0x462   : > { %4894 = vst.msk [vmem:[#allocation3 + $0xf8] sm:$0xff] %vm1508_vm10, %v4862_v37  ;;  %5312 = vst.msk [vmem:[#allocation3 + $0xd0] sm:$0xff] %vm1508_vm10, %v5280_v10  ;;  %v5281_v16 = vadd.f32 %v11735_v52, %v5249_v0  ;;  %v5247_v31 = vld [vmem:[#allocation3 + $0xc8] sm:$0xff]  ;;  %v12586_v41 = vld [vmem:[#allocation56_spill] sm:$0xff] }
 0x463   : > { %4892 = vst.msk [vmem:[#allocation3 + $0xe8] sm:$0xff] %vm1508_vm10, %v4860_v21  ;;  %5310 = vst.msk [vmem:[#allocation3 + $0xc0] sm:$0xff] %vm1508_vm10, %v5278_v51  ;;  %v5279_v35 = vadd.f32 %v5247_v31, %v11739_v45  ;;  %v6017_v26 = vld [vmem:[#allocation3 + $0x28] sm:$0xff]  ;;  %v12587_v51 = vld [vmem:[#allocation57_spill] sm:$0xff] }
 0x464   : > { %5313 = vst.msk [vmem:[#allocation3 + $0xd8] sm:$0xff] %vm1508_vm10, %v5281_v16  ;;  %v12588_v31 = vld [vmem:[#allocation58_spill] sm:$0xff] }
 0x465   : > { %v8955_v38 = vpop.f32.mrb[152].mxu1  ;;  %5311 = vst.msk [vmem:[#allocation3 + $0xc8] sm:$0xff] %vm1508_vm10, %v5279_v35 }
 0x466   : > { %v6046_v61 = vadd.f32 %v8955_v38, %v6014_v13  ;;  %v5885_v24 = vpop.f32.mrb[153].mxu1  ;;  %v6022_v13 = vld [vmem:[#allocation3 + $0x50] sm:$0xff] }
 0x467   : > { %v6044_v42 = vadd.f32 %v6012_v34, %v5885_v24  ;;  %v8956_v36 = vpop.f32.mrb[154].mxu1  ;;  %v5252_v52 = vld [vmem:[#allocation3 + $0xf0] sm:$0xff]  ;;  %v6020_v34 = vld [vmem:[#allocation3 + $0x40] sm:$0xff] }
 0x468   : > { %6078 = vst.msk [vmem:[#allocation3 + $0x10] sm:$0xff] %vm1508_vm10, %v6046_v61  ;;  %v6047_v40 = vadd.f32 %v8956_v36, %v6015_v58  ;;  %v5888_v33 = vpop.f32.mrb[155].mxu1  ;;  %v5284_v45 = vadd.f32 %v11753_v3, %v5252_v52  ;;  %v5250_v56 = vld [vmem:[#allocation3 + $0xe0] sm:$0xff]  ;;  %v6023_v52 = vld [vmem:[#allocation3 + $0x58] sm:$0xff] }
 0x469   : > { %6076 = vst.msk [vmem:[#allocation3] sm:$0xff] %vm1508_vm10, %v6044_v42  ;;  %v6045_v25 = vadd.f32 %v6013_v55, %v5888_v33  ;;  %v5282_v50 = vadd.f32 %v5250_v56, %v11761_v1  ;;  %v5253_v32 = vld [vmem:[#allocation3 + $0xf8] sm:$0xff]  ;;  %v12589_v33 = vld [vmem:[#allocation59_spill] sm:$0xff] }
 0x46a   : > { %6079 = vst.msk [vmem:[#allocation3 + $0x18] sm:$0xff] %vm1508_vm10, %v6047_v40  ;;  %5316 = vst.msk [vmem:[#allocation3 + $0xf0] sm:$0xff] %vm1508_vm10, %v5284_v45  ;;  %v5285_v60 = vadd.f32 %v11767_v7, %v5253_v32  ;;  %v5251_v29 = vld [vmem:[#allocation3 + $0xe8] sm:$0xff]  ;;  %v6019_v7 = vld [vmem:[#allocation3 + $0x38] sm:$0xff] }
 0x46b   : > { %6077 = vst.msk [vmem:[#allocation3 + $0x8] sm:$0xff] %vm1508_vm10, %v6045_v25  ;;  %5314 = vst.msk [vmem:[#allocation3 + $0xe0] sm:$0xff] %vm1508_vm10, %v5282_v50  ;;  %v5283_v3 = vadd.f32 %v5251_v29, %v12584_v18  ;;  %v12136_v40 = vld [vmem:[#allocation12] ss:$0 sm:$0xff]  ;;  %v6021_v50 = vld [vmem:[#allocation3 + $0x48] sm:$0xff] }
 0x46c   : > { %5317 = vst.msk [vmem:[#allocation3 + $0xf8] sm:$0xff] %vm1508_vm10, %v5285_v60  ;;  %v12590_v32 = vld [vmem:[#allocation60_spill] sm:$0xff] }
 0x46d   : > { %v8959_v28 = vpop.f32.mrb[156].mxu1  ;;  %5315 = vst.msk [vmem:[#allocation3 + $0xe8] sm:$0xff] %vm1508_vm10, %v5283_v3 }
 0x46e   : > { %v6050_v1 = vadd.f32 %v8959_v28, %v6018_v20  ;;  %v5901_v2 = vpop.f32.mrb[157].mxu1  ;;  %v12591_v28 = vld [vmem:[#allocation61_spill] sm:$0xff] }
 0x46f   : > { %v6580_v62 = vld [vmem:[#allocation3 + $0x10] sm:$0xff]  ;;  %v6048_v8 = vadd.f32 %v6016_v49, %v5901_v2  ;;  %v8960_v19 = vpop.f32.mrb[158].mxu1 }
 0x470   : > { %v6612_v9 = vadd.f32 %v12585_v27, %v6580_v62  ;;  %v6578_v6 = vld [vmem:[#allocation3] sm:$0xff]  ;;  %6082 = vst.msk [vmem:[#allocation3 + $0x30] sm:$0xff] %vm1508_vm10, %v6050_v1  ;;  %v6051_v11 = vadd.f32 %v8960_v19, %v6019_v7  ;;  %v5904_v37 = vpop.f32.mrb[159].mxu1  ;;  %v7278_v19 = vpop.permute.xlu0 %7277 }
 0x471   : > { %v6610_v10 = vadd.f32 %v6578_v6, %v12586_v41  ;;  %v6581_v48 = vld [vmem:[#allocation3 + $0x18] sm:$0xff]  ;;  %6080 = vst.msk [vmem:[#allocation3 + $0x20] sm:$0xff] %vm1508_vm10, %v6048_v8  ;;  %v6049_v21 = vadd.f32 %v6017_v26, %v5904_v37  ;;  %v12592_v62 = vld [vmem:[#allocation62_spill] sm:$0xff]  ;;  %v6026_v26 = vld [vmem:[#allocation3 + $0x70] sm:$0xff] }
 0x472   : > { %6644 = vst.msk [vmem:[#allocation3 + $0x10] sm:$0xff] %vm1508_vm10, %v6612_v9  ;;  %v6613_v0 = vadd.f32 %v12587_v51, %v6581_v48  ;;  %v6579_v16 = vld [vmem:[#allocation3 + $0x8] sm:$0xff]  ;;  %6083 = vst.msk [vmem:[#allocation3 + $0x38] sm:$0xff] %vm1508_vm10, %v6051_v11  ;;  %v6024_v48 = vld [vmem:[#allocation3 + $0x60] sm:$0xff] }
 0x473   : > { %6642 = vst.msk [vmem:[#allocation3] sm:$0xff] %vm1508_vm10, %v6610_v10  ;;  %v6611_v35 = vadd.f32 %v6579_v16, %v12588_v31  ;;  %6081 = vst.msk [vmem:[#allocation3 + $0x28] sm:$0xff] %vm1508_vm10, %v6049_v21 }
 0x474   : > { %6645 = vst.msk [vmem:[#allocation3 + $0x18] sm:$0xff] %vm1508_vm10, %v6613_v0 }
 0x475   : > { %6643 = vst.msk [vmem:[#allocation3 + $0x8] sm:$0xff] %vm1508_vm10, %v6611_v35  ;;  %v8963_v38 = vpop.f32.mrb[160].mxu1 }
 0x476   : > { %v6054_v61 = vadd.f32 %v8963_v38, %v6022_v13  ;;  %v5917_v24 = vpop.f32.mrb[161].mxu1  ;;  %v6027_v13 = vld [vmem:[#allocation3 + $0x78] sm:$0xff] }
 0x477   : > { %v6584_v42 = vld [vmem:[#allocation3 + $0x30] sm:$0xff]  ;;  %v6052_v36 = vadd.f32 %v6020_v34, %v5917_v24  ;;  %v8964_v58 = vpop.f32.mrb[162].mxu1 }
 0x478   : > { %v6616_v55 = vadd.f32 %v12589_v33, %v6584_v42  ;;  %v6582_v45 = vld [vmem:[#allocation3 + $0x20] sm:$0xff]  ;;  %6086 = vst.msk [vmem:[#allocation3 + $0x50] sm:$0xff] %vm1508_vm10, %v6054_v61  ;;  %v6055_v56 = vadd.f32 %v8964_v58, %v6023_v52  ;;  %v5920_v25 = vpop.f32.mrb[163].mxu1 }
 0x479   : > { %v6614_v60 = vadd.f32 %v6582_v45, %v12590_v32  ;;  %v6585_v29 = vld [vmem:[#allocation3 + $0x38] sm:$0xff]  ;;  %6084 = vst.msk [vmem:[#allocation3 + $0x40] sm:$0xff] %vm1508_vm10, %v6052_v36  ;;  %v6053_v18 = vadd.f32 %v6021_v50, %v5920_v25  ;;  %v6676_v3 = vld [vmem:[#allocation3 + $0x10] sm:$0xff]  ;;  %v6025_v36 = vld [vmem:[#allocation3 + $0x68] sm:$0xff] }
 0x47a   : > { %6648 = vst.msk [vmem:[#allocation3 + $0x30] sm:$0xff] %vm1508_vm10, %v6616_v55  ;;  %v6617_v20 = vadd.f32 %v12591_v28, %v6585_v29  ;;  %v6583_v1 = vld [vmem:[#allocation3 + $0x28] sm:$0xff]  ;;  %6087 = vst.msk [vmem:[#allocation3 + $0x58] sm:$0xff] %vm1508_vm10, %v6055_v56  ;;  %v6674_v2 = vld [vmem:[#allocation3] sm:$0xff]  ;;  %v6715_v49 = vadd.f32 %v12136_v40, %v6676_v3  ;;  %v7280_v56 = vpop.permute.xlu0 %7279  ;;  %v7282_v28 = vpop.permute.xlu1 %7281 }
 0x47b   : > { %6646 = vst.msk [vmem:[#allocation3 + $0x20] sm:$0xff] %vm1508_vm10, %v6614_v60  ;;  %v6615_v8 = vadd.f32 %v6583_v1, %v12592_v62  ;;  %6085 = vst.msk [vmem:[#allocation3 + $0x48] sm:$0xff] %vm1508_vm10, %v6053_v18  ;;  %v6713_v7 = vadd.f32 %v12136_v40, %v6674_v2  ;;  %v6677_v27 = vld [vmem:[#allocation3 + $0x18] sm:$0xff] }
 0x47c   : > { %6649 = vst.msk [vmem:[#allocation3 + $0x38] sm:$0xff] %vm1508_vm10, %v6617_v20  ;;  %v6675_v9 = vld [vmem:[#allocation3 + $0x8] sm:$0xff]  ;;  %v6716_v6 = vadd.f32 %v12136_v40, %v6677_v27  ;;  %v6747_v21 = vmax.f32 %v6715_v49, 0.0 }
 0x47d   : > { %6647 = vst.msk [vmem:[#allocation3 + $0x28] sm:$0xff] %vm1508_vm10, %v6615_v8  ;;  %v6714_v11 = vadd.f32 %v12136_v40, %v6675_v9  ;;  %v8967_v37 = vpop.f32.mrb[164].mxu1  ;;  %v6745_v16 = vmax.f32 %v6713_v7, 0.0  ;;  %v6030_v7 = vld [vmem:[#allocation3 + $0x90] sm:$0xff] }
 0x47e   : > { %v6058_v41 = vadd.f32 %v8967_v37, %v6026_v26  ;;  %v5933_v10 = vpop.f32.mrb[165].mxu1  ;;  %v6748_v51 = vmax.f32 %v6716_v6, 0.0  ;;  %v6028_v6 = vld [vmem:[#allocation3 + $0x80] sm:$0xff] }
 0x47f   : > { %v6588_v0 = vld [vmem:[#allocation3 + $0x50] sm:$0xff]  ;;  %v6746_v31 = vmax.f32 %v6714_v11, 0.0  ;;  %v6056_v35 = vadd.f32 %v6024_v48, %v5933_v10  ;;  %v8968_v38 = vpop.f32.mrb[166].mxu1 }
 0x480   : > { %v6620_v61 = vadd.f32 %v11842_v57, %v6588_v0  ;;  %v6586_v24 = vld [vmem:[#allocation3 + $0x40] sm:$0xff]  ;;  %6090 = vst.msk [vmem:[#allocation3 + $0x70] sm:$0xff] %vm1508_vm10, %v6058_v41  ;;  %v6059_v34 = vadd.f32 %v8968_v38, %v6027_v13  ;;  %v5936_v42 = vpop.f32.mrb[167].mxu1  ;;  %v6778_v58 = vpack.c.bf16 %v6748_v51, %v6747_v21  ;;  %v12593_v57 = vld [vmem:[#allocation63_spill] sm:$0xff]  ;;  %v6031_v51 = vld [vmem:[#allocation3 + $0x98] sm:$0xff] }
 0x481   : > { %v6618_v52 = vadd.f32 %v6586_v24, %v11847_v30  ;;  %v6589_v33 = vld [vmem:[#allocation3 + $0x58] sm:$0xff]  ;;  %v6777_v55 = vpack.c.bf16 %v6746_v31, %v6745_v16  ;;  %6088 = vst.msk [vmem:[#allocation3 + $0x60] sm:$0xff] %vm1508_vm10, %v6056_v35  ;;  %v6057_v45 = vadd.f32 %v6025_v36, %v5936_v42  ;;  %v6680_v25 = vld [vmem:[#allocation3 + $0x30] sm:$0xff]  ;;  %v6029_v38 = vld [vmem:[#allocation3 + $0x88] sm:$0xff]  ;;  %v7284_v36 = vpop.permute.xlu1 %7283 }
 0x482   : > { %6652 = vst.msk [vmem:[#allocation3 + $0x50] sm:$0xff] %vm1508_vm10, %v6620_v61  ;;  %v6621_v50 = vadd.f32 %v12593_v57, %v6589_v33  ;;  %v6587_v32 = vld [vmem:[#allocation3 + $0x48] sm:$0xff]  ;;  %6091 = vst.msk [vmem:[#allocation3 + $0x78] sm:$0xff] %vm1508_vm10, %v6059_v34  ;;  %v6678_v60 = vld [vmem:[#allocation3 + $0x20] sm:$0xff]  ;;  %v6719_v29 = vadd.f32 %v12136_v40, %v6680_v25  ;;  %v7314_v2 = vsel %vm1508_vm10, %v6778_v58, %v7280_v56 }
 0x483   : > { %6650 = vst.msk [vmem:[#allocation3 + $0x40] sm:$0xff] %vm1508_vm10, %v6618_v52  ;;  %v12594_v30 = vld [vmem:[#allocation64_spill] sm:$0xff]  ;;  %v7311_v3 = vsel %vm1508_vm10, %v6777_v55, %v7278_v19  ;;  %6089 = vst.msk [vmem:[#allocation3 + $0x68] sm:$0xff] %vm1508_vm10, %v6057_v45  ;;  %v6717_v20 = vadd.f32 %v12136_v40, %v6678_v60 }
 0x484   : > { %v6619_v18 = vadd.f32 %v6587_v32, %v12594_v30  ;;  %v6681_v1 = vld [vmem:[#allocation3 + $0x38] sm:$0xff]  ;;  %6653 = vst.msk [vmem:[#allocation3 + $0x58] sm:$0xff] %vm1508_vm10, %v6621_v50  ;;  %9021 = vmatprep.mubr.msk.bf16.mxu1 %vm7371_vm2, %v7311_v3  ;;  %v6679_v49 = vld [vmem:[#allocation3 + $0x28] sm:$0xff]  ;;  %v6751_v11 = vmax.f32 %v6719_v29, 0.0 }
 0x485   : > { %v6720_v62 = vadd.f32 %v12136_v40, %v6681_v1  ;;  %v6718_v8 = vadd.f32 %v12136_v40, %v6679_v49  ;;  %v8971_v19 = vpop.f32.mrb[168].mxu1  ;;  %9022 = vmatmul.mubr.msk.bf16.vlgmr.msra.gmra.mrb[184].mxu1 %vm7371_vm2, %v7314_v2  ;;  %v6749_v41 = vmax.f32 %v6717_v20, 0.0  ;;  %v6035_v49 = vld [vmem:[#allocation3 + $0xb8] sm:$0xff] }
 0x486   : > { %6651 = vst.msk [vmem:[#allocation3 + $0x48] sm:$0xff] %vm1508_vm10, %v6619_v18  ;;  %v6062_v27 = vadd.f32 %v8971_v19, %v6030_v7  ;;  %v5949_v9 = vpop.f32.mrb[169].mxu1  ;;  %v6032_v18 = vld [vmem:[#allocation3 + $0xa0] sm:$0xff] }
 0x487   : > { %v6752_v37 = vmax.f32 %v6720_v62, 0.0  ;;  %v6592_v26 = vld [vmem:[#allocation3 + $0x70] sm:$0xff]  ;;  %v6750_v10 = vmax.f32 %v6718_v8, 0.0  ;;  %v6060_v48 = vadd.f32 %v6028_v6, %v5949_v9  ;;  %v8972_v21 = vpop.f32.mrb[170].mxu1  ;;  %v6033_v6 = vld [vmem:[#allocation3 + $0xa8] sm:$0xff] }
 0x488   : > { %v6624_v0 = vadd.f32 %v11869_v59, %v6592_v26  ;;  %v6590_v16 = vld [vmem:[#allocation3 + $0x60] sm:$0xff]  ;;  %6094 = vst.msk [vmem:[#allocation3 + $0x90] sm:$0xff] %vm1508_vm10, %v6062_v27  ;;  %v6063_v31 = vadd.f32 %v8972_v21, %v6031_v51  ;;  %v5952_v35 = vpop.f32.mrb[171].mxu1 }
 0x489   : > { %v6780_v13 = vpack.c.bf16 %v6752_v37, %v6751_v11  ;;  %v6622_v61 = vadd.f32 %v6590_v16, %v11874_v15  ;;  %v6593_v24 = vld [vmem:[#allocation3 + $0x78] sm:$0xff]  ;;  %v6779_v34 = vpack.c.bf16 %v6750_v10, %v6749_v41  ;;  %6092 = vst.msk [vmem:[#allocation3 + $0x80] sm:$0xff] %vm1508_vm10, %v6060_v48  ;;  %v6061_v42 = vadd.f32 %v6029_v38, %v5952_v35  ;;  %v6684_v58 = vld [vmem:[#allocation3 + $0x50] sm:$0xff]  ;;  %v7286_v37 = vpop.permute.xlu0 %7285  ;;  %v7288_v48 = vpop.permute.xlu1 %7287 }
 0x48a   : > { %6656 = vst.msk [vmem:[#allocation3 + $0x70] sm:$0xff] %vm1508_vm10, %v6624_v0  ;;  %v6625_v59 = vadd.f32 %v11877_v5, %v6593_v24  ;;  %v6591_v52 = vld [vmem:[#allocation3 + $0x68] sm:$0xff]  ;;  %6095 = vst.msk [vmem:[#allocation3 + $0x98] sm:$0xff] %vm1508_vm10, %v6063_v31  ;;  %v6723_v33 = vadd.f32 %v12136_v40, %v6684_v58  ;;  %v6682_v55 = vld [vmem:[#allocation3 + $0x40] sm:$0xff] }
 0x48b   : > { %6654 = vst.msk [vmem:[#allocation3 + $0x60] sm:$0xff] %vm1508_vm10, %v6622_v61  ;;  %v6623_v15 = vadd.f32 %v6591_v52, %v11879_v12  ;;  %v7317_v45 = vsel %vm1508_vm10, %v6779_v34, %v7282_v28  ;;  %6093 = vst.msk [vmem:[#allocation3 + $0x88] sm:$0xff] %vm1508_vm10, %v6061_v42  ;;  %v6685_v56 = vld [vmem:[#allocation3 + $0x58] sm:$0xff]  ;;  %v6721_v25 = vadd.f32 %v12136_v40, %v6682_v55  ;;  %v6034_v12 = vld [vmem:[#allocation3 + $0xb0] sm:$0xff] }
 0x48c   : > { %6657 = vst.msk [vmem:[#allocation3 + $0x78] sm:$0xff] %vm1508_vm10, %v6625_v59  ;;  %v7320_v5 = vsel %vm1508_vm10, %v6780_v13, %v7284_v36  ;;  %9025 = vmatprep.mubr.msk.bf16.mxu1 %vm7371_vm2, %v7317_v45  ;;  %v6724_v57 = vadd.f32 %v12136_v40, %v6685_v56  ;;  %v6755_v3 = vmax.f32 %v6723_v33, 0.0  ;;  %v6036_v59 = vld [vmem:[#allocation3 + $0xc0] sm:$0xff]  ;;  %v6039_v56 = vld [vmem:[#allocation3 + $0xd8] sm:$0xff] }
 0x48d   : > { %v6683_v50 = vld [vmem:[#allocation3 + $0x48] sm:$0xff]  ;;  %6655 = vst.msk [vmem:[#allocation3 + $0x68] sm:$0xff] %vm1508_vm10, %v6623_v15  ;;  %v8975_v32 = vpop.f32.mrb[172].mxu1  ;;  %9026 = vmatmul.mubr.msk.bf16.gmra.mrb[188].mxu1 %vm7371_vm2, %v7320_v5  ;;  %v6753_v62 = vmax.f32 %v6721_v25, 0.0 }
 0x48e   : > { %v6722_v60 = vadd.f32 %v12136_v40, %v6683_v50  ;;  %v6066_v29 = vadd.f32 %v8975_v32, %v6034_v12  ;;  %v5965_v30 = vpop.f32.mrb[173].mxu1  ;;  %v6756_v28 = vmax.f32 %v6724_v57, 0.0 }
 0x48f   : > { %v6596_v20 = vld [vmem:[#allocation3 + $0x90] sm:$0xff]  ;;  %v6064_v1 = vadd.f32 %v6032_v18, %v5965_v30  ;;  %v8976_v2 = vpop.f32.mrb[174].mxu1  ;;  %v7290_v30 = vpop.permute.xlu0 %7289 }
 0x490   : > { %v6754_v8 = vmax.f32 %v6722_v60, 0.0  ;;  %v6628_v19 = vadd.f32 %v11889_v14, %v6596_v20  ;;  %v6594_v7 = vld [vmem:[#allocation3 + $0x80] sm:$0xff]  ;;  %6098 = vst.msk [vmem:[#allocation3 + $0xb0] sm:$0xff] %vm1508_vm10, %v6066_v29  ;;  %v6067_v27 = vadd.f32 %v8976_v2, %v6035_v49  ;;  %v5968_v9 = vpop.f32.mrb[175].mxu1  ;;  %v6782_v11 = vpack.c.bf16 %v6756_v28, %v6755_v3  ;;  %v6037_v60 = vld [vmem:[#allocation3 + $0xc8] sm:$0xff]  ;;  %v7292_v20 = vpop.permute.xlu1 %7291 }
 0x491   : > { %v6626_v26 = vadd.f32 %v6594_v7, %v11894_v4  ;;  %v6597_v41 = vld [vmem:[#allocation3 + $0x98] sm:$0xff]  ;;  %6096 = vst.msk [vmem:[#allocation3 + $0xa0] sm:$0xff] %vm1508_vm10, %v6064_v1  ;;  %v6065_v10 = vadd.f32 %v6033_v6, %v5968_v9  ;;  %v6688_v51 = vld [vmem:[#allocation3 + $0x70] sm:$0xff] }
 0x492   : > { %v6781_v21 = vpack.c.bf16 %v6754_v8, %v6753_v62  ;;  %6660 = vst.msk [vmem:[#allocation3 + $0x90] sm:$0xff] %vm1508_vm10, %v6628_v19  ;;  %v6629_v14 = vadd.f32 %v11899_v43, %v6597_v41  ;;  %v6595_v0 = vld [vmem:[#allocation3 + $0x88] sm:$0xff]  ;;  %6099 = vst.msk [vmem:[#allocation3 + $0xb8] sm:$0xff] %vm1508_vm10, %v6067_v27  ;;  %v6727_v16 = vadd.f32 %v12136_v40, %v6688_v51  ;;  %v6686_v31 = vld [vmem:[#allocation3 + $0x60] sm:$0xff] }
 0x493   : > { %6658 = vst.msk [vmem:[#allocation3 + $0x80] sm:$0xff] %vm1508_vm10, %v6626_v26  ;;  %v6627_v4 = vadd.f32 %v6595_v0, %v11901_v22  ;;  %6097 = vst.msk [vmem:[#allocation3 + $0xa8] sm:$0xff] %vm1508_vm10, %v6065_v10  ;;  %v6689_v38 = vld [vmem:[#allocation3 + $0x78] sm:$0xff]  ;;  %v6725_v13 = vadd.f32 %v12136_v40, %v6686_v31  ;;  %v7326_v43 = vsel %vm1508_vm10, %v6782_v11, %v7288_v48  ;;  %v6038_v22 = vld [vmem:[#allocation3 + $0xd0] sm:$0xff] }
 0x494   : > { %v7323_v35 = vsel %vm1508_vm10, %v6781_v21, %v7286_v37  ;;  %6661 = vst.msk [vmem:[#allocation3 + $0x98] sm:$0xff] %vm1508_vm10, %v6629_v14  ;;  %v6728_v61 = vadd.f32 %v12136_v40, %v6689_v38  ;;  %v6687_v24 = vld [vmem:[#allocation3 + $0x68] sm:$0xff]  ;;  %v6759_v52 = vmax.f32 %v6727_v16, 0.0  ;;  %v6040_v10 = vld [vmem:[#allocation3 + $0xe0] sm:$0xff]  ;;  %v6043_v16 = vld [vmem:[#allocation3 + $0xf8] sm:$0xff] }
 0x495   : > { %9029 = vmatprep.mubr.msk.bf16.mxu1 %vm7371_vm2, %v7323_v35  ;;  %6659 = vst.msk [vmem:[#allocation3 + $0x88] sm:$0xff] %vm1508_vm10, %v6627_v4  ;;  %v8979_v34 = vpop.f32.mrb[176].mxu1  ;;  %v6726_v42 = vadd.f32 %v12136_v40, %v6687_v24  ;;  %v6757_v25 = vmax.f32 %v6725_v13, 0.0 }
 0x496   : > { %9030 = vmatmul.mubr.msk.bf16.gmra.mrb[192].mxu1 %vm7371_vm2, %v7326_v43  ;;  %v6070_v36 = vadd.f32 %v8979_v34, %v6038_v22  ;;  %v5981_v58 = vpop.f32.mrb[177].mxu1  ;;  %v6760_v33 = vmax.f32 %v6728_v61, 0.0  ;;  %v6041_v61 = vld [vmem:[#allocation3 + $0xe8] sm:$0xff]  ;;  %v7294_v34 = vpop.permute.xlu0 %7293 }
 0x497   : > { %v6600_v55 = vld [vmem:[#allocation3 + $0xb0] sm:$0xff]  ;;  %v6068_v15 = vadd.f32 %v6036_v59, %v5981_v58  ;;  %v8980_v45 = vpop.f32.mrb[178].mxu1  ;;  %v6758_v5 = vmax.f32 %v6726_v42, 0.0  ;;  %v12595_v22 = vld [vmem:[#allocation22_spill] sm:$0xff]  ;;  %v7296_v59 = vpop.permute.xlu1 %7295 }
 0x498   : > { %v6632_v57 = vadd.f32 %v11906_v63, %v6600_v55  ;;  %v6598_v50 = vld [vmem:[#allocation3 + $0xa0] sm:$0xff]  ;;  %6102 = vst.msk [vmem:[#allocation3 + $0xd0] sm:$0xff] %vm1508_vm10, %v6070_v36  ;;  %v6071_v32 = vadd.f32 %v8980_v45, %v6039_v56  ;;  %v5984_v12 = vpop.f32.mrb[179].mxu1  ;;  %v6784_v29 = vpack.c.bf16 %v6760_v33, %v6759_v52 }
 0x499   : > { %v6630_v18 = vadd.f32 %v6598_v50, %v11909_v23  ;;  %v6601_v3 = vld [vmem:[#allocation3 + $0xb8] sm:$0xff]  ;;  %6100 = vst.msk [vmem:[#allocation3 + $0xc0] sm:$0xff] %vm1508_vm10, %v6068_v15  ;;  %v6069_v28 = vadd.f32 %v6037_v60, %v5984_v12  ;;  %v6783_v1 = vpack.c.bf16 %v6758_v5, %v6757_v25  ;;  %v6692_v2 = vld [vmem:[#allocation3 + $0x90] sm:$0xff] }
 0x49a   : > { %6664 = vst.msk [vmem:[#allocation3 + $0xb0] sm:$0xff] %vm1508_vm10, %v6632_v57  ;;  %v6633_v63 = vadd.f32 %v11912_v39, %v6601_v3  ;;  %v6599_v49 = vld [vmem:[#allocation3 + $0xa8] sm:$0xff]  ;;  %6103 = vst.msk [vmem:[#allocation3 + $0xd8] sm:$0xff] %vm1508_vm10, %v6071_v32  ;;  %v6731_v62 = vadd.f32 %v12136_v40, %v6692_v2  ;;  %v6690_v8 = vld [vmem:[#allocation3 + $0x80] sm:$0xff]  ;;  %v7332_v39 = vsel %vm1508_vm10, %v6784_v29, %v7292_v20 }
 0x49b   : > { %6662 = vst.msk [vmem:[#allocation3 + $0xa0] sm:$0xff] %vm1508_vm10, %v6630_v18  ;;  %v6631_v23 = vadd.f32 %v6599_v49, %v11914_v17  ;;  %6101 = vst.msk [vmem:[#allocation3 + $0xc8] sm:$0xff] %vm1508_vm10, %v6069_v28  ;;  %v7329_v19 = vsel %vm1508_vm10, %v6783_v1, %v7290_v30  ;;  %v6693_v7 = vld [vmem:[#allocation3 + $0x98] sm:$0xff]  ;;  %v6729_v27 = vadd.f32 %v12136_v40, %v6690_v8  ;;  %v6042_v17 = vld [vmem:[#allocation3 + $0xf0] sm:$0xff] }
 0x49c   : > { %6665 = vst.msk [vmem:[#allocation3 + $0xb8] sm:$0xff] %vm1508_vm10, %v6633_v63  ;;  %9033 = vmatprep.mubr.msk.bf16.mxu1 %vm7371_vm2, %v7329_v19  ;;  %v6732_v9 = vadd.f32 %v12136_v40, %v6693_v7  ;;  %v6691_v6 = vld [vmem:[#allocation3 + $0x88] sm:$0xff]  ;;  %v6763_v48 = vmax.f32 %v6731_v62, 0.0  ;;  %v12597_v25 = vld [vmem:[#allocation24_spill] sm:$0xff]  ;;  %v7298_v62 = vpop.permute.xlu0 %7297  ;;  %v7300_v19 = vpop.permute.xlu1 %7299 }
 0x49d   : > { %6663 = vst.msk [vmem:[#allocation3 + $0xa8] sm:$0xff] %vm1508_vm10, %v6631_v23  ;;  %v8983_v11 = vpop.f32.mrb[180].mxu1  ;;  %v6730_v37 = vadd.f32 %v12136_v40, %v6691_v6  ;;  %v6761_v31 = vmax.f32 %v6729_v27, 0.0 }
 0x49e   : > { %9034 = vmatmul.mubr.msk.bf16.gmra.mrb[196].mxu1 %vm7371_vm2, %v7332_v39  ;;  %v6074_v26 = vadd.f32 %v8983_v11, %v6042_v17  ;;  %v5997_v41 = vpop.f32.mrb[181].mxu1  ;;  %v6764_v21 = vmax.f32 %v6732_v9, 0.0 }
 0x49f   : > { %v6604_v51 = vld [vmem:[#allocation3 + $0xd0] sm:$0xff]  ;;  %v6072_v14 = vadd.f32 %v6040_v10, %v5997_v41  ;;  %v8984_v0 = vpop.f32.mrb[182].mxu1  ;;  %v6762_v4 = vmax.f32 %v6730_v37, 0.0 }
 0x4a0   : > { %v6636_v35 = vadd.f32 %v11919_v44, %v6604_v51  ;;  %v6602_v38 = vld [vmem:[#allocation3 + $0xc0] sm:$0xff]  ;;  %6106 = vst.msk [vmem:[#allocation3 + $0xf0] sm:$0xff] %vm1508_vm10, %v6074_v26  ;;  %v6075_v13 = vadd.f32 %v8984_v0, %v6043_v16  ;;  %v6000_v43 = vpop.f32.mrb[183].mxu1  ;;  %v6786_v24 = vpack.c.bf16 %v6764_v21, %v6763_v48  ;;  %v12596_v44 = vld [vmem:[#allocation23_spill] sm:$0xff]  ;;  %v7302_v0 = vpop.permute.xlu0 %7301 }
 0x4a1   : > { %v6634_v42 = vadd.f32 %v6602_v38, %v12595_v22  ;;  %v6605_v36 = vld [vmem:[#allocation3 + $0xd8] sm:$0xff]  ;;  %6104 = vst.msk [vmem:[#allocation3 + $0xe0] sm:$0xff] %vm1508_vm10, %v6072_v14  ;;  %v6073_v58 = vadd.f32 %v6041_v61, %v6000_v43  ;;  %v6785_v52 = vpack.c.bf16 %v6762_v4, %v6761_v31  ;;  %v6696_v33 = vld [vmem:[#allocation3 + $0xb0] sm:$0xff]  ;;  %v7304_v16 = vpop.permute.xlu1 %7303 }
 0x4a2   : > { %6668 = vst.msk [vmem:[#allocation3 + $0xd0] sm:$0xff] %vm1508_vm10, %v6636_v35  ;;  %v6637_v55 = vadd.f32 %v12596_v44, %v6605_v36  ;;  %v6603_v15 = vld [vmem:[#allocation3 + $0xc8] sm:$0xff]  ;;  %6107 = vst.msk [vmem:[#allocation3 + $0xf8] sm:$0xff] %vm1508_vm10, %v6075_v13  ;;  %v6735_v45 = vadd.f32 %v12136_v40, %v6696_v33  ;;  %v6694_v56 = vld [vmem:[#allocation3 + $0xa0] sm:$0xff]  ;;  %v7338_v12 = vsel %vm1508_vm10, %v6786_v24, %v7296_v59 }
 0x4a3   : > { %6666 = vst.msk [vmem:[#allocation3 + $0xc0] sm:$0xff] %vm1508_vm10, %v6634_v42  ;;  %v6635_v5 = vadd.f32 %v6603_v15, %v12597_v25  ;;  %6105 = vst.msk [vmem:[#allocation3 + $0xe8] sm:$0xff] %vm1508_vm10, %v6073_v58  ;;  %v7335_v57 = vsel %vm1508_vm10, %v6785_v52, %v7294_v34  ;;  %v6697_v50 = vld [vmem:[#allocation3 + $0xb8] sm:$0xff]  ;;  %v6733_v32 = vadd.f32 %v12136_v40, %v6694_v56  ;;  %v12282_v25 = vld [vmem:[#allocation15] ss:$0 sm:$0xff] }
 0x4a4   : > { %6669 = vst.msk [vmem:[#allocation3 + $0xd8] sm:$0xff] %vm1508_vm10, %v6637_v55  ;;  %9037 = vmatprep.mubr.msk.bf16.mxu1 %vm7371_vm2, %v7335_v57  ;;  %v6736_v60 = vadd.f32 %v12136_v40, %v6697_v50  ;;  %v6695_v29 = vld [vmem:[#allocation3 + $0xa8] sm:$0xff]  ;;  %v6767_v18 = vmax.f32 %v6735_v45, 0.0  ;;  %v7306_v44 = vpop.permute.xlu0 %7305 }
 0x4a5   : > { %6667 = vst.msk [vmem:[#allocation3 + $0xc8] sm:$0xff] %vm1508_vm10, %v6635_v5  ;;  %v6734_v30 = vadd.f32 %v12136_v40, %v6695_v29  ;;  %v6765_v20 = vmax.f32 %v6733_v32, 0.0  ;;  %v7308_v55 = vpop.permute.xlu1 %7307 }
 0x4a6   : > { %9038 = vmatmul.mubr.msk.bf16.gmra.mrb[200].mxu1 %vm7371_vm2, %v7338_v12  ;;  %v6768_v3 = vmax.f32 %v6736_v60, 0.0 }
 0x4a7   : > { %v6608_v28 = vld [vmem:[#allocation3 + $0xf0] sm:$0xff]  ;;  %v6766_v1 = vmax.f32 %v6734_v30, 0.0 }
 0x4a8   : > { %v6640_v2 = vadd.f32 %v12020_v47, %v6608_v28  ;;  %v6606_v63 = vld [vmem:[#allocation3 + $0xe0] sm:$0xff]  ;;  %v6788_v49 = vpack.c.bf16 %v6768_v3, %v6767_v18 }
 0x4a9   : > { %v6638_v8 = vadd.f32 %v6606_v63, %v12022_v46  ;;  %v6609_v23 = vld [vmem:[#allocation3 + $0xf8] sm:$0xff]  ;;  %v6787_v7 = vpack.c.bf16 %v6766_v1, %v6765_v20  ;;  %v6700_v27 = vld [vmem:[#allocation3 + $0xd0] sm:$0xff] }
 0x4aa   : > { %6672 = vst.msk [vmem:[#allocation3 + $0xf0] sm:$0xff] %vm1508_vm10, %v6640_v2  ;;  %v6641_v39 = vadd.f32 %v12028_v54, %v6609_v23  ;;  %v6607_v9 = vld [vmem:[#allocation3 + $0xe8] sm:$0xff]  ;;  %v6739_v6 = vadd.f32 %v12136_v40, %v6700_v27  ;;  %v6698_v11 = vld [vmem:[#allocation3 + $0xc0] sm:$0xff]  ;;  %v7344_v26 = vsel %vm1508_vm10, %v6788_v49, %v7300_v19 }
 0x4ab   : > { %6670 = vst.msk [vmem:[#allocation3 + $0xe0] sm:$0xff] %vm1508_vm10, %v6638_v8  ;;  %v6639_v47 = vadd.f32 %v6607_v9, %v12033_v53  ;;  %v7341_v17 = vsel %vm1508_vm10, %v6787_v7, %v7298_v62  ;;  %v6701_v37 = vld [vmem:[#allocation3 + $0xd8] sm:$0xff]  ;;  %v6737_v46 = vadd.f32 %v12136_v40, %v6698_v11 }
 0x4ac   : > { %6673 = vst.msk [vmem:[#allocation3 + $0xf8] sm:$0xff] %vm1508_vm10, %v6641_v39  ;;  %9041 = vmatprep.mubr.msk.bf16.mxu1 %vm7371_vm2, %v7341_v17  ;;  %v6740_v54 = vadd.f32 %v12136_v40, %v6701_v37  ;;  %v6699_v41 = vld [vmem:[#allocation3 + $0xc8] sm:$0xff]  ;;  %v6771_v10 = vmax.f32 %v6739_v6, 0.0 }
 0x4ad   : > { %6671 = vst.msk [vmem:[#allocation3 + $0xe8] sm:$0xff] %vm1508_vm10, %v6639_v47  ;;  %v6738_v53 = vadd.f32 %v12136_v40, %v6699_v41  ;;  %v6769_v21 = vmax.f32 %v6737_v46, 0.0 }
 0x4ae   : > { %9042 = vmatmul.mubr.msk.bf16.gmra.mrb[204].mxu1 %vm7371_vm2, %v7344_v26  ;;  %v6772_v48 = vmax.f32 %v6740_v54, 0.0 }
 0x4af   : > { %v6770_v51 = vmax.f32 %v6738_v53, 0.0 }
 0x4b0   : > { %v6790_v14 = vpack.c.bf16 %v6772_v48, %v6771_v10 }
 0x4b1   : > { %v6789_v31 = vpack.c.bf16 %v6770_v51, %v6769_v21  ;;  %v6704_v4 = vld [vmem:[#allocation3 + $0xf0] sm:$0xff] }
 0x4b2   : > { %v6743_v35 = vadd.f32 %v12136_v40, %v6704_v4  ;;  %v6702_v38 = vld [vmem:[#allocation3 + $0xe0] sm:$0xff]  ;;  %v7350_v24 = vsel %vm1508_vm10, %v6790_v14, %v7304_v16 }
 0x4b3   : > { %v7347_v13 = vsel %vm1508_vm10, %v6789_v31, %v7302_v0  ;;  %v6705_v43 = vld [vmem:[#allocation3 + $0xf8] sm:$0xff]  ;;  %v6741_v61 = vadd.f32 %v12136_v40, %v6702_v38 }
 0x4b4   : > { %9045 = vmatprep.mubr.msk.bf16.mxu1 %vm7371_vm2, %v7347_v13  ;;  %v6744_v34 = vadd.f32 %v12136_v40, %v6705_v43  ;;  %v6703_v22 = vld [vmem:[#allocation3 + $0xe8] sm:$0xff]  ;;  %v6775_v36 = vmax.f32 %v6743_v35, 0.0 }
 0x4b5   : > { %v6742_v42 = vadd.f32 %v12136_v40, %v6703_v22  ;;  %v6773_v59 = vmax.f32 %v6741_v61, 0.0 }
 0x4b6   : > { %9046 = vmatmul.mubr.msk.bf16.gmra.mrb[208].mxu1 %vm7371_vm2, %v7350_v24  ;;  %v6776_v58 = vmax.f32 %v6744_v34, 0.0 }
 0x4b7   : > { %v6774_v52 = vmax.f32 %v6742_v42, 0.0 }
 0x4b8   : > { %v6792_v33 = vpack.c.bf16 %v6776_v58, %v6775_v36 }
 0x4b9   : > { %v6791_v15 = vpack.c.bf16 %v6774_v52, %v6773_v59 }
 0x4ba   : > { %v7356_v56 = vsel %vm1508_vm10, %v6792_v33, %v7308_v55 }
 0x4bb   : > { %v7353_v45 = vsel %vm1508_vm10, %v6791_v15, %v7306_v44 }
 0x4bc   : > { %9049 = vmatprep.mubr.msk.bf16.mxu1 %vm7371_vm2, %v7353_v45 }
 0x4be   : > { %9050 = vmatmul.mubr.msk.bf16.gmra.mrb[212].mxu1 %vm7371_vm2, %v7356_v56 }
 0x558   : > { %v9023_v40 = vpop.f32.mrb[184].mxu1 }
 0x559   : > { %v7451_v5 = vadd.f32 %v9023_v40, %v12282_v25  ;;  %v7442_v57 = vpop.f32.mrb[185].mxu1 }
 0x55a   : > { %v7443_v50 = vadd.f32 %v12282_v25, %v7442_v57  ;;  %v9024_v32 = vpop.f32.mrb[186].mxu1 }
 0x55b   : > { %v7571_v12 = vmax.f32 %v7451_v5, 0.0  ;;  %v7454_v60 = vadd.f32 %v9024_v32, %v12282_v25  ;;  %v7445_v29 = vpop.f32.mrb[187].mxu1 }
 0x55c   : > { %v7569_v30 = vmax.f32 %v7443_v50, 0.0  ;;  %v7446_v18 = vadd.f32 %v12282_v25, %v7445_v29 }
 0x55d   : > { %7604 = vst.msk [vmem:[%s12289_s12 + $0x10] sm:$0xff] %vm7601_vm3, %v7571_v12  ;;  %v7572_v3 = vmax.f32 %v7454_v60, 0.0 }
 0x55e   : > { %7602 = vst.msk [vmem:[%s12289_s12] sm:$0xff] %vm7601_vm3, %v7569_v30  ;;  %v7570_v28 = vmax.f32 %v7446_v18, 0.0 }
 0x55f   : > { %7605 = vst.msk [vmem:[%s12289_s12 + $0x18] sm:$0xff] %vm7601_vm3, %v7572_v3 }
 0x560   : > { %7603 = vst.msk [vmem:[%s12289_s12 + $0x8] sm:$0xff] %vm7601_vm3, %v7570_v28  ;;  %v9027_v20 = vpop.f32.mrb[188].mxu1 }
 0x561   : > { %v7467_v1 = vadd.f32 %v9027_v20, %v12282_v25  ;;  %v7458_v2 = vpop.f32.mrb[189].mxu1 }
 0x562   : > { %v7459_v63 = vadd.f32 %v12282_v25, %v7458_v2  ;;  %v9028_v49 = vpop.f32.mrb[190].mxu1 }
 0x563   : > { %v7575_v62 = vmax.f32 %v7467_v1, 0.0  ;;  %v7470_v8 = vadd.f32 %v9028_v49, %v12282_v25  ;;  %v7461_v23 = vpop.f32.mrb[191].mxu1 }
 0x564   : > { %v7573_v19 = vmax.f32 %v7459_v63, 0.0  ;;  %v7462_v7 = vadd.f32 %v12282_v25, %v7461_v23 }
 0x565   : > { %7608 = vst.msk [vmem:[%s12289_s12 + $0x30] sm:$0xff] %vm7601_vm3, %v7575_v62  ;;  %v7576_v27 = vmax.f32 %v7470_v8, 0.0 }
 0x566   : > { %7606 = vst.msk [vmem:[%s12289_s12 + $0x20] sm:$0xff] %vm7601_vm3, %v7573_v19  ;;  %v7574_v39 = vmax.f32 %v7462_v7, 0.0 }
 0x567   : > { %7609 = vst.msk [vmem:[%s12289_s12 + $0x38] sm:$0xff] %vm7601_vm3, %v7576_v27 }
 0x568   : > { %7607 = vst.msk [vmem:[%s12289_s12 + $0x28] sm:$0xff] %vm7601_vm3, %v7574_v39 }
 0x569   : > { %v9031_v9 = vpop.f32.mrb[192].mxu1 }
 0x56a   : > { %v7483_v6 = vadd.f32 %v9031_v9, %v12282_v25  ;;  %v7474_v11 = vpop.f32.mrb[193].mxu1 }
 0x56b   : > { %v7475_v47 = vadd.f32 %v12282_v25, %v7474_v11  ;;  %v9032_v17 = vpop.f32.mrb[194].mxu1 }
 0x56c   : > { %v7579_v37 = vmax.f32 %v7483_v6, 0.0  ;;  %v7486_v46 = vadd.f32 %v9032_v17, %v12282_v25  ;;  %v7477_v26 = vpop.f32.mrb[195].mxu1 }
 0x56d   : > { %v7577_v54 = vmax.f32 %v7475_v47, 0.0  ;;  %v7478_v41 = vadd.f32 %v12282_v25, %v7477_v26 }
 0x56e   : > { %7612 = vst.msk [vmem:[%s12289_s12 + $0x50] sm:$0xff] %vm7601_vm3, %v7579_v37  ;;  %v7580_v53 = vmax.f32 %v7486_v46, 0.0 }
 0x56f   : > { %7610 = vst.msk [vmem:[%s12289_s12 + $0x40] sm:$0xff] %vm7601_vm3, %v7577_v54  ;;  %v7578_v10 = vmax.f32 %v7478_v41, 0.0 }
 0x570   : > { %7613 = vst.msk [vmem:[%s12289_s12 + $0x58] sm:$0xff] %vm7601_vm3, %v7580_v53 }
 0x571   : > { %7611 = vst.msk [vmem:[%s12289_s12 + $0x48] sm:$0xff] %vm7601_vm3, %v7578_v10  ;;  %v9035_v48 = vpop.f32.mrb[196].mxu1 }
 0x572   : > { %v7499_v21 = vadd.f32 %v9035_v48, %v12282_v25  ;;  %v7490_v51 = vpop.f32.mrb[197].mxu1 }
 0x573   : > { %v7491_v14 = vadd.f32 %v12282_v25, %v7490_v51  ;;  %v9036_v0 = vpop.f32.mrb[198].mxu1 }
 0x574   : > { %v7583_v16 = vmax.f32 %v7499_v21, 0.0  ;;  %v7502_v31 = vadd.f32 %v9036_v0, %v12282_v25  ;;  %v7493_v4 = vpop.f32.mrb[199].mxu1 }
 0x575   : > { %v7581_v35 = vmax.f32 %v7491_v14, 0.0  ;;  %v7494_v38 = vadd.f32 %v12282_v25, %v7493_v4 }
 0x576   : > { %7616 = vst.msk [vmem:[%s12289_s12 + $0x70] sm:$0xff] %vm7601_vm3, %v7583_v16  ;;  %v7584_v13 = vmax.f32 %v7502_v31, 0.0 }
 0x577   : > { %7614 = vst.msk [vmem:[%s12289_s12 + $0x60] sm:$0xff] %vm7601_vm3, %v7581_v35  ;;  %v7582_v43 = vmax.f32 %v7494_v38, 0.0 }
 0x578   : > { %7617 = vst.msk [vmem:[%s12289_s12 + $0x78] sm:$0xff] %vm7601_vm3, %v7584_v13 }
 0x579   : > { %7615 = vst.msk [vmem:[%s12289_s12 + $0x68] sm:$0xff] %vm7601_vm3, %v7582_v43  ;;  %v9039_v61 = vpop.f32.mrb[200].mxu1 }
 0x57a   : > { %v7515_v24 = vadd.f32 %v9039_v61, %v12282_v25  ;;  %v7506_v34 = vpop.f32.mrb[201].mxu1 }
 0x57b   : > { %v7507_v22 = vadd.f32 %v12282_v25, %v7506_v34  ;;  %v9040_v42 = vpop.f32.mrb[202].mxu1 }
 0x57c   : > { %v7587_v36 = vmax.f32 %v7515_v24, 0.0  ;;  %v7518_v58 = vadd.f32 %v9040_v42, %v12282_v25  ;;  %v7509_v59 = vpop.f32.mrb[203].mxu1 }
 0x57d   : > { %v7585_v52 = vmax.f32 %v7507_v22, 0.0  ;;  %v7510_v33 = vadd.f32 %v12282_v25, %v7509_v59 }
 0x57e   : > { %7620 = vst.msk [vmem:[%s12289_s12 + $0x90] sm:$0xff] %vm7601_vm3, %v7587_v36  ;;  %v7588_v44 = vmax.f32 %v7518_v58, 0.0 }
 0x57f   : > { %7618 = vst.msk [vmem:[%s12289_s12 + $0x80] sm:$0xff] %vm7601_vm3, %v7585_v52  ;;  %v7586_v55 = vmax.f32 %v7510_v33, 0.0 }
 0x580   : > { %7621 = vst.msk [vmem:[%s12289_s12 + $0x98] sm:$0xff] %vm7601_vm3, %v7588_v44 }
 0x581   : > { %7619 = vst.msk [vmem:[%s12289_s12 + $0x88] sm:$0xff] %vm7601_vm3, %v7586_v55  ;;  %v9043_v15 = vpop.f32.mrb[204].mxu1 }
 0x582   : > { %v7531_v45 = vadd.f32 %v9043_v15, %v12282_v25  ;;  %v7522_v56 = vpop.f32.mrb[205].mxu1 }
 0x583   : > { %v7523_v40 = vadd.f32 %v12282_v25, %v7522_v56  ;;  %v9044_v5 = vpop.f32.mrb[206].mxu1 }
 0x584   : > { %v7591_v57 = vmax.f32 %v7531_v45, 0.0  ;;  %v7534_v50 = vadd.f32 %v9044_v5, %v12282_v25  ;;  %v7525_v32 = vpop.f32.mrb[207].mxu1 }
 0x585   : > { %v7589_v12 = vmax.f32 %v7523_v40, 0.0  ;;  %v7526_v60 = vadd.f32 %v12282_v25, %v7525_v32 }
 0x586   : > { %7624 = vst.msk [vmem:[%s12289_s12 + $0xb0] sm:$0xff] %vm7601_vm3, %v7591_v57  ;;  %v7592_v29 = vmax.f32 %v7534_v50, 0.0 }
 0x587   : > { %7622 = vst.msk [vmem:[%s12289_s12 + $0xa0] sm:$0xff] %vm7601_vm3, %v7589_v12  ;;  %v7590_v30 = vmax.f32 %v7526_v60, 0.0 }
 0x588   : > { %7625 = vst.msk [vmem:[%s12289_s12 + $0xb8] sm:$0xff] %vm7601_vm3, %v7592_v29 }
 0x589   : > { %7623 = vst.msk [vmem:[%s12289_s12 + $0xa8] sm:$0xff] %vm7601_vm3, %v7590_v30  ;;  %v9047_v18 = vpop.f32.mrb[208].mxu1 }
 0x58a   : > { %v7547_v3 = vadd.f32 %v9047_v18, %v12282_v25  ;;  %v7538_v28 = vpop.f32.mrb[209].mxu1 }
 0x58b   : > { %v7539_v20 = vadd.f32 %v12282_v25, %v7538_v28  ;;  %v9048_v1 = vpop.f32.mrb[210].mxu1 }
 0x58c   : > { %v7595_v2 = vmax.f32 %v7547_v3, 0.0  ;;  %v7550_v63 = vadd.f32 %v9048_v1, %v12282_v25  ;;  %v7541_v49 = vpop.f32.mrb[211].mxu1 }
 0x58d   : > { %v7593_v62 = vmax.f32 %v7539_v20, 0.0  ;;  %v7542_v8 = vadd.f32 %v12282_v25, %v7541_v49 }
 0x58e   : > { %7628 = vst.msk [vmem:[%s12289_s12 + $0xd0] sm:$0xff] %vm7601_vm3, %v7595_v2  ;;  %v7596_v23 = vmax.f32 %v7550_v63, 0.0 }
 0x58f   : > { %7626 = vst.msk [vmem:[%s12289_s12 + $0xc0] sm:$0xff] %vm7601_vm3, %v7593_v62  ;;  %v7594_v19 = vmax.f32 %v7542_v8, 0.0 }
 0x590   : > { %7629 = vst.msk [vmem:[%s12289_s12 + $0xd8] sm:$0xff] %vm7601_vm3, %v7596_v23 }
 0x591   : > { %7627 = vst.msk [vmem:[%s12289_s12 + $0xc8] sm:$0xff] %vm7601_vm3, %v7594_v19  ;;  %v9051_v7 = vpop.f32.mrb[212].mxu1 }
 0x592   : > { %v7563_v27 = vadd.f32 %v9051_v7, %v12282_v25  ;;  %v7554_v39 = vpop.f32.mrb[213].mxu1 }
 0x593   : > { %v7555_v9 = vadd.f32 %v12282_v25, %v7554_v39  ;;  %v9052_v6 = vpop.f32.mrb[214].mxu1 }
 0x594   : > { %v7599_v11 = vmax.f32 %v7563_v27, 0.0  ;;  %v7566_v47 = vadd.f32 %v9052_v6, %v12282_v25  ;;  %v7557_v17 = vpop.f32.mrb[215].mxu1 }
 0x595   : > { %v7597_v37 = vmax.f32 %v7555_v9, 0.0  ;;  %v7558_v46 = vadd.f32 %v12282_v25, %v7557_v17 }
 0x596   : > { %7632 = vst.msk [vmem:[%s12289_s12 + $0xf0] sm:$0xff] %vm7601_vm3, %v7599_v11  ;;  %v7600_v26 = vmax.f32 %v7566_v47, 0.0 }
 0x597   : > { %7630 = vst.msk [vmem:[%s12289_s12 + $0xe0] sm:$0xff] %vm7601_vm3, %v7597_v37  ;;  %v7598_v54 = vmax.f32 %v7558_v46, 0.0 }
 0x598   : > { %7633 = vst.msk [vmem:[%s12289_s12 + $0xf8] sm:$0xff] %vm7601_vm3, %v7600_v26 }
 0x599   : > { %7631 = vst.msk [vmem:[%s12289_s12 + $0xe8] sm:$0xff] %vm7601_vm3, %v7598_v54 }
 0x59a   : > { %9487 = shalt.err (!%p9484_p8)
}
 0x59b   : > { %s9488_s1 = scalar_lea.hbm %s12382_s20, 4096  ;;  %s9492_s9 = scalar_lea.hbm %s12447_s7, 8192 }
 0x59c   : > { %p9489_p9 = scmp.ne.s32.totalorder %s12382_s20, %s9488_s1  ;;  %p9493_p3 = scmp.lt.u32.totalorder %s12382_s20, %s12447_s7 }
 0x59d   : > { %p9494_p7 = scmp.lt.u32.totalorder %s9492_s9, %s9488_s1  ;;  %p9496_p11 = scmp.lt.u32.totalorder %s9488_s1, %s12382_s20 }
 0x59e   : > { %p9490_p1 = pnand %p9489_p9, %p12598_p0 }
 0x59f   : > { %p9495_p12 = por %p9494_p7, %p9493_p3 }
 0x5a0   : > { %p9491_p6 = pneg %p9490_p1 }
 0x5a1   : > { %p9497_p5 = por %p9496_p11, %p9495_p12 }
 0x5a3   : > { %p9498_p4 = pnand %p9497_p5, %p9491_p6 }
 0x5a5   : > { %9501 = shalt.err (!%p9498_p4)
}
 0x5a6   : > { %s9584_s10 = smov 128  }
 0x5a7   : > { %9095 = dma.vmem_to_hbm [thread:$0]  (%p12598_p0), %s12386_s22, 4096, %s12382_s20, %s7635_s27, %s9584_s10, %s9584_s10, %s9582_s8  }
 0x5a8 PF: > { %s7666_s21 = sand.u32 1, %s9548_s24   ;;  %p12599_p10 = scmp.ne.s32.totalorder %s12470_s30, 0 }
 0x5a9   : > { %p12600_p13 = scmp.ge.s32.totalorder %s9568_s29, 2  ;;  %s7667_s14 = scalar_lea.sflag [#allocation6], %s7666_s21 }
 0x5ab   : > { %p9121_p2 = pnand %p12600_p13, %p12599_p10 }
 0x5ad   : > { %9543 = dma.done.wait (!%p9121_p2), %s7667_s14, 4096  }
 0x5ae   : > { %9545 = vsyncadd (!%p9121_p2), %s7667_s14, 4294963200  ;;  %s26_s29 = sadd.s32 1, %s9568_s29   ;;  %s12601_s24 = smov %s9552_s25 }
 0x5af   : > { %p23_p8 = scmp.ge.s32.totalorder %s26_s29, 4   ;;  %s12602_s25 = smov %s9556_s26 }
 0x5b0   : > { %s12603_s26 = smov %s9836_s18  ;;  %s12604_s27 = smov %s9564_s28 }
 0x5b1   : > { %s12605_s28 = smov %s12607_s19  ;;  %25 = sbr.rel (!%p23_p8) target bundleno = 13 (0xd), region = 134 }
 0x5b8   :  { %7672 = vsyncpa [#allocation5], 1 }
 0x5b9   :  { %7674 = vsyncpa [#allocation5 + $0x1], 1 }
 0x5ba   :  { %7675 = vsyncpa [#allocation8], 1 }
 0x5bb   :  { %7676 = vsyncpa [#allocation11], 1 }
 0x5bc   :  { %7677 = vsyncpa [#allocation14], 1 }
 0x5bd   :  { %7678 = vsyncpa [#allocation6], 1 }
 0x5be   :  { %7680 = vsyncpa [#allocation6 + $0x1], 1 }

</bundles_post_ra>
